<compile_context>
chip_gen: v7x
topology: tpu7x:2x2x1
jax: 0.10.0
libtpu: 0.0.40
codegen_flags: <defaults>
</compile_context>

<pallas_src>
import functools

import jax
import jax.numpy as jnp
from jax.experimental import pallas as pl
from jax.experimental.pallas import tpu as pltpu


# --------------------------- per-chip VMEM budgeting ------------------------ #

def _vmem_limit_bytes():
    """Scoped-VMEM limit derived per chip (review: don't hard-code 48 MiB on v7x)."""
    try:
        cap = int(pltpu.get_tpu_info().vmem_capacity_bytes)
    except Exception:
        cap = 64 * 1024 * 1024                    # conservative fallback (v7x per-TC)
    return max(16 * 1024 * 1024, min(cap * 3 // 4, 96 * 1024 * 1024))


def _largest_divisor_leq(n, cap):
    cap = max(1, min(n, cap))
    for t in range(cap, 0, -1):
        if n % t == 0:
            return t
    return 1


def _choose_d_tile(d, h, w, cin, cout, itemsize):
    """Largest divisor of D whose per-block footprint (halo scratch + double-buffered
    in/out + folded-tap staging + f32 accumulator, lane-padded) fits the VMEM budget."""
    budget = _vmem_limit_bytes() // 2
    lane = 128
    for td in sorted((t for t in range(1, d + 1) if d % t == 0), reverse=True):
        pad_b = (td + 2) * (h + 2) * (w + 2) * max(cin, lane) * itemsize
        x_b = 2 * td * h * w * max(cin, lane) * itemsize
        y_b = 2 * td * h * w * max(cout, lane) * itemsize
        x9_b = (td + 2) * h * w * max(9 * cin, lane) * itemsize
        acc_b = td * h * w * max(cout, lane) * 4
        if pad_b + x_b + y_b + x9_b + acc_b <= budget:
            return td
    return 1


def _pick_row_tile(rows, cap=4096):
    """M-tile for the lane-dense bn_relu pass (multiple of 8, or the full extent)."""
    if rows <= cap:
        return rows
    for t in range(cap, 0, -1):
        if rows % t == 0 and t % 8 == 0:
            return t
    return rows


# ----------------------------- Pallas kernels ------------------------------ #

def _conv3x3x3_kernel(x_ref, xlo_ref, xhi_ref, s_ref, t_ref, w_ref, b_ref,
                      y_ref, sum_ref, ssq_ref, xpad_ref, *,
                      prologue_relu, compute_dtype):
    """One (batch, D-tile) block of: [BN+ReLU prologue] -> 3x3x3 'same' conv -> bias
    -> per-block channel sum / sum-of-squares.

    x_ref   : (1, td, H, W, Cin)   main tile (unpadded)
    xlo_ref : (1, 1,  H, W, Cin)   plane at d = d0-1 (clamped; unused when t == 0)
    xhi_ref : (1, 1,  H, W, Cin)   plane at d = d0+td (clamped; unused on last tile)
    s_ref/t_ref : (1, Cin) f32     prologue scale/bias (previous BN; identity for conv #1)
    w_ref   : (3, 9*Cin, Cout)     weights with kh,kw folded into K (compute dtype)
    b_ref   : (1, Cout) f32        conv bias
    y_ref   : (1, td, H, W, Cout)  conv output (pre-BN of this layer)
    sum_ref : (1, 1, 1, Cout) f32  channel sum of this block
    ssq_ref : (1, 1, 1, Cout) f32  channel sum of squares of this block
    xpad_ref: (td+2, H+2, W+2, Cin) compute-dtype VMEM halo buffer
    """
    _, td, h, w, cin = x_ref.shape
    cout = y_ref.shape[-1]
    t = pl.program_id(1)
    nt = pl.num_programs(1)

    def prologue(v):                      # BN(prev)+ReLU in f32 (v5e: VPU has no bf16)
        v = v.astype(jnp.float32)
        if prologue_relu:
            v = jnp.maximum(v * s_ref[0].reshape(1, 1, 1, cin)
                            + t_ref[0].reshape(1, 1, 1, cin), 0.0)
        return v.astype(compute_dtype)

    # Build the zero halo in VMEM (replaces the wrapper-side jnp.pad HBM pass and the
    # HBM mask array).  Only the interior is overwritten, so the pad stays a true zero.
    xpad_ref[...] = jnp.zeros(xpad_ref.shape, compute_dtype)
    xpad_ref[1:td + 1, 1:h + 1, 1:w + 1, :] = prologue(x_ref[0])

    @pl.when(t > 0)
    def _():                              # lower D-halo plane from the previous tile
        xpad_ref[0:1, 1:h + 1, 1:w + 1, :] = prologue(xlo_ref[0])

    @pl.when(t < nt - 1)
    def _():                              # upper D-halo plane from the next tile
        xpad_ref[td + 1:td + 2, 1:h + 1, 1:w + 1, :] = prologue(xhi_ref[0])

    xp = xpad_ref[...]
    # Fold kw (3 sublane slices) and kh (3 leading-dim slices) into the lane axis once
    # per block -> K = 9*Cin; the remaining kd slices touch only the leading dim, so
    # the reshape below is contiguous (no gather-copy per tap).
    x3 = jnp.concatenate(
        [xp[:, :, 0:w, :], xp[:, :, 1:w + 1, :], xp[:, :, 2:w + 2, :]], axis=-1)
    x9 = jnp.concatenate(
        [x3[:, 0:h, :, :], x3[:, 1:h + 1, :, :], x3[:, 2:h + 2, :, :]], axis=-1)

    m = td * h * w
    k9 = 9 * cin
    # Direct assignment on the first tap (no zero-init, no accumulator RMW); MXU
    # operands in compute dtype (bf16 on v5e/v6e/v7x), accumulation in f32.
    acc = jnp.dot(x9[0:td].reshape(m, k9), w_ref[0],
                  preferred_element_type=jnp.float32)
    acc = acc + jnp.dot(x9[1:td + 1].reshape(m, k9), w_ref[1],
                        preferred_element_type=jnp.float32)
    acc = acc + jnp.dot(x9[2:td + 2].reshape(m, k9), w_ref[2],
                        preferred_element_type=jnp.float32)
    acc = acc + b_ref[0].reshape(1, cout)

    # Fused per-channel batch-stat partials (no extra HBM pass for mean/var).
    sum_ref[0, 0] = jnp.sum(acc, axis=0, keepdims=True)
    ssq_ref[0, 0] = jnp.sum(acc * acc, axis=0, keepdims=True)
    y_ref[0] = acc.reshape(td, h, w, cout).astype(y_ref.dtype)


def _affine_relu_lanes_kernel(x_ref, s_ref, b_ref, o_ref):
    """Lane-dense fused affine (BatchNorm) + ReLU.
    x_ref/o_ref: (1, Mt, 128); s_ref/b_ref: (1, 128) per-lane (= per-channel) pattern."""
    x = x_ref[0].astype(jnp.float32)
    o_ref[0] = jnp.maximum(
        x * s_ref[0].reshape(1, 128) + b_ref[0].reshape(1, 128), 0.0
    ).astype(o_ref.dtype)


def _affine_relu_ndhwc_kernel(x_ref, s_ref, b_ref, o_ref):
    """Fallback channel-last affine + ReLU (used when C does not divide 128)."""
    c = s_ref.shape[-1]
    x = x_ref[0].astype(jnp.float32)
    o_ref[0] = jnp.maximum(
        x * s_ref[0].reshape(1, 1, 1, c) + b_ref[0].reshape(1, 1, 1, c), 0.0
    ).astype(o_ref.dtype)


# ----------------------------- JAX wrappers -------------------------------- #

def conv3x3x3_fused(x, prologue_scale, prologue_bias, w, b, *,
                    prologue_relu, compute_dtype=jnp.float32,
                    out_dtype=None, d_tile=None):
    """3x3x3 'same' conv with fused BN prologue, in-kernel halo, D-tiling and fused
    channel-stat outputs.

    x: (N, D, H, W, Cin); prologue_scale/bias: (Cin,); w: (3,3,3,Cin,Cout); b: (Cout,).
    Returns (y, sums, sumsqs): y (N,D,H,W,Cout); sums/sumsqs (N, nt, 1, Cout) f32.
    """
    n, d, h, wd, cin = x.shape
    cout = w.shape[-1]
    out_dtype = out_dtype if out_dtype is not None else x.dtype
    itemsize = jnp.dtype(compute_dtype).itemsize

    if d_tile is None:
        d_tile = _choose_d_tile(d, h, wd, cin, cout, itemsize)
    td = _largest_divisor_leq(d, d_tile)          # ensure td | D
    nt = d // td

    wf = w.reshape(3, 9 * cin, cout).astype(compute_dtype)   # fold (kh,kw) into K
    kernel = functools.partial(_conv3x3x3_kernel,
                               prologue_relu=prologue_relu,
                               compute_dtype=compute_dtype)

    def main_map(i, t):
        return (i, t, 0, 0, 0)

    def lo_map(i, t):                              # plane d0-1, clamped at the boundary
        return (i, jnp.maximum(t * td - 1, 0), 0, 0, 0)

    def hi_map(i, t):                              # plane d0+td, clamped at the boundary
        return (i, jnp.minimum((t + 1) * td, d - 1), 0, 0, 0)

    return pl.pallas_call(
        kernel,
        out_shape=(
            jax.ShapeDtypeStruct((n, d, h, wd, cout), out_dtype),
            jax.ShapeDtypeStruct((n, nt, 1, cout), jnp.float32),
            jax.ShapeDtypeStruct((n, nt, 1, cout), jnp.float32),
        ),
        grid_spec=pltpu.PrefetchScalarGridSpec(
            num_scalar_prefetch=0,
            grid=(n, nt),
            in_specs=[
                pl.BlockSpec((1, td, h, wd, cin), main_map),
                pl.BlockSpec((1, 1, h, wd, cin), lo_map),
                pl.BlockSpec((1, 1, h, wd, cin), hi_map),
                pl.BlockSpec((1, cin), lambda i, t: (0, 0)),
                pl.BlockSpec((1, cin), lambda i, t: (0, 0)),
                pl.BlockSpec((3, 9 * cin, cout), lambda i, t: (0, 0, 0)),
                pl.BlockSpec((1, cout), lambda i, t: (0, 0)),
            ],
            out_specs=(
                pl.BlockSpec((1, td, h, wd, cout), main_map),
                pl.BlockSpec((1, 1, 1, cout), lambda i, t: (i, t, 0, 0)),
                pl.BlockSpec((1, 1, 1, cout), lambda i, t: (i, t, 0, 0)),
            ),
            scratch_shapes=[
                pltpu.VMEM((td + 2, h + 2, wd + 2, cin), compute_dtype),
            ],
        ),
        compiler_params=pltpu.CompilerParams(
            dimension_semantics=("parallel", "parallel"),
            vmem_limit_bytes=_vmem_limit_bytes()),
    )(x, x, x,
      prologue_scale.reshape(1, cin).astype(jnp.float32),
      prologue_bias.reshape(1, cin).astype(jnp.float32),
      wf, b.reshape(1, cout).astype(jnp.float32))


def bn_relu(y, mean, var, gamma, beta, eps=1e-5, out_dtype=None):
    """Affine BatchNorm (given precomputed batch stats) + ReLU.
    Lane-dense (last dim = 128, unmasked vst) and M-tiled when possible."""
    n, d, h, wd, c = y.shape
    out_dtype = out_dtype if out_dtype is not None else y.dtype
    scale = (gamma * jax.lax.rsqrt(var + eps)).astype(jnp.float32)
    bias = (beta - mean * scale).astype(jnp.float32)
    flat = d * h * wd * c

    if flat % 128 == 0 and 128 % c == 0:
        rows = flat // 128
        rt = _pick_row_tile(rows)
        reps = 128 // c
        s_l = jnp.tile(scale, reps).reshape(1, 128)
        b_l = jnp.tile(bias, reps).reshape(1, 128)
        yf = y.reshape(n, rows, 128)
        out = pl.pallas_call(
            _affine_relu_lanes_kernel,
            out_shape=jax.ShapeDtypeStruct((n, rows, 128), out_dtype),
            grid_spec=pltpu.PrefetchScalarGridSpec(
                num_scalar_prefetch=0,
                grid=(n, rows // rt),
                in_specs=[
                    pl.BlockSpec((1, rt, 128), lambda i, j: (i, j, 0)),
                    pl.BlockSpec((1, 128), lambda i, j: (0, 0)),
                    pl.BlockSpec((1, 128), lambda i, j: (0, 0)),
                ],
                out_specs=pl.BlockSpec((1, rt, 128), lambda i, j: (i, j, 0)),
            ),
            compiler_params=pltpu.CompilerParams(
                dimension_semantics=("parallel", "parallel"),
                vmem_limit_bytes=_vmem_limit_bytes()),
        )(yf, s_l, b_l)
        return out.reshape(n, d, h, wd, c)

    # Fallback: channel-last elementwise kernel.
    return pl.pallas_call(
        _affine_relu_ndhwc_kernel,
        out_shape=jax.ShapeDtypeStruct(y.shape, out_dtype),
        grid_spec=pltpu.PrefetchScalarGridSpec(
            num_scalar_prefetch=0,
            grid=(n,),
            in_specs=[
                pl.BlockSpec((1, d, h, wd, c), lambda i: (i, 0, 0, 0, 0)),
                pl.BlockSpec((1, c), lambda i: (0, 0)),
                pl.BlockSpec((1, c), lambda i: (0, 0)),
            ],
            out_specs=pl.BlockSpec((1, d, h, wd, c), lambda i: (i, 0, 0, 0, 0)),
        ),
        compiler_params=pltpu.CompilerParams(
            dimension_semantics=("parallel",),
            vmem_limit_bytes=_vmem_limit_bytes()),
    )(y, scale.reshape(1, c), bias.reshape(1, c))


def init_params(key, in_channels, out_channels):
    """Deterministic parameter init matching PyTorch defaults (weights stored as
    (kd,kh,kw,Cin,Cout) for the channels-last kernels)."""
    k1, k2, k3, k4 = jax.random.split(key, 4)
    lim1 = 1.0 / jnp.sqrt(in_channels * 27)
    lim2 = 1.0 / jnp.sqrt(out_channels * 27)
    return {
        "w1": jax.random.uniform(k1, (3, 3, 3, in_channels, out_channels),
                                 jnp.float32, -lim1, lim1),
        "b1": jax.random.uniform(k2, (out_channels,), jnp.float32, -lim1, lim1),
        "w2": jax.random.uniform(k3, (3, 3, 3, out_channels, out_channels),
                                 jnp.float32, -lim2, lim2),
        "b2": jax.random.uniform(k4, (out_channels,), jnp.float32, -lim2, lim2),
        "gamma1": jnp.ones((out_channels,), jnp.float32),
        "beta1": jnp.zeros((out_channels,), jnp.float32),
        "gamma2": jnp.ones((out_channels,), jnp.float32),
        "beta2": jnp.zeros((out_channels,), jnp.float32),
    }


@functools.partial(jax.jit, static_argnames=("compute_dtype", "d_tile"))
def double_conv3d(x_ncdhw, params, *, compute_dtype=jnp.bfloat16, d_tile=None):
    """Forward pass of DoubleConv3D. Input / output: NCDHW (PyTorch layout)."""
    eps = 1e-5
    x = jnp.transpose(x_ncdhw, (0, 2, 3, 4, 1))          # -> NDHWC (module boundary only)
    n, d, h, wd, cin = x.shape
    cnt = jnp.float32(n * d * h * wd)

    # Conv1 (identity prologue) + fused channel stats; inter-layer act in compute dtype.
    ident_s = jnp.ones((cin,), jnp.float32)
    ident_b = jnp.zeros((cin,), jnp.float32)
    y1, s1, q1 = conv3x3x3_fused(x, ident_s, ident_b, params["w1"], params["b1"],
                                 prologue_relu=False, compute_dtype=compute_dtype,
                                 out_dtype=compute_dtype, d_tile=d_tile)
    mean1 = jnp.sum(s1, axis=(0, 1, 2)) / cnt
    var1 = jnp.maximum(jnp.sum(q1, axis=(0, 1, 2)) / cnt - mean1 * mean1, 0.0)
    scale1 = params["gamma1"] * jax.lax.rsqrt(var1 + eps)
    bias1 = params["beta1"] - mean1 * scale1

    # Conv2 with BN1+ReLU fused as its in-kernel prologue; fused stats of its output.
    y2, s2, q2 = conv3x3x3_fused(y1, scale1, bias1, params["w2"], params["b2"],
                                 prologue_relu=True, compute_dtype=compute_dtype,
                                 out_dtype=compute_dtype, d_tile=d_tile)
    mean2 = jnp.sum(s2, axis=(0, 1, 2)) / cnt
    var2 = jnp.maximum(jnp.sum(q2, axis=(0, 1, 2)) / cnt - mean2 * mean2, 0.0)

    out = bn_relu(y2, mean2, var2, params["gamma2"], params["beta2"], eps,
                  out_dtype=x_ncdhw.dtype)
    return jnp.transpose(out, (0, 4, 1, 2, 3))            # -> NCDHW


# ----------------------------- pure-JAX reference --------------------------- #

def _reference(x_ncdhw, params, eps=1e-5):
    x = jnp.transpose(x_ncdhw, (0, 2, 3, 4, 1)).astype(jnp.float32)

    def conv(xx, w, b):
        n, d, h, wd, _ = xx.shape
        co = w.shape[-1]
        xp = jnp.pad(xx, ((0, 0), (1, 1), (1, 1), (1, 1), (0, 0)))
        acc = jnp.zeros((n, d, h, wd, co), jnp.float32)
        for kd in range(3):
            for kh in range(3):
                for kw in range(3):
                    acc = acc + jnp.einsum(
                        "ndhwc,co->ndhwo",
                        xp[:, kd:kd + d, kh:kh + h, kw:kw + wd, :],
                        w[kd, kh, kw],
                        precision=jax.lax.Precision.HIGHEST)
        return acc + b

    def bnr(y, g, bt):
        m = jnp.mean(y, axis=(0, 1, 2, 3))
        v = jnp.var(y, axis=(0, 1, 2, 3))
        return jnp.maximum((y - m) * (g / jnp.sqrt(v + eps)) + bt, 0.0)

    y = bnr(conv(x, params["w1"], params["b1"]), params["gamma1"], params["beta1"])
    y = bnr(conv(y, params["w2"], params["b2"]), params["gamma2"], params["beta2"])
    return jnp.transpose(y, (0, 4, 1, 2, 3))


# --------------------------------- main ------------------------------------ #

if __name__ == "__main__":
    key = jax.random.PRNGKey(0)
    kx, kp = jax.random.split(key)

    N, C_IN, C_OUT, D, H, W = 2, 4, 8, 8, 8, 8
    x = jax.random.normal(kx, (N, C_IN, D, H, W), jnp.float32)   # NCDHW
    params = init_params(kp, C_IN, C_OUT)

    ref = jax.block_until_ready(_reference(x, params))

    # f32 path, forcing D-tiling (d_tile=4 -> 2 halo'd tiles) -- strict tolerance.
    out_f32 = jax.block_until_ready(
        double_conv3d(x, params, compute_dtype=jnp.float32, d_tile=4))
    assert out_f32.shape == (N, C_OUT, D, H, W), out_f32.shape
    assert bool(jnp.all(out_f32 >= 0.0))                         # ReLU output
    err32 = float(jnp.max(jnp.abs(out_f32 - ref)))
    assert err32 < 2e-3, f"f32 max abs error vs reference: {err32}"

    # bf16 MXU-operand / bf16-activation path (per-chip recommendation); output is
    # BN-normalized (unit scale) so an absolute precision-bounded tolerance applies.
    out_bf16 = jax.block_until_ready(
        double_conv3d(x, params, compute_dtype=jnp.bfloat16))
    assert out_bf16.shape == (N, C_OUT, D, H, W), out_bf16.shape
    errbf = float(jnp.max(jnp.abs(out_bf16 - ref)))
    assert errbf < 1e-1, f"bf16 max abs error vs reference: {errbf}"

    print("KERNEL_OK")
</pallas_src>

<mosaic_0001>
module attributes {stable_mosaic.version = 11 : i64} {
  func.func @_conv3x3x3_kernel(%arg0: i32, %arg1: i32, %arg2: memref<1x4x8x8x4xf32, #tpu.memory_space<vmem>>, %arg3: memref<1x1x8x8x4xf32, #tpu.memory_space<vmem>>, %arg4: memref<1x1x8x8x4xf32, #tpu.memory_space<vmem>>, %arg5: memref<1x4xf32, #tpu.memory_space<vmem>>, %arg6: memref<1x4xf32, #tpu.memory_space<vmem>>, %arg7: memref<3x36x8xf32, #tpu.memory_space<vmem>>, %arg8: memref<1x8xf32, #tpu.memory_space<vmem>>, %arg9: memref<1x4x8x8x8xf32, #tpu.memory_space<vmem>>, %arg10: memref<1x1x1x8xf32, #tpu.memory_space<vmem>>, %arg11: memref<1x1x1x8xf32, #tpu.memory_space<vmem>>, %arg12: memref<6x10x10x4xf32, #tpu.memory_space<vmem>>) attributes {dimension_semantics = [#tpu.dimension_semantics<parallel>, #tpu.dimension_semantics<parallel>], iteration_bounds = array<i64: 2, 2>, scalar_prefetch = 0 : i64, scratch_operands = 1 : i64, tpu.core_type = #tpu.core_type<tc>, window_params = [{transform_indices = @transform_0, window_bounds = array<i64: 1, 4, 8, 8, 4>}, {transform_indices = @transform_1, window_bounds = array<i64: 1, 1, 8, 8, 4>}, {transform_indices = @transform_2, window_bounds = array<i64: 1, 1, 8, 8, 4>}, {pipeline_mode = #tpu.pipeline_mode<synchronous>, transform_indices = @transform_3, window_bounds = array<i64: 1, 4>}, {pipeline_mode = #tpu.pipeline_mode<synchronous>, transform_indices = @transform_4, window_bounds = array<i64: 1, 4>}, {pipeline_mode = #tpu.pipeline_mode<synchronous>, transform_indices = @transform_5, window_bounds = array<i64: 3, 36, 8>}, {pipeline_mode = #tpu.pipeline_mode<synchronous>, transform_indices = @transform_6, window_bounds = array<i64: 1, 8>}, {transform_indices = @transform_7, window_bounds = array<i64: 1, 4, 8, 8, 8>}, {transform_indices = @transform_8, window_bounds = array<i64: 1, 1, 1, 8>}, {transform_indices = @transform_9, window_bounds = array<i64: 1, 1, 1, 8>}]} {
    %cst = arith.constant 0.000000e+00 : f32
    %0 = vector.broadcast %cst : f32 to vector<6x10x10x4xf32>
    %c0 = arith.constant 0 : index
    %c0_0 = arith.constant 0 : index
    %c0_1 = arith.constant 0 : index
    %c0_2 = arith.constant 0 : index
    %1 = vector.load %arg12[%c0, %c0_0, %c0_1, %c0_2] : memref<6x10x10x4xf32, #tpu.memory_space<vmem>>, vector<6x10x10x4xf32>
    tpu.vector_store %arg12[%c0, %c0_0, %c0_1, %c0_2], %0 {strides = array<i32>} : memref<6x10x10x4xf32, #tpu.memory_space<vmem>>, vector<6x10x10x4xf32>,
    %c0_3 = arith.constant 0 : index
    %c0_4 = arith.constant 0 : index
    %c0_5 = arith.constant 0 : index
    %c0_6 = arith.constant 0 : index
    %c0_7 = arith.constant 0 : index
    %2 = vector.load %arg2[%c0_3, %c0_4, %c0_5, %c0_6, %c0_7] : memref<1x4x8x8x4xf32, #tpu.memory_space<vmem>>, vector<1x4x8x8x4xf32>
    %3 = vector.shape_cast %2 : vector<1x4x8x8x4xf32> to vector<4x8x8x4xf32>
    %c1 = arith.constant 1 : index
    %c1_8 = arith.constant 1 : index
    %c1_9 = arith.constant 1 : index
    %c0_10 = arith.constant 0 : index
    %4 = vector.load %arg12[%c1, %c1_8, %c1_9, %c0_10] : memref<6x10x10x4xf32, #tpu.memory_space<vmem>>, vector<4x8x8x4xf32>
    tpu.vector_store %arg12[%c1, %c1_8, %c1_9, %c0_10], %3 {strides = array<i32>} : memref<6x10x10x4xf32, #tpu.memory_space<vmem>>, vector<4x8x8x4xf32>,
    %c0_i32 = arith.constant 0 : i32
    %5 = arith.cmpi sgt, %arg1, %c0_i32 : i32
    %6 = arith.extui %5 : i1 to i32
    %c0_i32_11 = arith.constant 0 : i32
    %7 = arith.cmpi ne, %6, %c0_i32_11 : i32
    scf.if %7 {
      %c0_45 = arith.constant 0 : index
      %c0_46 = arith.constant 0 : index
      %c0_47 = arith.constant 0 : index
      %c0_48 = arith.constant 0 : index
      %c0_49 = arith.constant 0 : index
      %57 = vector.load %arg3[%c0_45, %c0_46, %c0_47, %c0_48, %c0_49] : memref<1x1x8x8x4xf32, #tpu.memory_space<vmem>>, vector<1x1x8x8x4xf32>
      %58 = vector.shape_cast %57 : vector<1x1x8x8x4xf32> to vector<1x8x8x4xf32>
      %c0_50 = arith.constant 0 : index
      %c1_51 = arith.constant 1 : index
      %c1_52 = arith.constant 1 : index
      %c0_53 = arith.constant 0 : index
      %59 = vector.load %arg12[%c0_50, %c1_51, %c1_52, %c0_53] : memref<6x10x10x4xf32, #tpu.memory_space<vmem>>, vector<1x8x8x4xf32>
      tpu.vector_store %arg12[%c0_50, %c1_51, %c1_52, %c0_53], %58 {strides = array<i32>} : memref<6x10x10x4xf32, #tpu.memory_space<vmem>>, vector<1x8x8x4xf32>,
    } else {
    }
    %c1_i32 = arith.constant 1 : i32
    %8 = arith.cmpi slt, %arg1, %c1_i32 : i32
    %9 = arith.extui %8 : i1 to i32
    %c0_i32_12 = arith.constant 0 : i32
    %10 = arith.cmpi ne, %9, %c0_i32_12 : i32
    scf.if %10 {
      %c0_45 = arith.constant 0 : index
      %c0_46 = arith.constant 0 : index
      %c0_47 = arith.constant 0 : index
      %c0_48 = arith.constant 0 : index
      %c0_49 = arith.constant 0 : index
      %57 = vector.load %arg4[%c0_45, %c0_46, %c0_47, %c0_48, %c0_49] : memref<1x1x8x8x4xf32, #tpu.memory_space<vmem>>, vector<1x1x8x8x4xf32>
      %58 = vector.shape_cast %57 : vector<1x1x8x8x4xf32> to vector<1x8x8x4xf32>
      %c5 = arith.constant 5 : index
      %c1_50 = arith.constant 1 : index
      %c1_51 = arith.constant 1 : index
      %c0_52 = arith.constant 0 : index
      %59 = vector.load %arg12[%c5, %c1_50, %c1_51, %c0_52] : memref<6x10x10x4xf32, #tpu.memory_space<vmem>>, vector<1x8x8x4xf32>
      tpu.vector_store %arg12[%c5, %c1_50, %c1_51, %c0_52], %58 {strides = array<i32>} : memref<6x10x10x4xf32, #tpu.memory_space<vmem>>, vector<1x8x8x4xf32>,
    } else {
    }
    %c0_13 = arith.constant 0 : index
    %c0_14 = arith.constant 0 : index
    %c0_15 = arith.constant 0 : index
    %c0_16 = arith.constant 0 : index
    %11 = vector.load %arg12[%c0_13, %c0_14, %c0_15, %c0_16] : memref<6x10x10x4xf32, #tpu.memory_space<vmem>>, vector<6x10x10x4xf32>
    %12 = vector.extract_strided_slice %11 {offsets = [0, 0, 0, 0], sizes = [6, 10, 8, 4], strides = [1, 1, 1, 1]} : vector<6x10x10x4xf32> to vector<6x10x8x4xf32>
    %13 = vector.extract_strided_slice %11 {offsets = [0, 0, 1, 0], sizes = [6, 10, 8, 4], strides = [1, 1, 1, 1]} : vector<6x10x10x4xf32> to vector<6x10x8x4xf32>
    %14 = vector.extract_strided_slice %11 {offsets = [0, 0, 2, 0], sizes = [6, 10, 8, 4], strides = [1, 1, 1, 1]} : vector<6x10x10x4xf32> to vector<6x10x8x4xf32>
    %15 = tpu.concatenate %12, %13, %14 in 3 : vector<6x10x8x4xf32>, vector<6x10x8x4xf32>, vector<6x10x8x4xf32> -> vector<6x10x8x12xf32>
    %16 = vector.extract_strided_slice %15 {offsets = [0, 0, 0, 0], sizes = [6, 8, 8, 12], strides = [1, 1, 1, 1]} : vector<6x10x8x12xf32> to vector<6x8x8x12xf32>
    %17 = vector.extract_strided_slice %15 {offsets = [0, 1, 0, 0], sizes = [6, 8, 8, 12], strides = [1, 1, 1, 1]} : vector<6x10x8x12xf32> to vector<6x8x8x12xf32>
    %18 = vector.extract_strided_slice %15 {offsets = [0, 2, 0, 0], sizes = [6, 8, 8, 12], strides = [1, 1, 1, 1]} : vector<6x10x8x12xf32> to vector<6x8x8x12xf32>
    %19 = tpu.concatenate %16, %17, %18 in 3 : vector<6x8x8x12xf32>, vector<6x8x8x12xf32>, vector<6x8x8x12xf32> -> vector<6x8x8x36xf32>
    %20 = vector.extract_strided_slice %19 {offsets = [0, 0, 0, 0], sizes = [4, 8, 8, 36], strides = [1, 1, 1, 1]} : vector<6x8x8x36xf32> to vector<4x8x8x36xf32>
    %21 = vector.shape_cast %20 : vector<4x8x8x36xf32> to vector<256x36xf32>
    %c0_17 = arith.constant 0 : index
    %c0_18 = arith.constant 0 : index
    %c0_19 = arith.constant 0 : index
    %22 = vector.load %arg7[%c0_17, %c0_18, %c0_19] : memref<3x36x8xf32, #tpu.memory_space<vmem>>, vector<1x36x8xf32>
    %23 = vector.shape_cast %22 : vector<1x36x8xf32> to vector<36x8xf32>
    %cst_20 = arith.constant dense<0.000000e+00> : vector<256x8xf32>
    %24 = tpu.matmul %21, %23, %cst_20 {dimension_numbers = #tpu.dot_dimension_numbers<[1], [0], [0], [1], [0, 0, 1, 1], [], []>} : vector<256x36xf32>, vector<36x8xf32>, vector<256x8xf32> -> vector<256x8xf32>
    %25 = vector.extract_strided_slice %19 {offsets = [1, 0, 0, 0], sizes = [4, 8, 8, 36], strides = [1, 1, 1, 1]} : vector<6x8x8x36xf32> to vector<4x8x8x36xf32>
    %26 = vector.shape_cast %25 : vector<4x8x8x36xf32> to vector<256x36xf32>
    %c1_21 = arith.constant 1 : index
    %c0_22 = arith.constant 0 : index
    %c0_23 = arith.constant 0 : index
    %27 = vector.load %arg7[%c1_21, %c0_22, %c0_23] : memref<3x36x8xf32, #tpu.memory_space<vmem>>, vector<1x36x8xf32>
    %28 = vector.shape_cast %27 : vector<1x36x8xf32> to vector<36x8xf32>
    %cst_24 = arith.constant dense<0.000000e+00> : vector<256x8xf32>
    %29 = tpu.matmul %26, %28, %cst_24 {dimension_numbers = #tpu.dot_dimension_numbers<[1], [0], [0], [1], [0, 0, 1, 1], [], []>} : vector<256x36xf32>, vector<36x8xf32>, vector<256x8xf32> -> vector<256x8xf32>
    %30 = arith.addf %24, %29 : vector<256x8xf32>
    %31 = vector.extract_strided_slice %19 {offsets = [2, 0, 0, 0], sizes = [4, 8, 8, 36], strides = [1, 1, 1, 1]} : vector<6x8x8x36xf32> to vector<4x8x8x36xf32>
    %32 = vector.shape_cast %31 : vector<4x8x8x36xf32> to vector<256x36xf32>
    %c2 = arith.constant 2 : index
    %c0_25 = arith.constant 0 : index
    %c0_26 = arith.constant 0 : index
    %33 = vector.load %arg7[%c2, %c0_25, %c0_26] : memref<3x36x8xf32, #tpu.memory_space<vmem>>, vector<1x36x8xf32>
    %34 = vector.shape_cast %33 : vector<1x36x8xf32> to vector<36x8xf32>
    %cst_27 = arith.constant dense<0.000000e+00> : vector<256x8xf32>
    %35 = tpu.matmul %32, %34, %cst_27 {dimension_numbers = #tpu.dot_dimension_numbers<[1], [0], [0], [1], [0, 0, 1, 1], [], []>} : vector<256x36xf32>, vector<36x8xf32>, vector<256x8xf32> -> vector<256x8xf32>
    %36 = arith.addf %30, %35 : vector<256x8xf32>
    %c0_28 = arith.constant 0 : index
    %c0_29 = arith.constant 0 : index
    %37 = vector.load %arg8[%c0_28, %c0_29] : memref<1x8xf32, #tpu.memory_space<vmem>>, vector<1x8xf32>
    %38 = vector.shape_cast %37 : vector<1x8xf32> to vector<8xf32>
    %39 = vector.shape_cast %38 : vector<8xf32> to vector<1x8xf32>
    %40 = vector.broadcast %39 : vector<1x8xf32> to vector<256x8xf32>
    %41 = arith.addf %36, %40 : vector<256x8xf32>
    %cst_30 = arith.constant dense<0.000000e+00> : vector<8xf32>
    %42 = vector.multi_reduction <add>, %41, %cst_30 [0] : vector<256x8xf32> to vector<8xf32>
    %43 = vector.shape_cast %42 : vector<8xf32> to vector<1x8xf32>
    %c0_31 = arith.constant 0 : index
    %c0_32 = arith.constant 0 : index
    %c0_33 = arith.constant 0 : index
    %c0_34 = arith.constant 0 : index
    %44 = vector.load %arg10[%c0_31, %c0_32, %c0_33, %c0_34] : memref<1x1x1x8xf32, #tpu.memory_space<vmem>>, vector<1x1x1x8xf32>
    %45 = vector.shape_cast %44 : vector<1x1x1x8xf32> to vector<1x8xf32>
    %46 = vector.shape_cast %43 : vector<1x8xf32> to vector<1x1x1x8xf32>
    tpu.vector_store %arg10[%c0_31, %c0_32, %c0_33, %c0_34], %46 {strides = array<i32>} : memref<1x1x1x8xf32, #tpu.memory_space<vmem>>, vector<1x1x1x8xf32>,
    %47 = arith.mulf %41, %41 : vector<256x8xf32>
    %cst_35 = arith.constant dense<0.000000e+00> : vector<8xf32>
    %48 = vector.multi_reduction <add>, %47, %cst_35 [0] : vector<256x8xf32> to vector<8xf32>
    %49 = vector.shape_cast %48 : vector<8xf32> to vector<1x8xf32>
    %c0_36 = arith.constant 0 : index
    %c0_37 = arith.constant 0 : index
    %c0_38 = arith.constant 0 : index
    %c0_39 = arith.constant 0 : index
    %50 = vector.load %arg11[%c0_36, %c0_37, %c0_38, %c0_39] : memref<1x1x1x8xf32, #tpu.memory_space<vmem>>, vector<1x1x1x8xf32>
    %51 = vector.shape_cast %50 : vector<1x1x1x8xf32> to vector<1x8xf32>
    %52 = vector.shape_cast %49 : vector<1x8xf32> to vector<1x1x1x8xf32>
    tpu.vector_store %arg11[%c0_36, %c0_37, %c0_38, %c0_39], %52 {strides = array<i32>} : memref<1x1x1x8xf32, #tpu.memory_space<vmem>>, vector<1x1x1x8xf32>,
    %53 = vector.shape_cast %41 : vector<256x8xf32> to vector<4x8x8x8xf32>
    %c0_40 = arith.constant 0 : index
    %c0_41 = arith.constant 0 : index
    %c0_42 = arith.constant 0 : index
    %c0_43 = arith.constant 0 : index
    %c0_44 = arith.constant 0 : index
    %54 = vector.load %arg9[%c0_40, %c0_41, %c0_42, %c0_43, %c0_44] : memref<1x4x8x8x8xf32, #tpu.memory_space<vmem>>, vector<1x4x8x8x8xf32>
    %55 = vector.shape_cast %54 : vector<1x4x8x8x8xf32> to vector<4x8x8x8xf32>
    %56 = vector.shape_cast %53 : vector<4x8x8x8xf32> to vector<1x4x8x8x8xf32>
    tpu.vector_store %arg9[%c0_40, %c0_41, %c0_42, %c0_43, %c0_44], %56 {strides = array<i32>} : memref<1x4x8x8x8xf32, #tpu.memory_space<vmem>>, vector<1x4x8x8x8xf32>,
    return
  }
  func.func @transform_0(%arg0: i32, %arg1: i32) -> (i32, i32, i32, i32, i32) {
    %c0_i32 = arith.constant 0 : i32
    %c0_i32_0 = arith.constant 0 : i32
    %c0_i32_1 = arith.constant 0 : i32
    %c0_i32_2 = arith.constant 0 : i32
    return %arg0, %arg1, %c0_i32, %c0_i32_0, %c0_i32_1 : i32, i32, i32, i32, i32
  }
  func.func @transform_1(%arg0: i32, %arg1: i32) -> (i32, i32, i32, i32, i32) {
    %c4_i32 = arith.constant 4 : i32
    %0 = arith.muli %arg1, %c4_i32 : i32
    %c1_i32 = arith.constant 1 : i32
    %1 = arith.subi %0, %c1_i32 : i32
    %c0_i32 = arith.constant 0 : i32
    %2 = arith.maxsi %1, %c0_i32 : i32
    %c0_i32_0 = arith.constant 0 : i32
    %c0_i32_1 = arith.constant 0 : i32
    %c0_i32_2 = arith.constant 0 : i32
    %c0_i32_3 = arith.constant 0 : i32
    return %arg0, %2, %c0_i32_0, %c0_i32_1, %c0_i32_2 : i32, i32, i32, i32, i32
  }
  func.func @transform_2(%arg0: i32, %arg1: i32) -> (i32, i32, i32, i32, i32) {
    %c1_i32 = arith.constant 1 : i32
    %0 = arith.addi %arg1, %c1_i32 : i32
    %c4_i32 = arith.constant 4 : i32
    %1 = arith.muli %0, %c4_i32 : i32
    %c7_i32 = arith.constant 7 : i32
    %2 = arith.minsi %1, %c7_i32 : i32
    %c0_i32 = arith.constant 0 : i32
    %c0_i32_0 = arith.constant 0 : i32
    %c0_i32_1 = arith.constant 0 : i32
    %c0_i32_2 = arith.constant 0 : i32
    return %arg0, %2, %c0_i32, %c0_i32_0, %c0_i32_1 : i32, i32, i32, i32, i32
  }
  func.func @transform_3(%arg0: i32, %arg1: i32) -> (i32, i32) {
    %c0_i32 = arith.constant 0 : i32
    %c0_i32_0 = arith.constant 0 : i32
    %c0_i32_1 = arith.constant 0 : i32
    return %c0_i32, %c0_i32_0 : i32, i32
  }
  func.func @transform_4(%arg0: i32, %arg1: i32) -> (i32, i32) {
    %c0_i32 = arith.constant 0 : i32
    %c0_i32_0 = arith.constant 0 : i32
    %c0_i32_1 = arith.constant 0 : i32
    return %c0_i32, %c0_i32_0 : i32, i32
  }
  func.func @transform_5(%arg0: i32, %arg1: i32) -> (i32, i32, i32) {
    %c0_i32 = arith.constant 0 : i32
    %c0_i32_0 = arith.constant 0 : i32
    %c0_i32_1 = arith.constant 0 : i32
    %c0_i32_2 = arith.constant 0 : i32
    return %c0_i32, %c0_i32_0, %c0_i32_1 : i32, i32, i32
  }
  func.func @transform_6(%arg0: i32, %arg1: i32) -> (i32, i32) {
    %c0_i32 = arith.constant 0 : i32
    %c0_i32_0 = arith.constant 0 : i32
    %c0_i32_1 = arith.constant 0 : i32
    return %c0_i32, %c0_i32_0 : i32, i32
  }
  func.func @transform_7(%arg0: i32, %arg1: i32) -> (i32, i32, i32, i32, i32) {
    %c0_i32 = arith.constant 0 : i32
    %c0_i32_0 = arith.constant 0 : i32
    %c0_i32_1 = arith.constant 0 : i32
    %c0_i32_2 = arith.constant 0 : i32
    return %arg0, %arg1, %c0_i32, %c0_i32_0, %c0_i32_1 : i32, i32, i32, i32, i32
  }
  func.func @transform_8(%arg0: i32, %arg1: i32) -> (i32, i32, i32, i32) {
    %c0_i32 = arith.constant 0 : i32
    %c0_i32_0 = arith.constant 0 : i32
    %c0_i32_1 = arith.constant 0 : i32
    return %arg0, %arg1, %c0_i32, %c0_i32_0 : i32, i32, i32, i32
  }
  func.func @transform_9(%arg0: i32, %arg1: i32) -> (i32, i32, i32, i32) {
    %c0_i32 = arith.constant 0 : i32
    %c0_i32_0 = arith.constant 0 : i32
    %c0_i32_1 = arith.constant 0 : i32
    return %arg0, %arg1, %c0_i32, %c0_i32_0 : i32, i32, i32, i32
  }
}

module attributes {stable_mosaic.version = 11 : i64} {
  func.func @_conv3x3x3_kernel(%arg0: i32, %arg1: i32, %arg2: memref<1x4x8x8x8xf32, #tpu.memory_space<vmem>>, %arg3: memref<1x1x8x8x8xf32, #tpu.memory_space<vmem>>, %arg4: memref<1x1x8x8x8xf32, #tpu.memory_space<vmem>>, %arg5: memref<1x8xf32, #tpu.memory_space<vmem>>, %arg6: memref<1x8xf32, #tpu.memory_space<vmem>>, %arg7: memref<3x72x8xf32, #tpu.memory_space<vmem>>, %arg8: memref<1x8xf32, #tpu.memory_space<vmem>>, %arg9: memref<1x4x8x8x8xf32, #tpu.memory_space<vmem>>, %arg10: memref<1x1x1x8xf32, #tpu.memory_space<vmem>>, %arg11: memref<1x1x1x8xf32, #tpu.memory_space<vmem>>, %arg12: memref<6x10x10x8xf32, #tpu.memory_space<vmem>>) attributes {dimension_semantics = [#tpu.dimension_semantics<parallel>, #tpu.dimension_semantics<parallel>], iteration_bounds = array<i64: 2, 2>, scalar_prefetch = 0 : i64, scratch_operands = 1 : i64, tpu.core_type = #tpu.core_type<tc>, window_params = [{transform_indices = @transform_0, window_bounds = array<i64: 1, 4, 8, 8, 8>}, {transform_indices = @transform_1, window_bounds = array<i64: 1, 1, 8, 8, 8>}, {transform_indices = @transform_2, window_bounds = array<i64: 1, 1, 8, 8, 8>}, {pipeline_mode = #tpu.pipeline_mode<synchronous>, transform_indices = @transform_3, window_bounds = array<i64: 1, 8>}, {pipeline_mode = #tpu.pipeline_mode<synchronous>, transform_indices = @transform_4, window_bounds = array<i64: 1, 8>}, {pipeline_mode = #tpu.pipeline_mode<synchronous>, transform_indices = @transform_5, window_bounds = array<i64: 3, 72, 8>}, {pipeline_mode = #tpu.pipeline_mode<synchronous>, transform_indices = @transform_6, window_bounds = array<i64: 1, 8>}, {transform_indices = @transform_7, window_bounds = array<i64: 1, 4, 8, 8, 8>}, {transform_indices = @transform_8, window_bounds = array<i64: 1, 1, 1, 8>}, {transform_indices = @transform_9, window_bounds = array<i64: 1, 1, 1, 8>}]} {
    %cst = arith.constant 0.000000e+00 : f32
    %0 = vector.broadcast %cst : f32 to vector<6x10x10x8xf32>
    %c0 = arith.constant 0 : index
    %c0_0 = arith.constant 0 : index
    %c0_1 = arith.constant 0 : index
    %c0_2 = arith.constant 0 : index
    %1 = vector.load %arg12[%c0, %c0_0, %c0_1, %c0_2] : memref<6x10x10x8xf32, #tpu.memory_space<vmem>>, vector<6x10x10x8xf32>
    tpu.vector_store %arg12[%c0, %c0_0, %c0_1, %c0_2], %0 {strides = array<i32>} : memref<6x10x10x8xf32, #tpu.memory_space<vmem>>, vector<6x10x10x8xf32>,
    %c0_3 = arith.constant 0 : index
    %c0_4 = arith.constant 0 : index
    %c0_5 = arith.constant 0 : index
    %c0_6 = arith.constant 0 : index
    %c0_7 = arith.constant 0 : index
    %2 = vector.load %arg2[%c0_3, %c0_4, %c0_5, %c0_6, %c0_7] : memref<1x4x8x8x8xf32, #tpu.memory_space<vmem>>, vector<1x4x8x8x8xf32>
    %3 = vector.shape_cast %2 : vector<1x4x8x8x8xf32> to vector<4x8x8x8xf32>
    %c0_8 = arith.constant 0 : index
    %c0_9 = arith.constant 0 : index
    %4 = vector.load %arg5[%c0_8, %c0_9] : memref<1x8xf32, #tpu.memory_space<vmem>>, vector<1x8xf32>
    %5 = vector.shape_cast %4 : vector<1x8xf32> to vector<8xf32>
    %6 = vector.shape_cast %5 : vector<8xf32> to vector<1x1x1x8xf32>
    %7 = vector.broadcast %6 : vector<1x1x1x8xf32> to vector<4x8x8x8xf32>
    %8 = arith.mulf %3, %7 : vector<4x8x8x8xf32>
    %c0_10 = arith.constant 0 : index
    %c0_11 = arith.constant 0 : index
    %9 = vector.load %arg6[%c0_10, %c0_11] : memref<1x8xf32, #tpu.memory_space<vmem>>, vector<1x8xf32>
    %10 = vector.shape_cast %9 : vector<1x8xf32> to vector<8xf32>
    %11 = vector.shape_cast %10 : vector<8xf32> to vector<1x1x1x8xf32>
    %12 = vector.broadcast %11 : vector<1x1x1x8xf32> to vector<4x8x8x8xf32>
    %13 = arith.addf %8, %12 : vector<4x8x8x8xf32>
    %cst_12 = arith.constant 0.000000e+00 : f32
    %14 = vector.broadcast %cst_12 : f32 to vector<4x8x8x8xf32>
    %15 = arith.maximumf %13, %14 : vector<4x8x8x8xf32>
    %c1 = arith.constant 1 : index
    %c1_13 = arith.constant 1 : index
    %c1_14 = arith.constant 1 : index
    %c0_15 = arith.constant 0 : index
    %16 = vector.load %arg12[%c1, %c1_13, %c1_14, %c0_15] : memref<6x10x10x8xf32, #tpu.memory_space<vmem>>, vector<4x8x8x8xf32>
    tpu.vector_store %arg12[%c1, %c1_13, %c1_14, %c0_15], %15 {strides = array<i32>} : memref<6x10x10x8xf32, #tpu.memory_space<vmem>>, vector<4x8x8x8xf32>,
    %c0_i32 = arith.constant 0 : i32
    %17 = arith.cmpi sgt, %arg1, %c0_i32 : i32
    %18 = arith.extui %17 : i1 to i32
    %c0_i32_16 = arith.constant 0 : i32
    %19 = arith.cmpi ne, %18, %c0_i32_16 : i32
    scf.if %19 {
      %c0_50 = arith.constant 0 : index
      %c0_51 = arith.constant 0 : index
      %c0_52 = arith.constant 0 : index
      %c0_53 = arith.constant 0 : index
      %c0_54 = arith.constant 0 : index
      %69 = vector.load %arg3[%c0_50, %c0_51, %c0_52, %c0_53, %c0_54] : memref<1x1x8x8x8xf32, #tpu.memory_space<vmem>>, vector<1x1x8x8x8xf32>
      %70 = vector.shape_cast %69 : vector<1x1x8x8x8xf32> to vector<1x8x8x8xf32>
      %c0_55 = arith.constant 0 : index
      %c0_56 = arith.constant 0 : index
      %71 = vector.load %arg5[%c0_55, %c0_56] : memref<1x8xf32, #tpu.memory_space<vmem>>, vector<1x8xf32>
      %72 = vector.shape_cast %71 : vector<1x8xf32> to vector<8xf32>
      %73 = vector.shape_cast %72 : vector<8xf32> to vector<1x1x1x8xf32>
      %74 = vector.broadcast %73 : vector<1x1x1x8xf32> to vector<1x8x8x8xf32>
      %75 = arith.mulf %70, %74 : vector<1x8x8x8xf32>
      %c0_57 = arith.constant 0 : index
      %c0_58 = arith.constant 0 : index
      %76 = vector.load %arg6[%c0_57, %c0_58] : memref<1x8xf32, #tpu.memory_space<vmem>>, vector<1x8xf32>
      %77 = vector.shape_cast %76 : vector<1x8xf32> to vector<8xf32>
      %78 = vector.shape_cast %77 : vector<8xf32> to vector<1x1x1x8xf32>
      %79 = vector.broadcast %78 : vector<1x1x1x8xf32> to vector<1x8x8x8xf32>
      %80 = arith.addf %75, %79 : vector<1x8x8x8xf32>
      %cst_59 = arith.constant 0.000000e+00 : f32
      %81 = vector.broadcast %cst_59 : f32 to vector<1x8x8x8xf32>
      %82 = arith.maximumf %80, %81 : vector<1x8x8x8xf32>
      %c0_60 = arith.constant 0 : index
      %c1_61 = arith.constant 1 : index
      %c1_62 = arith.constant 1 : index
      %c0_63 = arith.constant 0 : index
      %83 = vector.load %arg12[%c0_60, %c1_61, %c1_62, %c0_63] : memref<6x10x10x8xf32, #tpu.memory_space<vmem>>, vector<1x8x8x8xf32>
      tpu.vector_store %arg12[%c0_60, %c1_61, %c1_62, %c0_63], %82 {strides = array<i32>} : memref<6x10x10x8xf32, #tpu.memory_space<vmem>>, vector<1x8x8x8xf32>,
    } else {
    }
    %c1_i32 = arith.constant 1 : i32
    %20 = arith.cmpi slt, %arg1, %c1_i32 : i32
    %21 = arith.extui %20 : i1 to i32
    %c0_i32_17 = arith.constant 0 : i32
    %22 = arith.cmpi ne, %21, %c0_i32_17 : i32
    scf.if %22 {
      %c0_50 = arith.constant 0 : index
      %c0_51 = arith.constant 0 : index
      %c0_52 = arith.constant 0 : index
      %c0_53 = arith.constant 0 : index
      %c0_54 = arith.constant 0 : index
      %69 = vector.load %arg4[%c0_50, %c0_51, %c0_52, %c0_53, %c0_54] : memref<1x1x8x8x8xf32, #tpu.memory_space<vmem>>, vector<1x1x8x8x8xf32>
      %70 = vector.shape_cast %69 : vector<1x1x8x8x8xf32> to vector<1x8x8x8xf32>
      %c0_55 = arith.constant 0 : index
      %c0_56 = arith.constant 0 : index
      %71 = vector.load %arg5[%c0_55, %c0_56] : memref<1x8xf32, #tpu.memory_space<vmem>>, vector<1x8xf32>
      %72 = vector.shape_cast %71 : vector<1x8xf32> to vector<8xf32>
      %73 = vector.shape_cast %72 : vector<8xf32> to vector<1x1x1x8xf32>
      %74 = vector.broadcast %73 : vector<1x1x1x8xf32> to vector<1x8x8x8xf32>
      %75 = arith.mulf %70, %74 : vector<1x8x8x8xf32>
      %c0_57 = arith.constant 0 : index
      %c0_58 = arith.constant 0 : index
      %76 = vector.load %arg6[%c0_57, %c0_58] : memref<1x8xf32, #tpu.memory_space<vmem>>, vector<1x8xf32>
      %77 = vector.shape_cast %76 : vector<1x8xf32> to vector<8xf32>
      %78 = vector.shape_cast %77 : vector<8xf32> to vector<1x1x1x8xf32>
      %79 = vector.broadcast %78 : vector<1x1x1x8xf32> to vector<1x8x8x8xf32>
      %80 = arith.addf %75, %79 : vector<1x8x8x8xf32>
      %cst_59 = arith.constant 0.000000e+00 : f32
      %81 = vector.broadcast %cst_59 : f32 to vector<1x8x8x8xf32>
      %82 = arith.maximumf %80, %81 : vector<1x8x8x8xf32>
      %c5 = arith.constant 5 : index
      %c1_60 = arith.constant 1 : index
      %c1_61 = arith.constant 1 : index
      %c0_62 = arith.constant 0 : index
      %83 = vector.load %arg12[%c5, %c1_60, %c1_61, %c0_62] : memref<6x10x10x8xf32, #tpu.memory_space<vmem>>, vector<1x8x8x8xf32>
      tpu.vector_store %arg12[%c5, %c1_60, %c1_61, %c0_62], %82 {strides = array<i32>} : memref<6x10x10x8xf32, #tpu.memory_space<vmem>>, vector<1x8x8x8xf32>,
    } else {
    }
    %c0_18 = arith.constant 0 : index
    %c0_19 = arith.constant 0 : index
    %c0_20 = arith.constant 0 : index
    %c0_21 = arith.constant 0 : index
    %23 = vector.load %arg12[%c0_18, %c0_19, %c0_20, %c0_21] : memref<6x10x10x8xf32, #tpu.memory_space<vmem>>, vector<6x10x10x8xf32>
    %24 = vector.extract_strided_slice %23 {offsets = [0, 0, 0, 0], sizes = [6, 10, 8, 8], strides = [1, 1, 1, 1]} : vector<6x10x10x8xf32> to vector<6x10x8x8xf32>
    %25 = vector.extract_strided_slice %23 {offsets = [0, 0, 1, 0], sizes = [6, 10, 8, 8], strides = [1, 1, 1, 1]} : vector<6x10x10x8xf32> to vector<6x10x8x8xf32>
    %26 = vector.extract_strided_slice %23 {offsets = [0, 0, 2, 0], sizes = [6, 10, 8, 8], strides = [1, 1, 1, 1]} : vector<6x10x10x8xf32> to vector<6x10x8x8xf32>
    %27 = tpu.concatenate %24, %25, %26 in 3 : vector<6x10x8x8xf32>, vector<6x10x8x8xf32>, vector<6x10x8x8xf32> -> vector<6x10x8x24xf32>
    %28 = vector.extract_strided_slice %27 {offsets = [0, 0, 0, 0], sizes = [6, 8, 8, 24], strides = [1, 1, 1, 1]} : vector<6x10x8x24xf32> to vector<6x8x8x24xf32>
    %29 = vector.extract_strided_slice %27 {offsets = [0, 1, 0, 0], sizes = [6, 8, 8, 24], strides = [1, 1, 1, 1]} : vector<6x10x8x24xf32> to vector<6x8x8x24xf32>
    %30 = vector.extract_strided_slice %27 {offsets = [0, 2, 0, 0], sizes = [6, 8, 8, 24], strides = [1, 1, 1, 1]} : vector<6x10x8x24xf32> to vector<6x8x8x24xf32>
    %31 = tpu.concatenate %28, %29, %30 in 3 : vector<6x8x8x24xf32>, vector<6x8x8x24xf32>, vector<6x8x8x24xf32> -> vector<6x8x8x72xf32>
    %32 = vector.extract_strided_slice %31 {offsets = [0, 0, 0, 0], sizes = [4, 8, 8, 72], strides = [1, 1, 1, 1]} : vector<6x8x8x72xf32> to vector<4x8x8x72xf32>
    %33 = vector.shape_cast %32 : vector<4x8x8x72xf32> to vector<256x72xf32>
    %c0_22 = arith.constant 0 : index
    %c0_23 = arith.constant 0 : index
    %c0_24 = arith.constant 0 : index
    %34 = vector.load %arg7[%c0_22, %c0_23, %c0_24] : memref<3x72x8xf32, #tpu.memory_space<vmem>>, vector<1x72x8xf32>
    %35 = vector.shape_cast %34 : vector<1x72x8xf32> to vector<72x8xf32>
    %cst_25 = arith.constant dense<0.000000e+00> : vector<256x8xf32>
    %36 = tpu.matmul %33, %35, %cst_25 {dimension_numbers = #tpu.dot_dimension_numbers<[1], [0], [0], [1], [0, 0, 1, 1], [], []>} : vector<256x72xf32>, vector<72x8xf32>, vector<256x8xf32> -> vector<256x8xf32>
    %37 = vector.extract_strided_slice %31 {offsets = [1, 0, 0, 0], sizes = [4, 8, 8, 72], strides = [1, 1, 1, 1]} : vector<6x8x8x72xf32> to vector<4x8x8x72xf32>
    %38 = vector.shape_cast %37 : vector<4x8x8x72xf32> to vector<256x72xf32>
    %c1_26 = arith.constant 1 : index
    %c0_27 = arith.constant 0 : index
    %c0_28 = arith.constant 0 : index
    %39 = vector.load %arg7[%c1_26, %c0_27, %c0_28] : memref<3x72x8xf32, #tpu.memory_space<vmem>>, vector<1x72x8xf32>
    %40 = vector.shape_cast %39 : vector<1x72x8xf32> to vector<72x8xf32>
    %cst_29 = arith.constant dense<0.000000e+00> : vector<256x8xf32>
    %41 = tpu.matmul %38, %40, %cst_29 {dimension_numbers = #tpu.dot_dimension_numbers<[1], [0], [0], [1], [0, 0, 1, 1], [], []>} : vector<256x72xf32>, vector<72x8xf32>, vector<256x8xf32> -> vector<256x8xf32>
    %42 = arith.addf %36, %41 : vector<256x8xf32>
    %43 = vector.extract_strided_slice %31 {offsets = [2, 0, 0, 0], sizes = [4, 8, 8, 72], strides = [1, 1, 1, 1]} : vector<6x8x8x72xf32> to vector<4x8x8x72xf32>
    %44 = vector.shape_cast %43 : vector<4x8x8x72xf32> to vector<256x72xf32>
    %c2 = arith.constant 2 : index
    %c0_30 = arith.constant 0 : index
    %c0_31 = arith.constant 0 : index
    %45 = vector.load %arg7[%c2, %c0_30, %c0_31] : memref<3x72x8xf32, #tpu.memory_space<vmem>>, vector<1x72x8xf32>
    %46 = vector.shape_cast %45 : vector<1x72x8xf32> to vector<72x8xf32>
    %cst_32 = arith.constant dense<0.000000e+00> : vector<256x8xf32>
    %47 = tpu.matmul %44, %46, %cst_32 {dimension_numbers = #tpu.dot_dimension_numbers<[1], [0], [0], [1], [0, 0, 1, 1], [], []>} : vector<256x72xf32>, vector<72x8xf32>, vector<256x8xf32> -> vector<256x8xf32>
    %48 = arith.addf %42, %47 : vector<256x8xf32>
    %c0_33 = arith.constant 0 : index
    %c0_34 = arith.constant 0 : index
    %49 = vector.load %arg8[%c0_33, %c0_34] : memref<1x8xf32, #tpu.memory_space<vmem>>, vector<1x8xf32>
    %50 = vector.shape_cast %49 : vector<1x8xf32> to vector<8xf32>
    %51 = vector.shape_cast %50 : vector<8xf32> to vector<1x8xf32>
    %52 = vector.broadcast %51 : vector<1x8xf32> to vector<256x8xf32>
    %53 = arith.addf %48, %52 : vector<256x8xf32>
    %cst_35 = arith.constant dense<0.000000e+00> : vector<8xf32>
    %54 = vector.multi_reduction <add>, %53, %cst_35 [0] : vector<256x8xf32> to vector<8xf32>
    %55 = vector.shape_cast %54 : vector<8xf32> to vector<1x8xf32>
    %c0_36 = arith.constant 0 : index
    %c0_37 = arith.constant 0 : index
    %c0_38 = arith.constant 0 : index
    %c0_39 = arith.constant 0 : index
    %56 = vector.load %arg10[%c0_36, %c0_37, %c0_38, %c0_39] : memref<1x1x1x8xf32, #tpu.memory_space<vmem>>, vector<1x1x1x8xf32>
    %57 = vector.shape_cast %56 : vector<1x1x1x8xf32> to vector<1x8xf32>
    %58 = vector.shape_cast %55 : vector<1x8xf32> to vector<1x1x1x8xf32>
    tpu.vector_store %arg10[%c0_36, %c0_37, %c0_38, %c0_39], %58 {strides = array<i32>} : memref<1x1x1x8xf32, #tpu.memory_space<vmem>>, vector<1x1x1x8xf32>,
    %59 = arith.mulf %53, %53 : vector<256x8xf32>
    %cst_40 = arith.constant dense<0.000000e+00> : vector<8xf32>
    %60 = vector.multi_reduction <add>, %59, %cst_40 [0] : vector<256x8xf32> to vector<8xf32>
    %61 = vector.shape_cast %60 : vector<8xf32> to vector<1x8xf32>
    %c0_41 = arith.constant 0 : index
    %c0_42 = arith.constant 0 : index
    %c0_43 = arith.constant 0 : index
    %c0_44 = arith.constant 0 : index
    %62 = vector.load %arg11[%c0_41, %c0_42, %c0_43, %c0_44] : memref<1x1x1x8xf32, #tpu.memory_space<vmem>>, vector<1x1x1x8xf32>
    %63 = vector.shape_cast %62 : vector<1x1x1x8xf32> to vector<1x8xf32>
    %64 = vector.shape_cast %61 : vector<1x8xf32> to vector<1x1x1x8xf32>
    tpu.vector_store %arg11[%c0_41, %c0_42, %c0_43, %c0_44], %64 {strides = array<i32>} : memref<1x1x1x8xf32, #tpu.memory_space<vmem>>, vector<1x1x1x8xf32>,
    %65 = vector.shape_cast %53 : vector<256x8xf32> to vector<4x8x8x8xf32>
    %c0_45 = arith.constant 0 : index
    %c0_46 = arith.constant 0 : index
    %c0_47 = arith.constant 0 : index
    %c0_48 = arith.constant 0 : index
    %c0_49 = arith.constant 0 : index
    %66 = vector.load %arg9[%c0_45, %c0_46, %c0_47, %c0_48, %c0_49] : memref<1x4x8x8x8xf32, #tpu.memory_space<vmem>>, vector<1x4x8x8x8xf32>
    %67 = vector.shape_cast %66 : vector<1x4x8x8x8xf32> to vector<4x8x8x8xf32>
    %68 = vector.shape_cast %65 : vector<4x8x8x8xf32> to vector<1x4x8x8x8xf32>
    tpu.vector_store %arg9[%c0_45, %c0_46, %c0_47, %c0_48, %c0_49], %68 {strides = array<i32>} : memref<1x4x8x8x8xf32, #tpu.memory_space<vmem>>, vector<1x4x8x8x8xf32>,
    return
  }
  func.func @transform_0(%arg0: i32, %arg1: i32) -> (i32, i32, i32, i32, i32) {
    %c0_i32 = arith.constant 0 : i32
    %c0_i32_0 = arith.constant 0 : i32
    %c0_i32_1 = arith.constant 0 : i32
    %c0_i32_2 = arith.constant 0 : i32
    return %arg0, %arg1, %c0_i32, %c0_i32_0, %c0_i32_1 : i32, i32, i32, i32, i32
  }
  func.func @transform_1(%arg0: i32, %arg1: i32) -> (i32, i32, i32, i32, i32) {
    %c4_i32 = arith.constant 4 : i32
    %0 = arith.muli %arg1, %c4_i32 : i32
    %c1_i32 = arith.constant 1 : i32
    %1 = arith.subi %0, %c1_i32 : i32
    %c0_i32 = arith.constant 0 : i32
    %2 = arith.maxsi %1, %c0_i32 : i32
    %c0_i32_0 = arith.constant 0 : i32
    %c0_i32_1 = arith.constant 0 : i32
    %c0_i32_2 = arith.constant 0 : i32
    %c0_i32_3 = arith.constant 0 : i32
    return %arg0, %2, %c0_i32_0, %c0_i32_1, %c0_i32_2 : i32, i32, i32, i32, i32
  }
  func.func @transform_2(%arg0: i32, %arg1: i32) -> (i32, i32, i32, i32, i32) {
    %c1_i32 = arith.constant 1 : i32
    %0 = arith.addi %arg1, %c1_i32 : i32
    %c4_i32 = arith.constant 4 : i32
    %1 = arith.muli %0, %c4_i32 : i32
    %c7_i32 = arith.constant 7 : i32
    %2 = arith.minsi %1, %c7_i32 : i32
    %c0_i32 = arith.constant 0 : i32
    %c0_i32_0 = arith.constant 0 : i32
    %c0_i32_1 = arith.constant 0 : i32
    %c0_i32_2 = arith.constant 0 : i32
    return %arg0, %2, %c0_i32, %c0_i32_0, %c0_i32_1 : i32, i32, i32, i32, i32
  }
  func.func @transform_3(%arg0: i32, %arg1: i32) -> (i32, i32) {
    %c0_i32 = arith.constant 0 : i32
    %c0_i32_0 = arith.constant 0 : i32
    %c0_i32_1 = arith.constant 0 : i32
    return %c0_i32, %c0_i32_0 : i32, i32
  }
  func.func @transform_4(%arg0: i32, %arg1: i32) -> (i32, i32) {
    %c0_i32 = arith.constant 0 : i32
    %c0_i32_0 = arith.constant 0 : i32
    %c0_i32_1 = arith.constant 0 : i32
    return %c0_i32, %c0_i32_0 : i32, i32
  }
  func.func @transform_5(%arg0: i32, %arg1: i32) -> (i32, i32, i32) {
    %c0_i32 = arith.constant 0 : i32
    %c0_i32_0 = arith.constant 0 : i32
    %c0_i32_1 = arith.constant 0 : i32
    %c0_i32_2 = arith.constant 0 : i32
    return %c0_i32, %c0_i32_0, %c0_i32_1 : i32, i32, i32
  }
  func.func @transform_6(%arg0: i32, %arg1: i32) -> (i32, i32) {
    %c0_i32 = arith.constant 0 : i32
    %c0_i32_0 = arith.constant 0 : i32
    %c0_i32_1 = arith.constant 0 : i32
    return %c0_i32, %c0_i32_0 : i32, i32
  }
  func.func @transform_7(%arg0: i32, %arg1: i32) -> (i32, i32, i32, i32, i32) {
    %c0_i32 = arith.constant 0 : i32
    %c0_i32_0 = arith.constant 0 : i32
    %c0_i32_1 = arith.constant 0 : i32
    %c0_i32_2 = arith.constant 0 : i32
    return %arg0, %arg1, %c0_i32, %c0_i32_0, %c0_i32_1 : i32, i32, i32, i32, i32
  }
  func.func @transform_8(%arg0: i32, %arg1: i32) -> (i32, i32, i32, i32) {
    %c0_i32 = arith.constant 0 : i32
    %c0_i32_0 = arith.constant 0 : i32
    %c0_i32_1 = arith.constant 0 : i32
    return %arg0, %arg1, %c0_i32, %c0_i32_0 : i32, i32, i32, i32
  }
  func.func @transform_9(%arg0: i32, %arg1: i32) -> (i32, i32, i32, i32) {
    %c0_i32 = arith.constant 0 : i32
    %c0_i32_0 = arith.constant 0 : i32
    %c0_i32_1 = arith.constant 0 : i32
    return %arg0, %arg1, %c0_i32, %c0_i32_0 : i32, i32, i32, i32
  }
}

module attributes {stable_mosaic.version = 11 : i64} {
  func.func @_affine_relu_lanes_kernel(%arg0: i32, %arg1: i32, %arg2: memref<1x32x128xf32, #tpu.memory_space<vmem>>, %arg3: memref<1x128xf32, #tpu.memory_space<vmem>>, %arg4: memref<1x128xf32, #tpu.memory_space<vmem>>, %arg5: memref<1x32x128xf32, #tpu.memory_space<vmem>>) attributes {dimension_semantics = [#tpu.dimension_semantics<parallel>, #tpu.dimension_semantics<parallel>], iteration_bounds = array<i64: 2, 1>, scalar_prefetch = 0 : i64, scratch_operands = 0 : i64, tpu.core_type = #tpu.core_type<tc>, window_params = [{transform_indices = @transform_0, window_bounds = array<i64: 1, 32, 128>}, {pipeline_mode = #tpu.pipeline_mode<synchronous>, transform_indices = @transform_1, window_bounds = array<i64: 1, 128>}, {pipeline_mode = #tpu.pipeline_mode<synchronous>, transform_indices = @transform_2, window_bounds = array<i64: 1, 128>}, {transform_indices = @transform_3, window_bounds = array<i64: 1, 32, 128>}]} {
    %c0 = arith.constant 0 : index
    %c0_0 = arith.constant 0 : index
    %c0_1 = arith.constant 0 : index
    %0 = vector.load %arg2[%c0, %c0_0, %c0_1] : memref<1x32x128xf32, #tpu.memory_space<vmem>>, vector<1x32x128xf32>
    %1 = vector.shape_cast %0 : vector<1x32x128xf32> to vector<32x128xf32>
    %c0_2 = arith.constant 0 : index
    %c0_3 = arith.constant 0 : index
    %2 = vector.load %arg3[%c0_2, %c0_3] : memref<1x128xf32, #tpu.memory_space<vmem>>, vector<1x128xf32>
    %3 = vector.shape_cast %2 : vector<1x128xf32> to vector<128xf32>
    %4 = vector.shape_cast %3 : vector<128xf32> to vector<1x128xf32>
    %5 = vector.broadcast %4 : vector<1x128xf32> to vector<32x128xf32>
    %6 = arith.mulf %1, %5 : vector<32x128xf32>
    %c0_4 = arith.constant 0 : index
    %c0_5 = arith.constant 0 : index
    %7 = vector.load %arg4[%c0_4, %c0_5] : memref<1x128xf32, #tpu.memory_space<vmem>>, vector<1x128xf32>
    %8 = vector.shape_cast %7 : vector<1x128xf32> to vector<128xf32>
    %9 = vector.shape_cast %8 : vector<128xf32> to vector<1x128xf32>
    %10 = vector.broadcast %9 : vector<1x128xf32> to vector<32x128xf32>
    %11 = arith.addf %6, %10 : vector<32x128xf32>
    %cst = arith.constant 0.000000e+00 : f32
    %12 = vector.broadcast %cst : f32 to vector<32x128xf32>
    %13 = arith.maximumf %11, %12 : vector<32x128xf32>
    %c0_6 = arith.constant 0 : index
    %c0_7 = arith.constant 0 : index
    %c0_8 = arith.constant 0 : index
    %14 = vector.load %arg5[%c0_6, %c0_7, %c0_8] : memref<1x32x128xf32, #tpu.memory_space<vmem>>, vector<1x32x128xf32>
    %15 = vector.shape_cast %14 : vector<1x32x128xf32> to vector<32x128xf32>
    %16 = vector.shape_cast %13 : vector<32x128xf32> to vector<1x32x128xf32>
    tpu.vector_store %arg5[%c0_6, %c0_7, %c0_8], %16 {strides = array<i32>} : memref<1x32x128xf32, #tpu.memory_space<vmem>>, vector<1x32x128xf32>,
    return
  }
  func.func @transform_0(%arg0: i32, %arg1: i32) -> (i32, i32, i32) {
    %c0_i32 = arith.constant 0 : i32
    %c0_i32_0 = arith.constant 0 : i32
    return %arg0, %arg1, %c0_i32 : i32, i32, i32
  }
  func.func @transform_1(%arg0: i32, %arg1: i32) -> (i32, i32) {
    %c0_i32 = arith.constant 0 : i32
    %c0_i32_0 = arith.constant 0 : i32
    %c0_i32_1 = arith.constant 0 : i32
    return %c0_i32, %c0_i32_0 : i32, i32
  }
  func.func @transform_2(%arg0: i32, %arg1: i32) -> (i32, i32) {
    %c0_i32 = arith.constant 0 : i32
    %c0_i32_0 = arith.constant 0 : i32
    %c0_i32_1 = arith.constant 0 : i32
    return %c0_i32, %c0_i32_0 : i32, i32
  }
  func.func @transform_3(%arg0: i32, %arg1: i32) -> (i32, i32, i32) {
    %c0_i32 = arith.constant 0 : i32
    %c0_i32_0 = arith.constant 0 : i32
    return %arg0, %arg1, %c0_i32 : i32, i32, i32
  }
}

</mosaic_0001>

<bundles_post_ra>
// kernel: tile.18
= control target key start
LH: loop header
LB: loop body
LE: loop exit
PB: predicated region body
PF: predicated region fallthrough
CT: control target
= control target key end

     0   :  { %s28_s0 = inlined_call_operand.vmem [shape: f32[8], index: 0, kind: input, shape index: {}]   ;;  %s29_s1 = inlined_call_operand.vmem [shape: f32[16,8], index: 1, kind: output, shape index: {}]  }
   0x1   :  { %v4_v0 = vld [vmem:[%s28_s0] ss:$0 sm:$0xff] }
   0x2   :  { %5 = vst [vmem:[%s29_s1] sm:$0xff] %v4_v0  ;;  %8 = vst [vmem:[%s29_s1 + $0x8] sm:$0xff] %v4_v0 }

// kernel: tile.19
= control target key start
LH: loop header
LB: loop body
LE: loop exit
PB: predicated region body
PF: predicated region fallthrough
CT: control target
= control target key end

     0   :  { %s131_s10 = smov 120   ;;  %s132_s11 = smov 104   ;;  %vm3_vm0 = vcmask 64512   ;;  %vm9_vm1 = vcmask 1048512   ;;  %vm15_vm2 = vcmask 982912   ;;  %vm21_vm3 = vcmask 917312   ;;  %s207_s0 = inlined_call_operand.vmem [shape: f32[16,8], index: 0, kind: input, shape index: {}]   ;;  %s208_s1 = inlined_call_operand.vmem [shape: f32[1,128], index: 1, kind: output, shape index: {}]  }
   0x1   :  { %v101_v0 = vld [vmem:[%s207_s0 + $0xf] sm:$0x1]   ;;  %v103_v1 = vld [vmem:[%s207_s0 + $0xd] sm:$0x1]   ;;  %v102_v2 = vld [vmem:[%s207_s0 + $0xe] sm:$0x1]  }
   0x2   :  { %7 = vrot.lane.b32.xlu0 %v101_v0, %s131_s10  ;;  %19 = vrot.lane.b32.xlu1 %v103_v1, %s132_s11  ;;  %v104_v3 = vld [vmem:[%s207_s0 + $0xc] sm:$0x1]   ;;  %s133_s16 = smov 112   ;;  %s134_s17 = smov 96   ;;  %v105_v4 = vld [vmem:[%s207_s0 + $0xb] sm:$0x1]  }
   0x3   :  { %v106_v5 = vld [vmem:[%s207_s0 + $0xa] sm:$0x1]   ;;  %v2_v6 = vld [vmem:[%s207_s0] sm:$0x1]   ;;  %s135_s24 = smov 88   ;;  %s136_s25 = smov 80  }
   0x4   :  { %4 = vst.msk [vmem:[#allocation0] sm:$0x1] %vm3_vm0, %v2_v6   ;;  %v107_v7 = vld [vmem:[%s207_s0 + $0x9] sm:$0x1]   ;;  %v108_v8 = vld [vmem:[%s207_s0 + $0x8] sm:$0x1]  }
   0x5   :  { %s137_s30 = smov 72   ;;  %s138_s2 = smov 64   ;;  %v109_v9 = vld [vmem:[%s207_s0 + $0x7] sm:$0x1]   ;;  %v110_v10 = vld [vmem:[%s207_s0 + $0x6] sm:$0x1]  }
   0x6   :  { %13 = vrot.lane.b32.xlu0 %v102_v2, %s133_s16  ;;  %25 = vrot.lane.b32.xlu1 %v104_v3, %s134_s17  ;;  %s139_s7 = smov 56   ;;  %s140_s8 = smov 48   ;;  %v111_v11 = vld [vmem:[%s207_s0 + $0x5] sm:$0x1]   ;;  %v112_v12 = vld [vmem:[%s207_s0 + $0x4] sm:$0x1]  }
   0x7   :  { %s141_s13 = smov 40   ;;  %s142_s14 = smov 32   ;;  %v113_v13 = vld [vmem:[%s207_s0 + $0x3] sm:$0x1]   ;;  %v114_v14 = vld [vmem:[%s207_s0 + $0x2] sm:$0x1]  }
   0x8   :  { %s143_s19 = smov 24   ;;  %s144_s20 = smov 16   ;;  %v115_v15 = vld [vmem:[%s207_s0 + $0x1] sm:$0x1]   ;;  %vm27_vm4 = vcmask 851712   ;;  %vm33_vm5 = vcmask 786112  }
   0x9   :  { %s145_s0 = smov 8   ;;  %vm39_vm6 = vcmask 720512   ;;  %vm45_vm7 = vcmask 654912   ;;  %vm51_vm8 = vcmask 589312   ;;  %vm57_vm9 = vcmask 523712  }
   0xa   :  { %31 = vrot.lane.b32.xlu0 %v105_v4, %s135_s24  ;;  %37 = vrot.lane.b32.xlu1 %v106_v5, %s136_s25  ;;  %vm63_vm10 = vcmask 458112   ;;  %vm69_vm11 = vcmask 392512   ;;  %vm75_vm12 = vcmask 326912   ;;  %vm81_vm13 = vcmask 261312  }
   0xb   :  { %vm87_vm14 = vcmask 195712   ;;  %vm93_vm15 = vcmask 130112  }
   0xe   :  { %43 = vrot.lane.b32.xlu0 %v107_v7, %s137_s30  ;;  %49 = vrot.lane.b32.xlu1 %v108_v8, %s138_s2 }
  0x12   :  { %55 = vrot.lane.b32.xlu0 %v109_v9, %s139_s7  ;;  %61 = vrot.lane.b32.xlu1 %v110_v10, %s140_s8 }
  0x16   :  { %67 = vrot.lane.b32.xlu0 %v111_v11, %s141_s13  ;;  %73 = vrot.lane.b32.xlu1 %v112_v12, %s142_s14 }
  0x1a   :  { %79 = vrot.lane.b32.xlu0 %v113_v13, %s143_s19  ;;  %85 = vrot.lane.b32.xlu1 %v114_v14, %s144_s20 }
  0x1e   :  { %91 = vrot.lane.b32.xlu0 %v115_v15, %s145_s0 }
  0x74   :  { %v8_v16 = vpop.permute.xlu0 %7   ;;  %v20_v17 = vpop.permute.xlu1 %19  }
  0x75   :  { %10 = vst.msk [vmem:[#allocation0] sm:$0x1] %vm9_vm1, %v8_v16  }
  0x78   :  { %v14_v18 = vpop.permute.xlu0 %13   ;;  %v26_v19 = vpop.permute.xlu1 %25  }
  0x79   :  { %16 = vst.msk [vmem:[#allocation0] sm:$0x1] %vm15_vm2, %v14_v18  }
  0x7a   :  { %22 = vst.msk [vmem:[#allocation0] sm:$0x1] %vm21_vm3, %v20_v17  }
  0x7b   :  { %28 = vst.msk [vmem:[#allocation0] sm:$0x1] %vm27_vm4, %v26_v19  }
  0x7c   :  { %v32_v20 = vpop.permute.xlu0 %31   ;;  %v38_v21 = vpop.permute.xlu1 %37  }
  0x7d   :  { %34 = vst.msk [vmem:[#allocation0] sm:$0x1] %vm33_vm5, %v32_v20  }
  0x7e   :  { %40 = vst.msk [vmem:[#allocation0] sm:$0x1] %vm39_vm6, %v38_v21  }
  0x80   :  { %v44_v22 = vpop.permute.xlu0 %43   ;;  %v50_v23 = vpop.permute.xlu1 %49  }
  0x81   :  { %46 = vst.msk [vmem:[#allocation0] sm:$0x1] %vm45_vm7, %v44_v22  }
  0x82   :  { %52 = vst.msk [vmem:[#allocation0] sm:$0x1] %vm51_vm8, %v50_v23  }
  0x84   :  { %v56_v24 = vpop.permute.xlu0 %55   ;;  %v62_v25 = vpop.permute.xlu1 %61  }
  0x85   :  { %58 = vst.msk [vmem:[#allocation0] sm:$0x1] %vm57_vm9, %v56_v24  }
  0x86   :  { %64 = vst.msk [vmem:[#allocation0] sm:$0x1] %vm63_vm10, %v62_v25  }
  0x88   :  { %v68_v26 = vpop.permute.xlu0 %67   ;;  %v74_v27 = vpop.permute.xlu1 %73  }
  0x89   :  { %70 = vst.msk [vmem:[#allocation0] sm:$0x1] %vm69_vm11, %v68_v26  }
  0x8a   :  { %76 = vst.msk [vmem:[#allocation0] sm:$0x1] %vm75_vm12, %v74_v27  }
  0x8c   :  { %v80_v28 = vpop.permute.xlu0 %79   ;;  %v86_v29 = vpop.permute.xlu1 %85  }
  0x8d   :  { %82 = vst.msk [vmem:[#allocation0] sm:$0x1] %vm81_vm13, %v80_v28  }
  0x8e   :  { %88 = vst.msk [vmem:[#allocation0] sm:$0x1] %vm87_vm14, %v86_v29  }
  0x90   :  { %v92_v30 = vpop.permute.xlu0 %91  }
  0x91   :  { %94 = vst.msk [vmem:[#allocation0] sm:$0x1] %vm93_vm15, %v92_v30  }
  0x98   :  { %v98_v31 = vld [vmem:[#allocation0] sm:$0x1] }
  0x99   :  { %100 = vst [vmem:[%s208_s1] sm:$0x1] %v98_v31 }

// kernel: double_conv3d.5
= control target key start
LH: loop header
LB: loop body
LE: loop exit
PB: predicated region body
PF: predicated region fallthrough
CT: control target
= control target key end

     0   :  { %s414_s12 = smov 0   ;;  %s416_s13 = smov 0   ;;  %s453_s0 = inlined_call_operand.vmem [shape: f32[2,32,128], index: 0, kind: input, shape index: {}]   ;;  %s454_s1 = inlined_call_operand.vmem [shape: f32[1,128], index: 1, kind: input, shape index: {}]   ;;  %s455_s2 = inlined_call_operand.vmem [shape: f32[1,128], index: 2, kind: input, shape index: {}]   ;;  %s456_s3 = inlined_call_operand.vmem [shape: f32[2,32,128], index: 3, kind: output, shape index: {}]  }
   0x1   :  { %s418_s14 = smov 0  }
   0x2 LB: > { %s25_s15 = sadd.s32 1, %s388_s13  ;;  %p335_p0 = scmp.ge.s32.totalorder %s392_s14, 1  ;;  %s392_s14 = sphi %s418_s14, %s13_s14   ;;  %s388_s13 = sphi %s416_s13, %s458_s13   ;;  %s384_s12 = sphi %s414_s12, %s457_s12  }
   0x3   : > { %p27_p1 = scmp.ge.s32.totalorder %s25_s15, 2  ;;  %p158_p2 = scmp.lt.s32.totalorder %s392_s14, 3 }
   0x5   : > { %s460_s15 = smov (%p27_p1, %s25_s15), 0  ;;  %p159_p3 = pnand %p335_p0, %p158_p2 }
   0x6   : > { %p191_p4 = scmp.lt.s32.totalorder (!%p159_p3), %s384_s12, 1  ;;  %v340_v0 = vld [vmem:[%s454_s1] ss:$0 sm:$0xff] (!%p159_p3) }
   0x7   : > { %162 = sbr.rel (%p159_p3) target bundleno = 26 (0x1a), region = 32  ;;  %v341_v1 = vld [vmem:[%s455_s2] ss:$0 sm:$0xff] (!%p159_p3) }
   0xe   : > { %s462_s12 = smov (!%p191_p4, %s384_s12), 1 }
   0xf   : > { %s344_s16 = sshll.u32 %s462_s12, 5 }
  0x10   : > { %s198_s21 = scalar_lea.vmem %s453_s0, %s344_s16  ;;  %s208_s26 = scalar_lea.vmem %s456_s3, %s344_s16 }
  0x11   : > { %v210_v2 = vld [vmem:[%s198_s21] sm:$0xff]  ;;  %v211_v3 = vld [vmem:[%s198_s21 + $0x8] sm:$0xff]  ;;  %v212_v4 = vld [vmem:[%s198_s21 + $0x10] sm:$0xff] }
  0x12   : > { %v221_v5 = vmul.f32 %v340_v0, %v210_v2  ;;  %v222_v6 = vmul.f32 %v340_v0, %v211_v3  ;;  %v223_v7 = vmul.f32 %v340_v0, %v212_v4  ;;  %v213_v8 = vld [vmem:[%s198_s21 + $0x18] sm:$0xff] }
  0x13   : > { %v224_v9 = vmul.f32 %v340_v0, %v213_v8 }
  0x14   : > { %v232_v10 = vadd.f32 %v341_v1, %v221_v5  ;;  %v233_v11 = vadd.f32 %v341_v1, %v222_v6  ;;  %v234_v12 = vadd.f32 %v341_v1, %v223_v7 }
  0x15   : > { %v235_v13 = vadd.f32 %v341_v1, %v224_v9 }
  0x16   : > { %v236_v14 = vmax.f32 %v232_v10, 0.0  ;;  %v237_v15 = vmax.f32 %v233_v11, 0.0  ;;  %v238_v16 = vmax.f32 %v234_v12, 0.0 }
  0x17   : > { %v239_v17 = vmax.f32 %v235_v13, 0.0 }
  0x18   : > { %240 = vst [vmem:[%s208_s26] sm:$0xff] %v236_v14  ;;  %241 = vst [vmem:[%s208_s26 + $0x8] sm:$0xff] %v237_v15 }
  0x19   : > { %242 = vst [vmem:[%s208_s26 + $0x10] sm:$0xff] %v238_v16  ;;  %243 = vst [vmem:[%s208_s26 + $0x18] sm:$0xff] %v239_v17 }
  0x1a PF: > { %s13_s14 = sadd.s32 1, %s392_s14   ;;  %s457_s12 = smov %s388_s13 }
  0x1b   : > { %p10_p5 = scmp.ge.s32.totalorder %s13_s14, 4   ;;  %s458_s13 = smov %s460_s15 }
  0x1d   :  { %12 = sbr.rel (!%p10_p5) target bundleno = 2 (0x2), region = 62 }

// kernel: double_conv3d.3
= control target key start
LH: loop header
LB: loop body
LE: loop exit
PB: predicated region body
PF: predicated region fallthrough
CT: control target
= control target key end

     0   :  { %s4343_s30 = smov 0   ;;  %s4345_s3 = smov 0   ;;  %s6473_s0 = inlined_call_operand.vmem [shape: f32[2,8,8,8,4], index: 0, kind: input, shape index: {}, may-alias: {0,1,2}]   ;;  %s6474_s1 = inlined_call_operand.vmem [shape: f32[2,8,8,8,4], index: 1, kind: input, shape index: {}, may-alias: {0,1,2}]   ;;  %s6475_s2 = inlined_call_operand.vmem [shape: f32[2,8,8,8,4], index: 2, kind: input, shape index: {}, may-alias: {0,1,2}]   ;;  %s6476_s3 = inlined_call_operand.vmem [shape: f32[1,4], index: 3, kind: input, shape index: {}]   ;;  %s6477_s4 = inlined_call_operand.vmem [shape: f32[1,4], index: 4, kind: input, shape index: {}]   ;;  %s6478_s5 = inlined_call_operand.vmem [shape: f32[3,36,8], index: 5, kind: input, shape index: {}]   ;;  %s6479_s6 = inlined_call_operand.vmem [shape: f32[1,8], index: 6, kind: input, shape index: {}]   ;;  %s6480_s7 = inlined_call_operand.vmem [shape: f32[2,8,8,8,8], index: 7, kind: output, shape index: {0}]   ;;  %s6481_s8 = inlined_call_operand.vmem [shape: f32[2,2,1,8], index: 8, kind: output, shape index: {1}]   ;;  %s6482_s9 = inlined_call_operand.vmem [shape: f32[2,2,1,8], index: 9, kind: output, shape index: {2}]  }
   0x1   :  { %s4347_s4 = smov 0   ;;  %s4349_s10 = smov 0  }
   0x2   :  { %s4351_s11 = smov 0  }
   0x3 LB: > { %s29_s12 = sadd.s32 1, %s4278_s4  ;;  %s32_s13 = sadd.s32 1, %s4282_s10  ;;  %s4286_s11 = sphi %s4351_s11, %s20_s11   ;;  %s4282_s10 = sphi %s4349_s10, %s6573_s10   ;;  %s4278_s4 = sphi %s4347_s4, %s6572_s4   ;;  %s4274_s3 = sphi %s4345_s3, %s6571_s3   ;;  %s4270_s30 = sphi %s4343_s30, %s6570_s30  }
   0x4   : > { %p30_p0 = scmp.ge.s32.totalorder %s29_s12, 2  ;;  %p3646_p1 = scmp.ge.s32.totalorder %s4286_s11, 1 }
   0x5   : > { %p382_p2 = scmp.lt.s32.totalorder %s4286_s11, 5 }
   0x6   : > { %s6575_s12 = smov (%p30_p0, %s29_s12), 0  ;;  %s6577_s13 = smov (!%p30_p0, %s32_s13), %s4282_s10 }
   0x7   : > { %p383_p3 = pnand %p3646_p1, %p382_p2  ;;  %p34_p4 = scmp.ge.s32.totalorder %s6577_s13, 2 }
   0x9   : > { %s6579_s13 = smov (%p34_p4, %s6577_s13), 0  ;;  %386 = sbr.rel (%p383_p3) target bundleno = 911 (0x38f), region = 48 }
  0x10   : > { %vm538_vm0 = vcmask 31744   ;;  %vm540_vm1 = vcmask 25600   ;;  %s4378_s14 = sshll.u32 %s4270_s30, 2  ;;  %p469_p5 = scmp.lt.s32.totalorder %s4274_s3, 1  ;;  %v4288_v0 = vmov 0.0  }
  0x11   : > { %562 = vst.msk [vmem:[#allocation2 + $0xb0] sm:$0xff] %vm538_vm0, %v4288_v0  ;;  %539 = vst.msk [vmem:[#allocation2] sm:$0xff] %vm538_vm0, %v4288_v0  ;;  %p471_p6 = scmp.lt.s32.totalorder %s4378_s14, 7  ;;  %s3652_s15 = sadd.s32 4294967295, %s4378_s14 }
  0x12   : > { %542 = vst.msk [vmem:[#allocation2 + $0x10] sm:$0xff] %vm538_vm0, %v4288_v0  ;;  %544 = vst.msk [vmem:[#allocation2 + $0x20] sm:$0xff] %vm538_vm0, %v4288_v0  ;;  %s6581_s3 = smov (!%p469_p5, %s4274_s3), 1  ;;  %p481_p7 = scmp.gt.s32.totalorder %s3652_s15, 0 }
  0x13   : > { %546 = vst.msk [vmem:[#allocation2 + $0x30] sm:$0xff] %vm538_vm0, %v4288_v0  ;;  %548 = vst.msk [vmem:[#allocation2 + $0x40] sm:$0xff] %vm538_vm0, %v4288_v0  ;;  %s472_s16 = scalar_select %p471_p6, %s4378_s14, 7 }
  0x14   : > { %550 = vst.msk [vmem:[#allocation2 + $0x50] sm:$0xff] %vm538_vm0, %v4288_v0  ;;  %552 = vst.msk [vmem:[#allocation2 + $0x60] sm:$0xff] %vm538_vm0, %v4288_v0  ;;  %s4630_s17 = sshll.u32 %s6581_s3, 6  ;;  %p3653_p8 = scmp.lt.s32.totalorder %s3652_s15, 7 }
  0x15   : > { %554 = vst.msk [vmem:[#allocation2 + $0x70] sm:$0xff] %vm538_vm0, %v4288_v0  ;;  %556 = vst.msk [vmem:[#allocation2 + $0x80] sm:$0xff] %vm538_vm0, %v4288_v0  ;;  %s3648_s18 = sshll.u32 %s472_s16, 3  ;;  %s3795_s20 = sadd.s32 4, %s4378_s14 }
  0x16   : > { %558 = vst.msk [vmem:[#allocation2 + $0x90] sm:$0xff] %vm538_vm0, %v4288_v0  ;;  %560 = vst.msk [vmem:[#allocation2 + $0xa0] sm:$0xff] %vm538_vm0, %v4288_v0  ;;  %s475_s19 = sadd.s32 %s4630_s17, %s3648_s18  ;;  %p4634_p9 = scmp.lt.s32.totalorder %s3795_s20, 7 }
  0x17   : > { %564 = vst.msk [vmem:[#allocation2 + $0xc0] sm:$0xff] %vm538_vm0, %v4288_v0  ;;  %566 = vst.msk [vmem:[#allocation2 + $0xd0] sm:$0xff] %vm538_vm0, %v4288_v0  ;;  %s3650_s21 = sshll.u32 %s475_s19, 3  ;;  %p526_p10 = scmp.lt.s32.totalorder %s4270_s30, 1 }
  0x18   : > { %568 = vst.msk [vmem:[#allocation2 + $0xe0] sm:$0xff] %vm538_vm0, %v4288_v0  ;;  %570 = vst.msk [vmem:[#allocation2 + $0xf0] sm:$0xff] %vm538_vm0, %v4288_v0  ;;  %s4641_s25 = scalar_lea.vmem %s6473_s0, %s3650_s21  ;;  %s4646_s28 = scalar_lea.vmem %s6480_s7, %s3650_s21 }
  0x19   : > { %572 = vst.msk [vmem:[#allocation2 + $0x100] sm:$0xff] %vm538_vm0, %v4288_v0  ;;  %574 = vst.msk [vmem:[#allocation2 + $0x110] sm:$0xff] %vm538_vm0, %v4288_v0  ;;  %s482_s29 = scalar_select %p481_p7, %s3652_s15, 0  ;;  %v660_v1 = vld [vmem:[%s4641_s25] sm:$0xff]  ;;  %v661_v2 = vld [vmem:[%s4641_s25 + $0x8] sm:$0xff] }
  0x1a   : > { %576 = vst.msk [vmem:[#allocation2 + $0x120] sm:$0xff] %vm538_vm0, %v4288_v0  ;;  %578 = vst.msk [vmem:[#allocation2 + $0x130] sm:$0xff] %vm538_vm0, %v4288_v0  ;;  %v662_v3 = vld [vmem:[%s4641_s25 + $0x10] sm:$0xff]  ;;  %s6583_s20 = smov (!%p4634_p9, %s3795_s20), 7  ;;  %v663_v4 = vld [vmem:[%s4641_s25 + $0x18] sm:$0xff]  ;;  %s3672_s27 = sshll.u32 %s6581_s3, 1 }
  0x1b   : > { %580 = vst.msk [vmem:[#allocation2 + $0x140] sm:$0xff] %vm538_vm0, %v4288_v0  ;;  %582 = vst.msk [vmem:[#allocation2 + $0x150] sm:$0xff] %vm538_vm0, %v4288_v0  ;;  %v664_v5 = vld [vmem:[%s4641_s25 + $0x20] sm:$0xff]  ;;  %v665_v6 = vld [vmem:[%s4641_s25 + $0x28] sm:$0xff]  ;;  %s6585_s29 = smov (!%p3653_p8, %s482_s29), 7  ;;  %s6587_s20 = smov (!%p4634_p9, %s6583_s20), 7 }
  0x1c   : > { %584 = vst.msk [vmem:[#allocation2 + $0x160] sm:$0xff] %vm538_vm0, %v4288_v0  ;;  %586 = vst.msk [vmem:[#allocation2 + $0x170] sm:$0xff] %vm538_vm0, %v4288_v0  ;;  %v666_v7 = vld [vmem:[%s4641_s25 + $0x30] sm:$0xff]  ;;  %v667_v8 = vld [vmem:[%s4641_s25 + $0x38] sm:$0xff]  ;;  %s3658_s14 = sshll.u32 %s6585_s29, 3  ;;  %s3665_s16 = sshll.u32 %s6587_s20, 3 }
  0x1d   : > { %588 = vst.msk [vmem:[#allocation2 + $0x180] sm:$0xff] %vm538_vm0, %v4288_v0  ;;  %590 = vst.msk [vmem:[#allocation2 + $0x190] sm:$0xff] %vm538_vm0, %v4288_v0  ;;  %v668_v9 = vld [vmem:[%s4641_s25 + $0x40] sm:$0xff]  ;;  %v669_v10 = vld [vmem:[%s4641_s25 + $0x48] sm:$0xff]  ;;  %s489_s15 = sadd.s32 %s3658_s14, %s4630_s17  ;;  %s506_s19 = sadd.s32 %s3665_s16, %s4630_s17 }
  0x1e   : > { %592 = vst.msk [vmem:[#allocation2 + $0x1a0] sm:$0xff] %vm538_vm0, %v4288_v0  ;;  %594 = vst.msk [vmem:[#allocation2 + $0x1b0] sm:$0xff] %vm538_vm0, %v4288_v0  ;;  %v670_v11 = vld [vmem:[%s4641_s25 + $0x50] sm:$0xff]  ;;  %v671_v12 = vld [vmem:[%s4641_s25 + $0x58] sm:$0xff]  ;;  %s3660_s18 = sshll.u32 %s489_s15, 3  ;;  %s3667_s17 = sshll.u32 %s506_s19, 3 }
  0x1f   : > { %596 = vst.msk [vmem:[#allocation2 + $0x1c0] sm:$0xff] %vm538_vm0, %v4288_v0  ;;  %598 = vst.msk [vmem:[#allocation2 + $0x1d0] sm:$0xff] %vm538_vm0, %v4288_v0  ;;  %v672_v13 = vld [vmem:[%s4641_s25 + $0x60] sm:$0xff]  ;;  %v673_v14 = vld [vmem:[%s4641_s25 + $0x68] sm:$0xff]  ;;  %s4701_s22 = scalar_lea.vmem %s6474_s1, %s3660_s18  ;;  %s4712_s26 = scalar_lea.vmem %s6475_s2, %s3667_s17 }
  0x20   : > { %600 = vst.msk [vmem:[#allocation2 + $0x1e0] sm:$0xff] %vm538_vm0, %v4288_v0  ;;  %602 = vst.msk [vmem:[#allocation2 + $0x1f0] sm:$0xff] %vm538_vm0, %v4288_v0  ;;  %v674_v15 = vld [vmem:[%s4641_s25 + $0x70] sm:$0xff]  ;;  %v675_v16 = vld [vmem:[%s4641_s25 + $0x78] sm:$0xff]  ;;  %s527_s29 = scalar_select %p526_p10, %s4270_s30, 1 }
  0x21   : > { %604 = vst.msk [vmem:[#allocation2 + $0x200] sm:$0xff] %vm538_vm0, %v4288_v0  ;;  %606 = vst.msk [vmem:[#allocation2 + $0x210] sm:$0xff] %vm538_vm0, %v4288_v0  ;;  %v676_v17 = vld [vmem:[%s4641_s25 + $0x80] sm:$0xff]  ;;  %v677_v18 = vld [vmem:[%s4641_s25 + $0x88] sm:$0xff]  ;;  %p3674_p11 = scmp.le.s32.totalorder %s4270_s30, 0 }
  0x22   : > { %608 = vst.msk [vmem:[#allocation2 + $0x220] sm:$0xff] %vm538_vm0, %v4288_v0  ;;  %610 = vst.msk [vmem:[#allocation2 + $0x230] sm:$0xff] %vm538_vm0, %v4288_v0  ;;  %v678_v19 = vld [vmem:[%s4641_s25 + $0x90] sm:$0xff]  ;;  %v679_v20 = vld [vmem:[%s4641_s25 + $0x98] sm:$0xff]  ;;  %s4735_s3 = sadd.s32 %s3672_s27, %s527_s29 }
  0x23   : > { %612 = vst.msk [vmem:[#allocation2 + $0x240] sm:$0xff] %vm538_vm0, %v4288_v0  ;;  %614 = vst.msk [vmem:[#allocation2 + $0x250] sm:$0xff] %vm538_vm0, %v4288_v0  ;;  %v680_v21 = vld [vmem:[%s4641_s25 + $0xa0] sm:$0xff]  ;;  %v681_v22 = vld [vmem:[%s4641_s25 + $0xa8] sm:$0xff]  ;;  %s530_s16 = scalar_lea.vmem %s6481_s8, %s4735_s3  ;;  %s537_s20 = scalar_lea.vmem %s6482_s9, %s4735_s3 }
  0x24   : > { %616 = vst.msk [vmem:[#allocation2 + $0x260] sm:$0xff] %vm538_vm0, %v4288_v0  ;;  %618 = vst.msk [vmem:[#allocation2 + $0x270] sm:$0xff] %vm538_vm0, %v4288_v0  ;;  %v682_v23 = vld [vmem:[%s4641_s25 + $0xb0] sm:$0xff]  ;;  %v683_v24 = vld [vmem:[%s4641_s25 + $0xb8] sm:$0xff] }
  0x25   : > { %620 = vst.msk [vmem:[#allocation2 + $0x280] sm:$0xff] %vm538_vm0, %v4288_v0  ;;  %622 = vst.msk [vmem:[#allocation2 + $0x290] sm:$0xff] %vm538_vm0, %v4288_v0  ;;  %v684_v25 = vld [vmem:[%s4641_s25 + $0xc0] sm:$0xff]  ;;  %v685_v26 = vld [vmem:[%s4641_s25 + $0xc8] sm:$0xff] }
  0x26   : > { %624 = vst.msk [vmem:[#allocation2 + $0x2a0] sm:$0xff] %vm538_vm0, %v4288_v0  ;;  %626 = vst.msk [vmem:[#allocation2 + $0x2b0] sm:$0xff] %vm538_vm0, %v4288_v0  ;;  %v686_v27 = vld [vmem:[%s4641_s25 + $0xd0] sm:$0xff]  ;;  %v687_v28 = vld [vmem:[%s4641_s25 + $0xd8] sm:$0xff] }
  0x27   : > { %628 = vst.msk [vmem:[#allocation2 + $0x2c0] sm:$0xff] %vm538_vm0, %v4288_v0  ;;  %630 = vst.msk [vmem:[#allocation2 + $0x2d0] sm:$0xff] %vm538_vm0, %v4288_v0  ;;  %v688_v29 = vld [vmem:[%s4641_s25 + $0xe0] sm:$0xff]  ;;  %v689_v30 = vld [vmem:[%s4641_s25 + $0xe8] sm:$0xff] }
  0x28   : > { %632 = vst.msk [vmem:[#allocation2 + $0x2e0] sm:$0xff] %vm538_vm0, %v4288_v0  ;;  %634 = vst.msk [vmem:[#allocation2 + $0x2f0] sm:$0xff] %vm538_vm0, %v4288_v0  ;;  %v690_v31 = vld [vmem:[%s4641_s25 + $0xf0] sm:$0xff]  ;;  %v691_v32 = vld [vmem:[%s4641_s25 + $0xf8] sm:$0xff] }
  0x29   : > { %636 = vst.msk [vmem:[#allocation2 + $0x300] sm:$0xff] %vm538_vm0, %v4288_v0  ;;  %638 = vst.msk [vmem:[#allocation2 + $0x310] sm:$0xff] %vm538_vm0, %v4288_v0  ;;  %v729_v33 = vld [vmem:[%s4701_s22] sm:$0xff] (!%p3674_p11)  ;;  %v730_v34 = vld [vmem:[%s4701_s22 + $0x8] sm:$0xff] (!%p3674_p11) }
  0x2a   : > { %640 = vst.msk [vmem:[#allocation2 + $0x320] sm:$0xff] %vm538_vm0, %v4288_v0  ;;  %642 = vst.msk [vmem:[#allocation2 + $0x330] sm:$0xff] %vm538_vm0, %v4288_v0  ;;  %v731_v35 = vld [vmem:[%s4701_s22 + $0x10] sm:$0xff] (!%p3674_p11)  ;;  %v732_v36 = vld [vmem:[%s4701_s22 + $0x18] sm:$0xff] (!%p3674_p11) }
  0x2b   : > { %644 = vst.msk [vmem:[#allocation2 + $0x340] sm:$0xff] %vm538_vm0, %v4288_v0  ;;  %646 = vst.msk [vmem:[#allocation2 + $0x350] sm:$0xff] %vm538_vm0, %v4288_v0  ;;  %v733_v37 = vld [vmem:[%s4701_s22 + $0x20] sm:$0xff] (!%p3674_p11)  ;;  %v734_v38 = vld [vmem:[%s4701_s22 + $0x28] sm:$0xff] (!%p3674_p11) }
  0x2c   : > { %648 = vst.msk [vmem:[#allocation2 + $0x360] sm:$0xff] %vm538_vm0, %v4288_v0  ;;  %650 = vst.msk [vmem:[#allocation2 + $0x370] sm:$0xff] %vm538_vm0, %v4288_v0  ;;  %v735_v39 = vld [vmem:[%s4701_s22 + $0x30] sm:$0xff] (!%p3674_p11)  ;;  %v736_v40 = vld [vmem:[%s4701_s22 + $0x38] sm:$0xff] (!%p3674_p11) }
  0x2d   : > { %652 = vst.msk [vmem:[#allocation2 + $0x380] sm:$0xff] %vm538_vm0, %v4288_v0  ;;  %654 = vst.msk [vmem:[#allocation2 + $0x390] sm:$0xff] %vm538_vm0, %v4288_v0 }
  0x2e   : > { %656 = vst.msk [vmem:[#allocation2 + $0x3a0] sm:$0xff] %vm538_vm0, %v4288_v0  ;;  %658 = vst.msk [vmem:[#allocation2 + $0x3b0] sm:$0xff] %vm538_vm0, %v4288_v0 }
  0x2f   : > { %563 = vst.msk [vmem:[#allocation2 + $0xb8] sm:$0x3] %vm540_vm1, %v4288_v0  ;;  %541 = vst.msk [vmem:[#allocation2 + $0x8] sm:$0x3] %vm540_vm1, %v4288_v0 }
  0x30   : > { %543 = vst.msk [vmem:[#allocation2 + $0x18] sm:$0x3] %vm540_vm1, %v4288_v0  ;;  %545 = vst.msk [vmem:[#allocation2 + $0x28] sm:$0x3] %vm540_vm1, %v4288_v0 }
  0x31   : > { %547 = vst.msk [vmem:[#allocation2 + $0x38] sm:$0x3] %vm540_vm1, %v4288_v0  ;;  %549 = vst.msk [vmem:[#allocation2 + $0x48] sm:$0x3] %vm540_vm1, %v4288_v0 }
  0x32   : > { %551 = vst.msk [vmem:[#allocation2 + $0x58] sm:$0x3] %vm540_vm1, %v4288_v0  ;;  %553 = vst.msk [vmem:[#allocation2 + $0x68] sm:$0x3] %vm540_vm1, %v4288_v0 }
  0x33   : > { %555 = vst.msk [vmem:[#allocation2 + $0x78] sm:$0x3] %vm540_vm1, %v4288_v0  ;;  %557 = vst.msk [vmem:[#allocation2 + $0x88] sm:$0x3] %vm540_vm1, %v4288_v0 }
  0x34   : > { %559 = vst.msk [vmem:[#allocation2 + $0x98] sm:$0x3] %vm540_vm1, %v4288_v0  ;;  %561 = vst.msk [vmem:[#allocation2 + $0xa8] sm:$0x3] %vm540_vm1, %v4288_v0 }
  0x35   : > { %565 = vst.msk [vmem:[#allocation2 + $0xc8] sm:$0x3] %vm540_vm1, %v4288_v0  ;;  %567 = vst.msk [vmem:[#allocation2 + $0xd8] sm:$0x3] %vm540_vm1, %v4288_v0 }
  0x36   : > { %569 = vst.msk [vmem:[#allocation2 + $0xe8] sm:$0x3] %vm540_vm1, %v4288_v0  ;;  %571 = vst.msk [vmem:[#allocation2 + $0xf8] sm:$0x3] %vm540_vm1, %v4288_v0 }
  0x37   : > { %573 = vst.msk [vmem:[#allocation2 + $0x108] sm:$0x3] %vm540_vm1, %v4288_v0  ;;  %575 = vst.msk [vmem:[#allocation2 + $0x118] sm:$0x3] %vm540_vm1, %v4288_v0 }
  0x38   : > { %577 = vst.msk [vmem:[#allocation2 + $0x128] sm:$0x3] %vm540_vm1, %v4288_v0  ;;  %579 = vst.msk [vmem:[#allocation2 + $0x138] sm:$0x3] %vm540_vm1, %v4288_v0 }
  0x39   : > { %581 = vst.msk [vmem:[#allocation2 + $0x148] sm:$0x3] %vm540_vm1, %v4288_v0  ;;  %583 = vst.msk [vmem:[#allocation2 + $0x158] sm:$0x3] %vm540_vm1, %v4288_v0 }
  0x3a   : > { %585 = vst.msk [vmem:[#allocation2 + $0x168] sm:$0x3] %vm540_vm1, %v4288_v0  ;;  %587 = vst.msk [vmem:[#allocation2 + $0x178] sm:$0x3] %vm540_vm1, %v4288_v0 }
  0x3b   : > { %589 = vst.msk [vmem:[#allocation2 + $0x188] sm:$0x3] %vm540_vm1, %v4288_v0  ;;  %591 = vst.msk [vmem:[#allocation2 + $0x198] sm:$0x3] %vm540_vm1, %v4288_v0 }
  0x3c   : > { %593 = vst.msk [vmem:[#allocation2 + $0x1a8] sm:$0x3] %vm540_vm1, %v4288_v0  ;;  %595 = vst.msk [vmem:[#allocation2 + $0x1b8] sm:$0x3] %vm540_vm1, %v4288_v0 }
  0x3d   : > { %597 = vst.msk [vmem:[#allocation2 + $0x1c8] sm:$0x3] %vm540_vm1, %v4288_v0  ;;  %599 = vst.msk [vmem:[#allocation2 + $0x1d8] sm:$0x3] %vm540_vm1, %v4288_v0 }
  0x3e   : > { %601 = vst.msk [vmem:[#allocation2 + $0x1e8] sm:$0x3] %vm540_vm1, %v4288_v0  ;;  %603 = vst.msk [vmem:[#allocation2 + $0x1f8] sm:$0x3] %vm540_vm1, %v4288_v0 }
  0x3f   : > { %605 = vst.msk [vmem:[#allocation2 + $0x208] sm:$0x3] %vm540_vm1, %v4288_v0  ;;  %607 = vst.msk [vmem:[#allocation2 + $0x218] sm:$0x3] %vm540_vm1, %v4288_v0 }
  0x40   : > { %609 = vst.msk [vmem:[#allocation2 + $0x228] sm:$0x3] %vm540_vm1, %v4288_v0  ;;  %611 = vst.msk [vmem:[#allocation2 + $0x238] sm:$0x3] %vm540_vm1, %v4288_v0 }
  0x41   : > { %613 = vst.msk [vmem:[#allocation2 + $0x248] sm:$0x3] %vm540_vm1, %v4288_v0  ;;  %615 = vst.msk [vmem:[#allocation2 + $0x258] sm:$0x3] %vm540_vm1, %v4288_v0 }
  0x42   : > { %617 = vst.msk [vmem:[#allocation2 + $0x268] sm:$0x3] %vm540_vm1, %v4288_v0  ;;  %619 = vst.msk [vmem:[#allocation2 + $0x278] sm:$0x3] %vm540_vm1, %v4288_v0 }
  0x43   : > { %621 = vst.msk [vmem:[#allocation2 + $0x288] sm:$0x3] %vm540_vm1, %v4288_v0  ;;  %623 = vst.msk [vmem:[#allocation2 + $0x298] sm:$0x3] %vm540_vm1, %v4288_v0 }
  0x44   : > { %625 = vst.msk [vmem:[#allocation2 + $0x2a8] sm:$0x3] %vm540_vm1, %v4288_v0  ;;  %627 = vst.msk [vmem:[#allocation2 + $0x2b8] sm:$0x3] %vm540_vm1, %v4288_v0 }
  0x45   : > { %629 = vst.msk [vmem:[#allocation2 + $0x2c8] sm:$0x3] %vm540_vm1, %v4288_v0  ;;  %631 = vst.msk [vmem:[#allocation2 + $0x2d8] sm:$0x3] %vm540_vm1, %v4288_v0 }
  0x46   : > { %633 = vst.msk [vmem:[#allocation2 + $0x2e8] sm:$0x3] %vm540_vm1, %v4288_v0  ;;  %635 = vst.msk [vmem:[#allocation2 + $0x2f8] sm:$0x3] %vm540_vm1, %v4288_v0 }
  0x47   : > { %637 = vst.msk [vmem:[#allocation2 + $0x308] sm:$0x3] %vm540_vm1, %v4288_v0  ;;  %639 = vst.msk [vmem:[#allocation2 + $0x318] sm:$0x3] %vm540_vm1, %v4288_v0 }
  0x48   : > { %641 = vst.msk [vmem:[#allocation2 + $0x328] sm:$0x3] %vm540_vm1, %v4288_v0  ;;  %643 = vst.msk [vmem:[#allocation2 + $0x338] sm:$0x3] %vm540_vm1, %v4288_v0 }
  0x49   : > { %645 = vst.msk [vmem:[#allocation2 + $0x348] sm:$0x3] %vm540_vm1, %v4288_v0  ;;  %647 = vst.msk [vmem:[#allocation2 + $0x358] sm:$0x3] %vm540_vm1, %v4288_v0 }
  0x4a   : > { %649 = vst.msk [vmem:[#allocation2 + $0x368] sm:$0x3] %vm540_vm1, %v4288_v0  ;;  %651 = vst.msk [vmem:[#allocation2 + $0x378] sm:$0x3] %vm540_vm1, %v4288_v0 }
  0x4b   : > { %653 = vst.msk [vmem:[#allocation2 + $0x388] sm:$0x3] %vm540_vm1, %v4288_v0  ;;  %655 = vst.msk [vmem:[#allocation2 + $0x398] sm:$0x3] %vm540_vm1, %v4288_v0 }
  0x4c   : > { %657 = vst.msk [vmem:[#allocation2 + $0x3a8] sm:$0x3] %vm540_vm1, %v4288_v0  ;;  %659 = vst.msk [vmem:[#allocation2 + $0x3b8] sm:$0x3] %vm540_vm1, %v4288_v0 }
  0x4d   : > { %693 = vst.msk [vmem:[#allocation2 + $0xb1] sm:$0xff] %vm538_vm0, %v660_v1  ;;  %694 = vst.msk [vmem:[#allocation2 + $0xc1] sm:$0xff] %vm538_vm0, %v661_v2 }
  0x4e   : > { %695 = vst.msk [vmem:[#allocation2 + $0xd1] sm:$0xff] %vm538_vm0, %v662_v3  ;;  %696 = vst.msk [vmem:[#allocation2 + $0xe1] sm:$0xff] %vm538_vm0, %v663_v4 }
  0x4f   : > { %697 = vst.msk [vmem:[#allocation2 + $0xf1] sm:$0xff] %vm538_vm0, %v664_v5  ;;  %698 = vst.msk [vmem:[#allocation2 + $0x101] sm:$0xff] %vm538_vm0, %v665_v6 }
  0x50   : > { %699 = vst.msk [vmem:[#allocation2 + $0x111] sm:$0xff] %vm538_vm0, %v666_v7  ;;  %700 = vst.msk [vmem:[#allocation2 + $0x121] sm:$0xff] %vm538_vm0, %v667_v8 }
  0x51   : > { %701 = vst.msk [vmem:[#allocation2 + $0x151] sm:$0xff] %vm538_vm0, %v668_v9  ;;  %702 = vst.msk [vmem:[#allocation2 + $0x161] sm:$0xff] %vm538_vm0, %v669_v10 }
  0x52   : > { %703 = vst.msk [vmem:[#allocation2 + $0x171] sm:$0xff] %vm538_vm0, %v670_v11  ;;  %704 = vst.msk [vmem:[#allocation2 + $0x181] sm:$0xff] %vm538_vm0, %v671_v12 }
  0x53   : > { %705 = vst.msk [vmem:[#allocation2 + $0x191] sm:$0xff] %vm538_vm0, %v672_v13  ;;  %706 = vst.msk [vmem:[#allocation2 + $0x1a1] sm:$0xff] %vm538_vm0, %v673_v14 }
  0x54   : > { %707 = vst.msk [vmem:[#allocation2 + $0x1b1] sm:$0xff] %vm538_vm0, %v674_v15  ;;  %708 = vst.msk [vmem:[#allocation2 + $0x1c1] sm:$0xff] %vm538_vm0, %v675_v16 }
  0x55   : > { %709 = vst.msk [vmem:[#allocation2 + $0x1f1] sm:$0xff] %vm538_vm0, %v676_v17  ;;  %710 = vst.msk [vmem:[#allocation2 + $0x201] sm:$0xff] %vm538_vm0, %v677_v18 }
  0x56   : > { %711 = vst.msk [vmem:[#allocation2 + $0x211] sm:$0xff] %vm538_vm0, %v678_v19  ;;  %712 = vst.msk [vmem:[#allocation2 + $0x221] sm:$0xff] %vm538_vm0, %v679_v20  ;;  %728 = sbr.rel (%p3674_p11) target bundleno = 97 (0x61), region = 52 }
  0x57   : > { %713 = vst.msk [vmem:[#allocation2 + $0x231] sm:$0xff] %vm538_vm0, %v680_v21  ;;  %714 = vst.msk [vmem:[#allocation2 + $0x241] sm:$0xff] %vm538_vm0, %v681_v22 }
  0x58   : > { %715 = vst.msk [vmem:[#allocation2 + $0x251] sm:$0xff] %vm538_vm0, %v682_v23  ;;  %716 = vst.msk [vmem:[#allocation2 + $0x261] sm:$0xff] %vm538_vm0, %v683_v24 }
  0x59   : > { %717 = vst.msk [vmem:[#allocation2 + $0x291] sm:$0xff] %vm538_vm0, %v684_v25  ;;  %718 = vst.msk [vmem:[#allocation2 + $0x2a1] sm:$0xff] %vm538_vm0, %v685_v26 }
  0x5a   : > { %719 = vst.msk [vmem:[#allocation2 + $0x2b1] sm:$0xff] %vm538_vm0, %v686_v27  ;;  %720 = vst.msk [vmem:[#allocation2 + $0x2c1] sm:$0xff] %vm538_vm0, %v687_v28 }
  0x5b   : > { %721 = vst.msk [vmem:[#allocation2 + $0x2d1] sm:$0xff] %vm538_vm0, %v688_v29  ;;  %722 = vst.msk [vmem:[#allocation2 + $0x2e1] sm:$0xff] %vm538_vm0, %v689_v30 }
  0x5c   : > { %723 = vst.msk [vmem:[#allocation2 + $0x2f1] sm:$0xff] %vm538_vm0, %v690_v31  ;;  %724 = vst.msk [vmem:[#allocation2 + $0x301] sm:$0xff] %vm538_vm0, %v691_v32 }
  0x5d   : > { %738 = vst.msk [vmem:[#allocation2 + $0x11] sm:$0xff] %vm538_vm0, %v729_v33  ;;  %739 = vst.msk [vmem:[#allocation2 + $0x21] sm:$0xff] %vm538_vm0, %v730_v34 }
  0x5e   : > { %740 = vst.msk [vmem:[#allocation2 + $0x31] sm:$0xff] %vm538_vm0, %v731_v35  ;;  %741 = vst.msk [vmem:[#allocation2 + $0x41] sm:$0xff] %vm538_vm0, %v732_v36 }
  0x5f   : > { %742 = vst.msk [vmem:[#allocation2 + $0x51] sm:$0xff] %vm538_vm0, %v733_v37  ;;  %743 = vst.msk [vmem:[#allocation2 + $0x61] sm:$0xff] %vm538_vm0, %v734_v38 }
  0x60   : > { %744 = vst.msk [vmem:[#allocation2 + $0x71] sm:$0xff] %vm538_vm0, %v735_v39  ;;  %745 = vst.msk [vmem:[#allocation2 + $0x81] sm:$0xff] %vm538_vm0, %v736_v40 }
  0x61 PF: > { %p3675_p12 = scmp.ge.s32.totalorder %s4270_s30, 1 }
  0x62   : > { %v750_v41 = vld [vmem:[%s4712_s26] sm:$0xff] (!%p3675_p12)  ;;  %v751_v42 = vld [vmem:[%s4712_s26 + $0x8] sm:$0xff] (!%p3675_p12)  ;;  %v752_v43 = vld [vmem:[%s4712_s26 + $0x10] sm:$0xff] (!%p3675_p12) }
  0x63   : > { %749 = sbr.rel (%p3675_p12) target bundleno = 106 (0x6a), region = 56  ;;  %759 = vst.msk [vmem:[#allocation2 + $0x331] sm:$0xff] (!%p3675_p12), %vm538_vm0, %v750_v41  ;;  %760 = vst.msk [vmem:[#allocation2 + $0x341] sm:$0xff] (!%p3675_p12), %vm538_vm0, %v751_v42  ;;  %v753_v44 = vld [vmem:[%s4712_s26 + $0x18] sm:$0xff] (!%p3675_p12)  ;;  %v754_v45 = vld [vmem:[%s4712_s26 + $0x20] sm:$0xff] (!%p3675_p12) }
  0x64   : > { %761 = vst.msk [vmem:[#allocation2 + $0x351] sm:$0xff] (!%p3675_p12), %vm538_vm0, %v752_v43  ;;  %v755_v46 = vld [vmem:[%s4712_s26 + $0x28] sm:$0xff] (!%p3675_p12)  ;;  %762 = vst.msk [vmem:[#allocation2 + $0x361] sm:$0xff] (!%p3675_p12), %vm538_vm0, %v753_v44  ;;  %v756_v47 = vld [vmem:[%s4712_s26 + $0x30] sm:$0xff] (!%p3675_p12) }
  0x65   : > { %763 = vst.msk [vmem:[#allocation2 + $0x371] sm:$0xff] (!%p3675_p12), %vm538_vm0, %v754_v45  ;;  %764 = vst.msk [vmem:[#allocation2 + $0x381] sm:$0xff] (!%p3675_p12), %vm538_vm0, %v755_v46  ;;  %v757_v48 = vld [vmem:[%s4712_s26 + $0x38] sm:$0xff] (!%p3675_p12) }
  0x66   : > { %765 = vst.msk [vmem:[#allocation2 + $0x391] sm:$0xff] (!%p3675_p12), %vm538_vm0, %v756_v47  ;;  %766 = vst.msk [vmem:[#allocation2 + $0x3a1] sm:$0xff] (!%p3675_p12), %vm538_vm0, %v757_v48 }
  0x6a PF: > { %v771_v49 = vld [vmem:[#allocation2 + $0x20] sm:$0xff]  ;;  %v772_v50 = vld [vmem:[#allocation2 + $0x28] sm:$0x3]  ;;  %vm1007_vm2 = vcmask 1046528   ;;  %v4781_v51 = vld [vmem:[#allocation2 + $0x10] sm:$0xff]  ;;  %s4289_s30 = smov 4  }
  0x6b   : > { %v1014_v52 = vrot.slane %v771_v49, 1  ;;  %v1015_v53 = vrot.slane %v772_v50, 1  ;;  %v770_v54 = vld [vmem:[#allocation2 + $0x18] sm:$0x3]  ;;  %v1011_v55 = vrot.slane %v4781_v51, 1  ;;  %v791_v56 = vld [vmem:[#allocation2 + $0xc0] sm:$0xff] }
  0x6c   : > { %v1012_v57 = vrot.slane %v770_v54, 1  ;;  %v792_v58 = vld [vmem:[#allocation2 + $0xc8] sm:$0x3]  ;;  %v1044_v59 = vrot.slane %v791_v56, 1  ;;  %v4784_v60 = vld [vmem:[#allocation2 + $0xb0] sm:$0xff]  ;;  %vm1368_vm3 = vcmask 1045504  }
  0x6d   : > { %v1016_v61 = vsel %vm1007_vm2, %v1014_v52, %v1015_v53  ;;  %v1045_v62 = vrot.slane %v792_v58, 1  ;;  %v790_v63 = vld [vmem:[#allocation2 + $0xb8] sm:$0x3]  ;;  %v1041_v0 = vrot.slane %v4784_v60, 1  ;;  %v1402_v4 = vrot.slane %v4784_v60, 2  ;;  %v793_v9 = vld [vmem:[#allocation2 + $0xd0] sm:$0xff] }
  0x6e   : > { %1192 = vrot.lane.b32.xlu1 %v1016_v61, %s4289_s30  ;;  %v1013_v1 = vsel %vm1007_vm2, %v1011_v55, %v1012_v57  ;;  %v1042_v2 = vrot.slane %v790_v63, 1  ;;  %v1403_v5 = vrot.slane %v790_v63, 2  ;;  %v1372_v7 = vrot.slane %v4781_v51, 2  ;;  %v794_v10 = vld [vmem:[#allocation2 + $0xd8] sm:$0x3]  ;;  %v773_v11 = vld [vmem:[#allocation2 + $0x30] sm:$0xff] }
  0x6f   : > { %1190 = vrot.lane.b32.xlu0 %v1013_v1, %s4289_s30  ;;  %v1046_v3 = vsel %vm1007_vm2, %v1044_v59, %v1045_v62  ;;  %v1373_v8 = vrot.slane %v770_v54, 2  ;;  %v774_v12 = vld [vmem:[#allocation2 + $0x38] sm:$0x3]  ;;  %v1047_v14 = vrot.slane %v793_v9, 1  ;;  %v1048_v15 = vrot.slane %v794_v10, 1  ;;  %s4290_s25 = smov 8  }
  0x70   : > { %v1043_v6 = vsel %vm1007_vm2, %v1041_v0, %v1042_v2  ;;  %v1404_v13 = vsel %vm1368_vm3, %v1402_v4, %v1403_v5  ;;  %v1017_v17 = vrot.slane %v773_v11, 1  ;;  %v1018_v18 = vrot.slane %v774_v12, 1  ;;  %v795_v31 = vld [vmem:[#allocation2 + $0xe0] sm:$0xff]  ;;  %v796_v32 = vld [vmem:[#allocation2 + $0xe8] sm:$0x3]  ;;  %v797_v41 = vld [vmem:[#allocation2 + $0xf0] sm:$0xff] }
  0x71   : > { %v1374_v16 = vsel %vm1368_vm3, %v1372_v7, %v1373_v8  ;;  %v1049_v19 = vsel %vm1007_vm2, %v1047_v14, %v1048_v15  ;;  %v1405_v20 = vrot.slane %v791_v56, 2  ;;  %v1406_v21 = vrot.slane %v792_v58, 2  ;;  %v775_v33 = vld [vmem:[#allocation2 + $0x40] sm:$0xff]  ;;  %v776_v34 = vld [vmem:[#allocation2 + $0x48] sm:$0x3]  ;;  %v777_v43 = vld [vmem:[#allocation2 + $0x50] sm:$0xff] }
  0x72   : > { %1212 = vrot.lane.b32.xlu1 %v1046_v3, %s4289_s30  ;;  %v1019_v22 = vsel %vm1007_vm2, %v1017_v17, %v1018_v18  ;;  %v1375_v23 = vrot.slane %v771_v49, 2  ;;  %v1376_v24 = vrot.slane %v772_v50, 2  ;;  %v1408_v26 = vrot.slane %v793_v9, 2  ;;  %v798_v42 = vld [vmem:[#allocation2 + $0xf8] sm:$0x3]  ;;  %v4823_v1 = vld [vmem:[#allocation2 + $0x100] sm:$0xff] }
  0x73   : > { %1210 = vrot.lane.b32.xlu0 %v1043_v6, %s4289_s30  ;;  %v1407_v25 = vsel %vm1368_vm3, %v1405_v20, %v1406_v21  ;;  %v1409_v27 = vrot.slane %v794_v10, 2  ;;  %v1378_v29 = vrot.slane %v773_v11, 2  ;;  %v1379_v30 = vrot.slane %v774_v12, 2  ;;  %v778_v44 = vld [vmem:[#allocation2 + $0x58] sm:$0x3]  ;;  %v4825_v3 = vld [vmem:[#allocation2 + $0x60] sm:$0xff] }
  0x74   : > { %v1377_v28 = vsel %vm1368_vm3, %v1375_v23, %v1376_v24  ;;  %v1050_v36 = vrot.slane %v795_v31, 1  ;;  %v1051_v37 = vrot.slane %v796_v32, 1  ;;  %v1020_v39 = vrot.slane %v775_v33, 1  ;;  %v800_v2 = vld [vmem:[#allocation2 + $0x108] sm:$0x3]  ;;  %v4833_v11 = vld [vmem:[#allocation2 + $0x110] sm:$0xff] }
  0x75   : > { %v1410_v35 = vsel %vm1368_vm3, %v1408_v26, %v1409_v27  ;;  %v1380_v38 = vsel %vm1368_vm3, %v1378_v29, %v1379_v30  ;;  %v1021_v40 = vrot.slane %v776_v34, 1  ;;  %v1053_v46 = vrot.slane %v797_v41, 1  ;;  %v780_v4 = vld [vmem:[#allocation2 + $0x68] sm:$0x3]  ;;  %v802_v12 = vld [vmem:[#allocation2 + $0x118] sm:$0x3] }
  0x76   : > { %1571 = vrot.lane.b32.xlu1 %v1404_v13, %s4290_s25  ;;  %v1052_v45 = vsel %vm1007_vm2, %v1050_v36, %v1051_v37  ;;  %v1054_v47 = vrot.slane %v798_v42, 1  ;;  %v1023_v49 = vrot.slane %v777_v43, 1  ;;  %v1024_v50 = vrot.slane %v778_v44, 1  ;;  %v4835_v13 = vld [vmem:[#allocation2 + $0x70] sm:$0xff]  ;;  %v782_v14 = vld [vmem:[#allocation2 + $0x78] sm:$0x3] }
  0x77   : > { %1551 = vrot.lane.b32.xlu0 %v1374_v16, %s4290_s25  ;;  %v1022_v48 = vsel %vm1007_vm2, %v1020_v39, %v1021_v40  ;;  %v1411_v53 = vrot.slane %v795_v31, 2  ;;  %v1412_v54 = vrot.slane %v796_v32, 2  ;;  %v1381_v56 = vrot.slane %v775_v33, 2  ;;  %v4855_v33 = vld [vmem:[#allocation2 + $0x120] sm:$0xff]  ;;  %v784_v36 = vld [vmem:[#allocation2 + $0x88] sm:$0x3] }
  0x78   : > { %v1055_v52 = vsel %vm1007_vm2, %v1053_v46, %v1054_v47  ;;  %v1025_v55 = vsel %vm1007_vm2, %v1023_v49, %v1024_v50  ;;  %v1382_v57 = vrot.slane %v776_v34, 2  ;;  %v1414_v59 = vrot.slane %v797_v41, 2  ;;  %v804_v34 = vld [vmem:[#allocation2 + $0x128] sm:$0x3]  ;;  %v786_v46 = vld [vmem:[#allocation2 + $0x98] sm:$0x3] }
  0x79   : > { %v1413_v58 = vsel %vm1368_vm3, %v1411_v53, %v1412_v54  ;;  %v1415_v61 = vrot.slane %v798_v42, 2  ;;  %v1384_v63 = vrot.slane %v777_v43, 2  ;;  %v1385_v0 = vrot.slane %v778_v44, 2  ;;  %v4865_v43 = vld [vmem:[#allocation2 + $0x130] sm:$0xff]  ;;  %v806_v44 = vld [vmem:[#allocation2 + $0x138] sm:$0x3] }
  0x7a   : > { %1214 = vrot.lane.b32.xlu1 %v1049_v19, %s4289_s30  ;;  %v1383_v62 = vsel %vm1368_vm3, %v1381_v56, %v1382_v57  ;;  %v1056_v6 = vrot.slane %v4823_v1, 1  ;;  %v1057_v7 = vrot.slane %v800_v2, 1  ;;  %v1026_v9 = vrot.slane %v4825_v3, 1  ;;  %s4291_s21 = smov 12   ;;  %s4292_s15 = smov 24  }
  0x7b   : > { %1194 = vrot.lane.b32.xlu0 %v1019_v22, %s4289_s30  ;;  %v1416_v5 = vsel %vm1368_vm3, %v1414_v59, %v1415_v61  ;;  %v1386_v8 = vsel %vm1368_vm3, %v1384_v63, %v1385_v0  ;;  %v1027_v10 = vrot.slane %v780_v4, 1  ;;  %v1059_v16 = vrot.slane %v4833_v11, 1 }
  0x7c   : > { %v1058_v15 = vsel %vm1007_vm2, %v1056_v6, %v1057_v7  ;;  %v1060_v17 = vrot.slane %v802_v12, 1  ;;  %v1029_v19 = vrot.slane %v4835_v13, 1  ;;  %v1030_v20 = vrot.slane %v782_v14, 1  ;;  %v812_v6 = vld [vmem:[#allocation2 + $0x168] sm:$0x3]  ;;  %v4889_v7 = vld [vmem:[#allocation2 + $0x150] sm:$0xff] }
  0x7d   : > { %v1028_v18 = vsel %vm1007_vm2, %v1026_v9, %v1027_v10  ;;  %v1417_v22 = vrot.slane %v4823_v1, 2  ;;  %v1418_v23 = vrot.slane %v800_v2, 2  ;;  %v1388_v26 = vrot.slane %v780_v4, 2 }
  0x7e   : > { %1573 = vrot.lane.b32.xlu1 %v1407_v25, %s4290_s25  ;;  %v1061_v21 = vsel %vm1007_vm2, %v1059_v16, %v1060_v17  ;;  %v1031_v24 = vsel %vm1007_vm2, %v1029_v19, %v1030_v20  ;;  %v1387_v25 = vrot.slane %v4825_v3, 2  ;;  %v1421_v29 = vrot.slane %v802_v12, 2  ;;  %v4897_v17 = vld [vmem:[#allocation2 + $0x170] sm:$0xff] }
  0x7f   : > { %1553 = vrot.lane.b32.xlu0 %v1377_v28, %s4290_s25  ;;  %v1419_v27 = vsel %vm1368_vm3, %v1417_v22, %v1418_v23  ;;  %v1420_v28 = vrot.slane %v4833_v11, 2  ;;  %v1390_v31 = vrot.slane %v4835_v13, 2  ;;  %v1391_v32 = vrot.slane %v782_v14, 2 }
  0x80   : > { %v1389_v30 = vsel %vm1368_vm3, %v1387_v25, %v1388_v26  ;;  %v1063_v39 = vrot.slane %v804_v34, 1  ;;  %v1033_v42 = vrot.slane %v784_v36, 1  ;;  %v1066_v49 = vrot.slane %v806_v44, 1 }
  0x81   : > { %v1422_v37 = vsel %vm1368_vm3, %v1420_v28, %v1421_v29  ;;  %v1392_v40 = vsel %vm1368_vm3, %v1390_v31, %v1391_v32  ;;  %v1036_v53 = vrot.slane %v786_v46, 1  ;;  %v1424_v56 = vrot.slane %v804_v34, 2  ;;  %v4911_v31 = vld [vmem:[#allocation2 + $0x190] sm:$0xff]  ;;  %v818_v32 = vld [vmem:[#allocation2 + $0x198] sm:$0x3]  ;;  %v4913_v34 = vld [vmem:[#allocation2 + $0x180] sm:$0xff] }
  0x82   : > { %1575 = vrot.lane.b32.xlu1 %v1410_v35, %s4290_s25  ;;  %v4857_v35 = vld [vmem:[#allocation2 + $0x80] sm:$0xff]  ;;  %v1394_v59 = vrot.slane %v784_v36, 2  ;;  %v1427_v63 = vrot.slane %v806_v44, 2  ;;  %v1397_v4 = vrot.slane %v786_v46, 2  ;;  %v1075_v12 = vrot.slane %v812_v6, 1 }
  0x83   : > { %1555 = vrot.lane.b32.xlu0 %v1380_v38, %s4290_s25  ;;  %v1062_v38 = vrot.slane %v4855_v33, 1  ;;  %v1032_v41 = vrot.slane %v4857_v35, 1  ;;  %v1077_v20 = vrot.slane %v4897_v17, 1  ;;  %v1432_v23 = vrot.slane %v4889_v7, 2  ;;  %v816_v36 = vld [vmem:[#allocation2 + $0x188] sm:$0x3] }
  0x84   : > { %v1438_v26 = vrot.slane %v4897_v17, 2  ;;  %v1444_v46 = vrot.slane %v4911_v31, 2  ;;  %vm1789_vm4 = vcmask 64512   ;;  %vm2398_vm5 = vcmask 1043456  }
  0x85   : > { %v1064_v47 = vsel %vm1007_vm2, %v1062_v38, %v1063_v39  ;;  %v1034_v50 = vsel %vm1007_vm2, %v1032_v41, %v1033_v42  ;;  %v1083_v38 = vrot.slane %v4911_v31, 1  ;;  %v1084_v39 = vrot.slane %v818_v32, 1 }
  0x86   : > { %1216 = vrot.lane.b32.xlu1 %v1052_v45, %s4289_s30  ;;  %v4867_v45 = vld [vmem:[#allocation2 + $0x90] sm:$0xff]  ;;  %v1080_v41 = vrot.slane %v4913_v34, 1  ;;  %v1081_v42 = vrot.slane %v816_v36, 1  ;;  %vm2192_vm6 = vcmask 97280   ;;  %vm2241_vm7 = vcmask 195584  }
  0x87   : > { %1196 = vrot.lane.b32.xlu0 %v1022_v48, %s4289_s30  ;;  %v1065_v48 = vrot.slane %v4865_v43, 1  ;;  %v1396_v2 = vrot.slane %v4867_v45, 2  ;;  %v1085_v44 = vsel %vm1007_vm2, %v1083_v38, %v1084_v39  ;;  %vm2301_vm8 = vcmask 293888  }
  0x88   : > { %vm3277_vm9 = vcmask 57344  }
  0x89   : > { %v1067_v54 = vsel %vm1007_vm2, %v1065_v48, %v1066_v49  ;;  %v1398_v14 = vsel %vm1368_vm3, %v1396_v2, %v1397_v4  ;;  %v1082_v48 = vsel %vm1007_vm2, %v1080_v41, %v1081_v42  ;;  %v1441_v49 = vrot.slane %v4913_v34, 2  ;;  %v833_v42 = vld [vmem:[#allocation2 + $0x210] sm:$0xff] }
  0x8a   : > { %1218 = vrot.lane.b32.xlu1 %v1055_v52, %s4289_s30  ;;  %v1035_v52 = vrot.slane %v4867_v45, 1 }
  0x8b   : > { %1198 = vrot.lane.b32.xlu0 %v1025_v55, %s4289_s30  ;;  %v1423_v55 = vrot.slane %v4855_v33, 2 }
  0x8c   : > { %v1037_v57 = vsel %vm1007_vm2, %v1035_v52, %v1036_v53  ;;  %v821_v52 = vld [vmem:[#allocation2 + $0x1b0] sm:$0xff]  ;;  %v822_v53 = vld [vmem:[#allocation2 + $0x1b8] sm:$0x3] }
  0x8d   : > { %v1425_v61 = vsel %vm1368_vm3, %v1423_v55, %v1424_v56  ;;  %v820_v55 = vld [vmem:[#allocation2 + $0x1a8] sm:$0x3]  ;;  %v1451_v2 = vrot.slane %v822_v53, 2 }
  0x8e   : > { %1577 = vrot.lane.b32.xlu1 %v1413_v58, %s4290_s25  ;;  %v1393_v58 = vrot.slane %v4857_v35, 2 }
  0x8f   : > { %1557 = vrot.lane.b32.xlu0 %v1383_v62, %s4290_s25  ;;  %v1426_v62 = vrot.slane %v4865_v43, 2 }
  0x90   : > { %v1395_v0 = vsel %vm1368_vm3, %v1393_v58, %v1394_v59  ;;  %v1090_v58 = vrot.slane %v822_v53, 1 }
  0x91   : > { %v1428_v9 = vsel %vm1368_vm3, %v1426_v62, %v1427_v63  ;;  %v1087_v62 = vrot.slane %v820_v55, 1 }
  0x92   : > { %1579 = vrot.lane.b32.xlu1 %v1416_v5, %s4290_s25  ;;  %v4887_v5 = vld [vmem:[#allocation2 + $0x160] sm:$0xff] }
  0x93   : > { %1559 = vrot.lane.b32.xlu0 %v1386_v8, %s4290_s25  ;;  %v810_v8 = vld [vmem:[#allocation2 + $0x158] sm:$0x3]  ;;  %v1074_v10 = vrot.slane %v4887_v5, 1  ;;  %v1435_v29 = vrot.slane %v4887_v5, 2 }
  0x94   : > { %v1072_v16 = vrot.slane %v810_v8, 1 }
  0x95   : > { %v1076_v19 = vsel %vm1007_vm2, %v1074_v10, %v1075_v12  ;;  %v826_v10 = vld [vmem:[#allocation2 + $0x1d8] sm:$0x3]  ;;  %v823_v12 = vld [vmem:[#allocation2 + $0x1c0] sm:$0xff] }
  0x96   : > { %1220 = vrot.lane.b32.xlu1 %v1058_v15, %s4289_s30  ;;  %v1071_v15 = vrot.slane %v4889_v7, 1 }
  0x97   : > { %1200 = vrot.lane.b32.xlu0 %v1028_v18, %s4289_s30  ;;  %v814_v18 = vld [vmem:[#allocation2 + $0x178] sm:$0x3] }
  0x98   : > { %v1073_v22 = vsel %vm1007_vm2, %v1071_v15, %v1072_v16 }
  0x9a   : > { %1222 = vrot.lane.b32.xlu1 %v1061_v21, %s4289_s30  ;;  %v1078_v21 = vrot.slane %v814_v18, 1 }
  0x9b   : > { %1202 = vrot.lane.b32.xlu0 %v1031_v24, %s4289_s30  ;;  %v1433_v24 = vrot.slane %v810_v8, 2  ;;  %v1448_v8 = vrot.slane %v820_v55, 2  ;;  %v1468_v55 = vrot.slane %v833_v42, 2 }
  0x9c   : > { %v1079_v25 = vsel %vm1007_vm2, %v1077_v20, %v1078_v21  ;;  %v1092_v20 = vrot.slane %v823_v12, 1 }
  0x9d   : > { %v1434_v28 = vsel %vm1368_vm3, %v1432_v23, %v1433_v24  ;;  %v1457_v24 = vrot.slane %v826_v10, 2 }
  0x9e   : > { %1581 = vrot.lane.b32.xlu1 %v1419_v27, %s4290_s25  ;;  %v1439_v27 = vrot.slane %v814_v18, 2  ;;  %v1096_v18 = vrot.slane %v826_v10, 1 }
  0x9f   : > { %1561 = vrot.lane.b32.xlu0 %v1389_v30, %s4290_s25  ;;  %v1436_v30 = vrot.slane %v812_v6, 2 }
  0xa2   : > { %1583 = vrot.lane.b32.xlu1 %v1422_v37, %s4290_s25  ;;  %v1440_v37 = vsel %vm1368_vm3, %v1438_v26, %v1439_v27  ;;  %v1453_v26 = vrot.slane %v823_v12, 2 }
  0xa3   : > { %1563 = vrot.lane.b32.xlu0 %v1392_v40, %s4290_s25  ;;  %v1437_v40 = vsel %vm1368_vm3, %v1435_v29, %v1436_v30  ;;  %v832_v29 = vld [vmem:[#allocation2 + $0x208] sm:$0x3]  ;;  %v829_v30 = vld [vmem:[#allocation2 + $0x1f0] sm:$0xff] }
  0xa4   : > { %v1105_v38 = vrot.slane %v832_v29, 1 }
  0xa6   : > { %1224 = vrot.lane.b32.xlu1 %v1064_v47, %s4289_s30  ;;  %v1445_v47 = vrot.slane %v818_v32, 2  ;;  %v830_v32 = vld [vmem:[#allocation2 + $0x1f8] sm:$0x3] }
  0xa7   : > { %1204 = vrot.lane.b32.xlu0 %v1034_v50, %s4289_s30  ;;  %v1442_v50 = vrot.slane %v816_v36, 2  ;;  %v1102_v41 = vrot.slane %v830_v32, 1 }
  0xa8   : > { %v1446_v56 = vsel %vm1368_vm3, %v1444_v46, %v1445_v47  ;;  %v1107_v47 = vrot.slane %v833_v42, 1 }
  0xa9   : > { %v1443_v59 = vsel %vm1368_vm3, %v1441_v49, %v1442_v50  ;;  %v1462_v50 = vrot.slane %v829_v30, 2 }
  0xaa   : > { %1226 = vrot.lane.b32.xlu1 %v1067_v54, %s4289_s30  ;;  %v4927_v54 = vld [vmem:[#allocation2 + $0x1a0] sm:$0xff] }
  0xab   : > { %1206 = vrot.lane.b32.xlu0 %v1037_v57, %s4289_s30  ;;  %6508 = vst [vmem:[#allocation3_spill] sm:$0xff] %v4927_v54  ;;  %v1089_v57 = vrot.slane %v821_v52, 1  ;;  %v1447_v6 = vrot.slane %v4927_v54, 2 }
  0xad   : > { %v1091_v63 = vsel %vm1007_vm2, %v1089_v57, %v1090_v58 }
  0xae   : > { %1585 = vrot.lane.b32.xlu1 %v1425_v61, %s4290_s25  ;;  %v1086_v61 = vrot.slane %v4927_v54, 1 }
  0xaf   : > { %1565 = vrot.lane.b32.xlu0 %v1395_v0, %s4290_s25  ;;  %v1450_v0 = vrot.slane %v821_v52, 2  ;;  %v1463_v52 = vrot.slane %v830_v32, 2 }
  0xb0   : > { %v1088_v4 = vsel %vm1007_vm2, %v1086_v61, %v1087_v62  ;;  %v837_v61 = vld [vmem:[#allocation2 + $0x230] sm:$0xff]  ;;  %v838_v62 = vld [vmem:[#allocation2 + $0x238] sm:$0x3] }
  0xb1   : > { %v1452_v15 = vsel %vm1368_vm3, %v1450_v0, %v1451_v2  ;;  %v1464_v57 = vsel %vm1368_vm3, %v1462_v50, %v1463_v52  ;;  %v836_v0 = vld [vmem:[#allocation2 + $0x228] sm:$0x3]  ;;  %v846_v50 = vld [vmem:[#allocation2 + $0x278] sm:$0x3] }
  0xb2   : > { %1587 = vrot.lane.b32.xlu1 %v1428_v9, %s4290_s25  ;;  %v825_v9 = vld [vmem:[#allocation2 + $0x1d0] sm:$0xff]  ;;  %v1111_v12 = vrot.slane %v836_v0, 1 }
  0xb3   : > { %1567 = vrot.lane.b32.xlu0 %v1398_v14, %s4290_s25  ;;  %v824_v14 = vld [vmem:[#allocation2 + $0x1c8] sm:$0x3]  ;;  %v1095_v16 = vrot.slane %v825_v9, 1  ;;  %v1456_v23 = vrot.slane %v825_v9, 2 }
  0xb4   : > { %v1093_v21 = vrot.slane %v824_v14, 1  ;;  %v1454_v27 = vrot.slane %v824_v14, 2 }
  0xb5   : > { %v1458_v36 = vsel %vm1368_vm3, %v1456_v23, %v1457_v24  ;;  %v841_v23 = vld [vmem:[#allocation2 + $0x250] sm:$0xff]  ;;  %v842_v24 = vld [vmem:[#allocation2 + $0x258] sm:$0x3] }
  0xb6   : > { %1232 = vrot.lane.b32.xlu1 %v1076_v19, %s4289_s30  ;;  %v1449_v19 = vsel %vm1368_vm3, %v1447_v6, %v1448_v8  ;;  %v1455_v39 = vsel %vm1368_vm3, %v1453_v26, %v1454_v27  ;;  %v1114_v6 = vrot.slane %v838_v62, 1  ;;  %v839_v26 = vld [vmem:[#allocation2 + $0x240] sm:$0xff]  ;;  %v840_v27 = vld [vmem:[#allocation2 + $0x248] sm:$0x3]  ;;  %v1481_v42 = vrot.slane %v842_v24, 2 }
  0xb7   : > { %1230 = vrot.lane.b32.xlu0 %v1073_v22, %s4289_s30  ;;  %v1097_v22 = vsel %vm1007_vm2, %v1095_v16, %v1096_v18  ;;  %v1474_v16 = vrot.slane %v837_v61, 2  ;;  %v1475_v18 = vrot.slane %v838_v62, 2 }
  0xba   : > { %1234 = vrot.lane.b32.xlu1 %v1079_v25, %s4289_s30  ;;  %v1094_v25 = vsel %vm1007_vm2, %v1092_v20, %v1093_v21 }
  0xbb   : > { %1591 = vrot.lane.b32.xlu0 %v1434_v28, %s4290_s25  ;;  %v831_v28 = vld [vmem:[#allocation2 + $0x200] sm:$0xff] }
  0xbc   : > { %v1465_v58 = vrot.slane %v831_v28, 2 }
  0xbe   : > { %1595 = vrot.lane.b32.xlu1 %v1440_v37, %s4290_s25  ;;  %v1104_v37 = vrot.slane %v831_v28, 1  ;;  %v1476_v28 = vsel %vm1368_vm3, %v1474_v16, %v1475_v18  ;;  %v851_v16 = vld [vmem:[#allocation2 + $0x2a0] sm:$0xff]  ;;  %v852_v18 = vld [vmem:[#allocation2 + $0x2a8] sm:$0x3] }
  0xbf   : > { %1593 = vrot.lane.b32.xlu0 %v1437_v40, %s4290_s25  ;;  %v1101_v40 = vrot.slane %v829_v30, 1  ;;  %v1120_v30 = vrot.slane %v842_v24, 1  ;;  %v1134_v24 = vrot.slane %v851_v16, 1 }
  0xc0   : > { %v1106_v46 = vsel %vm1007_vm2, %v1104_v37, %v1105_v38  ;;  %v1116_v37 = vrot.slane %v839_v26, 1  ;;  %v1117_v38 = vrot.slane %v840_v27, 1 }
  0xc1   : > { %v1103_v49 = vsel %vm1007_vm2, %v1101_v40, %v1102_v41  ;;  %v1480_v41 = vrot.slane %v841_v23, 2 }
  0xc2   : > { %1238 = vrot.lane.b32.xlu1 %v1085_v44, %s4289_s30  ;;  %v834_v44 = vld [vmem:[#allocation2 + $0x218] sm:$0x3] }
  0xc3   : > { %1236 = vrot.lane.b32.xlu0 %v1082_v48, %s4289_s30  ;;  %v1108_v48 = vrot.slane %v834_v44, 1 }
  0xc5   : > { %v1109_v53 = vsel %vm1007_vm2, %v1107_v47, %v1108_v48  ;;  %v1477_v47 = vrot.slane %v839_v26, 2  ;;  %v1478_v48 = vrot.slane %v840_v27, 2  ;;  %v1135_v26 = vrot.slane %v852_v18, 1 }
  0xc6   : > { %1599 = vrot.lane.b32.xlu1 %v1446_v56, %s4290_s25  ;;  %v1469_v56 = vrot.slane %v834_v44, 2 }
  0xc7   : > { %1597 = vrot.lane.b32.xlu0 %v1443_v59, %s4290_s25  ;;  %v1466_v59 = vrot.slane %v832_v29, 2  ;;  %v1119_v29 = vrot.slane %v841_v23, 1 }
  0xc8   : > { %v1470_v2 = vsel %vm1368_vm3, %v1468_v55, %v1469_v56  ;;  %v844_v55 = vld [vmem:[#allocation2 + $0x268] sm:$0x3]  ;;  %v1482_v56 = vsel %vm1368_vm3, %v1480_v41, %v1481_v42 }
  0xc9   : > { %v1467_v9 = vsel %vm1368_vm3, %v1465_v58, %v1466_v59  ;;  %v1121_v40 = vsel %vm1007_vm2, %v1119_v29, %v1120_v30  ;;  %v1126_v58 = vrot.slane %v846_v50, 1 }
  0xca   : > { %1242 = vrot.lane.b32.xlu1 %v1091_v63, %s4289_s30  ;;  %v835_v63 = vld [vmem:[#allocation2 + $0x220] sm:$0xff] }
  0xcb   : > { %1240 = vrot.lane.b32.xlu0 %v1088_v4, %s4289_s30  ;;  %v1113_v4 = vrot.slane %v837_v61, 1  ;;  %v1110_v10 = vrot.slane %v835_v63, 1  ;;  %v1471_v21 = vrot.slane %v835_v63, 2  ;;  %v1479_v61 = vsel %vm1368_vm3, %v1477_v47, %v1478_v48 }
  0xcc   : > { %v1123_v63 = vrot.slane %v844_v55, 1 }
  0xcd   : > { %v1112_v20 = vsel %vm1007_vm2, %v1110_v10, %v1111_v12 }
  0xce   : > { %1603 = vrot.lane.b32.xlu1 %v1452_v15, %s4290_s25  ;;  %v1115_v15 = vsel %vm1007_vm2, %v1113_v4, %v1114_v6  ;;  %v1487_v6 = vrot.slane %v846_v50, 2 }
  0xcf   : > { %1601 = vrot.lane.b32.xlu0 %v1449_v19, %s4290_s25 }
  0xd2   : > { %1246 = vrot.lane.b32.xlu1 %v1097_v22, %s4289_s30  ;;  %v1472_v22 = vrot.slane %v836_v0, 2 }
  0xd3   : > { %1244 = vrot.lane.b32.xlu0 %v1094_v25, %s4289_s30 }
  0xd6   : > { %1607 = vrot.lane.b32.xlu1 %v1458_v36, %s4290_s25  ;;  %v1473_v36 = vsel %vm1368_vm3, %v1471_v21, %v1472_v22  ;;  %v849_v21 = vld [vmem:[#allocation2 + $0x290] sm:$0xff]  ;;  %v850_v22 = vld [vmem:[#allocation2 + $0x298] sm:$0x3] }
  0xd7   : > { %1605 = vrot.lane.b32.xlu0 %v1455_v39, %s4290_s25  ;;  %v1131_v29 = vrot.slane %v849_v21, 1  ;;  %v1132_v30 = vrot.slane %v850_v22, 1  ;;  %v1492_v48 = vrot.slane %v849_v21, 2 }
  0xd9   : > { %v1133_v47 = vsel %vm1007_vm2, %v1131_v29, %v1132_v30 }
  0xda   : > { %1252 = vrot.lane.b32.xlu1 %v1106_v46, %s4289_s30  ;;  %v1118_v46 = vsel %vm1007_vm2, %v1116_v37, %v1117_v38  ;;  %v854_v37 = vld [vmem:[#allocation2 + $0x2b8] sm:$0x3] }
  0xdb   : > { %1250 = vrot.lane.b32.xlu0 %v1103_v49, %s4289_s30  ;;  %v845_v49 = vld [vmem:[#allocation2 + $0x270] sm:$0xff]  ;;  %v1138_v42 = vrot.slane %v854_v37, 1 }
  0xdc   : > { %v1486_v4 = vrot.slane %v845_v49, 2 }
  0xde   : > { %1254 = vrot.lane.b32.xlu1 %v1109_v53, %s4289_s30  ;;  %v843_v53 = vld [vmem:[#allocation2 + $0x260] sm:$0xff]  ;;  %v1488_v23 = vsel %vm1368_vm3, %v1486_v4, %v1487_v6 }
  0xdf   : > { %1611 = vrot.lane.b32.xlu0 %v1464_v57, %s4290_s25  ;;  %v1125_v57 = vrot.slane %v845_v49, 1  ;;  %v1122_v62 = vrot.slane %v843_v53, 1  ;;  %v1483_v12 = vrot.slane %v843_v53, 2  ;;  %v1493_v49 = vrot.slane %v850_v22, 2  ;;  %v855_v6 = vld [vmem:[#allocation2 + $0x2c0] sm:$0xff] }
  0xe0   : > { %v4962_v8 = vpop.permute.xlu1 %1192 }
  0xe1   : > { %v4965_v14 = vpop.permute.xlu0 %1190  ;;  %v1124_v10 = vsel %vm1007_vm2, %v1122_v62, %v1123_v63  ;;  %v1496_v62 = vrot.slane %v852_v18, 2  ;;  %v857_v63 = vld [vmem:[#allocation2 + $0x2d0] sm:$0xff] }
  0xe2   : > { %1615 = vrot.lane.b32.xlu1 %v1470_v2, %s4290_s25  ;;  %v1127_v2 = vsel %vm1007_vm2, %v1125_v57, %v1126_v58  ;;  %v1494_v58 = vsel %vm1368_vm3, %v1492_v48, %v1493_v49  ;;  %v859_v48 = vld [vmem:[#allocation2 + $0x2e0] sm:$0xff]  ;;  %v860_v49 = vld [vmem:[#allocation2 + $0x2e8] sm:$0x3] }
  0xe3   : > { %1613 = vrot.lane.b32.xlu0 %v1467_v9, %s4290_s25 }
  0xe4   : > { %v4970_v19 = vpop.permute.xlu1 %1212 }
  0xe5   : > { %v4973_v25 = vpop.permute.xlu0 %1210 }
  0xe6   : > { %1258 = vrot.lane.b32.xlu1 %v1115_v15, %s4289_s30  ;;  %v1484_v15 = vrot.slane %v844_v55, 2 }
  0xe7   : > { %1256 = vrot.lane.b32.xlu0 %v1112_v20, %s4289_s30 }
  0xe8   : > { %v4978_v32 = vpop.permute.xlu1 %1571 }
  0xe9   : > { %v4981_v39 = vpop.permute.xlu0 %1551 }
  0xea   : > { %1619 = vrot.lane.b32.xlu1 %v1476_v28, %s4290_s25  ;;  %v1485_v28 = vsel %vm1368_vm3, %v1483_v12, %v1484_v15  ;;  %v1143_v15 = vrot.slane %v857_v63, 1 }
  0xeb   : > { %1617 = vrot.lane.b32.xlu0 %v1473_v36, %s4290_s25  ;;  %v853_v36 = vld [vmem:[#allocation2 + $0x2b0] sm:$0xff] }
  0xec   : > { %v4986_v44 = vpop.permute.xlu1 %1214  ;;  %v1137_v41 = vrot.slane %v853_v36, 1  ;;  %v1498_v55 = vrot.slane %v853_v36, 2 }
  0xed   : > { %v4989_v52 = vpop.permute.xlu0 %1194 }
  0xee   : > { %1262 = vrot.lane.b32.xlu1 %v1121_v40, %s4289_s30  ;;  %v1136_v40 = vsel %vm1007_vm2, %v1134_v24, %v1135_v26  ;;  %v1139_v53 = vsel %vm1007_vm2, %v1137_v41, %v1138_v42  ;;  %v5045_v41 = vld [vmem:[#allocation2] sm:$0xff]  ;;  %v768_v42 = vld [vmem:[#allocation2 + $0x8] sm:$0x3] }
  0xef   : > { %1260 = vrot.lane.b32.xlu0 %v1118_v46, %s4289_s30  ;;  %6509 = vst [vmem:[#allocation4_spill] sm:$0xff] %v5045_v41 }
  0xf0   : > { %v4994_v59 = vpop.permute.xlu1 %1573 }
  0xf1   : > { %v4997_v0 = vpop.permute.xlu0 %1553 }
  0xf2   : > { %1623 = vrot.lane.b32.xlu1 %v1482_v56, %s4290_s25  ;;  %v1499_v56 = vrot.slane %v854_v37, 2  ;;  %v1501_v37 = vrot.slane %v855_v6, 2 }
  0xf3   : > { %1621 = vrot.lane.b32.xlu0 %v1479_v61, %s4290_s25  ;;  %v1495_v61 = vrot.slane %v851_v16, 2  ;;  %v1140_v16 = vrot.slane %v855_v6, 1  ;;  %v862_v6 = vld [vmem:[#allocation2 + $0x2f8] sm:$0x3] }
  0xf4   : > { %v5002_v9 = vpop.permute.xlu1 %1575  ;;  %v1500_v12 = vsel %vm1368_vm3, %v1498_v55, %v1499_v56  ;;  %v1008_v55 = vrot.slane %v5045_v41, 1  ;;  %v1009_v56 = vrot.slane %v768_v42, 1  ;;  %v1511_v54 = vrot.slane %v862_v6, 2 }
  0xf5   : > { %v5005_v20 = vpop.permute.xlu0 %1555 }
  0xf6   : > { %1266 = vrot.lane.b32.xlu1 %v1127_v2, %s4289_s30  ;;  %v858_v2 = vld [vmem:[#allocation2 + $0x2d8] sm:$0x3] }
  0xf7   : > { %1264 = vrot.lane.b32.xlu0 %v1124_v10, %s4289_s30  ;;  %v856_v10 = vld [vmem:[#allocation2 + $0x2c8] sm:$0x3]  ;;  %v1144_v21 = vrot.slane %v858_v2, 1  ;;  %v1505_v29 = vrot.slane %v858_v2, 2  ;;  %v861_v2 = vld [vmem:[#allocation2 + $0x2f0] sm:$0xff] }
  0xf8   : > { %v5010_v27 = vpop.permute.xlu1 %1216  ;;  %v1141_v18 = vrot.slane %v856_v10, 1 }
  0xf9   : > { %v5013_v38 = vpop.permute.xlu0 %1196  ;;  %v1145_v26 = vsel %vm1007_vm2, %v1143_v15, %v1144_v21  ;;  %v788_v15 = vld [vmem:[#allocation2 + $0xa8] sm:$0x3]  ;;  %v1010_v21 = vsel %vm1007_vm2, %v1008_v55, %v1009_v56 }
  0xfa   : > { %1627 = vrot.lane.b32.xlu1 %v1488_v23, %s4290_s25  ;;  %v1497_v23 = vsel %vm1368_vm3, %v1495_v61, %v1496_v62  ;;  %v1142_v36 = vsel %vm1007_vm2, %v1140_v16, %v1141_v18  ;;  %v1146_v62 = vrot.slane %v859_v48, 1  ;;  %v1150_v16 = vrot.slane %v862_v6, 1 }
  0xfb   : > { %1625 = vrot.lane.b32.xlu0 %v1485_v28, %s4290_s25  ;;  %v1504_v28 = vrot.slane %v857_v63, 2  ;;  %v1147_v63 = vrot.slane %v860_v49, 1 }
  0xfc   : > { %v5018_v46 = vpop.permute.xlu1 %1218 }
  0xfd   : > { %v5021_v50 = vpop.permute.xlu0 %1198 }
  0xfe   : > { %1272 = vrot.lane.b32.xlu1 %v1136_v40, %s4289_s30  ;;  %v1502_v40 = vrot.slane %v856_v10, 2 }
  0xff   : > { %1270 = vrot.lane.b32.xlu0 %v1133_v47, %s4289_s30 }
 0x100   : > { %v5026_v57 = vpop.permute.xlu1 %1577  ;;  %v1503_v61 = vsel %vm1368_vm3, %v1501_v37, %v1502_v40  ;;  %v1369_v40 = vrot.slane %v5045_v41, 2  ;;  %v1400_v41 = vrot.slane %v788_v15, 2 }
 0x101   : > { %v5029_v4 = vpop.permute.xlu0 %1557 }
 0x102   : > { %1274 = vrot.lane.b32.xlu1 %v1139_v53, %s4289_s30  ;;  %v1506_v53 = vsel %vm1368_vm3, %v1504_v28, %v1505_v29  ;;  %v1039_v29 = vrot.slane %v788_v15, 1 }
 0x103   : > { %1631 = vrot.lane.b32.xlu0 %v1494_v58, %s4290_s25 }
 0x104   : > { %v5034_v22 = vpop.permute.xlu1 %1579 }
 0x105   : > { %v5037_v24 = vpop.permute.xlu0 %1559 }
 0x106   : > { %1635 = vrot.lane.b32.xlu1 %v1500_v12, %s4290_s25  ;;  %v5058_v12 = vld [vmem:[#allocation2 + $0xa0] sm:$0xff] }
 0x107   : > { %1633 = vrot.lane.b32.xlu0 %v1497_v23, %s4290_s25  ;;  %v1149_v23 = vrot.slane %v861_v2, 1  ;;  %v1038_v28 = vrot.slane %v5058_v12, 1 }
 0x108   : > { %v5042_v30 = vpop.permute.xlu1 %1220 }
 0x109   : > { %v5047_v47 = vpop.permute.xlu0 %1200  ;;  %v1151_v37 = vsel %vm1007_vm2, %v1149_v23, %v1150_v16  ;;  %v1040_v56 = vsel %vm1007_vm2, %v1038_v28, %v1039_v29  ;;  %v1399_v16 = vrot.slane %v5058_v12, 2 }
 0x10a   : > { %1278 = vrot.lane.b32.xlu1 %v1145_v26, %s4289_s30  ;;  %v1148_v26 = vsel %vm1007_vm2, %v1146_v62, %v1147_v63  ;;  %v1508_v62 = vrot.slane %v860_v49, 2  ;;  %v2291_v49 = vld [vmem:[%s6478_s5 + $0x8] sm:$0xff] }
 0x10b   : > { %1276 = vrot.lane.b32.xlu0 %v1142_v36, %s4289_s30  ;;  %v1401_v15 = vsel %vm1368_vm3, %v1399_v16, %v1400_v41  ;;  %v3677_v41 = vld [vmem:[%s6478_s5 + $0x30] sm:$0xff]  ;;  %v1730_v16 = vsel %vm538_vm0, %v4781_v51, %v4965_v14  ;;  %v3678_v51 = vld [vmem:[%s6478_s5 + $0x38] sm:$0xff]  ;;  %v3679_v14 = vld [vmem:[%s6478_s5 + $0x40] sm:$0xff] }
 0x10c   : > { %v5053_v58 = vpop.permute.xlu1 %1222 }
 0x10d   : > { %v5056_v10 = vpop.permute.xlu0 %1202 }
 0x10e   : > { %1639 = vrot.lane.b32.xlu1 %v1506_v53, %s4290_s25  ;;  %v1370_v53 = vrot.slane %v768_v42, 2 }
 0x10f   : > { %1637 = vrot.lane.b32.xlu0 %v1503_v61, %s4290_s25  ;;  %v1507_v61 = vrot.slane %v859_v48, 2  ;;  %v2290_v48 = vld [vmem:[%s6478_s5] sm:$0xff] }
 0x110   : > { %v5063_v18 = vpop.permute.xlu1 %1581  ;;  %v5096_v6 = vpack.c.bf16 %v2291_v49, %v2290_v48 }
 0x111   : > { %v5067_v36 = vpop.permute.xlu0 %1561  ;;  %v1509_v42 = vsel %vm1368_vm3, %v1507_v61, %v1508_v62  ;;  %v2292_v61 = vld [vmem:[%s6478_s5 + $0x10] sm:$0xff] }
 0x112   : > { %1188 = vrot.lane.b32.xlu1 %v1010_v21, %s4289_s30  ;;  %v1371_v21 = vsel %vm1368_vm3, %v1369_v40, %v1370_v53  ;;  %v5103_v40 = vld [vmem:[#allocation2 + $0x300] sm:$0xff]  ;;  %v5105_v53 = vld [vmem:[#allocation2 + $0x308] sm:$0x3]  ;;  %4090 = vmatprep.subr.bf16.mxu0 %v5096_v6 }
 0x113   : > { %1280 = vrot.lane.b32.xlu0 %v1148_v26, %s4289_s30  ;;  %v1510_v26 = vrot.slane %v861_v2, 2  ;;  %4092 = vmatpush3.bf16.msra.mxu0 %v5096_v6 }
 0x114   : > { %v5073_v55 = vpop.permute.xlu1 %1583 }
 0x115   : > { %v5076_v63 = vpop.permute.xlu0 %1563  ;;  %v1512_v2 = vsel %vm1368_vm3, %v1510_v26, %v1511_v54  ;;  %v3676_v54 = vld [vmem:[%s6478_s5 + $0x28] sm:$0xff]  ;;  %v1153_v26 = vrot.slane %v5105_v53, 1 }
 0x116   : > { %1282 = vrot.lane.b32.xlu1 %v1151_v37, %s4289_s30 }
 0x117   : > { %1208 = vrot.lane.b32.xlu0 %v1040_v56, %s4289_s30  ;;  %v1740_v56 = vsel %vm538_vm0, %v4784_v60, %v4973_v25  ;;  %v4081_v60 = vpack.c.bf16 %v3677_v41, %v3676_v54  ;;  %v2293_v25 = vld [vmem:[%s6478_s5 + $0x18] sm:$0xff] }
 0x118   : > { %v5081_v23 = vpop.permute.xlu1 %1224  ;;  %v5139_v49 = vsel %vm1789_vm4, %v1740_v56, %v4978_v32  ;;  %v4085_v32 = vpack.c.bf16 %v3679_v14, %v3678_v51 }
 0x119   : > { %v5085_v28 = vpop.permute.xlu0 %1204  ;;  %4082 = vmatprep.subr.bf16.mxu1 %v4081_v60 }
 0x11a   : > { %1549 = vrot.lane.b32.xlu1 %v1371_v21, %s4290_s25  ;;  %v1152_v21 = vrot.slane %v5103_v40, 1  ;;  %4084 = vmatpush3.bf16.msra.mxu1 %v4081_v60 }
 0x11b   : > { %1641 = vrot.lane.b32.xlu0 %v1509_v42, %s4290_s25  ;;  %v5130_v42 = vpack.c.bf16 %v2293_v25, %v2292_v61  ;;  %v5166_v61 = vld [vmem:[#allocation2 + $0x310] sm:$0xff]  ;;  %v866_v25 = vld [vmem:[#allocation2 + $0x318] sm:$0x3]  ;;  %4086 = vmatprep.subr.bf16.mxu1 %v4085_v32 }
 0x11c   : > { %v5098_v29 = vpop.permute.xlu1 %1226  ;;  %v1154_v41 = vsel %vm1007_vm2, %v1152_v21, %v1153_v26  ;;  %6511 = vst [vmem:[#allocation6_spill] sm:$0xff] %v5166_v61  ;;  %v1156_v21 = vrot.slane %v866_v25, 1  ;;  %v3680_v26 = vld [vmem:[%s6478_s5 + $0x48] sm:$0xf] }
 0x11d   : > { %v5101_v37 = vpop.permute.xlu0 %1206  ;;  %4094 = vmatprep.subr.bf16.mxu0 %v5130_v42 }
 0x11e   : > { %1643 = vrot.lane.b32.xlu1 %v1512_v2, %s4290_s25  ;;  %v5143_v2 = vsel %vm1789_vm4, %v1730_v16, %v4981_v39  ;;  %v5159_v39 = vld [vmem:[%s6478_s5 + $0x20] sm:$0xf]  ;;  %4096 = vmatpush3.bf16.msra.mxu0 %v5130_v42 }
 0x11f   : > { %1569 = vrot.lane.b32.xlu0 %v1401_v15, %s4290_s25  ;;  %6510 = vst [vmem:[#allocation5_spill] sm:$0xff] %v5159_v39  ;;  %v4220_v15 = vld [vmem:[#allocation2 + $0x20] sm:$0xff]  ;;  %3973 = vmatprep.subr.msk.mxu0 %vm2398_vm5, %v5159_v39 }
 0x120   : > { %v5126_v62 = vpop.permute.xlu1 %1585  ;;  %v1731_v56 = vsel %vm538_vm0, %v4220_v15, %v4962_v8  ;;  %v1155_v8 = vrot.slane %v5166_v61, 1  ;;  %4088 = vmatpush3.bf16.msra.mxu1 %v4085_v32 }
 0x121   : > { %v5135_v48 = vpop.permute.xlu0 %1565  ;;  %v5173_v16 = vsel %vm1789_vm4, %v1731_v56, %v4997_v0  ;;  %3915 = vmatprep.subr.msk.mxu1 %vm2398_vm5, %v3680_v26  ;;  %v4221_v0 = vld [vmem:[#allocation2 + $0xc0] sm:$0xff] }
 0x122   : > { %1914 = vrot.lane.b32.xlu1 %v5139_v49, %s4291_s21  ;;  %6512 = vst [vmem:[#allocation7_spill] sm:$0xff] %v5173_v16  ;;  %3974 = vmatpush3.msk.msra.mxu0 %vm2398_vm5, %v5159_v39  ;;  %v1741_v14 = vsel %vm538_vm0, %v4221_v0, %v4970_v19  ;;  %v1157_v56 = vsel %vm1007_vm2, %v1155_v8, %v1156_v21  ;;  %v1513_v19 = vrot.slane %v5103_v40, 2  ;;  %v1514_v0 = vrot.slane %v5105_v53, 2  ;;  %v4222_v21 = vld [vmem:[#allocation2 + $0x30] sm:$0xff] }
 0x123   : > { %1898 = vrot.lane.b32.xlu0 %v5143_v2, %s4291_s21  ;;  %v5195_v32 = vsel %vm1789_vm4, %v1741_v14, %v4994_v59  ;;  %v1516_v14 = vrot.slane %v5166_v61, 2  ;;  %v1517_v8 = vrot.slane %v866_v25, 2 }
 0x124   : > { %v5163_v54 = vpop.permute.xlu1 %1587  ;;  %3916 = vmatpush3.msk.msra.mxu1 %vm2398_vm5, %v3680_v26  ;;  %v1732_v26 = vsel %vm538_vm0, %v4222_v21, %v4989_v52  ;;  %v1515_v40 = vsel %vm1368_vm3, %v1513_v19, %v1514_v0  ;;  %v4223_v52 = vld [vmem:[#allocation2 + $0xd0] sm:$0xff] }
 0x125   : > { %v5169_v60 = vpop.permute.xlu0 %1567  ;;  %4105 = vmatprep.subr.bf16.mxu1 %v5096_v6  ;;  %v5221_v53 = vsel %vm1789_vm4, %v1732_v26, %v5005_v20  ;;  %v1518_v25 = vsel %vm1368_vm3, %v1516_v14, %v1517_v8  ;;  %v1742_v21 = vsel %vm538_vm0, %v4223_v52, %v4986_v44  ;;  %v4224_v44 = vld [vmem:[#allocation2 + $0xe0] sm:$0xff] }
 0x126   : > { %1900 = vrot.lane.b32.xlu1 %v5173_v16, %s4291_s21  ;;  %v5237_v20 = vsel %vm1789_vm4, %v1742_v21, %v5002_v9  ;;  %v1743_v9 = vsel %vm538_vm0, %v4224_v44, %v5010_v27  ;;  %v4225_v26 = vld [vmem:[#allocation2 + $0x40] sm:$0xff] }
 0x127   : > { %1284 = vrot.lane.b32.xlu0 %v1154_v41, %s4289_s30 }
 0x128   : > { %v5184_v51 = vpop.permute.xlu1 %1232 }
 0x129   : > { %v5191_v15 = vpop.permute.xlu0 %1230 }
 0x12a   : > { %2048 = vrot.lane.b32.xlu1 %v5173_v16, %s4292_s15 }
 0x12b   : > { %1916 = vrot.lane.b32.xlu0 %v5195_v32, %s4291_s21 }
 0x12c   : > { %v5203_v41 = vpop.permute.xlu1 %1234 }
 0x12d   : > { %v5208_v59 = vpop.permute.xlu0 %1591 }
 0x12e   : > { %1286 = vrot.lane.b32.xlu1 %v1157_v56, %s4289_s30 }
 0x12f   : > { %2064 = vrot.lane.b32.xlu0 %v5195_v32, %s4292_s15 }
 0x130   : > { %v5216_v16 = vpop.permute.xlu1 %1595 }
 0x131   : > { %v5223_v39 = vpop.permute.xlu0 %1593 }
 0x132   : > { %2050 = vrot.lane.b32.xlu1 %v5221_v53, %s4292_s15 }
 0x133   : > { %1645 = vrot.lane.b32.xlu0 %v1515_v40, %s4290_s25  ;;  %v1733_v40 = vsel %vm538_vm0, %v4225_v26, %v5013_v38  ;;  %v4226_v38 = vld [vmem:[#allocation2 + $0xf0] sm:$0xff] }
 0x134   : > { %v5229_v56 = vpop.permute.xlu1 %1238  ;;  %v5264_v21 = vsel %vm1789_vm4, %v1733_v40, %v5029_v4 }
 0x135   : > { %v5233_v19 = vpop.permute.xlu0 %1236 }
 0x136   : > { %1647 = vrot.lane.b32.xlu1 %v1518_v25, %s4290_s25  ;;  %v5258_v25 = vsel %vm1789_vm4, %v1743_v9, %v5026_v57  ;;  %v1744_v57 = vsel %vm538_vm0, %v4226_v38, %v5018_v46  ;;  %v4227_v9 = vld [vmem:[#allocation2 + $0x50] sm:$0xff] }
 0x137   : > { %2066 = vrot.lane.b32.xlu0 %v5237_v20, %s4292_s15  ;;  %6513 = vst [vmem:[#allocation8_spill] sm:$0xff] %v5258_v25  ;;  %v1734_v26 = vsel %vm538_vm0, %v4227_v9, %v5021_v50  ;;  %v5286_v40 = vsel %vm1789_vm4, %v1744_v57, %v5034_v22  ;;  %v1745_v50 = vsel %vm538_vm0, %v4823_v1, %v5042_v30 }
 0x138   : > { %v5242_v0 = vpop.permute.xlu1 %1599  ;;  %6514 = vst [vmem:[#allocation9_spill] sm:$0xff] %v5286_v40  ;;  %v5316_v57 = vsel %vm1789_vm4, %v1745_v50, %v5063_v18  ;;  %v1736_v18 = vsel %vm538_vm0, %v4835_v13, %v5056_v10  ;;  %v1747_v13 = vsel %vm538_vm0, %v4855_v33, %v5081_v23 }
 0x139   : > { %v5244_v14 = vpop.permute.xlu0 %1597  ;;  %6516 = vst [vmem:[#allocation11_spill] sm:$0xff] %v5316_v57 }
 0x13a   : > { %1918 = vrot.lane.b32.xlu1 %v5237_v20, %s4291_s21 }
 0x13b   : > { %1902 = vrot.lane.b32.xlu0 %v5221_v53, %s4291_s21 }
 0x13c   : > { %v5252_v8 = vpop.permute.xlu1 %1242 }
 0x13d   : > { %v5260_v52 = vpop.permute.xlu0 %1240 }
 0x13e   : > { %1920 = vrot.lane.b32.xlu1 %v5258_v25, %s4291_s21 }
 0x13f   : > { %1904 = vrot.lane.b32.xlu0 %v5264_v21, %s4291_s21 }
 0x140   : > { %v5270_v27 = vpop.permute.xlu1 %1603 }
 0x141   : > { %v5272_v44 = vpop.permute.xlu0 %1601 }
 0x142   : > { %2068 = vrot.lane.b32.xlu1 %v5258_v25, %s4292_s15  ;;  %v5292_v25 = vsel %vm1789_vm4, %v1734_v26, %v5037_v24  ;;  %v1735_v24 = vsel %vm538_vm0, %v4825_v3, %v5047_v47  ;;  %v1746_v3 = vsel %vm538_vm0, %v4833_v11, %v5053_v58 }
 0x143   : > { %2052 = vrot.lane.b32.xlu0 %v5264_v21, %s4292_s15  ;;  %6515 = vst [vmem:[#allocation10_spill] sm:$0xff] %v5292_v25  ;;  %v5322_v26 = vsel %vm1789_vm4, %v1735_v24, %v5067_v36  ;;  %v5346_v36 = vsel %vm1789_vm4, %v1746_v3, %v5073_v55  ;;  %v5352_v24 = vsel %vm1789_vm4, %v1736_v18, %v5076_v63  ;;  %v5378_v18 = vld [vmem:[#allocation2 + $0x140] sm:$0xff] }
 0x144   : > { %v5280_v4 = vpop.permute.xlu1 %1246  ;;  %6517 = vst [vmem:[#allocation12_spill] sm:$0xff] %v5322_v26  ;;  %6518 = vst [vmem:[#allocation13_spill] sm:$0xff] %v5346_v36  ;;  %v1737_v55 = vsel %vm538_vm0, %v4857_v35, %v5085_v28  ;;  %v1808_v63 = vsel %vm1789_vm4, %v1747_v13, %v5126_v62  ;;  %v1068_v23 = vrot.slane %v5378_v18, 1  ;;  %v3747_v62 = vld [vmem:[%s6478_s5 + $0x50] sm:$0xff]  ;;  %v1429_v13 = vrot.slane %v5378_v18, 2 }
 0x145   : > { %v5288_v61 = vpop.permute.xlu0 %1244  ;;  %6519 = vst [vmem:[#allocation14_spill] sm:$0xff] %v5352_v24 }
 0x146   : > { %2070 = vrot.lane.b32.xlu1 %v5286_v40, %s4292_s15 }
 0x147   : > { %2054 = vrot.lane.b32.xlu0 %v5292_v25, %s4292_s15 }
 0x148   : > { %v5298_v46 = vpop.permute.xlu1 %1607 }
 0x149   : > { %v5300_v38 = vpop.permute.xlu0 %1605 }
 0x14a   : > { %1922 = vrot.lane.b32.xlu1 %v5286_v40, %s4291_s21 }
 0x14b   : > { %1906 = vrot.lane.b32.xlu0 %v5292_v25, %s4291_s21 }
 0x14c   : > { %v5309_v22 = vpop.permute.xlu1 %1252 }
 0x14d   : > { %v5318_v9 = vpop.permute.xlu0 %1250 }
 0x14e   : > { %1924 = vrot.lane.b32.xlu1 %v5316_v57, %s4291_s21 }
 0x14f   : > { %1908 = vrot.lane.b32.xlu0 %v5322_v26, %s4291_s21 }
 0x150   : > { %v5328_v1 = vpop.permute.xlu1 %1254 }
 0x151   : > { %v5330_v30 = vpop.permute.xlu0 %1611 }
 0x152   : > { %2072 = vrot.lane.b32.xlu1 %v5316_v57, %s4292_s15  ;;  %v1738_v57 = vsel %vm538_vm0, %v4867_v45, %v5101_v37  ;;  %v1748_v45 = vsel %vm538_vm0, %v4865_v43, %v5098_v29 }
 0x153   : > { %2056 = vrot.lane.b32.xlu0 %v5322_v26, %s4292_s15  ;;  %v1799_v40 = vsel %vm1789_vm4, %v1738_v57, %v5169_v60  ;;  %v1809_v60 = vsel %vm1789_vm4, %v1748_v45, %v5163_v54  ;;  %v5439_v54 = vld [vmem:[#allocation2 + $0x330] sm:$0xff] }
 0x154   : > { %v5339_v47 = vpop.permute.xlu1 %1615  ;;  %6522 = vst [vmem:[#allocation17_spill] sm:$0xff] %v5439_v54 }
 0x155   : > { %v5348_v50 = vpop.permute.xlu0 %1613 }
 0x156   : > { %2074 = vrot.lane.b32.xlu1 %v5346_v36, %s4292_s15 }
 0x157   : > { %2058 = vrot.lane.b32.xlu0 %v5352_v24, %s4292_s15 }
 0x158   : > { %v5358_v11 = vpop.permute.xlu1 %1258 }
 0x159   : > { %v5360_v58 = vpop.permute.xlu0 %1256 }
 0x15a   : > { %1926 = vrot.lane.b32.xlu1 %v5346_v36, %s4291_s21  ;;  %v808_v36 = vld [vmem:[#allocation2 + $0x148] sm:$0x3] }
 0x15b   : > { %1910 = vrot.lane.b32.xlu0 %v5352_v24, %s4291_s21  ;;  %v1798_v24 = vsel %vm1789_vm4, %v1737_v55, %v5135_v48  ;;  %v1069_v35 = vrot.slane %v808_v36, 1  ;;  %v3748_v48 = vld [vmem:[%s6478_s5 + $0x58] sm:$0xff]  ;;  %v1430_v55 = vrot.slane %v808_v36, 2 }
 0x15c   : > { %v5369_v10 = vpop.permute.xlu1 %1619  ;;  %v5398_v26 = vpack.c.bf16 %v3748_v48, %v3747_v62  ;;  %v5461_v62 = vld [vmem:[#allocation2 + $0x340] sm:$0xff]  ;;  %v872_v48 = vld [vmem:[#allocation2 + $0x348] sm:$0x3] }
 0x15d   : > { %v5376_v3 = vpop.permute.xlu0 %1617  ;;  %v1070_v25 = vsel %vm1007_vm2, %v1068_v23, %v1069_v35  ;;  %v1431_v36 = vsel %vm1368_vm3, %v1429_v13, %v1430_v55  ;;  %v870_v23 = vld [vmem:[#allocation2 + $0x338] sm:$0x3]  ;;  %6525 = vst [vmem:[#allocation20_spill] sm:$0xff] %v5461_v62 }
 0x15e   : > { %1928 = vrot.lane.b32.xlu1 %v1808_v63, %s4291_s21  ;;  %4098 = vmatprep.subr.bf16.mxu0 %v5398_v26 }
 0x15f   : > { %1912 = vrot.lane.b32.xlu0 %v1798_v24, %s4291_s21 }
 0x160   : > { %v5384_v33 = vpop.permute.xlu1 %1262 }
 0x161   : > { %6520 = vst [vmem:[#allocation15_spill] sm:$0xff] %v5384_v33  ;;  %v5387_v28 = vpop.permute.xlu0 %1260 }
 0x162   : > { %2076 = vrot.lane.b32.xlu1 %v1808_v63, %s4292_s15 }
 0x163   : > { %2060 = vrot.lane.b32.xlu0 %v1798_v24, %s4292_s15 }
 0x164   : > { %v5403_v63 = vpop.permute.xlu1 %1623 }
 0x165   : > { %v5408_v33 = vpop.permute.xlu0 %1621 }
 0x166   : > { %2062 = vrot.lane.b32.xlu1 %v1799_v40, %s4292_s15  ;;  %v1750_v40 = vsel %vm538_vm0, %v4889_v7, %v5191_v15  ;;  %v1162_v15 = vrot.slane %v870_v23, 1 }
 0x167   : > { %1228 = vrot.lane.b32.xlu0 %v1070_v25, %s4289_s30  ;;  %v1751_v25 = vsel %vm538_vm0, %v4887_v5, %v5184_v51  ;;  %v5443_v7 = vsel %vm1789_vm4, %v1750_v40, %v5208_v59  ;;  %v1752_v5 = vsel %vm538_vm0, %v4897_v17, %v5203_v41  ;;  %v1161_v51 = vrot.slane %v5439_v54, 1 }
 0x168   : > { %v5414_v24 = vpop.permute.xlu1 %1266  ;;  %v5435_v43 = vsel %vm1789_vm4, %v1751_v25, %v5223_v39  ;;  %6523 = vst [vmem:[#allocation18_spill] sm:$0xff] %v5443_v7  ;;  %v5457_v35 = vsel %vm1789_vm4, %v1752_v5, %v5216_v16  ;;  %v1522_v17 = vrot.slane %v5439_v54, 2  ;;  %v1523_v41 = vrot.slane %v870_v23, 2  ;;  %v5483_v5 = vld [vmem:[#allocation2 + $0x350] sm:$0xff] }
 0x169   : > { %v5419_v37 = vpop.permute.xlu0 %1264  ;;  %6521 = vst [vmem:[#allocation16_spill] sm:$0xff] %v5435_v43  ;;  %6524 = vst [vmem:[#allocation19_spill] sm:$0xff] %v5457_v35  ;;  %v1163_v55 = vsel %vm1007_vm2, %v1161_v51, %v1162_v15  ;;  %v1164_v16 = vrot.slane %v5461_v62, 1  ;;  %v874_v51 = vld [vmem:[#allocation2 + $0x358] sm:$0x3]  ;;  %v1753_v15 = vsel %vm538_vm0, %v4913_v34, %v5233_v19  ;;  %v1528_v19 = vrot.slane %v5483_v5, 2 }
 0x16a   : > { %1589 = vrot.lane.b32.xlu1 %v1431_v36, %s4290_s25  ;;  %v1165_v36 = vrot.slane %v872_v48, 1  ;;  %6526 = vst [vmem:[#allocation21_spill] sm:$0xff] %v5483_v5  ;;  %v5496_v54 = vsel %vm1789_vm4, %v1753_v15, %v5244_v14  ;;  %v876_v14 = vld [vmem:[#allocation2 + $0x368] sm:$0x3] }
 0x16b   : > { %2078 = vrot.lane.b32.xlu0 %v1809_v60, %s4292_s15  ;;  %v1524_v60 = vsel %vm1368_vm3, %v1522_v17, %v1523_v41  ;;  %v1526_v17 = vrot.slane %v872_v48, 2  ;;  %6528 = vst [vmem:[#allocation23_spill] sm:$0xff] %v5496_v54  ;;  %v1529_v48 = vrot.slane %v874_v51, 2 }
 0x16c   : > { %v5431_v57 = vpop.permute.xlu1 %1627  ;;  %v1166_v25 = vsel %vm1007_vm2, %v1164_v16, %v1165_v36  ;;  %v1167_v16 = vrot.slane %v5483_v5, 1  ;;  %v1168_v36 = vrot.slane %v874_v51, 1  ;;  %v1754_v51 = vsel %vm538_vm0, %v4911_v31, %v5229_v56  ;;  %v878_v31 = vld [vmem:[#allocation2 + $0x378] sm:$0x3]  ;;  %v6535_v56 = vld [vmem:[#allocation3_spill] sm:$0xff] }
 0x16d   : > { %v5437_v29 = vpop.permute.xlu0 %1625 }
 0x16e   : > { %1932 = vrot.lane.b32.xlu1 %v5435_v43, %s4291_s21 }
 0x16f   : > { %1930 = vrot.lane.b32.xlu0 %v5443_v7, %s4291_s21 }
 0x170   : > { %v5452_v39 = vpop.permute.xlu1 %1272 }
 0x171   : > { %v5459_v59 = vpop.permute.xlu0 %1270 }
 0x172   : > { %2082 = vrot.lane.b32.xlu1 %v5457_v35, %s4292_s15 }
 0x173   : > { %2080 = vrot.lane.b32.xlu0 %v5435_v43, %s4292_s15  ;;  %v1755_v43 = vsel %vm538_vm0, %v6535_v56, %v5260_v52 }
 0x174   : > { %v5468_v13 = vpop.permute.xlu1 %1274 }
 0x175   : > { %v5472_v45 = vpop.permute.xlu0 %1631 }
 0x176   : > { %1934 = vrot.lane.b32.xlu1 %v5457_v35, %s4291_s21 }
 0x177   : > { %1290 = vrot.lane.b32.xlu0 %v1163_v55, %s4289_s30  ;;  %v1525_v55 = vrot.slane %v5461_v62, 2  ;;  %v5509_v62 = vld [vmem:[#allocation2 + $0x360] sm:$0xff] }
 0x178   : > { %v5478_v40 = vpop.permute.xlu1 %1635  ;;  %6530 = vst [vmem:[#allocation25_spill] sm:$0xff] %v5509_v62 }
 0x179   : > { %v5481_v23 = vpop.permute.xlu0 %1633  ;;  %v1527_v34 = vsel %vm1368_vm3, %v1525_v55, %v1526_v17  ;;  %v1170_v55 = vrot.slane %v5509_v62, 1  ;;  %v1171_v17 = vrot.slane %v876_v14, 1 }
 0x17a   : > { %1651 = vrot.lane.b32.xlu1 %v1524_v60, %s4290_s25 }
 0x17b   : > { %1292 = vrot.lane.b32.xlu0 %v1166_v25, %s4289_s30  ;;  %v1169_v25 = vsel %vm1007_vm2, %v1167_v16, %v1168_v36  ;;  %v5524_v36 = vsel %vm1789_vm4, %v1754_v51, %v5242_v0  ;;  %v1531_v0 = vrot.slane %v5509_v62, 2  ;;  %v1174_v51 = vrot.slane %v878_v31, 1  ;;  %v5559_v62 = vld [vmem:[#allocation2 + $0x380] sm:$0xff] }
 0x17c   : > { %v5491_v41 = vpop.permute.xlu1 %1278  ;;  %6532 = vst [vmem:[#allocation27_spill] sm:$0xff] %v5524_v36 }
 0x17d   : > { %6527 = vst [vmem:[#allocation22_spill] sm:$0xff] %v5491_v41  ;;  %v5498_v35 = vpop.permute.xlu0 %1276 }
 0x17e   : > { %2084 = vrot.lane.b32.xlu1 %v5496_v54, %s4292_s15 }
 0x17f   : > { %1936 = vrot.lane.b32.xlu0 %v5496_v54, %s4291_s21  ;;  %v1530_v54 = vsel %vm1368_vm3, %v1528_v19, %v1529_v48 }
 0x180   : > { %v5506_v60 = vpop.permute.xlu1 %1639 }
 0x181   : > { %6529 = vst [vmem:[#allocation24_spill] sm:$0xff] %v5506_v60  ;;  %v5511_v15 = vpop.permute.xlu0 %1637  ;;  %v4229_v60 = vld [vmem:[#allocation2 + $0x1c0] sm:$0xff] }
 0x182   : > { %1653 = vrot.lane.b32.xlu1 %v1527_v34, %s4290_s25  ;;  %v1172_v34 = vsel %vm1007_vm2, %v1170_v55, %v1171_v17 }
 0x183   : > { %1294 = vrot.lane.b32.xlu0 %v1169_v25, %s4289_s30  ;;  %v5534_v25 = vld [vmem:[#allocation2 + $0x370] sm:$0xff] }
 0x184   : > { %v1189_v5 = vpop.permute.xlu1 %1188  ;;  %6534 = vst [vmem:[#allocation29_spill] sm:$0xff] %v5534_v25  ;;  %v1173_v17 = vrot.slane %v5534_v25, 1 }
 0x185   : > { %v5520_v16 = vpop.permute.xlu0 %1280 }
 0x186   : > { %6531 = vst [vmem:[#allocation26_spill] sm:$0xff] %v5520_v16  ;;  %1655 = vrot.lane.b32.xlu1 %v1530_v54, %s4290_s25  ;;  %v1532_v54 = vrot.slane %v876_v14, 2  ;;  %v1534_v14 = vrot.slane %v5534_v25, 2  ;;  %v4228_v25 = vld [vmem:[#allocation2 + $0x1b0] sm:$0xff] }
 0x187   : > { %2086 = vrot.lane.b32.xlu0 %v5524_v36, %s4292_s15 }
 0x188   : > { %v5530_v19 = vpop.permute.xlu1 %1282  ;;  %v1533_v52 = vsel %vm1368_vm3, %v1531_v0, %v1532_v54 }
 0x189   : > { %6533 = vst [vmem:[#allocation28_spill] sm:$0xff] %v5530_v19  ;;  %v5532_v48 = vpop.permute.xlu0 %1208  ;;  %v5546_v19 = vsel %vm1789_vm4, %v1755_v43, %v5272_v44  ;;  %v880_v44 = vld [vmem:[#allocation2 + $0x388] sm:$0x3] }
 0x18a   : > { %1296 = vrot.lane.b32.xlu1 %v1172_v34, %s4289_s30  ;;  %6536 = vst [vmem:[#allocation3_spill] sm:$0xff] %v5546_v19  ;;  %v1535_v34 = vrot.slane %v878_v31, 2  ;;  %v1177_v0 = vrot.slane %v880_v44, 1  ;;  %v1756_v31 = vsel %vm538_vm0, %v4228_v25, %v5252_v8  ;;  %v5579_v8 = vld [vmem:[#allocation2 + $0x1e0] sm:$0xff]  ;;  %v828_v25 = vld [vmem:[#allocation2 + $0x1e8] sm:$0x3] }
 0x18b   : > { %1938 = vrot.lane.b32.xlu0 %v5524_v36, %s4291_s21  ;;  %v1175_v36 = vsel %vm1007_vm2, %v1173_v17, %v1174_v51  ;;  %v5569_v17 = vsel %vm1789_vm4, %v1756_v31, %v5270_v27  ;;  %v1757_v27 = vsel %vm538_vm0, %v4229_v60, %v5288_v61  ;;  %v1098_v61 = vrot.slane %v5579_v8, 1 }
 0x18c   : > { %v1550_v55 = vpop.permute.xlu1 %1549  ;;  %v1099_v60 = vrot.slane %v828_v25, 1 }
 0x18d   : > { %v5548_v16 = vpop.permute.xlu0 %1641 }
 0x18e   : > { %6537 = vst [vmem:[#allocation30_spill] sm:$0xff] %v5548_v16  ;;  %2088 = vrot.lane.b32.xlu1 %v5546_v19, %s4292_s15  ;;  %v1536_v16 = vsel %vm1368_vm3, %v1534_v14, %v1535_v34  ;;  %v882_v14 = vld [vmem:[#allocation2 + $0x398] sm:$0x3] }
 0x18f   : > { %1940 = vrot.lane.b32.xlu0 %v5546_v19, %s4291_s21  ;;  %v1176_v19 = vrot.slane %v5559_v62, 1 }
 0x190   : > { %v5556_v56 = vpop.permute.xlu1 %1643 }
 0x191   : > { %6538 = vst [vmem:[#allocation31_spill] sm:$0xff] %v5556_v56  ;;  %v1570_v43 = vpop.permute.xlu0 %1569 }
 0x192   : > { %1657 = vrot.lane.b32.xlu1 %v1533_v52, %s4290_s25  ;;  %v5575_v52 = vld [vmem:[#allocation2 + $0x390] sm:$0xff] }
 0x193   : > { %1298 = vrot.lane.b32.xlu0 %v1175_v36, %s4289_s30  ;;  %v1178_v36 = vsel %vm1007_vm2, %v1176_v19, %v1177_v0  ;;  %v1179_v0 = vrot.slane %v5575_v52, 1 }
 0x194   : > { %v1915_v54 = vpop.permute.xlu1 %1914 }
 0x195   : > { %v1899_v56 = vpop.permute.xlu0 %1898 }
 0x196   : > { %1659 = vrot.lane.b32.xlu1 %v1536_v16, %s4290_s25  ;;  %v6540_v16 = vld [vmem:[#allocation4_spill] sm:$0xff] }
 0x197   : > { %2090 = vrot.lane.b32.xlu0 %v5569_v17, %s4292_s15  ;;  %v1729_v31 = vsel %vm538_vm0, %v6540_v16, %v1189_v5  ;;  %v1818_v5 = vsel %vm1789_vm4, %v1757_v27, %v5300_v38 }
 0x198   : > { %v1901_v51 = vpop.permute.xlu1 %1900  ;;  %v1790_v19 = vsel %vm1789_vm4, %v1729_v31, %v1550_v55  ;;  %v1739_v55 = vsel %vm538_vm0, %v5058_v12, %v5532_v48  ;;  %v1537_v31 = vrot.slane %v5559_v62, 2  ;;  %v3749_v12 = vld [vmem:[%s6478_s5 + $0x60] sm:$0xff]  ;;  %v3750_v48 = vld [vmem:[%s6478_s5 + $0x68] sm:$0xff] }
 0x199   : > { %v5577_v34 = vpop.permute.xlu0 %1284  ;;  %v2193_v7 = vsel %vm2192_vm6, %v1790_v19, %v1899_v56  ;;  %v1538_v19 = vrot.slane %v880_v44, 2  ;;  %v1800_v38 = vsel %vm1789_vm4, %v1739_v55, %v1570_v43 }
 0x19a   : > { %6539 = vst [vmem:[#allocation32_spill] sm:$0xff] %v5577_v34  ;;  %1300 = vrot.lane.b32.xlu1 %v1178_v36, %s4289_s30  ;;  %v1180_v34 = vrot.slane %v882_v14, 1 }
 0x19b   : > { %1942 = vrot.lane.b32.xlu0 %v5569_v17, %s4291_s21  ;;  %v1539_v43 = vsel %vm1368_vm3, %v1537_v31, %v1538_v19 }
 0x19c   : > { %v2049_v41 = vpop.permute.xlu1 %2048  ;;  %v1181_v56 = vsel %vm1007_vm2, %v1179_v0, %v1180_v34  ;;  %v1540_v34 = vrot.slane %v5575_v52, 2  ;;  %v1541_v0 = vrot.slane %v882_v14, 2 }
 0x19d   : > { %v1917_v36 = vpop.permute.xlu0 %1916  ;;  %v2242_v16 = vsel %vm2241_vm7, %v2193_v7, %v2049_v41  ;;  %v1100_v7 = vsel %vm1007_vm2, %v1098_v61, %v1099_v60  ;;  %v2201_v41 = vsel %vm2192_vm6, %v1800_v38, %v1915_v54  ;;  %v1459_v54 = vrot.slane %v5579_v8, 2  ;;  %v4230_v61 = vld [vmem:[#allocation2 + $0x1d0] sm:$0xff]  ;;  %v5628_v38 = vld [vmem:[#allocation2 + $0x3a0] sm:$0xff] }
 0x19e   : > { %2092 = vrot.lane.b32.xlu1 %v1818_v5, %s4292_s15  ;;  %3975 = vmatprep.mubr.msk.f32.mxu0 %vm2301_vm8, %v2242_v16  ;;  %v1758_v60 = vsel %vm538_vm0, %v4230_v61, %v5280_v4  ;;  %v1182_v4 = vrot.slane %v5628_v38, 1  ;;  %v886_v61 = vld [vmem:[#allocation2 + $0x3b8] sm:$0x3] }
 0x19f   : > { %1944 = vrot.lane.b32.xlu0 %v1818_v5, %s4291_s21  ;;  %v2194_v5 = vsel %vm2192_vm6, %v5143_v2, %v1901_v51  ;;  %v1819_v31 = vsel %vm1789_vm4, %v1758_v60, %v5298_v46  ;;  %v1542_v2 = vsel %vm1368_vm3, %v1540_v34, %v1541_v0  ;;  %v4231_v34 = vld [vmem:[#allocation2 + $0x1f0] sm:$0xff]  ;;  %v1543_v60 = vrot.slane %v5628_v38, 2 }
 0x1a0   : > { %v5604_v27 = vpop.permute.xlu1 %1286  ;;  %v5660_v0 = vld [vmem:[#allocation2 + $0x3b0] sm:$0xff] }
 0x1a1   : > { %v2065_v16 = vpop.permute.xlu0 %2064 }
 0x1a2   : > { %1302 = vrot.lane.b32.xlu1 %v1181_v56, %s4289_s30  ;;  %v5616_v44 = vsel %vm2241_vm7, %v2201_v41, %v2065_v16  ;;  %v1460_v56 = vrot.slane %v828_v25, 2  ;;  %v4101_v41 = vpack.c.bf16 %v3750_v48, %v3749_v12  ;;  %v2202_v16 = vsel %vm2192_vm6, %v5139_v49, %v1917_v36 }
 0x1a3   : > { %1248 = vrot.lane.b32.xlu0 %v1100_v7, %s4289_s30  ;;  %3917 = vmatprep.mubr.msk.f32.mxu1 %vm2301_vm8, %v5616_v44  ;;  %v884_v7 = vld [vmem:[#allocation2 + $0x3a8] sm:$0x3] }
 0x1a4   : > { %v2051_v55 = vpop.permute.xlu1 %2050  ;;  %v1183_v51 = vrot.slane %v884_v7, 1  ;;  %v1461_v46 = vsel %vm1368_vm3, %v1459_v54, %v1460_v56 }
 0x1a5   : > { %v5632_v19 = vpop.permute.xlu0 %1645  ;;  %v2243_v14 = vsel %vm2241_vm7, %v2194_v5, %v2051_v55  ;;  %v4232_v5 = vld [vmem:[#allocation2 + $0x200] sm:$0xff] }
 0x1a6   : > { %2094 = vrot.lane.b32.xlu1 %v1819_v31, %s4292_s15  ;;  %3976 = vmatmul.mubr.msk.f32.vlgmr.msra.gmra.mrb[0].mxu0 %vm2301_vm8, %v2243_v14  ;;  %v1184_v49 = vsel %vm1007_vm2, %v1182_v4, %v1183_v51  ;;  %v1761_v55 = vsel %vm538_vm0, %v4232_v5, %v5309_v22  ;;  %v1186_v31 = vrot.slane %v886_v61, 1  ;;  %v1547_v4 = vrot.slane %v886_v61, 2 }
 0x1a7   : > { %1661 = vrot.lane.b32.xlu0 %v1539_v43, %s4290_s25  ;;  %4100 = vmatpush3.bf16.msra.mxu0 %v5398_v26  ;;  %v3751_v43 = vld [vmem:[%s6478_s5 + $0x70] sm:$0xf]  ;;  %v1760_v26 = vsel %vm538_vm0, %v4231_v34, %v5318_v9 }
 0x1a8   : > { %v5641_v25 = vpop.permute.xlu1 %1647  ;;  %4102 = vmatprep.subr.bf16.mxu0 %v4101_v41  ;;  %v5666_v9 = vsel %vm1789_vm4, %v1760_v26, %v5330_v30  ;;  %v5679_v30 = vsel %vm1789_vm4, %v1761_v55, %v5348_v50  ;;  %v4234_v55 = vld [vmem:[#allocation2 + $0x220] sm:$0xff] }
 0x1a9   : > { %v2067_v12 = vpop.permute.xlu0 %2066 }
 0x1aa   : > { %v5647_v48 = vsel %vm2241_vm7, %v2202_v16, %v2067_v12  ;;  %1663 = vrot.lane.b32.xlu1 %v1542_v2, %s4290_s25  ;;  %v6541_v2 = vld [vmem:[#allocation5_spill] sm:$0xff] }
 0x1ab   : > { %1609 = vrot.lane.b32.xlu0 %v1461_v46, %s4290_s25  ;;  %3918 = vmatmul.mubr.msk.f32.vlgmr.msra.gmra.mrb[0].mxu1 %vm2301_vm8, %v5647_v48  ;;  %v6542_v46 = vld [vmem:[#allocation7_spill] sm:$0xff] }
 0x1ac   : > { %v1919_v36 = vpop.permute.xlu1 %1918  ;;  %4104 = vmatpush3.bf16.msra.mxu0 %v4101_v41  ;;  %4108 = vmatpush3.bf16.msra.mxu1 %v5096_v6  ;;  %v1544_v6 = vrot.slane %v884_v7, 2  ;;  %v1185_v41 = vrot.slane %v5660_v0, 1  ;;  %v1546_v7 = vrot.slane %v5660_v0, 2 }
 0x1ad   : > { %v1903_v54 = vpop.permute.xlu0 %1902  ;;  %4031 = vmatprep.subr.msk.mxu0 %vm2398_vm5, %v3751_v43  ;;  %4106 = vmatprep.subr.bf16.mxu1 %v5130_v42 }
 0x1ae   : > { %1304 = vrot.lane.b32.xlu1 %v1184_v49, %s4289_s30  ;;  %v1545_v22 = vsel %vm1368_vm3, %v1543_v60, %v1544_v6  ;;  %v1187_v51 = vsel %vm1007_vm2, %v1185_v41, %v1186_v31  ;;  %v2195_v16 = vsel %vm2192_vm6, %v6542_v46, %v1903_v54  ;;  %v6544_v46 = vld [vmem:[#allocation15_spill] sm:$0xff] }
 0x1af   : > { %1946 = vrot.lane.b32.xlu0 %v5666_v9, %s4291_s21 }
 0x1b0   : > { %v1921_v56 = vpop.permute.xlu1 %1920  ;;  %4032 = vmatpush3.msk.msra.mxu0 %vm2398_vm5, %v3751_v43  ;;  %4109 = vmatpush3.bf16.msra.mxu1 %v5130_v42  ;;  %v2203_v42 = vsel %vm2192_vm6, %v5195_v32, %v1919_v36  ;;  %v1548_v32 = vsel %vm1368_vm3, %v1546_v7, %v1547_v4  ;;  %v4233_v36 = vld [vmem:[#allocation2 + $0x210] sm:$0xff]  ;;  %v6543_v7 = vld [vmem:[#allocation8_spill] sm:$0xff] }
 0x1b1   : > { %v1905_v14 = vpop.permute.xlu0 %1904  ;;  %4107 = vmatprep.subr.msk.mxu1 %vm2398_vm5, %v6541_v2  ;;  %v2204_v26 = vsel %vm2192_vm6, %v5237_v20, %v1921_v56  ;;  %v1762_v54 = vsel %vm538_vm0, %v4233_v36, %v5328_v1  ;;  %v1763_v20 = vsel %vm538_vm0, %v4234_v55, %v5360_v58  ;;  %v4235_v58 = vld [vmem:[#allocation2 + $0x230] sm:$0xff]  ;;  %v6546_v36 = vld [vmem:[#allocation10_spill] sm:$0xff]  ;;  %v4238_v55 = vld [vmem:[#allocation2 + $0x260] sm:$0xff] }
 0x1b2   : > { %2096 = vrot.lane.b32.xlu1 %v5679_v30, %s4292_s15  ;;  %v2196_v61 = vsel %vm2192_vm6, %v5221_v53, %v1905_v14  ;;  %v5717_v5 = vsel %vm1789_vm4, %v1762_v54, %v5339_v47  ;;  %v5730_v1 = vsel %vm1789_vm4, %v1763_v20, %v5376_v3  ;;  %v1764_v41 = vsel %vm538_vm0, %v4235_v58, %v5358_v11 }
 0x1b3   : > { %1948 = vrot.lane.b32.xlu0 %v5679_v30, %s4291_s21  ;;  %v5740_v14 = vsel %vm1789_vm4, %v1764_v41, %v5369_v10  ;;  %v1767_v20 = vsel %vm538_vm0, %v4238_v55, %v5419_v37 }
 0x1b4   : > { %v2069_v50 = vpop.permute.xlu1 %2068  ;;  %4110 = vmatpush3.msk.msra.mxu1 %vm2398_vm5, %v6541_v2  ;;  %v1828_v37 = vsel %vm1789_vm4, %v1767_v20, %v5437_v29  ;;  %v6547_v29 = vld [vmem:[#allocation11_spill] sm:$0xff] }
 0x1b5   : > { %v2053_v12 = vpop.permute.xlu0 %2052  ;;  %v5697_v43 = vsel %vm2241_vm7, %v2203_v42, %v2069_v50 }
 0x1b6   : > { %v2244_v34 = vsel %vm2241_vm7, %v2195_v16, %v2053_v12  ;;  %1665 = vrot.lane.b32.xlu1 %v1545_v22, %s4290_s25  ;;  %3920 = vmatprep.mubr.msk.f32.mxu1 %vm2301_vm8, %v5697_v43  ;;  %v4236_v22 = vld [vmem:[#allocation2 + $0x240] sm:$0xff]  ;;  %v6545_v16 = vld [vmem:[#allocation9_spill] sm:$0xff] }
 0x1b7   : > { %1306 = vrot.lane.b32.xlu0 %v1187_v51, %s4289_s30  ;;  %3978 = vmatprep.mubr.msk.f32.mxu0 %vm2301_vm8, %v2244_v34  ;;  %v1765_v3 = vsel %vm538_vm0, %v4236_v22, %v5387_v28 }
 0x1b8   : > { %v2071_v49 = vpop.permute.xlu1 %2070  ;;  %v5752_v42 = vsel %vm1789_vm4, %v1765_v3, %v5408_v33  ;;  %v4237_v33 = vld [vmem:[#allocation2 + $0x250] sm:$0xff] }
 0x1b9   : > { %v2055_v60 = vpop.permute.xlu0 %2054  ;;  %v5713_v6 = vsel %vm2241_vm7, %v2204_v26, %v2071_v49  ;;  %v848_v26 = vld [vmem:[#allocation2 + $0x288] sm:$0x3] }
 0x1ba   : > { %v2245_v56 = vsel %vm2241_vm7, %v2196_v61, %v2055_v60  ;;  %1667 = vrot.lane.b32.xlu1 %v1548_v32, %s4290_s25  ;;  %3921 = vmatmul.mubr.msk.f32.gmra.mrb[2].mxu1 %vm2301_vm8, %v5713_v6  ;;  %v5771_v32 = vld [vmem:[#allocation2 + $0x280] sm:$0xff] }
 0x1bb   : > { %2098 = vrot.lane.b32.xlu0 %v5717_v5, %s4292_s15  ;;  %3979 = vmatmul.mubr.msk.f32.gmra.mrb[2].mxu0 %vm2301_vm8, %v2245_v56 }
 0x1bc   : > { %v1923_v53 = vpop.permute.xlu1 %1922 }
 0x1bd   : > { %v1907_v47 = vpop.permute.xlu0 %1906  ;;  %v2205_v4 = vsel %vm2192_vm6, %v6543_v7, %v1923_v53  ;;  %v1129_v53 = vrot.slane %v848_v26, 1 }
 0x1be   : > { %1952 = vrot.lane.b32.xlu1 %v5730_v1, %s4291_s21  ;;  %v2197_v10 = vsel %vm2192_vm6, %v5264_v21, %v1907_v47  ;;  %v1766_v21 = vsel %vm538_vm0, %v4237_v33, %v6544_v46 }
 0x1bf   : > { %1950 = vrot.lane.b32.xlu0 %v5717_v5, %s4291_s21  ;;  %v5775_v49 = vsel %vm1789_vm4, %v1766_v21, %v5403_v63  ;;  %v1128_v63 = vrot.slane %v5771_v32, 1 }
 0x1c0   : > { %v1925_v31 = vpop.permute.xlu1 %1924 }
 0x1c1   : > { %v1909_v2 = vpop.permute.xlu0 %1908  ;;  %v2206_v12 = vsel %vm2192_vm6, %v6545_v16, %v1925_v31  ;;  %v1130_v41 = vsel %vm1007_vm2, %v1128_v63, %v1129_v53  ;;  %v1489_v31 = vrot.slane %v5771_v32, 2  ;;  %v6550_v53 = vld [vmem:[#allocation13_spill] sm:$0xff] }
 0x1c2   : > { %2102 = vrot.lane.b32.xlu1 %v5740_v14, %s4292_s15  ;;  %v2198_v54 = vsel %vm2192_vm6, %v6546_v36, %v1909_v2  ;;  %v1490_v2 = vrot.slane %v848_v26, 2 }
 0x1c3   : > { %2100 = vrot.lane.b32.xlu0 %v5730_v1, %s4292_s15 }
 0x1c4   : > { %v2073_v11 = vpop.permute.xlu1 %2072  ;;  %v1491_v7 = vsel %vm1368_vm3, %v1489_v31, %v1490_v2 }
 0x1c5   : > { %v2057_v50 = vpop.permute.xlu0 %2056  ;;  %v5757_v28 = vsel %vm2241_vm7, %v2205_v4, %v2073_v11 }
 0x1c6   : > { %v2246_v51 = vsel %vm2241_vm7, %v2197_v10, %v2057_v50  ;;  %1956 = vrot.lane.b32.xlu1 %v5752_v42, %s4291_s21  ;;  %3923 = vmatprep.mubr.msk.f32.mxu1 %vm2301_vm8, %v5757_v28  ;;  %v4239_v10 = vld [vmem:[#allocation2 + $0x270] sm:$0xff] }
 0x1c7   : > { %1954 = vrot.lane.b32.xlu0 %v5740_v14, %s4291_s21  ;;  %3981 = vmatprep.mubr.msk.f32.mxu0 %vm2301_vm8, %v2246_v51  ;;  %v1768_v50 = vsel %vm538_vm0, %v4239_v10, %v5414_v24  ;;  %v6548_v51 = vld [vmem:[#allocation12_spill] sm:$0xff]  ;;  %v4241_v24 = vld [vmem:[#allocation2 + $0x2a0] sm:$0xff] }
 0x1c8   : > { %v2075_v34 = vpop.permute.xlu1 %2074  ;;  %v1829_v16 = vsel %vm1789_vm4, %v1768_v50, %v5431_v57  ;;  %v1771_v36 = vsel %vm538_vm0, %v4241_v24, %v5452_v39  ;;  %v4242_v39 = vld [vmem:[#allocation2 + $0x2b0] sm:$0xff]  ;;  %v4245_v10 = vld [vmem:[#allocation2 + $0x2e0] sm:$0xff]  ;;  %v6554_v50 = vld [vmem:[#allocation26_spill] sm:$0xff] }
 0x1c9   : > { %v2059_v61 = vpop.permute.xlu0 %2058  ;;  %v5780_v60 = vsel %vm2241_vm7, %v2206_v12, %v2075_v34  ;;  %v4240_v34 = vld [vmem:[#allocation2 + $0x290] sm:$0xff]  ;;  %v5825_v55 = vsel %vm1789_vm4, %v1771_v36, %v5481_v23  ;;  %v1772_v23 = vsel %vm538_vm0, %v4242_v39, %v5468_v13  ;;  %v6557_v24 = vld [vmem:[#allocation31_spill] sm:$0xff] }
 0x1ca   : > { %v2247_v56 = vsel %vm2241_vm7, %v2198_v54, %v2059_v61  ;;  %2106 = vrot.lane.b32.xlu1 %v5775_v49, %s4292_s15  ;;  %3924 = vmatmul.mubr.msk.f32.gmra.mrb[4].mxu1 %vm2301_vm8, %v5780_v60  ;;  %v1770_v26 = vsel %vm538_vm0, %v4240_v34, %v5459_v59  ;;  %v6549_v54 = vld [vmem:[#allocation14_spill] sm:$0xff]  ;;  %v6556_v34 = vld [vmem:[#allocation28_spill] sm:$0xff] }
 0x1cb   : > { %2104 = vrot.lane.b32.xlu0 %v5752_v42, %s4292_s15  ;;  %3982 = vmatmul.mubr.msk.f32.gmra.mrb[4].mxu0 %vm2301_vm8, %v2247_v56  ;;  %v5830_v59 = vsel %vm1789_vm4, %v1770_v26, %v5472_v45  ;;  %v5843_v45 = vsel %vm1789_vm4, %v1772_v23, %v5478_v40 }
 0x1cc   : > { %v1927_v47 = vpop.permute.xlu1 %1926 }
 0x1cd   : > { %v1911_v58 = vpop.permute.xlu0 %1910  ;;  %v2207_v4 = vsel %vm2192_vm6, %v6547_v29, %v1927_v47 }
 0x1ce   : > { %1960 = vrot.lane.b32.xlu1 %v1828_v37, %s4291_s21  ;;  %v2199_v33 = vsel %vm2192_vm6, %v6548_v51, %v1911_v58  ;;  %v4243_v58 = vld [vmem:[#allocation2 + $0x2c0] sm:$0xff]  ;;  %v1775_v51 = vsel %vm538_vm0, %v4245_v10, %v6554_v50  ;;  %v6563_v10 = vld [vmem:[#allocation20_spill] sm:$0xff] }
 0x1cf   : > { %1958 = vrot.lane.b32.xlu0 %v5775_v49, %s4291_s21 }
 0x1d0   : > { %v1929_v22 = vpop.permute.xlu1 %1928 }
 0x1d1   : > { %v1913_v3 = vpop.permute.xlu0 %1912  ;;  %v2208_v47 = vsel %vm2192_vm6, %v6550_v53, %v1929_v22  ;;  %v868_v53 = vld [vmem:[#allocation2 + $0x328] sm:$0x3] }
 0x1d2   : > { %1268 = vrot.lane.b32.xlu1 %v1130_v41, %s4289_s30  ;;  %v2200_v57 = vsel %vm2192_vm6, %v6549_v54, %v1913_v3  ;;  %v1773_v41 = vsel %vm538_vm0, %v4243_v58, %v5498_v35 }
 0x1d3   : > { %2108 = vrot.lane.b32.xlu0 %v1828_v37, %s4292_s15  ;;  %v5861_v35 = vsel %vm1789_vm4, %v1773_v41, %v5511_v15 }
 0x1d4   : > { %v2077_v11 = vpop.permute.xlu1 %2076 }
 0x1d5   : > { %v2061_v46 = vpop.permute.xlu0 %2060  ;;  %v2256_v21 = vsel %vm2241_vm7, %v2207_v4, %v2077_v11 }
 0x1d6   : > { %v2248_v12 = vsel %vm2241_vm7, %v2199_v33, %v2061_v46  ;;  %1629 = vrot.lane.b32.xlu1 %v1491_v7, %s4290_s25  ;;  %3926 = vmatprep.mubr.msk.f32.mxu1 %vm2301_vm8, %v2256_v21  ;;  %v6553_v7 = vld [vmem:[#allocation24_spill] sm:$0xff]  ;;  %v6555_v46 = vld [vmem:[#allocation30_spill] sm:$0xff] }
 0x1d7   : > { %2110 = vrot.lane.b32.xlu0 %v1829_v16, %s4292_s15  ;;  %3984 = vmatprep.mubr.msk.f32.mxu0 %vm2301_vm8, %v2248_v12  ;;  %v5904_v16 = vsel %vm1789_vm4, %v1775_v51, %v6555_v46  ;;  %v4246_v12 = vld [vmem:[#allocation2 + $0x2f0] sm:$0xff] }
 0x1d8   : > { %v2063_v61 = vpop.permute.xlu1 %2062 }
 0x1d9   : > { %v1229_v20 = vpop.permute.xlu0 %1228  ;;  %v2249_v56 = vsel %vm2241_vm7, %v2200_v57, %v2063_v61  ;;  %v4247_v57 = vld [vmem:[#allocation2 + $0x300] sm:$0xff]  ;;  %v6558_v61 = vld [vmem:[#allocation32_spill] sm:$0xff] }
 0x1da   : > { %1964 = vrot.lane.b32.xlu1 %v5825_v55, %s4291_s21  ;;  %3985 = vmatmul.mubr.msk.f32.gmra.mrb[6].mxu0 %vm2301_vm8, %v2249_v56  ;;  %v1749_v40 = vsel %vm538_vm0, %v5378_v18, %v1229_v20  ;;  %v6552_v18 = vld [vmem:[#allocation18_spill] sm:$0xff]  ;;  %v1777_v20 = vsel %vm538_vm0, %v4247_v57, %v6558_v61  ;;  %v6559_v56 = vld [vmem:[#allocation16_spill] sm:$0xff] }
 0x1db   : > { %1962 = vrot.lane.b32.xlu0 %v5830_v59, %s4291_s21  ;;  %3987 = vmatprep.mubr.msk.f32.mxu0 %vm2301_vm8, %v5616_v44 }
 0x1dc   : > { %v1590_v63 = vpop.permute.xlu1 %1589 }
 0x1dd   : > { %v2079_v37 = vpop.permute.xlu0 %2078  ;;  %v1810_v2 = vsel %vm1789_vm4, %v1749_v40, %v1590_v63  ;;  %v5929_v63 = vld [vmem:[#allocation2 + $0x320] sm:$0xff] }
 0x1de   : > { %v2257_v31 = vsel %vm2241_vm7, %v2208_v47, %v2079_v37  ;;  %2114 = vrot.lane.b32.xlu1 %v5843_v45, %s4292_s15  ;;  %3988 = vmatmul.mubr.msk.f32.gmra.mrb[8].mxu0 %vm2301_vm8, %v5647_v48  ;;  %v4244_v48 = vld [vmem:[#allocation2 + $0x2d0] sm:$0xff]  ;;  %v1838_v47 = vsel %vm1789_vm4, %v1777_v20, %v5632_v19  ;;  %v1519_v41 = vrot.slane %v5929_v63, 2  ;;  %v6560_v19 = vld [vmem:[#allocation6_spill] sm:$0xff] }
 0x1df   : > { %2112 = vrot.lane.b32.xlu0 %v5825_v55, %s4292_s15  ;;  %3927 = vmatmul.mubr.msk.f32.gmra.mrb[6].mxu1 %vm2301_vm8, %v2257_v31  ;;  %v6566_v20 = vld [vmem:[#allocation25_spill] sm:$0xff] }
 0x1e0   : > { %3990 = vmatprep.mubr.msk.f32.mxu0 %vm2301_vm8, %v5697_v43  ;;  %v1933_v13 = vpop.permute.xlu1 %1932  ;;  %v6551_v43 = vld [vmem:[#allocation22_spill] sm:$0xff] }
 0x1e1   : > { %v1931_v44 = vpop.permute.xlu0 %1930  ;;  %v1774_v15 = vsel %vm538_vm0, %v4244_v48, %v6551_v43  ;;  %v2210_v22 = vsel %vm2192_vm6, %v6552_v18, %v1933_v13  ;;  %v1778_v13 = vsel %vm538_vm0, %v6560_v19, %v5604_v27  ;;  %v1159_v48 = vrot.slane %v868_v53, 1 }
 0x1e2   : > { %1968 = vrot.lane.b32.xlu1 %v5861_v35, %s4291_s21  ;;  %3991 = vmatmul.mubr.msk.f32.gmra.mrb[10].mxu0 %vm2301_vm8, %v5713_v6  ;;  %v5880_v29 = vsel %vm1789_vm4, %v1774_v15, %v6553_v7  ;;  %v2209_v6 = vsel %vm2192_vm6, %v1810_v2, %v1931_v44  ;;  %v1158_v44 = vrot.slane %v5929_v63, 1  ;;  %v1839_v43 = vsel %vm1789_vm4, %v1778_v13, %v5641_v25  ;;  %v6562_v25 = vld [vmem:[#allocation17_spill] sm:$0xff] }
 0x1e3   : > { %1966 = vrot.lane.b32.xlu0 %v5843_v45, %s4291_s21  ;;  %3993 = vmatprep.mubr.msk.f32.mxu0 %vm2301_vm8, %v5757_v28 }
 0x1e4   : > { %v2083_v3 = vpop.permute.xlu1 %2082 }
 0x1e5   : > { %v2081_v4 = vpop.permute.xlu0 %2080  ;;  %v5884_v11 = vsel %vm2241_vm7, %v2210_v22, %v2083_v3  ;;  %v1160_v22 = vsel %vm1007_vm2, %v1158_v44, %v1159_v48  ;;  %v6561_v3 = vld [vmem:[#allocation19_spill] sm:$0xff] }
 0x1e6   : > { %v5887_v28 = vsel %vm2241_vm7, %v2209_v6, %v2081_v4  ;;  %2118 = vrot.lane.b32.xlu1 %v5880_v29, %s4292_s15  ;;  %3994 = vmatmul.mubr.msk.f32.gmra.mrb[12].mxu0 %vm2301_vm8, %v5780_v60 }
 0x1e7   : > { %2116 = vrot.lane.b32.xlu0 %v5861_v35, %s4292_s15  ;;  %3929 = vmatprep.mubr.msk.f32.mxu1 %vm2301_vm8, %v5887_v28 }
 0x1e8   : > { %3930 = vmatmul.mubr.msk.f32.gmra.mrb[8].mxu1 %vm2301_vm8, %v5884_v11  ;;  %3996 = vmatprep.mubr.msk.f32.mxu0 %vm2301_vm8, %v2256_v21  ;;  %v1935_v33 = vpop.permute.xlu1 %1934  ;;  %v1776_v21 = vsel %vm538_vm0, %v4246_v12, %v6556_v34 }
 0x1e9   : > { %v1291_v60 = vpop.permute.xlu0 %1290  ;;  %v5917_v36 = vsel %vm1789_vm4, %v1776_v21, %v6557_v24  ;;  %v2211_v39 = vsel %vm2192_vm6, %v6559_v56, %v1935_v33  ;;  %v6565_v21 = vld [vmem:[#allocation23_spill] sm:$0xff] }
 0x1ea   : > { %1972 = vrot.lane.b32.xlu1 %v5904_v16, %s4291_s21  ;;  %3997 = vmatmul.mubr.msk.f32.gmra.mrb[14].mxu0 %vm2301_vm8, %v2257_v31  ;;  %v1520_v31 = vrot.slane %v868_v53, 2  ;;  %v1780_v4 = vsel %vm538_vm0, %v6562_v25, %v1291_v60  ;;  %v6564_v60 = vld [vmem:[#allocation21_spill] sm:$0xff] }
 0x1eb   : > { %1970 = vrot.lane.b32.xlu0 %v5880_v29, %s4291_s21  ;;  %4033 = vmatprep.mubr.msk.f32.mxu0 %vm2301_vm8, %v5887_v28 }
 0x1ec   : > { %v1652_v26 = vpop.permute.xlu1 %1651  ;;  %v1521_v2 = vsel %vm1368_vm3, %v1519_v41, %v1520_v31  ;;  %v6568_v31 = vld [vmem:[#allocation27_spill] sm:$0xff] }
 0x1ed   : > { %v1293_v54 = vpop.permute.xlu0 %1292  ;;  %v5973_v12 = vsel %vm1789_vm4, %v1780_v4, %v1652_v26 }
 0x1ee   : > { %2122 = vrot.lane.b32.xlu1 %v5917_v36, %s4292_s15  ;;  %4034 = vmatmul.mubr.msk.f32.vlgmr.msra.gmra.mrb[0].mxu0 %vm2301_vm8, %v5884_v11  ;;  %v1781_v50 = vsel %vm538_vm0, %v6563_v10, %v1293_v54 }
 0x1ef   : > { %2120 = vrot.lane.b32.xlu0 %v5904_v16, %s4292_s15 }
 0x1f0   : > { %v2085_v23 = vpop.permute.xlu1 %2084 }
 0x1f1   : > { %v1937_v37 = vpop.permute.xlu0 %1936  ;;  %v5934_v58 = vsel %vm2241_vm7, %v2211_v39, %v2085_v23 }
 0x1f2   : > { %1976 = vrot.lane.b32.xlu1 %v1838_v47, %s4291_s21  ;;  %3932 = vmatprep.mubr.msk.f32.mxu1 %vm2301_vm8, %v5934_v58  ;;  %v2212_v27 = vsel %vm2192_vm6, %v6561_v3, %v1937_v37 }
 0x1f3   : > { %1974 = vrot.lane.b32.xlu0 %v5917_v36, %s4291_s21  ;;  %4036 = vmatprep.mubr.msk.f32.mxu0 %vm2301_vm8, %v5934_v58 }
 0x1f4   : > { %v1654_v40 = vpop.permute.xlu1 %1653 }
 0x1f5   : > { %v1295_v15 = vpop.permute.xlu0 %1294  ;;  %v5970_v33 = vsel %vm1789_vm4, %v1781_v50, %v1654_v40 }
 0x1f6   : > { %2126 = vrot.lane.b32.xlu1 %v1839_v43, %s4292_s15  ;;  %v1782_v34 = vsel %vm538_vm0, %v6564_v60, %v1295_v15  ;;  %v6569_v15 = vld [vmem:[#allocation3_spill] sm:$0xff] }
 0x1f7   : > { %2124 = vrot.lane.b32.xlu0 %v1838_v47, %s4292_s15  ;;  %v6567_v47 = vld [vmem:[#allocation29_spill] sm:$0xff] }
 0x1f8   : > { %v1656_v18 = vpop.permute.xlu1 %1655 }
 0x1f9   : > { %v2087_v7 = vpop.permute.xlu0 %2086  ;;  %v5984_v57 = vsel %vm1789_vm4, %v1782_v34, %v1656_v18 }
 0x1fa   : > { %v5957_v6 = vsel %vm2241_vm7, %v2212_v27, %v2087_v7  ;;  %1649 = vrot.lane.b32.xlu1 %v1521_v2, %s4290_s25 }
 0x1fb   : > { %1288 = vrot.lane.b32.xlu0 %v1160_v22, %s4289_s30  ;;  %3933 = vmatmul.mubr.msk.f32.gmra.mrb[10].mxu1 %vm2301_vm8, %v5957_v6 }
 0x1fc   : > { %4037 = vmatmul.mubr.msk.f32.gmra.mrb[2].mxu0 %vm2301_vm8, %v5957_v6  ;;  %v1297_v51 = vpop.permute.xlu1 %1296 }
 0x1fd   : > { %v1939_v46 = vpop.permute.xlu0 %1938  ;;  %v1783_v56 = vsel %vm538_vm0, %v6566_v20, %v1297_v51 }
 0x1fe   : > { %1980 = vrot.lane.b32.xlu1 %v5970_v33, %s4291_s21  ;;  %v2213_v24 = vsel %vm2192_vm6, %v6565_v21, %v1939_v46 }
 0x1ff   : > { %1978 = vrot.lane.b32.xlu0 %v5973_v12, %s4291_s21 }
 0x200   : > { %v2089_v54 = vpop.permute.xlu1 %2088 }
 0x201   : > { %v1941_v61 = vpop.permute.xlu0 %1940  ;;  %v5987_v26 = vsel %vm2241_vm7, %v2213_v24, %v2089_v54 }
 0x202   : > { %2130 = vrot.lane.b32.xlu1 %v5984_v57, %s4292_s15  ;;  %3935 = vmatprep.mubr.msk.f32.mxu1 %vm2301_vm8, %v5987_v26  ;;  %v2214_v19 = vsel %vm2192_vm6, %v6568_v31, %v1941_v61 }
 0x203   : > { %2128 = vrot.lane.b32.xlu0 %v5970_v33, %s4292_s15  ;;  %4039 = vmatprep.mubr.msk.f32.mxu0 %vm2301_vm8, %v5987_v26 }
 0x204   : > { %v1658_v39 = vpop.permute.xlu1 %1657 }
 0x205   : > { %v1299_v23 = vpop.permute.xlu0 %1298  ;;  %v6000_v53 = vsel %vm1789_vm4, %v1783_v56, %v1658_v39 }
 0x206   : > { %v1784_v37 = vsel %vm538_vm0, %v6567_v47, %v1299_v23  ;;  %1984 = vrot.lane.b32.xlu1 %v6000_v53, %s4291_s21 }
 0x207   : > { %1982 = vrot.lane.b32.xlu0 %v5984_v57, %s4291_s21 }
 0x208   : > { %v1660_v41 = vpop.permute.xlu1 %1659 }
 0x209   : > { %v2091_v13 = vpop.permute.xlu0 %2090  ;;  %v6011_v40 = vsel %vm1789_vm4, %v1784_v37, %v1660_v41 }
 0x20a   : > { %v6014_v44 = vsel %vm2241_vm7, %v2214_v19, %v2091_v13  ;;  %2134 = vrot.lane.b32.xlu1 %v6011_v40, %s4292_s15 }
 0x20b   : > { %3936 = vmatmul.mubr.msk.f32.gmra.mrb[12].mxu1 %vm2301_vm8, %v6014_v44  ;;  %4040 = vmatmul.mubr.msk.f32.gmra.mrb[4].mxu0 %vm2301_vm8, %v6014_v44 }
 0x20c   : > { %2132 = vrot.lane.b32.xlu0 %v6000_v53, %s4292_s15  ;;  %v1301_v48 = vpop.permute.xlu1 %1300 }
 0x20d   : > { %v1943_v43 = vpop.permute.xlu0 %1942  ;;  %v1785_v10 = vsel %vm538_vm0, %v5559_v62, %v1301_v48 }
 0x20e   : > { %v2215_v2 = vsel %vm2192_vm6, %v6569_v15, %v1943_v43 }
 0x210   : > { %1986 = vrot.lane.b32.xlu0 %v6011_v40, %s4291_s21  ;;  %v2093_v18 = vpop.permute.xlu1 %2092 }
 0x211   : > { %v1945_v22 = vpop.permute.xlu0 %1944  ;;  %v6029_v3 = vsel %vm2241_vm7, %v2215_v2, %v2093_v18 }
 0x212   : > { %3938 = vmatprep.mubr.msk.f32.mxu1 %vm2301_vm8, %v6029_v3  ;;  %4042 = vmatprep.mubr.msk.f32.mxu0 %vm2301_vm8, %v6029_v3  ;;  %v2216_v25 = vsel %vm2192_vm6, %v5569_v17, %v1945_v22 }
 0x214   : > { %v1303_v27 = vpop.permute.xlu1 %1302 }
 0x215   : > { %v1249_v7 = vpop.permute.xlu0 %1248  ;;  %v1786_v62 = vsel %vm538_vm0, %v5575_v52, %v1303_v27 }
 0x216   : > { %v1759_v54 = vsel %vm538_vm0, %v5579_v8, %v1249_v7 }
 0x218   : > { %v2095_v4 = vpop.permute.xlu1 %2094 }
 0x219   : > { %v1662_v50 = vpop.permute.xlu0 %1661  ;;  %v6040_v51 = vsel %vm2241_vm7, %v2216_v25, %v2095_v4 }
 0x21a   : > { %v6043_v46 = vsel %vm1789_vm4, %v1785_v10, %v1662_v50  ;;  %3939 = vmatmul.mubr.msk.f32.gmra.mrb[14].mxu1 %vm2301_vm8, %v6040_v51  ;;  %4043 = vmatmul.mubr.msk.f32.gmra.mrb[6].mxu0 %vm2301_vm8, %v6040_v51 }
 0x21b   : > { %2136 = vrot.lane.b32.xlu0 %v6043_v46, %s4292_s15  ;;  %1988 = vrot.lane.b32.xlu1 %v6043_v46, %s4291_s21 }
 0x21c   : > { %v1664_v17 = vpop.permute.xlu1 %1663 }
 0x21d   : > { %v1610_v60 = vpop.permute.xlu0 %1609  ;;  %v6056_v34 = vsel %vm1789_vm4, %v1786_v62, %v1664_v17 }
 0x21e   : > { %v1820_v61 = vsel %vm1789_vm4, %v1759_v54, %v1610_v60 }
 0x21f   : > { %1990 = vrot.lane.b32.xlu0 %v6056_v34, %s4291_s21  ;;  %2138 = vrot.lane.b32.xlu1 %v6056_v34, %s4292_s15 }
 0x220   : > { %v1305_v21 = vpop.permute.xlu1 %1304 }
 0x221   : > { %v1947_v24 = vpop.permute.xlu0 %1946  ;;  %v1787_v23 = vsel %vm538_vm0, %v5628_v38, %v1305_v21 }
 0x222   : > { %v2217_v52 = vsel %vm2192_vm6, %v1820_v61, %v1947_v24 }
 0x224   : > { %v2097_v20 = vpop.permute.xlu1 %2096 }
 0x225   : > { %v1949_v56 = vpop.permute.xlu0 %1948  ;;  %v6067_v39 = vsel %vm2241_vm7, %v2217_v52, %v2097_v20 }
 0x226   : > { %3941 = vmatprep.mubr.msk.f32.mxu1 %vm2301_vm8, %v6067_v39  ;;  %4045 = vmatprep.mubr.msk.f32.mxu0 %vm2301_vm8, %v6067_v39  ;;  %v2218_v19 = vsel %vm2192_vm6, %v5666_v9, %v1949_v56 }
 0x228   : > { %v1666_v47 = vpop.permute.xlu1 %1665 }
 0x229   : > { %v1307_v8 = vpop.permute.xlu0 %1306  ;;  %v1848_v37 = vsel %vm1789_vm4, %v1787_v23, %v1666_v47 }
 0x22a   : > { %v1788_v41 = vsel %vm538_vm0, %v5660_v0, %v1307_v8  ;;  %2140 = vrot.lane.b32.xlu0 %v1848_v37, %s4292_s15  ;;  %1992 = vrot.lane.b32.xlu1 %v1848_v37, %s4291_s21 }
 0x22c   : > { %v1668_v31 = vpop.permute.xlu1 %1667 }
 0x22d   : > { %v2099_v13 = vpop.permute.xlu0 %2098  ;;  %v1849_v48 = vsel %vm1789_vm4, %v1788_v41, %v1668_v31 }
 0x22e   : > { %v6084_v38 = vsel %vm2241_vm7, %v2218_v19, %v2099_v13  ;;  %2142 = vrot.lane.b32.xlu1 %v1849_v48, %s4292_s15 }
 0x22f   : > { %3942 = vmatmul.mubr.msk.f32.gmra.mrb[16].mxu1 %vm2301_vm8, %v6084_v38  ;;  %4046 = vmatmul.mubr.msk.f32.gmra.mrb[8].mxu0 %vm2301_vm8, %v6084_v38 }
 0x230   : > { %v1953_v0 = vpop.permute.xlu1 %1952 }
 0x231   : > { %v1951_v43 = vpop.permute.xlu0 %1950  ;;  %v2220_v15 = vsel %vm2192_vm6, %v5717_v5, %v1953_v0 }
 0x232   : > { %v2219_v2 = vsel %vm2192_vm6, %v5679_v30, %v1951_v43 }
 0x234   : > { %v2103_v9 = vpop.permute.xlu1 %2102 }
 0x235   : > { %v2101_v18 = vpop.permute.xlu0 %2100  ;;  %v6096_v22 = vsel %vm2241_vm7, %v2220_v15, %v2103_v9 }
 0x236   : > { %v6099_v27 = vsel %vm2241_vm7, %v2219_v2, %v2101_v18 }
 0x237   : > { %3944 = vmatprep.mubr.msk.f32.mxu1 %vm2301_vm8, %v6099_v27  ;;  %4048 = vmatprep.mubr.msk.f32.mxu0 %vm2301_vm8, %v6099_v27 }
 0x238   : > { %3945 = vmatmul.mubr.msk.f32.gmra.mrb[18].mxu1 %vm2301_vm8, %v6096_v22  ;;  %4049 = vmatmul.mubr.msk.f32.gmra.mrb[10].mxu0 %vm2301_vm8, %v6096_v22  ;;  %v1957_v30 = vpop.permute.xlu1 %1956 }
 0x239   : > { %v1955_v5 = vpop.permute.xlu0 %1954  ;;  %v2222_v7 = vsel %vm2192_vm6, %v5740_v14, %v1957_v30 }
 0x23a   : > { %v2221_v4 = vsel %vm2192_vm6, %v5730_v1, %v1955_v5 }
 0x23c   : > { %v2107_v25 = vpop.permute.xlu1 %2106 }
 0x23d   : > { %v2105_v10 = vpop.permute.xlu0 %2104  ;;  %v6114_v50 = vsel %vm2241_vm7, %v2222_v7, %v2107_v25 }
 0x23e   : > { %v6117_v62 = vsel %vm2241_vm7, %v2221_v4, %v2105_v10 }
 0x23f   : > { %3947 = vmatprep.mubr.msk.f32.mxu1 %vm2301_vm8, %v6117_v62  ;;  %4051 = vmatprep.mubr.msk.f32.mxu0 %vm2301_vm8, %v6117_v62 }
 0x240   : > { %3948 = vmatmul.mubr.msk.f32.gmra.mrb[20].mxu1 %vm2301_vm8, %v6114_v50  ;;  %4052 = vmatmul.mubr.msk.f32.gmra.mrb[12].mxu0 %vm2301_vm8, %v6114_v50  ;;  %v1961_v1 = vpop.permute.xlu1 %1960 }
 0x241   : > { %v1959_v14 = vpop.permute.xlu0 %1958  ;;  %v2224_v61 = vsel %vm2192_vm6, %v5775_v49, %v1961_v1 }
 0x242   : > { %v2223_v60 = vsel %vm2192_vm6, %v5752_v42, %v1959_v14 }
 0x244   : > { %v1269_v17 = vpop.permute.xlu1 %1268 }
 0x245   : > { %v2109_v21 = vpop.permute.xlu0 %2108  ;;  %v1769_v42 = vsel %vm538_vm0, %v5771_v32, %v1269_v17 }
 0x246   : > { %v6130_v24 = vsel %vm2241_vm7, %v2223_v60, %v2109_v21 }
 0x247   : > { %3950 = vmatprep.mubr.msk.f32.mxu1 %vm2301_vm8, %v6130_v24  ;;  %4054 = vmatprep.mubr.msk.f32.mxu0 %vm2301_vm8, %v6130_v24 }
 0x248   : > { %v1630_v54 = vpop.permute.xlu1 %1629 }
 0x249   : > { %v2111_v52 = vpop.permute.xlu0 %2110  ;;  %v1830_v47 = vsel %vm1789_vm4, %v1769_v42, %v1630_v54 }
 0x24a   : > { %v6139_v20 = vsel %vm2241_vm7, %v2224_v61, %v2111_v52 }
 0x24b   : > { %3951 = vmatmul.mubr.msk.f32.gmra.mrb[22].mxu1 %vm2301_vm8, %v6139_v20  ;;  %4055 = vmatmul.mubr.msk.f32.gmra.mrb[14].mxu0 %vm2301_vm8, %v6139_v20 }
 0x24c   : > { %v1965_v56 = vpop.permute.xlu1 %1964 }
 0x24d   : > { %v1963_v23 = vpop.permute.xlu0 %1962  ;;  %v2226_v49 = vsel %vm2192_vm6, %v5830_v59, %v1965_v56 }
 0x24e   : > { %v2225_v37 = vsel %vm2192_vm6, %v1830_v47, %v1963_v23 }
 0x250   : > { %v2115_v8 = vpop.permute.xlu1 %2114 }
 0x251   : > { %v2113_v41 = vpop.permute.xlu0 %2112  ;;  %v2275_v31 = vsel %vm2241_vm7, %v2226_v49, %v2115_v8 }
 0x252   : > { %v2274_v32 = vsel %vm2241_vm7, %v2225_v37, %v2113_v41 }
 0x253   : > { %3953 = vmatprep.mubr.msk.f32.mxu1 %vm2301_vm8, %v2274_v32  ;;  %4057 = vmatprep.mubr.msk.f32.mxu0 %vm2301_vm8, %v2274_v32 }
 0x254   : > { %3954 = vmatmul.mubr.msk.f32.gmra.mrb[24].mxu1 %vm2301_vm8, %v2275_v31  ;;  %4058 = vmatmul.mubr.msk.f32.gmra.mrb[16].mxu0 %vm2301_vm8, %v2275_v31  ;;  %v1969_v19 = vpop.permute.xlu1 %1968 }
 0x255   : > { %v1967_v13 = vpop.permute.xlu0 %1966  ;;  %v2228_v59 = vsel %vm2192_vm6, %v5843_v45, %v1969_v19 }
 0x256   : > { %v2227_v0 = vsel %vm2192_vm6, %v5825_v55, %v1967_v13 }
 0x258   : > { %v2119_v48 = vpop.permute.xlu1 %2118 }
 0x259   : > { %v2117_v43 = vpop.permute.xlu0 %2116  ;;  %v2277_v15 = vsel %vm2241_vm7, %v2228_v59, %v2119_v48 }
 0x25a   : > { %v2276_v9 = vsel %vm2241_vm7, %v2227_v0, %v2117_v43 }
 0x25b   : > { %3956 = vmatprep.mubr.msk.f32.mxu1 %vm2301_vm8, %v2276_v9  ;;  %4060 = vmatprep.mubr.msk.f32.mxu0 %vm2301_vm8, %v2276_v9 }
 0x25c   : > { %3957 = vmatmul.mubr.msk.f32.gmra.mrb[26].mxu1 %vm2301_vm8, %v2277_v15  ;;  %4061 = vmatmul.mubr.msk.f32.gmra.mrb[18].mxu0 %vm2301_vm8, %v2277_v15  ;;  %v1973_v2 = vpop.permute.xlu1 %1972 }
 0x25d   : > { %v1971_v18 = vpop.permute.xlu0 %1970  ;;  %v2230_v45 = vsel %vm2192_vm6, %v5880_v29, %v1973_v2 }
 0x25e   : > { %v2229_v55 = vsel %vm2192_vm6, %v5861_v35, %v1971_v18 }
 0x260   : > { %v2123_v30 = vpop.permute.xlu1 %2122 }
 0x261   : > { %v2121_v5 = vpop.permute.xlu0 %2120  ;;  %v2279_v7 = vsel %vm2241_vm7, %v2230_v45, %v2123_v30 }
 0x262   : > { %v2278_v25 = vsel %vm2241_vm7, %v2229_v55, %v2121_v5 }
 0x263   : > { %3959 = vmatprep.mubr.msk.f32.mxu1 %vm2301_vm8, %v2278_v25  ;;  %4063 = vmatprep.mubr.msk.f32.mxu0 %vm2301_vm8, %v2278_v25 }
 0x264   : > { %3960 = vmatmul.mubr.msk.f32.gmra.mrb[28].mxu1 %vm2301_vm8, %v2279_v7  ;;  %4064 = vmatmul.mubr.msk.f32.gmra.mrb[20].mxu0 %vm2301_vm8, %v2279_v7  ;;  %v1977_v4 = vpop.permute.xlu1 %1976 }
 0x265   : > { %v1975_v10 = vpop.permute.xlu0 %1974  ;;  %v2232_v29 = vsel %vm2192_vm6, %v5917_v36, %v1977_v4 }
 0x266   : > { %v2231_v35 = vsel %vm2192_vm6, %v5904_v16, %v1975_v10 }
 0x268   : > { %v2127_v1 = vpop.permute.xlu1 %2126 }
 0x269   : > { %v2125_v14 = vpop.permute.xlu0 %2124  ;;  %v2281_v17 = vsel %vm2241_vm7, %v2232_v29, %v2127_v1 }
 0x26a   : > { %v2280_v60 = vsel %vm2241_vm7, %v2231_v35, %v2125_v14 }
 0x26b   : > { %3962 = vmatprep.mubr.msk.f32.mxu1 %vm2301_vm8, %v2280_v60  ;;  %4066 = vmatprep.mubr.msk.f32.mxu0 %vm2301_vm8, %v2280_v60 }
 0x26c   : > { %3963 = vmatmul.mubr.msk.f32.gmra.mrb[30].mxu1 %vm2301_vm8, %v2281_v17  ;;  %4067 = vmatmul.mubr.msk.f32.gmra.mrb[22].mxu0 %vm2301_vm8, %v2281_v17  ;;  %v1650_v21 = vpop.permute.xlu1 %1649 }
 0x26d   : > { %v1289_v54 = vpop.permute.xlu0 %1288  ;;  %3999 = vmatprep.mubr.msk.f32.mxu1 %vm2301_vm8, %v5887_v28 }
 0x26e   : > { %v1779_v16 = vsel %vm538_vm0, %v5929_v63, %v1289_v54 }
 0x26f   : > { %v1840_v52 = vsel %vm1789_vm4, %v1779_v16, %v1650_v21 }
 0x270   : > { %4000 = vmatmul.mubr.msk.f32.vlgmr.msra.gmra.mrb[16].mxu1 %vm2301_vm8, %v5884_v11  ;;  %v1981_v36 = vpop.permute.xlu1 %1980 }
 0x271   : > { %v1979_v61 = vpop.permute.xlu0 %1978  ;;  %4002 = vmatprep.mubr.msk.f32.mxu1 %vm2301_vm8, %v5934_v58  ;;  %v2234_v42 = vsel %vm2192_vm6, %v5973_v12, %v1981_v36 }
 0x272   : > { %v2233_v56 = vsel %vm2192_vm6, %v1840_v52, %v1979_v61 }
 0x274   : > { %4003 = vmatmul.mubr.msk.f32.gmra.mrb[18].mxu1 %vm2301_vm8, %v5957_v6  ;;  %v2131_v28 = vpop.permute.xlu1 %2130 }
 0x275   : > { %v2129_v63 = vpop.permute.xlu0 %2128  ;;  %4005 = vmatprep.mubr.msk.f32.mxu1 %vm2301_vm8, %v5987_v26  ;;  %v2283_v11 = vsel %vm2241_vm7, %v2234_v42, %v2131_v28 }
 0x276   : > { %v2282_v23 = vsel %vm2241_vm7, %v2233_v56, %v2129_v63 }
 0x277   : > { %4069 = vmatprep.mubr.msk.f32.mxu0 %vm2301_vm8, %v2282_v23 }
 0x278   : > { %4006 = vmatmul.mubr.msk.f32.gmra.mrb[20].mxu1 %vm2301_vm8, %v6014_v44  ;;  %4070 = vmatmul.mubr.msk.f32.gmra.mrb[24].mxu0 %vm2301_vm8, %v2283_v11  ;;  %v1985_v58 = vpop.permute.xlu1 %1984 }
 0x279   : > { %v1983_v6 = vpop.permute.xlu0 %1982  ;;  %4008 = vmatprep.mubr.msk.f32.mxu1 %vm2301_vm8, %v6029_v3  ;;  %v2236_v26 = vsel %vm2192_vm6, %v5984_v57, %v1985_v58 }
 0x27a   : > { %v2235_v44 = vsel %vm2192_vm6, %v5970_v33, %v1983_v6 }
 0x27c   : > { %4009 = vmatmul.mubr.msk.f32.gmra.mrb[22].mxu1 %vm2301_vm8, %v6040_v51  ;;  %v2135_v12 = vpop.permute.xlu1 %2134 }
 0x27d   : > { %4011 = vmatprep.mubr.msk.f32.mxu1 %vm2301_vm8, %v6067_v39  ;;  %v2285_v49 = vsel %vm2241_vm7, %v2236_v26, %v2135_v12 }
 0x27e   : > { %v2133_v47 = vpop.permute.xlu0 %2132  ;;  %v3919_v8 = vpop.f32.mrb[0].mxu1 }
 0x27f   : > { %v2284_v37 = vsel %vm2241_vm7, %v2235_v44, %v2133_v47  ;;  %v2468_v3 = vpop.f32.mrb[1].mxu1 }
 0x280   : > { %4072 = vmatprep.mubr.msk.f32.mxu0 %vm2301_vm8, %v2284_v37  ;;  %4012 = vmatmul.mubr.msk.f32.gmra.mrb[24].mxu1 %vm2301_vm8, %v6084_v38 }
 0x281   : > { %4073 = vmatmul.mubr.msk.f32.gmra.mrb[26].mxu0 %vm2301_vm8, %v2285_v49  ;;  %4014 = vmatprep.mubr.msk.f32.mxu1 %vm2301_vm8, %v6099_v27 }
 0x282   : > { %v1987_v33 = vpop.permute.xlu0 %1986 }
 0x283   : > { %v2237_v57 = vsel %vm2192_vm6, %v6000_v53, %v1987_v33 }
 0x284   : > { %4015 = vmatmul.mubr.msk.f32.gmra.mrb[26].mxu1 %vm2301_vm8, %v6096_v22 }
 0x285   : > { %4017 = vmatprep.mubr.msk.f32.mxu1 %vm2301_vm8, %v6117_v62 }
 0x288   : > { %4018 = vmatmul.mubr.msk.f32.gmra.mrb[28].mxu1 %vm2301_vm8, %v6114_v50 }
 0x289   : > { %4020 = vmatprep.mubr.msk.f32.mxu1 %vm2301_vm8, %v6130_v24 }
 0x28c   : > { %4021 = vmatmul.mubr.msk.f32.gmra.mrb[30].mxu1 %vm2301_vm8, %v6139_v20 }
 0x28d   : > { %v2137_v51 = vpop.permute.xlu0 %2136  ;;  %v1989_v39 = vpop.permute.xlu1 %1988 }
 0x28e   : > { %v2286_v38 = vsel %vm2241_vm7, %v2237_v57, %v2137_v51  ;;  %v3922_v22 = vpop.f32.mrb[2].mxu1  ;;  %v2238_v50 = vsel %vm2192_vm6, %v6011_v40, %v1989_v39 }
 0x28f   : > { %v2478_v27 = vpop.f32.mrb[3].mxu1  ;;  %4075 = vmatprep.mubr.msk.f32.mxu0 %vm2301_vm8, %v2286_v38 }
 0x291   : > { %v2139_v62 = vpop.permute.xlu1 %2138  ;;  %v1991_v20 = vpop.permute.xlu0 %1990 }
 0x292   : > { %v2287_v24 = vsel %vm2241_vm7, %v2238_v50, %v2139_v62  ;;  %v2239_v53 = vsel %vm2192_vm6, %v6043_v46, %v1991_v20 }
 0x293   : > { %4076 = vmatmul.mubr.msk.f32.gmra.mrb[28].mxu0 %vm2301_vm8, %v2287_v24 }
 0x29c   : > { %v2141_v41 = vpop.permute.xlu0 %2140  ;;  %v1993_v31 = vpop.permute.xlu1 %1992 }
 0x29d   : > { %v2288_v32 = vsel %vm2241_vm7, %v2239_v53, %v2141_v41  ;;  %v3925_v19 = vpop.f32.mrb[4].mxu1  ;;  %v2240_v40 = vsel %vm2192_vm6, %v6056_v34, %v1993_v31  ;;  %v6264_v34 = vld [vmem:[%s6479_s6] ss:$0 sm:$0xff] }
 0x29e   : > { %v2488_v13 = vpop.f32.mrb[5].mxu1  ;;  %4078 = vmatprep.mubr.msk.f32.mxu0 %vm2301_vm8, %v2288_v32 }
 0x2a0   : > { %v2143_v59 = vpop.permute.xlu1 %2142 }
 0x2a1   : > { %v2289_v48 = vsel %vm2241_vm7, %v2240_v40, %v2143_v59 }
 0x2a2   : > { %4079 = vmatmul.mubr.msk.f32.gmra.mrb[30].mxu0 %vm2301_vm8, %v2289_v48 }
 0x2b2   : > { %v6253_v0 = vpop.f32.mrb[6].mxu1 }
 0x2b3   : > { %v6255_v46 = vpop.f32.mrb[7].mxu1 }
 0x2bb   : > { %v6257_v43 = vpop.f32.mrb[8].mxu1 }
 0x2bc   : > { %v6259_v15 = vpop.f32.mrb[9].mxu1 }
 0x2c1   : > { %v4035_v9 = vpop.f32.mrb[0].mxu0 }
 0x2c2   : > { %v4111_v2 = vadd.f32 %v4035_v9, %v3919_v8  ;;  %v2978_v18 = vpop.f32.mrb[1].mxu0 }
 0x2c3   : > { %v4112_v45 = vadd.f32 %v2978_v18, %v2468_v3 }
 0x2c4   : > { %v3177_v30 = vadd.f32 %v4111_v2, %v6264_v34 }
 0x2c5   : > { %v3176_v55 = vadd.f32 %v4112_v45, %v6264_v34 }
 0x2c6   : > { %v3209_v5 = vsel %vm1789_vm4, %v3177_v30, 0.0  ;;  %v3280_v7 = vmul.f32 %v3177_v30, %v3177_v30  ;;  %3382 = vst.msk [vmem:[%s4646_s28 + $0x8] sm:$0xff] %vm1789_vm4, %v3177_v30 }
 0x2c7   : > { %v3208_v25 = vsel %vm1789_vm4, %v3176_v55, 0.0  ;;  %v3279_v4 = vmul.f32 %v3176_v55, %v3176_v55  ;;  %3381 = vst.msk [vmem:[%s4646_s28] sm:$0xff] %vm1789_vm4, %v3176_v55 }
 0x2c8   : > { %v3312_v10 = vsel %vm1789_vm4, %v3280_v7, 0.0  ;;  %v3210_v29 = vadd.f32 %v3209_v5, %v3208_v25 }
 0x2c9   : > { %v3311_v1 = vsel %vm1789_vm4, %v3279_v4, 0.0 }
 0x2ca   : > { %v3313_v35 = vadd.f32 %v3312_v10, %v3311_v1 }
 0x2ce   : > { %v6276_v14 = vpop.f32.mrb[10].mxu1 }
 0x2cf   : > { %v4038_v17 = vpop.f32.mrb[2].mxu0  ;;  %v6278_v60 = vpop.f32.mrb[11].mxu1 }
 0x2d0   : > { %v4113_v21 = vadd.f32 %v4038_v17, %v3922_v22  ;;  %v2988_v54 = vpop.f32.mrb[3].mxu0 }
 0x2d1   : > { %v4114_v16 = vadd.f32 %v2988_v54, %v2478_v27 }
 0x2d2   : > { %v3179_v36 = vadd.f32 %v4113_v21, %v6264_v34 }
 0x2d3   : > { %v3178_v61 = vadd.f32 %v4114_v16, %v6264_v34 }
 0x2d4   : > { %3384 = vst.msk [vmem:[%s4646_s28 + $0x18] sm:$0xff] %vm1789_vm4, %v3179_v36  ;;  %v3282_v52 = vmul.f32 %v3179_v36, %v3179_v36  ;;  %v3213_v63 = vsel %vm1789_vm4, %v3179_v36, 0.0 }
 0x2d5   : > { %v3211_v42 = vsel %vm1789_vm4, %v3178_v61, 0.0  ;;  %v3281_v28 = vmul.f32 %v3178_v61, %v3178_v61  ;;  %3383 = vst.msk [vmem:[%s4646_s28 + $0x10] sm:$0xff] %vm1789_vm4, %v3178_v61 }
 0x2d6   : > { %v3212_v56 = vadd.f32 %v3211_v42, %v3210_v29  ;;  %v3316_v6 = vsel %vm1789_vm4, %v3282_v52, 0.0 }
 0x2d7   : > { %v3314_v11 = vsel %vm1789_vm4, %v3281_v28, 0.0 }
 0x2d8   : > { %v3315_v23 = vadd.f32 %v3314_v11, %v3313_v35  ;;  %v3214_v58 = vadd.f32 %v3213_v63, %v3212_v56 }
 0x2da   : > { %v3317_v12 = vadd.f32 %v3316_v6, %v3315_v23 }
 0x2de   : > { %v6290_v26 = vpop.f32.mrb[12].mxu1  ;;  %v4041_v44 = vpop.f32.mrb[4].mxu0 }
 0x2df   : > { %v4115_v47 = vadd.f32 %v4041_v44, %v3925_v19  ;;  %v6292_v49 = vpop.f32.mrb[13].mxu1  ;;  %v2998_v8 = vpop.f32.mrb[5].mxu0 }
 0x2e0   : > { %v4116_v37 = vadd.f32 %v2998_v8, %v2488_v13 }
 0x2e1   : > { %v3181_v3 = vadd.f32 %v4115_v47, %v6264_v34 }
 0x2e2   : > { %v3180_v33 = vadd.f32 %v4116_v37, %v6264_v34 }
 0x2e3   : > { %3386 = vst.msk [vmem:[%s4646_s28 + $0x28] sm:$0xff] %vm1789_vm4, %v3181_v3  ;;  %v3284_v57 = vmul.f32 %v3181_v3, %v3181_v3  ;;  %v3217_v22 = vsel %vm1789_vm4, %v3181_v3, 0.0 }
 0x2e4   : > { %v3215_v51 = vsel %vm1789_vm4, %v3180_v33, 0.0  ;;  %v3283_v39 = vmul.f32 %v3180_v33, %v3180_v33  ;;  %3385 = vst.msk [vmem:[%s4646_s28 + $0x20] sm:$0xff] %vm1789_vm4, %v3180_v33 }
 0x2e5   : > { %v3216_v38 = vadd.f32 %v3215_v51, %v3214_v58  ;;  %v3320_v24 = vsel %vm1789_vm4, %v3284_v57, 0.0 }
 0x2e6   : > { %v3318_v27 = vsel %vm1789_vm4, %v3283_v39, 0.0 }
 0x2e7   : > { %v3319_v50 = vadd.f32 %v3318_v27, %v3317_v12  ;;  %v3218_v62 = vadd.f32 %v3217_v22, %v3216_v38 }
 0x2e9   : > { %v3321_v20 = vadd.f32 %v3320_v24, %v3319_v50 }
 0x2ed   : > { %v6304_v53 = vpop.f32.mrb[14].mxu1  ;;  %v4044_v41 = vpop.f32.mrb[6].mxu0 }
 0x2ee   : > { %v4117_v31 = vadd.f32 %v4044_v41, %v6253_v0  ;;  %v6307_v32 = vpop.f32.mrb[15].mxu1  ;;  %v3008_v19 = vpop.f32.mrb[7].mxu0 }
 0x2ef   : > { %v4118_v13 = vadd.f32 %v3008_v19, %v6255_v46 }
 0x2f0   : > { %v3183_v40 = vadd.f32 %v4117_v31, %v6264_v34 }
 0x2f1   : > { %v3182_v59 = vadd.f32 %v4118_v13, %v6264_v34 }
 0x2f2   : > { %3388 = vst.msk [vmem:[%s4646_s28 + $0x38] sm:$0xff] %vm1789_vm4, %v3183_v40  ;;  %v3286_v48 = vmul.f32 %v3183_v40, %v3183_v40  ;;  %v3221_v0 = vsel %vm1789_vm4, %v3183_v40, 0.0 }
 0x2f3   : > { %v3219_v9 = vsel %vm1789_vm4, %v3182_v59, 0.0  ;;  %v3285_v2 = vmul.f32 %v3182_v59, %v3182_v59  ;;  %3387 = vst.msk [vmem:[%s4646_s28 + $0x30] sm:$0xff] %vm1789_vm4, %v3182_v59 }
 0x2f4   : > { %v3220_v18 = vadd.f32 %v3219_v9, %v3218_v62  ;;  %v3324_v55 = vsel %vm1789_vm4, %v3286_v48, 0.0 }
 0x2f5   : > { %v3322_v45 = vsel %vm1789_vm4, %v3285_v2, 0.0 }
 0x2f6   : > { %v3323_v46 = vadd.f32 %v3322_v45, %v3321_v20  ;;  %v3222_v30 = vadd.f32 %v3221_v0, %v3220_v18 }
 0x2f8   : > { %v3325_v5 = vadd.f32 %v3324_v55, %v3323_v46 }
 0x302   : > { %v4047_v7 = vpop.f32.mrb[8].mxu0 }
 0x303   : > { %v4119_v25 = vadd.f32 %v4047_v7, %v6257_v43  ;;  %v3018_v4 = vpop.f32.mrb[9].mxu0 }
 0x304   : > { %v4120_v10 = vadd.f32 %v3018_v4, %v6259_v15 }
 0x305   : > { %v3185_v29 = vadd.f32 %v4119_v25, %v6264_v34 }
 0x306   : > { %v3184_v1 = vadd.f32 %v4120_v10, %v6264_v34 }
 0x307   : > { %3390 = vst.msk [vmem:[%s4646_s28 + $0x48] sm:$0xff] %vm1789_vm4, %v3185_v29  ;;  %v3288_v35 = vmul.f32 %v3185_v29, %v3185_v29  ;;  %v3225_v16 = vsel %vm1789_vm4, %v3185_v29, 0.0 }
 0x308   : > { %v3223_v17 = vsel %vm1789_vm4, %v3184_v1, 0.0  ;;  %v3287_v21 = vmul.f32 %v3184_v1, %v3184_v1  ;;  %3389 = vst.msk [vmem:[%s4646_s28 + $0x40] sm:$0xff] %vm1789_vm4, %v3184_v1 }
 0x309   : > { %v3224_v54 = vadd.f32 %v3223_v17, %v3222_v30  ;;  %v3328_v52 = vsel %vm1789_vm4, %v3288_v35, 0.0 }
 0x30a   : > { %v3326_v43 = vsel %vm1789_vm4, %v3287_v21, 0.0 }
 0x30b   : > { %v3327_v15 = vadd.f32 %v3326_v43, %v3325_v5  ;;  %v4050_v36 = vpop.f32.mrb[10].mxu0  ;;  %v3226_v61 = vadd.f32 %v3225_v16, %v3224_v54 }
 0x30c   : > { %v4121_v42 = vadd.f32 %v4050_v36, %v6276_v14  ;;  %v3028_v28 = vpop.f32.mrb[11].mxu0 }
 0x30d   : > { %v4122_v56 = vadd.f32 %v3028_v28, %v6278_v60  ;;  %v3329_v63 = vadd.f32 %v3328_v52, %v3327_v15 }
 0x30e   : > { %v3187_v11 = vadd.f32 %v4121_v42, %v6264_v34 }
 0x30f   : > { %v3186_v23 = vadd.f32 %v4122_v56, %v6264_v34 }
 0x310   : > { %3392 = vst.msk [vmem:[%s4646_s28 + $0x58] sm:$0xff] %vm1789_vm4, %v3187_v11  ;;  %v3290_v58 = vmul.f32 %v3187_v11, %v3187_v11  ;;  %v3229_v14 = vsel %vm1789_vm4, %v3187_v11, 0.0 }
 0x311   : > { %v3227_v6 = vsel %vm1789_vm4, %v3186_v23, 0.0  ;;  %v3289_v12 = vmul.f32 %v3186_v23, %v3186_v23  ;;  %3391 = vst.msk [vmem:[%s4646_s28 + $0x50] sm:$0xff] %vm1789_vm4, %v3186_v23 }
 0x312   : > { %v3228_v44 = vadd.f32 %v3227_v6, %v3226_v61  ;;  %v3332_v57 = vsel %vm1789_vm4, %v3290_v58, 0.0 }
 0x313   : > { %v3330_v60 = vsel %vm1789_vm4, %v3289_v12, 0.0  ;;  %v4053_v47 = vpop.f32.mrb[12].mxu0 }
 0x314   : > { %v3331_v8 = vadd.f32 %v3330_v60, %v3329_v63  ;;  %v4123_v37 = vadd.f32 %v4053_v47, %v6290_v26  ;;  %v3038_v3 = vpop.f32.mrb[13].mxu0  ;;  %v3230_v33 = vadd.f32 %v3229_v14, %v3228_v44 }
 0x315   : > { %v4124_v51 = vadd.f32 %v3038_v3, %v6292_v49 }
 0x316   : > { %v3189_v39 = vadd.f32 %v4123_v37, %v6264_v34  ;;  %v3333_v38 = vadd.f32 %v3332_v57, %v3331_v8 }
 0x317   : > { %v3188_v22 = vadd.f32 %v4124_v51, %v6264_v34 }
 0x318   : > { %3394 = vst.msk [vmem:[%s4646_s28 + $0x68] sm:$0xff] %vm1789_vm4, %v3189_v39  ;;  %v3292_v27 = vmul.f32 %v3189_v39, %v3189_v39  ;;  %v3233_v24 = vsel %vm1789_vm4, %v3189_v39, 0.0 }
 0x319   : > { %v3231_v50 = vsel %vm1789_vm4, %v3188_v22, 0.0  ;;  %v3291_v62 = vmul.f32 %v3188_v22, %v3188_v22  ;;  %3393 = vst.msk [vmem:[%s4646_s28 + $0x60] sm:$0xff] %vm1789_vm4, %v3188_v22 }
 0x31a   : > { %v3232_v26 = vadd.f32 %v3231_v50, %v3230_v33  ;;  %v3336_v31 = vsel %vm1789_vm4, %v3292_v27, 0.0 }
 0x31b   : > { %v3334_v49 = vsel %vm1789_vm4, %v3291_v62, 0.0 }
 0x31c   : > { %v3335_v20 = vadd.f32 %v3334_v49, %v3333_v38  ;;  %v3234_v41 = vadd.f32 %v3233_v24, %v3232_v26 }
 0x31e   : > { %v4056_v19 = vpop.f32.mrb[14].mxu0  ;;  %v3337_v13 = vadd.f32 %v3336_v31, %v3335_v20 }
 0x31f   : > { %v4125_v40 = vadd.f32 %v4056_v19, %v6304_v53  ;;  %v3048_v59 = vpop.f32.mrb[15].mxu0 }
 0x320   : > { %v4126_v48 = vadd.f32 %v3048_v59, %v6307_v32 }
 0x321   : > { %v3191_v9 = vadd.f32 %v4125_v40, %v6264_v34 }
 0x322   : > { %v3190_v2 = vadd.f32 %v4126_v48, %v6264_v34 }
 0x323   : > { %3396 = vst.msk [vmem:[%s4646_s28 + $0x78] sm:$0xff] %vm1789_vm4, %v3191_v9  ;;  %v3294_v18 = vmul.f32 %v3191_v9, %v3191_v9  ;;  %v3237_v30 = vsel %vm1789_vm4, %v3191_v9, 0.0 }
 0x324   : > { %v3235_v0 = vsel %vm1789_vm4, %v3190_v2, 0.0  ;;  %v3293_v45 = vmul.f32 %v3190_v2, %v3190_v2  ;;  %3395 = vst.msk [vmem:[%s4646_s28 + $0x70] sm:$0xff] %vm1789_vm4, %v3190_v2 }
 0x325   : > { %v3236_v46 = vadd.f32 %v3235_v0, %v3234_v41  ;;  %v3340_v7 = vsel %vm1789_vm4, %v3294_v18, 0.0 }
 0x326   : > { %v3338_v53 = vsel %vm1789_vm4, %v3293_v45, 0.0 }
 0x327   : > { %v3339_v55 = vadd.f32 %v3338_v53, %v3337_v13  ;;  %v4059_v5 = vpop.f32.mrb[16].mxu0  ;;  %v3238_v32 = vadd.f32 %v3237_v30, %v3236_v46 }
 0x328   : > { %v3058_v25 = vpop.f32.mrb[17].mxu0 }
 0x329   : > { %v3341_v4 = vadd.f32 %v3340_v7, %v3339_v55 }
 0x32f   : > { %v4062_v10 = vpop.f32.mrb[18].mxu0 }
 0x330   : > { %v3068_v29 = vpop.f32.mrb[19].mxu0 }
 0x337   : > { %v4065_v1 = vpop.f32.mrb[20].mxu0 }
 0x338   : > { %v3078_v35 = vpop.f32.mrb[21].mxu0 }
 0x33f   : > { %v4068_v17 = vpop.f32.mrb[22].mxu0 }
 0x340   : > { %v3088_v21 = vpop.f32.mrb[23].mxu0 }
 0x343   : > { %v4001_v54 = vpop.f32.mrb[16].mxu1 }
 0x344   : > { %v4127_v16 = vadd.f32 %v4059_v5, %v4001_v54  ;;  %v2800_v43 = vpop.f32.mrb[17].mxu1 }
 0x345   : > { %v4128_v15 = vadd.f32 %v3058_v25, %v2800_v43 }
 0x346   : > { %v3193_v36 = vadd.f32 %v4127_v16, %v6264_v34 }
 0x347   : > { %v3192_v61 = vadd.f32 %v4128_v15, %v6264_v34  ;;  %v4004_v52 = vpop.f32.mrb[18].mxu1 }
 0x348   : > { %v3296_v42 = vmul.f32 %v3193_v36, %v3193_v36  ;;  %3398 = vst.msk [vmem:[%s4646_s28 + $0x88] sm:$0xff] %vm1789_vm4, %v3193_v36  ;;  %v4129_v28 = vadd.f32 %v4062_v10, %v4004_v52  ;;  %v2810_v56 = vpop.f32.mrb[19].mxu1  ;;  %v3241_v12 = vsel %vm1789_vm4, %v3193_v36, 0.0 }
 0x349   : > { %v3239_v63 = vsel %vm1789_vm4, %v3192_v61, 0.0  ;;  %v3295_v11 = vmul.f32 %v3192_v61, %v3192_v61  ;;  %3397 = vst.msk [vmem:[%s4646_s28 + $0x80] sm:$0xff] %vm1789_vm4, %v3192_v61  ;;  %v4130_v23 = vadd.f32 %v3068_v29, %v2810_v56 }
 0x34a   : > { %v3240_v58 = vadd.f32 %v3239_v63, %v3238_v32  ;;  %v3195_v6 = vadd.f32 %v4129_v28, %v6264_v34  ;;  %v3344_v8 = vsel %vm1789_vm4, %v3296_v42, 0.0 }
 0x34b   : > { %v3342_v44 = vsel %vm1789_vm4, %v3295_v11, 0.0  ;;  %v3194_v14 = vadd.f32 %v4130_v23, %v6264_v34  ;;  %v4007_v60 = vpop.f32.mrb[20].mxu1  ;;  %v4071_v47 = vpop.f32.mrb[24].mxu0 }
 0x34c   : > { %v3343_v37 = vadd.f32 %v3342_v44, %v3341_v4  ;;  %v3298_v3 = vmul.f32 %v3195_v6, %v3195_v6  ;;  %3400 = vst.msk [vmem:[%s4646_s28 + $0x98] sm:$0xff] %vm1789_vm4, %v3195_v6  ;;  %v3242_v33 = vadd.f32 %v3241_v12, %v3240_v58  ;;  %v2820_v57 = vpop.f32.mrb[21].mxu1  ;;  %v3098_v51 = vpop.f32.mrb[25].mxu0  ;;  %v4131_v22 = vadd.f32 %v4065_v1, %v4007_v60 }
 0x34d   : > { %v3243_v39 = vsel %vm1789_vm4, %v3194_v14, 0.0  ;;  %v3297_v38 = vmul.f32 %v3194_v14, %v3194_v14  ;;  %3399 = vst.msk [vmem:[%s4646_s28 + $0x90] sm:$0xff] %vm1789_vm4, %v3194_v14  ;;  %v4132_v27 = vadd.f32 %v3078_v35, %v2820_v57  ;;  %v3245_v26 = vsel %vm1789_vm4, %v3195_v6, 0.0 }
 0x34e   : > { %v3244_v50 = vadd.f32 %v3243_v39, %v3242_v33  ;;  %v3345_v62 = vadd.f32 %v3344_v8, %v3343_v37  ;;  %v3197_v49 = vadd.f32 %v4131_v22, %v6264_v34  ;;  %v3348_v59 = vsel %vm1789_vm4, %v3298_v3, 0.0 }
 0x34f   : > { %v3346_v24 = vsel %vm1789_vm4, %v3297_v38, 0.0  ;;  %v3196_v20 = vadd.f32 %v4132_v27, %v6264_v34  ;;  %v4010_v41 = vpop.f32.mrb[22].mxu1 }
 0x350   : > { %v3347_v31 = vadd.f32 %v3346_v24, %v3345_v62  ;;  %v3246_v19 = vadd.f32 %v3245_v26, %v3244_v50  ;;  %v4133_v13 = vadd.f32 %v4068_v17, %v4010_v41  ;;  %v2830_v40 = vpop.f32.mrb[23].mxu1  ;;  %v3300_v48 = vmul.f32 %v3197_v49, %v3197_v49  ;;  %3402 = vst.msk [vmem:[%s4646_s28 + $0xa8] sm:$0xff] %vm1789_vm4, %v3197_v49 }
 0x351   : > { %v3247_v9 = vsel %vm1789_vm4, %v3196_v20, 0.0  ;;  %v3299_v2 = vmul.f32 %v3196_v20, %v3196_v20  ;;  %3401 = vst.msk [vmem:[%s4646_s28 + $0xa0] sm:$0xff] %vm1789_vm4, %v3196_v20  ;;  %v4134_v46 = vadd.f32 %v3088_v21, %v2830_v40  ;;  %v3249_v55 = vsel %vm1789_vm4, %v3197_v49, 0.0 }
 0x352   : > { %v3248_v18 = vadd.f32 %v3247_v9, %v3246_v19  ;;  %v3349_v0 = vadd.f32 %v3348_v59, %v3347_v31  ;;  %v3199_v45 = vadd.f32 %v4133_v13, %v6264_v34  ;;  %v3352_v5 = vsel %vm1789_vm4, %v3300_v48, 0.0 }
 0x353   : > { %v3350_v30 = vsel %vm1789_vm4, %v3299_v2, 0.0  ;;  %v4013_v53 = vpop.f32.mrb[24].mxu1  ;;  %v3198_v7 = vadd.f32 %v4134_v46, %v6264_v34 }
 0x354   : > { %v3351_v32 = vadd.f32 %v3350_v30, %v3349_v0  ;;  %3404 = vst.msk [vmem:[%s4646_s28 + $0xb8] sm:$0xff] %vm1789_vm4, %v3199_v45  ;;  %v4074_v25 = vpop.f32.mrb[26].mxu0  ;;  %v2840_v4 = vpop.f32.mrb[25].mxu1  ;;  %v3302_v10 = vmul.f32 %v3199_v45, %v3199_v45  ;;  %v3250_v29 = vadd.f32 %v3249_v55, %v3248_v18  ;;  %v4135_v1 = vadd.f32 %v4071_v47, %v4013_v53 }
 0x355   : > { %v4136_v35 = vadd.f32 %v3098_v51, %v2840_v4  ;;  %v3108_v17 = vpop.f32.mrb[27].mxu0  ;;  %v3251_v21 = vsel %vm1789_vm4, %v3198_v7, 0.0  ;;  %v3301_v54 = vmul.f32 %v3198_v7, %v3198_v7  ;;  %3403 = vst.msk [vmem:[%s4646_s28 + $0xb0] sm:$0xff] %vm1789_vm4, %v3198_v7  ;;  %v3253_v52 = vsel %vm1789_vm4, %v3199_v45, 0.0 }
 0x356   : > { %v3353_v16 = vadd.f32 %v3352_v5, %v3351_v32  ;;  %v3252_v43 = vadd.f32 %v3251_v21, %v3250_v29  ;;  %v3201_v15 = vadd.f32 %v4135_v1, %v6264_v34  ;;  %v3356_v63 = vsel %vm1789_vm4, %v3302_v10, 0.0 }
 0x357   : > { %v3200_v36 = vadd.f32 %v4136_v35, %v6264_v34  ;;  %v4016_v61 = vpop.f32.mrb[26].mxu1  ;;  %v3354_v42 = vsel %vm1789_vm4, %v3301_v54, 0.0 }
 0x358   : > { %v4137_v28 = vadd.f32 %v4074_v25, %v4016_v61  ;;  %v2850_v56 = vpop.f32.mrb[27].mxu1  ;;  %v3355_v11 = vadd.f32 %v3354_v42, %v3353_v16  ;;  %v3304_v23 = vmul.f32 %v3201_v15, %v3201_v15  ;;  %3406 = vst.msk [vmem:[%s4646_s28 + $0xc8] sm:$0xff] %vm1789_vm4, %v3201_v15  ;;  %v3254_v58 = vadd.f32 %v3253_v52, %v3252_v43 }
 0x359   : > { %3405 = vst.msk [vmem:[%s4646_s28 + $0xc0] sm:$0xff] %vm1789_vm4, %v3200_v36  ;;  %v3255_v6 = vsel %vm1789_vm4, %v3200_v36, 0.0  ;;  %v3303_v12 = vmul.f32 %v3200_v36, %v3200_v36  ;;  %v4138_v14 = vadd.f32 %v3108_v17, %v2850_v56  ;;  %v3257_v37 = vsel %vm1789_vm4, %v3201_v15, 0.0 }
 0x35a   : > { %v3203_v44 = vadd.f32 %v4137_v28, %v6264_v34  ;;  %v3256_v60 = vadd.f32 %v3255_v6, %v3254_v58  ;;  %v3357_v47 = vadd.f32 %v3356_v63, %v3355_v11  ;;  %v3360_v38 = vsel %vm1789_vm4, %v3304_v23, 0.0 }
 0x35b   : > { %v4019_v8 = vpop.f32.mrb[28].mxu1  ;;  %v3358_v3 = vsel %vm1789_vm4, %v3303_v12, 0.0  ;;  %v3202_v33 = vadd.f32 %v4138_v14, %v6264_v34 }
 0x35c   : > { %3408 = vst.msk [vmem:[%s4646_s28 + $0xd8] sm:$0xff] %vm1789_vm4, %v3203_v44  ;;  %v2860_v57 = vpop.f32.mrb[29].mxu1  ;;  %v3359_v51 = vadd.f32 %v3358_v3, %v3357_v47  ;;  %v3258_v39 = vadd.f32 %v3257_v37, %v3256_v60  ;;  %v3306_v22 = vmul.f32 %v3203_v44, %v3203_v44  ;;  %v3261_v49 = vsel %vm1789_vm4, %v3203_v44, 0.0 }
 0x35d   : > { %v3259_v27 = vsel %vm1789_vm4, %v3202_v33, 0.0  ;;  %v3305_v50 = vmul.f32 %v3202_v33, %v3202_v33  ;;  %3407 = vst.msk [vmem:[%s4646_s28 + $0xd0] sm:$0xff] %vm1789_vm4, %v3202_v33 }
 0x35e   : > { %v3260_v62 = vadd.f32 %v3259_v27, %v3258_v39  ;;  %v3361_v26 = vadd.f32 %v3360_v38, %v3359_v51  ;;  %v3364_v13 = vsel %vm1789_vm4, %v3306_v22, 0.0 }
 0x35f   : > { %v4022_v24 = vpop.f32.mrb[30].mxu1  ;;  %v3362_v20 = vsel %vm1789_vm4, %v3305_v50, 0.0 }
 0x360   : > { %v2870_v41 = vpop.f32.mrb[31].mxu1  ;;  %v3363_v31 = vadd.f32 %v3362_v20, %v3361_v26  ;;  %v3262_v19 = vadd.f32 %v3261_v49, %v3260_v62 }
 0x362   : > { %v3365_v40 = vadd.f32 %v3364_v13, %v3363_v31 }
 0x366   : > { %v4077_v59 = vpop.f32.mrb[28].mxu0 }
 0x367   : > { %v4139_v48 = vadd.f32 %v4077_v59, %v4019_v8  ;;  %v3118_v9 = vpop.f32.mrb[29].mxu0 }
 0x368   : > { %v4140_v2 = vadd.f32 %v3118_v9, %v2860_v57 }
 0x369   : > { %v3205_v18 = vadd.f32 %v4139_v48, %v6264_v34 }
 0x36a   : > { %v3204_v0 = vadd.f32 %v4140_v2, %v6264_v34 }
 0x36b   : > { %3410 = vst.msk [vmem:[%s4646_s28 + $0xe8] sm:$0xff] %vm1789_vm4, %v3205_v18  ;;  %v3308_v45 = vmul.f32 %v3205_v18, %v3205_v18  ;;  %v3265_v55 = vsel %vm1789_vm4, %v3205_v18, 0.0 }
 0x36c   : > { %v3263_v46 = vsel %vm1789_vm4, %v3204_v0, 0.0  ;;  %v3307_v30 = vmul.f32 %v3204_v0, %v3204_v0  ;;  %3409 = vst.msk [vmem:[%s4646_s28 + $0xe0] sm:$0xff] %vm1789_vm4, %v3204_v0 }
 0x36d   : > { %v3264_v53 = vadd.f32 %v3263_v46, %v3262_v19  ;;  %v3368_v25 = vsel %vm1789_vm4, %v3308_v45, 0.0 }
 0x36e   : > { %v3366_v5 = vsel %vm1789_vm4, %v3307_v30, 0.0 }
 0x36f   : > { %v3367_v32 = vadd.f32 %v3366_v5, %v3365_v40  ;;  %v3266_v7 = vadd.f32 %v3265_v55, %v3264_v53 }
 0x371   : > { %v3369_v4 = vadd.f32 %v3368_v25, %v3367_v32 }
 0x375   : > { %v4080_v10 = vpop.f32.mrb[30].mxu0 }
 0x376   : > { %v4141_v29 = vadd.f32 %v4080_v10, %v4022_v24  ;;  %v3128_v1 = vpop.f32.mrb[31].mxu0 }
 0x377   : > { %v4142_v35 = vadd.f32 %v3128_v1, %v2870_v41 }
 0x378   : > { %v3207_v17 = vadd.f32 %v4141_v29, %v6264_v34 }
 0x379   : > { %v3206_v21 = vadd.f32 %v4142_v35, %v6264_v34 }
 0x37a   : > { %3412 = vst.msk [vmem:[%s4646_s28 + $0xf8] sm:$0xff] %vm1789_vm4, %v3207_v17  ;;  %v3310_v54 = vmul.f32 %v3207_v17, %v3207_v17  ;;  %v3269_v36 = vsel %vm1789_vm4, %v3207_v17, 0.0 }
 0x37b   : > { %v3267_v16 = vsel %vm1789_vm4, %v3206_v21, 0.0  ;;  %v3309_v43 = vmul.f32 %v3206_v21, %v3206_v21  ;;  %3411 = vst.msk [vmem:[%s4646_s28 + $0xf0] sm:$0xff] %vm1789_vm4, %v3206_v21 }
 0x37c   : > { %v3268_v15 = vadd.f32 %v3267_v16, %v3266_v7  ;;  %v3372_v28 = vsel %vm1789_vm4, %v3310_v54, 0.0 }
 0x37d   : > { %v3370_v61 = vsel %vm1789_vm4, %v3309_v43, 0.0 }
 0x37e   : > { %v3270_v52 = vadd.f32 %v3269_v36, %v3268_v15  ;;  %v3371_v42 = vadd.f32 %v3370_v61, %v3369_v4 }
 0x380   : > { %v3271_v34 = vrot.slane %v3270_v52, 4  ;;  %v3373_v56 = vadd.f32 %v3372_v28, %v3371_v42 }
 0x382   : > { %v3272_v63 = vadd.f32 %v3271_v34, %v3270_v52  ;;  %v3374_v11 = vrot.slane %v3373_v56, 4 }
 0x384   : > { %v3273_v23 = vrot.slane %v3272_v63, 2  ;;  %v3375_v58 = vadd.f32 %v3374_v11, %v3373_v56 }
 0x386   : > { %v3274_v6 = vadd.f32 %v3273_v23, %v3272_v63  ;;  %v3376_v12 = vrot.slane %v3375_v58, 2 }
 0x388   : > { %v3275_v44 = vrot.slane %v3274_v6, 1  ;;  %v3377_v14 = vadd.f32 %v3376_v12, %v3375_v58 }
 0x38a   : > { %v3276_v60 = vadd.f32 %v3275_v44, %v3274_v6  ;;  %v3378_v47 = vrot.slane %v3377_v14, 1 }
 0x38c   : > { %3278 = vst.msk [vmem:[%s530_s16] sm:$0x1] %vm3277_vm9, %v3276_v60  ;;  %v3379_v8 = vadd.f32 %v3378_v47, %v3377_v14 }
 0x38e   : > { %3380 = vst.msk [vmem:[%s537_s20] sm:$0x1] %vm3277_vm9, %v3379_v8 }
 0x38f PF: > { %s20_s11 = sadd.s32 1, %s4286_s11   ;;  %s6570_s30 = smov %s4278_s4 }
 0x390   : > { %p17_p13 = scmp.ge.s32.totalorder %s20_s11, 6   ;;  %s6571_s3 = smov %s4282_s10 }
 0x391   : > { %s6572_s4 = smov %s6575_s12  ;;  %s6573_s10 = smov %s6579_s13 }
 0x392   :  { %19 = sbr.rel (!%p17_p13) target bundleno = 3 (0x3), region = 121 }

// kernel: double_conv3d.4
= control target key start
LH: loop header
LB: loop body
LE: loop exit
PB: predicated region body
PF: predicated region fallthrough
CT: control target
= control target key end

     0   :  { %s4615_s30 = smov 0   ;;  %s4617_s10 = smov 0   ;;  %s6830_s0 = inlined_call_operand.vmem [shape: f32[2,8,8,8,8], index: 0, kind: input, shape index: {}, may-alias: {0,1,2}]   ;;  %s6831_s1 = inlined_call_operand.vmem [shape: f32[2,8,8,8,8], index: 1, kind: input, shape index: {}, may-alias: {0,1,2}]   ;;  %s6832_s2 = inlined_call_operand.vmem [shape: f32[2,8,8,8,8], index: 2, kind: input, shape index: {}, may-alias: {0,1,2}]   ;;  %s6833_s3 = inlined_call_operand.vmem [shape: f32[1,8], index: 3, kind: input, shape index: {}]   ;;  %s6834_s4 = inlined_call_operand.vmem [shape: f32[1,8], index: 4, kind: input, shape index: {}]   ;;  %s6835_s5 = inlined_call_operand.vmem [shape: f32[3,72,8], index: 5, kind: input, shape index: {}]   ;;  %s6836_s6 = inlined_call_operand.vmem [shape: f32[1,8], index: 6, kind: input, shape index: {}]   ;;  %s6837_s7 = inlined_call_operand.vmem [shape: f32[2,8,8,8,8], index: 7, kind: output, shape index: {0}]   ;;  %s6838_s8 = inlined_call_operand.vmem [shape: f32[2,2,1,8], index: 8, kind: output, shape index: {1}]   ;;  %s6839_s9 = inlined_call_operand.vmem [shape: f32[2,2,1,8], index: 9, kind: output, shape index: {2}]  }
   0x1   :  { %s4619_s11 = smov 0   ;;  %s4621_s12 = smov 0  }
   0x2   :  { %s4623_s13 = smov 0  }
   0x3 LB: > { %s29_s14 = sadd.s32 1, %s4550_s11  ;;  %s32_s15 = sadd.s32 1, %s4554_s12  ;;  %s4558_s13 = sphi %s4623_s13, %s20_s13   ;;  %s4554_s12 = sphi %s4621_s12, %s6926_s12   ;;  %s4550_s11 = sphi %s4619_s11, %s6925_s11   ;;  %s4546_s10 = sphi %s4617_s10, %s6924_s10   ;;  %s4542_s30 = sphi %s4615_s30, %s6923_s30  }
   0x4   : > { %p30_p0 = scmp.ge.s32.totalorder %s29_s14, 2  ;;  %p3834_p1 = scmp.ge.s32.totalorder %s4558_s13, 1 }
   0x5   : > { %p382_p2 = scmp.lt.s32.totalorder %s4558_s13, 5 }
   0x6   : > { %s6928_s14 = smov (%p30_p0, %s29_s14), 0  ;;  %s6930_s15 = smov (!%p30_p0, %s32_s15), %s4554_s12 }
   0x7   : > { %p383_p3 = pnand %p3834_p1, %p382_p2  ;;  %p34_p4 = scmp.ge.s32.totalorder %s6930_s15, 2 }
   0x9   : > { %s6932_s15 = smov (%p34_p4, %s6930_s15), 0  ;;  %386 = sbr.rel (%p383_p3) target bundleno = 915 (0x393), region = 48 }
   0xa   : > { %6860 = sst [smem:[#allocation3_spill]] %s6932_s15 }
  0x10   : > { %vm538_vm0 = vcmask 64512   ;;  %vm540_vm1 = vcmask 58368   ;;  %s4650_s16 = sshll.u32 %s4542_s30, 2  ;;  %p469_p5 = scmp.lt.s32.totalorder %s4546_s10, 1  ;;  %v4560_v0 = vmov 0.0  }
  0x11   : > { %562 = vst.msk [vmem:[#allocation2 + $0xb0] sm:$0xff] %vm538_vm0, %v4560_v0  ;;  %539 = vst.msk [vmem:[#allocation2] sm:$0xff] %vm538_vm0, %v4560_v0  ;;  %p471_p6 = scmp.lt.s32.totalorder %s4650_s16, 7  ;;  %s3840_s17 = sadd.s32 4294967295, %s4650_s16  ;;  %v4913_v1 = vld [vmem:[%s6833_s3] ss:$0 sm:$0xff] }
  0x12   : > { %542 = vst.msk [vmem:[#allocation2 + $0x10] sm:$0xff] %vm538_vm0, %v4560_v0  ;;  %544 = vst.msk [vmem:[#allocation2 + $0x20] sm:$0xff] %vm538_vm0, %v4560_v0  ;;  %s6934_s10 = smov (!%p469_p5, %s4546_s10), 1  ;;  %p481_p7 = scmp.gt.s32.totalorder %s3840_s17, 0  ;;  %v4928_v2 = vld [vmem:[%s6834_s4] ss:$0 sm:$0xff] }
  0x13   : > { %546 = vst.msk [vmem:[#allocation2 + $0x30] sm:$0xff] %vm538_vm0, %v4560_v0  ;;  %548 = vst.msk [vmem:[#allocation2 + $0x40] sm:$0xff] %vm538_vm0, %v4560_v0  ;;  %s472_s18 = scalar_select %p471_p6, %s4650_s16, 7 }
  0x14   : > { %550 = vst.msk [vmem:[#allocation2 + $0x50] sm:$0xff] %vm538_vm0, %v4560_v0  ;;  %552 = vst.msk [vmem:[#allocation2 + $0x60] sm:$0xff] %vm538_vm0, %v4560_v0  ;;  %s4902_s19 = sshll.u32 %s6934_s10, 6  ;;  %p3841_p8 = scmp.lt.s32.totalorder %s3840_s17, 7 }
  0x15   : > { %554 = vst.msk [vmem:[#allocation2 + $0x70] sm:$0xff] %vm538_vm0, %v4560_v0  ;;  %556 = vst.msk [vmem:[#allocation2 + $0x80] sm:$0xff] %vm538_vm0, %v4560_v0  ;;  %s3836_s20 = sshll.u32 %s472_s18, 3  ;;  %s3994_s22 = sadd.s32 4, %s4650_s16 }
  0x16   : > { %558 = vst.msk [vmem:[#allocation2 + $0x90] sm:$0xff] %vm538_vm0, %v4560_v0  ;;  %560 = vst.msk [vmem:[#allocation2 + $0xa0] sm:$0xff] %vm538_vm0, %v4560_v0  ;;  %s475_s21 = sadd.s32 %s4902_s19, %s3836_s20  ;;  %p4906_p9 = scmp.lt.s32.totalorder %s3994_s22, 7 }
  0x17   : > { %564 = vst.msk [vmem:[#allocation2 + $0xc0] sm:$0xff] %vm538_vm0, %v4560_v0  ;;  %566 = vst.msk [vmem:[#allocation2 + $0xd0] sm:$0xff] %vm538_vm0, %v4560_v0  ;;  %s3838_s23 = sshll.u32 %s475_s21, 3  ;;  %p526_p10 = scmp.lt.s32.totalorder %s4542_s30, 1 }
  0x18   : > { %568 = vst.msk [vmem:[#allocation2 + $0xe0] sm:$0xff] %vm538_vm0, %v4560_v0  ;;  %570 = vst.msk [vmem:[#allocation2 + $0xf0] sm:$0xff] %vm538_vm0, %v4560_v0  ;;  %s4918_s29 = scalar_lea.vmem %s6830_s0, %s3838_s23  ;;  %s4923_s16 = scalar_lea.vmem %s6837_s7, %s3838_s23 }
  0x19   : > { %572 = vst.msk [vmem:[#allocation2 + $0x100] sm:$0xff] %vm538_vm0, %v4560_v0  ;;  %574 = vst.msk [vmem:[#allocation2 + $0x110] sm:$0xff] %vm538_vm0, %v4560_v0  ;;  %s482_s25 = scalar_select %p481_p7, %s3840_s17, 0  ;;  %v660_v3 = vld [vmem:[%s4918_s29] sm:$0xff]  ;;  %v661_v4 = vld [vmem:[%s4918_s29 + $0x8] sm:$0xff] }
  0x1a   : > { %576 = vst.msk [vmem:[#allocation2 + $0x120] sm:$0xff] %vm538_vm0, %v4560_v0  ;;  %578 = vst.msk [vmem:[#allocation2 + $0x130] sm:$0xff] %vm538_vm0, %v4560_v0  ;;  %v662_v5 = vld [vmem:[%s4918_s29 + $0x10] sm:$0xff]  ;;  %s6936_s22 = smov (!%p4906_p9, %s3994_s22), 7  ;;  %v699_v6 = vmul.f32 %v4913_v1, %v660_v3  ;;  %v700_v7 = vmul.f32 %v4913_v1, %v661_v4  ;;  %v663_v9 = vld [vmem:[%s4918_s29 + $0x18] sm:$0xff]  ;;  %p3864_p11 = scmp.le.s32.totalorder %s4542_s30, 0 }
  0x1b   : > { %580 = vst.msk [vmem:[#allocation2 + $0x140] sm:$0xff] %vm538_vm0, %v4560_v0  ;;  %582 = vst.msk [vmem:[#allocation2 + $0x150] sm:$0xff] %vm538_vm0, %v4560_v0  ;;  %v701_v8 = vmul.f32 %v4913_v1, %v662_v5  ;;  %v664_v10 = vld [vmem:[%s4918_s29 + $0x20] sm:$0xff]  ;;  %v665_v11 = vld [vmem:[%s4918_s29 + $0x28] sm:$0xff]  ;;  %s6938_s25 = smov (!%p3841_p8, %s482_s25), 7  ;;  %v702_v12 = vmul.f32 %v4913_v1, %v663_v9  ;;  %s6940_s22 = smov (!%p4906_p9, %s6936_s22), 7 }
  0x1c   : > { %584 = vst.msk [vmem:[#allocation2 + $0x160] sm:$0xff] %vm538_vm0, %v4560_v0  ;;  %586 = vst.msk [vmem:[#allocation2 + $0x170] sm:$0xff] %vm538_vm0, %v4560_v0  ;;  %v703_v13 = vmul.f32 %v4913_v1, %v664_v10  ;;  %v704_v14 = vmul.f32 %v4913_v1, %v665_v11  ;;  %v666_v15 = vld [vmem:[%s4918_s29 + $0x30] sm:$0xff]  ;;  %v667_v16 = vld [vmem:[%s4918_s29 + $0x38] sm:$0xff]  ;;  %v738_v17 = vadd.f32 %v4928_v2, %v699_v6  ;;  %s3846_s15 = sshll.u32 %s6938_s25, 3  ;;  %s3853_s23 = sshll.u32 %s6940_s22, 3 }
  0x1d   : > { %588 = vst.msk [vmem:[#allocation2 + $0x180] sm:$0xff] %vm538_vm0, %v4560_v0  ;;  %590 = vst.msk [vmem:[#allocation2 + $0x190] sm:$0xff] %vm538_vm0, %v4560_v0  ;;  %v739_v18 = vadd.f32 %v4928_v2, %v700_v7  ;;  %v740_v19 = vadd.f32 %v4928_v2, %v701_v8  ;;  %v705_v20 = vmul.f32 %v4913_v1, %v666_v15  ;;  %v668_v21 = vld [vmem:[%s4918_s29 + $0x40] sm:$0xff]  ;;  %v669_v26 = vld [vmem:[%s4918_s29 + $0x48] sm:$0xff]  ;;  %s489_s17 = sadd.s32 %s3846_s15, %s4902_s19  ;;  %s506_s26 = sadd.s32 %s3853_s23, %s4902_s19 }
  0x1e   : > { %592 = vst.msk [vmem:[#allocation2 + $0x1a0] sm:$0xff] %vm538_vm0, %v4560_v0  ;;  %594 = vst.msk [vmem:[#allocation2 + $0x1b0] sm:$0xff] %vm538_vm0, %v4560_v0  ;;  %v741_v22 = vadd.f32 %v4928_v2, %v702_v12  ;;  %v742_v23 = vadd.f32 %v4928_v2, %v703_v13  ;;  %v743_v24 = vadd.f32 %v4928_v2, %v704_v14  ;;  %v670_v27 = vld [vmem:[%s4918_s29 + $0x50] sm:$0xff]  ;;  %v671_v28 = vld [vmem:[%s4918_s29 + $0x58] sm:$0xff]  ;;  %v770_v29 = vmax.f32 %v738_v17, 0.0  ;;  %s3848_s24 = sshll.u32 %s489_s17, 3 }
  0x1f   : > { %596 = vst.msk [vmem:[#allocation2 + $0x1c0] sm:$0xff] %vm538_vm0, %v4560_v0  ;;  %598 = vst.msk [vmem:[#allocation2 + $0x1d0] sm:$0xff] %vm538_vm0, %v4560_v0  ;;  %v706_v25 = vmul.f32 %v4913_v1, %v667_v16  ;;  %v771_v30 = vmax.f32 %v739_v18, 0.0  ;;  %v772_v31 = vmax.f32 %v740_v19, 0.0  ;;  %v744_v32 = vadd.f32 %v4928_v2, %v705_v20  ;;  %v672_v33 = vld [vmem:[%s4918_s29 + $0x60] sm:$0xff]  ;;  %v673_v34 = vld [vmem:[%s4918_s29 + $0x68] sm:$0xff]  ;;  %s4975_s22 = scalar_lea.vmem %s6831_s1, %s3848_s24 }
  0x20   : > { %600 = vst.msk [vmem:[#allocation2 + $0x1e0] sm:$0xff] %vm538_vm0, %v4560_v0  ;;  %602 = vst.msk [vmem:[#allocation2 + $0x1f0] sm:$0xff] %vm538_vm0, %v4560_v0  ;;  %v773_v35 = vmax.f32 %v741_v22, 0.0  ;;  %v774_v36 = vmax.f32 %v742_v23, 0.0  ;;  %v775_v37 = vmax.f32 %v743_v24, 0.0  ;;  %v674_v39 = vld [vmem:[%s4918_s29 + $0x70] sm:$0xff]  ;;  %v707_v41 = vmul.f32 %v4913_v1, %v668_v21 }
  0x21   : > { %604 = vst.msk [vmem:[#allocation2 + $0x200] sm:$0xff] %vm538_vm0, %v4560_v0  ;;  %606 = vst.msk [vmem:[#allocation2 + $0x210] sm:$0xff] %vm538_vm0, %v4560_v0  ;;  %v745_v38 = vadd.f32 %v4928_v2, %v706_v25  ;;  %s3855_s18 = sshll.u32 %s506_s26, 3  ;;  %v776_v40 = vmax.f32 %v744_v32, 0.0  ;;  %v708_v42 = vmul.f32 %v4913_v1, %v669_v26  ;;  %v709_v43 = vmul.f32 %v4913_v1, %v670_v27  ;;  %v675_v44 = vld [vmem:[%s4918_s29 + $0x78] sm:$0xff]  ;;  %s3860_s25 = sshll.u32 %s6934_s10, 1 }
  0x22   : > { %608 = vst.msk [vmem:[#allocation2 + $0x220] sm:$0xff] %vm538_vm0, %v4560_v0  ;;  %610 = vst.msk [vmem:[#allocation2 + $0x230] sm:$0xff] %vm538_vm0, %v4560_v0  ;;  %s4987_s21 = scalar_lea.vmem %s6832_s2, %s3855_s18  ;;  %v710_v46 = vmul.f32 %v4913_v1, %v671_v28  ;;  %v711_v47 = vmul.f32 %v4913_v1, %v672_v33  ;;  %v712_v48 = vmul.f32 %v4913_v1, %v673_v34  ;;  %v676_v57 = vld [vmem:[%s4918_s29 + $0x80] sm:$0xff]  ;;  %v677_v58 = vld [vmem:[%s4918_s29 + $0x88] sm:$0xff] }
  0x23   : > { %612 = vst.msk [vmem:[#allocation2 + $0x240] sm:$0xff] %vm538_vm0, %v4560_v0  ;;  %614 = vst.msk [vmem:[#allocation2 + $0x250] sm:$0xff] %vm538_vm0, %v4560_v0  ;;  %v777_v45 = vmax.f32 %v745_v38, 0.0  ;;  %s527_s15 = scalar_select %p526_p10, %s4542_s30, 1  ;;  %v746_v49 = vadd.f32 %v4928_v2, %v707_v41  ;;  %v747_v50 = vadd.f32 %v4928_v2, %v708_v42  ;;  %v748_v51 = vadd.f32 %v4928_v2, %v709_v43  ;;  %v678_v59 = vld [vmem:[%s4918_s29 + $0x90] sm:$0xff]  ;;  %v680_v3 = vld [vmem:[%s4918_s29 + $0xa0] sm:$0xff] }
  0x24   : > { %616 = vst.msk [vmem:[#allocation2 + $0x260] sm:$0xff] %vm538_vm0, %v4560_v0  ;;  %618 = vst.msk [vmem:[#allocation2 + $0x270] sm:$0xff] %vm538_vm0, %v4560_v0  ;;  %v713_v52 = vmul.f32 %v4913_v1, %v674_v39  ;;  %v749_v53 = vadd.f32 %v4928_v2, %v710_v46  ;;  %v750_v54 = vadd.f32 %v4928_v2, %v711_v47  ;;  %v681_v4 = vld [vmem:[%s4918_s29 + $0xa8] sm:$0xff]  ;;  %v682_v9 = vld [vmem:[%s4918_s29 + $0xb0] sm:$0xff] }
  0x25   : > { %620 = vst.msk [vmem:[#allocation2 + $0x280] sm:$0xff] %vm538_vm0, %v4560_v0  ;;  %622 = vst.msk [vmem:[#allocation2 + $0x290] sm:$0xff] %vm538_vm0, %v4560_v0  ;;  %v751_v55 = vadd.f32 %v4928_v2, %v712_v48  ;;  %v714_v56 = vmul.f32 %v4913_v1, %v675_v44  ;;  %s5012_s10 = sadd.s32 %s3860_s25, %s527_s15  ;;  %v778_v60 = vmax.f32 %v746_v49, 0.0  ;;  %v779_v61 = vmax.f32 %v747_v50, 0.0  ;;  %v683_v14 = vld [vmem:[%s4918_s29 + $0xb8] sm:$0xff]  ;;  %v684_v27 = vld [vmem:[%s4918_s29 + $0xc0] sm:$0xff] }
  0x26   : > { %624 = vst.msk [vmem:[#allocation2 + $0x2a0] sm:$0xff] %vm538_vm0, %v4560_v0  ;;  %626 = vst.msk [vmem:[#allocation2 + $0x2b0] sm:$0xff] %vm538_vm0, %v4560_v0  ;;  %v780_v62 = vmax.f32 %v748_v51, 0.0  ;;  %v752_v63 = vadd.f32 %v4928_v2, %v713_v52  ;;  %s530_s24 = scalar_lea.vmem %s6838_s8, %s5012_s10  ;;  %s537_s28 = scalar_lea.vmem %s6839_s9, %s5012_s10  ;;  %v781_v5 = vmax.f32 %v749_v53, 0.0  ;;  %v782_v6 = vmax.f32 %v750_v54, 0.0  ;;  %v685_v28 = vld [vmem:[%s4918_s29 + $0xc8] sm:$0xff] }
  0x27   : > { %628 = vst.msk [vmem:[#allocation2 + $0x2c0] sm:$0xff] %vm538_vm0, %v4560_v0  ;;  %630 = vst.msk [vmem:[#allocation2 + $0x2d0] sm:$0xff] %vm538_vm0, %v4560_v0  ;;  %v783_v7 = vmax.f32 %v751_v55, 0.0  ;;  %v753_v8 = vadd.f32 %v4928_v2, %v714_v56  ;;  %v715_v11 = vmul.f32 %v4913_v1, %v676_v57  ;;  %v716_v12 = vmul.f32 %v4913_v1, %v677_v58  ;;  %v687_v34 = vld [vmem:[%s4918_s29 + $0xd8] sm:$0xff]  ;;  %v690_v41 = vld [vmem:[%s4918_s29 + $0xf0] sm:$0xff] }
  0x28   : > { %632 = vst.msk [vmem:[#allocation2 + $0x2e0] sm:$0xff] %vm538_vm0, %v4560_v0  ;;  %634 = vst.msk [vmem:[#allocation2 + $0x2f0] sm:$0xff] %vm538_vm0, %v4560_v0  ;;  %v784_v10 = vmax.f32 %v752_v63, 0.0  ;;  %v717_v13 = vmul.f32 %v4913_v1, %v678_v59  ;;  %v719_v17 = vmul.f32 %v4913_v1, %v680_v3  ;;  %v720_v18 = vmul.f32 %v4913_v1, %v681_v4  ;;  %v691_v46 = vld [vmem:[%s4918_s29 + $0xf8] sm:$0xff] }
  0x29   : > { %636 = vst.msk [vmem:[#allocation2 + $0x300] sm:$0xff] %vm538_vm0, %v4560_v0  ;;  %638 = vst.msk [vmem:[#allocation2 + $0x310] sm:$0xff] %vm538_vm0, %v4560_v0  ;;  %v785_v15 = vmax.f32 %v753_v8, 0.0  ;;  %v754_v19 = vadd.f32 %v4928_v2, %v715_v11  ;;  %v755_v20 = vadd.f32 %v4928_v2, %v716_v12  ;;  %v721_v22 = vmul.f32 %v4913_v1, %v682_v9  ;;  %v840_v9 = vld [vmem:[%s4975_s22 + $0x8] sm:$0xff] (!%p3864_p11)  ;;  %v842_v11 = vld [vmem:[%s4975_s22 + $0x18] sm:$0xff] (!%p3864_p11) }
  0x2a   : > { %640 = vst.msk [vmem:[#allocation2 + $0x320] sm:$0xff] %vm538_vm0, %v4560_v0  ;;  %642 = vst.msk [vmem:[#allocation2 + $0x330] sm:$0xff] %vm538_vm0, %v4560_v0  ;;  %v756_v21 = vadd.f32 %v4928_v2, %v717_v13  ;;  %v758_v24 = vadd.f32 %v4928_v2, %v719_v17  ;;  %v759_v25 = vadd.f32 %v4928_v2, %v720_v18  ;;  %v845_v17 = vld [vmem:[%s4975_s22 + $0x30] sm:$0xff] (!%p3864_p11) }
  0x2b   : > { %644 = vst.msk [vmem:[#allocation2 + $0x340] sm:$0xff] %vm538_vm0, %v4560_v0  ;;  %646 = vst.msk [vmem:[#allocation2 + $0x350] sm:$0xff] %vm538_vm0, %v4560_v0  ;;  %v722_v26 = vmul.f32 %v4913_v1, %v683_v14  ;;  %v760_v33 = vadd.f32 %v4928_v2, %v721_v22  ;;  %v723_v43 = vmul.f32 %v4913_v1, %v684_v27  ;;  %v846_v22 = vld [vmem:[%s4975_s22 + $0x38] sm:$0xff] (!%p3864_p11) }
  0x2c   : > { %648 = vst.msk [vmem:[#allocation2 + $0x360] sm:$0xff] %vm538_vm0, %v4560_v0  ;;  %650 = vst.msk [vmem:[#allocation2 + $0x370] sm:$0xff] %vm538_vm0, %v4560_v0  ;;  %v788_v32 = vmax.f32 %v756_v21, 0.0  ;;  %v790_v38 = vmax.f32 %v758_v24, 0.0  ;;  %v791_v39 = vmax.f32 %v759_v25, 0.0  ;;  %v724_v44 = vmul.f32 %v4913_v1, %v685_v28 }
  0x2d   : > { %652 = vst.msk [vmem:[#allocation2 + $0x380] sm:$0xff] %vm538_vm0, %v4560_v0  ;;  %654 = vst.msk [vmem:[#allocation2 + $0x390] sm:$0xff] %vm538_vm0, %v4560_v0  ;;  %v792_v42 = vmax.f32 %v760_v33, 0.0  ;;  %v726_v48 = vmul.f32 %v4913_v1, %v687_v34  ;;  %v762_v51 = vadd.f32 %v4928_v2, %v723_v43  ;;  %v729_v54 = vmul.f32 %v4913_v1, %v690_v41 }
  0x2e   : > { %656 = vst.msk [vmem:[#allocation2 + $0x3a0] sm:$0xff] %vm538_vm0, %v4560_v0  ;;  %658 = vst.msk [vmem:[#allocation2 + $0x3b0] sm:$0xff] %vm538_vm0, %v4560_v0  ;;  %v763_v52 = vadd.f32 %v4928_v2, %v724_v44  ;;  %v730_v58 = vmul.f32 %v4913_v1, %v691_v46 }
  0x2f   : > { %563 = vst.msk [vmem:[#allocation2 + $0xb8] sm:$0x3] %vm540_vm1, %v4560_v0  ;;  %541 = vst.msk [vmem:[#allocation2 + $0x8] sm:$0x3] %vm540_vm1, %v4560_v0  ;;  %v765_v55 = vadd.f32 %v4928_v2, %v726_v48  ;;  %v794_v59 = vmax.f32 %v762_v51, 0.0 }
  0x30   : > { %543 = vst.msk [vmem:[#allocation2 + $0x18] sm:$0x3] %vm540_vm1, %v4560_v0  ;;  %545 = vst.msk [vmem:[#allocation2 + $0x28] sm:$0x3] %vm540_vm1, %v4560_v0  ;;  %v769_v4 = vadd.f32 %v4928_v2, %v730_v58 }
  0x31   : > { %547 = vst.msk [vmem:[#allocation2 + $0x38] sm:$0x3] %vm540_vm1, %v4560_v0  ;;  %549 = vst.msk [vmem:[#allocation2 + $0x48] sm:$0x3] %vm540_vm1, %v4560_v0  ;;  %v797_v63 = vmax.f32 %v765_v55, 0.0 }
  0x32   : > { %551 = vst.msk [vmem:[#allocation2 + $0x58] sm:$0x3] %vm540_vm1, %v4560_v0  ;;  %553 = vst.msk [vmem:[#allocation2 + $0x68] sm:$0x3] %vm540_vm1, %v4560_v0 }
  0x33   : > { %555 = vst.msk [vmem:[#allocation2 + $0x78] sm:$0x3] %vm540_vm1, %v4560_v0  ;;  %557 = vst.msk [vmem:[#allocation2 + $0x88] sm:$0x3] %vm540_vm1, %v4560_v0 }
  0x34   : > { %559 = vst.msk [vmem:[#allocation2 + $0x98] sm:$0x3] %vm540_vm1, %v4560_v0  ;;  %561 = vst.msk [vmem:[#allocation2 + $0xa8] sm:$0x3] %vm540_vm1, %v4560_v0 }
  0x35   : > { %565 = vst.msk [vmem:[#allocation2 + $0xc8] sm:$0x3] %vm540_vm1, %v4560_v0  ;;  %567 = vst.msk [vmem:[#allocation2 + $0xd8] sm:$0x3] %vm540_vm1, %v4560_v0 }
  0x36   : > { %569 = vst.msk [vmem:[#allocation2 + $0xe8] sm:$0x3] %vm540_vm1, %v4560_v0  ;;  %571 = vst.msk [vmem:[#allocation2 + $0xf8] sm:$0x3] %vm540_vm1, %v4560_v0 }
  0x37   : > { %573 = vst.msk [vmem:[#allocation2 + $0x108] sm:$0x3] %vm540_vm1, %v4560_v0  ;;  %575 = vst.msk [vmem:[#allocation2 + $0x118] sm:$0x3] %vm540_vm1, %v4560_v0 }
  0x38   : > { %577 = vst.msk [vmem:[#allocation2 + $0x128] sm:$0x3] %vm540_vm1, %v4560_v0  ;;  %579 = vst.msk [vmem:[#allocation2 + $0x138] sm:$0x3] %vm540_vm1, %v4560_v0 }
  0x39   : > { %581 = vst.msk [vmem:[#allocation2 + $0x148] sm:$0x3] %vm540_vm1, %v4560_v0  ;;  %583 = vst.msk [vmem:[#allocation2 + $0x158] sm:$0x3] %vm540_vm1, %v4560_v0 }
  0x3a   : > { %585 = vst.msk [vmem:[#allocation2 + $0x168] sm:$0x3] %vm540_vm1, %v4560_v0  ;;  %587 = vst.msk [vmem:[#allocation2 + $0x178] sm:$0x3] %vm540_vm1, %v4560_v0 }
  0x3b   : > { %589 = vst.msk [vmem:[#allocation2 + $0x188] sm:$0x3] %vm540_vm1, %v4560_v0  ;;  %591 = vst.msk [vmem:[#allocation2 + $0x198] sm:$0x3] %vm540_vm1, %v4560_v0 }
  0x3c   : > { %593 = vst.msk [vmem:[#allocation2 + $0x1a8] sm:$0x3] %vm540_vm1, %v4560_v0  ;;  %595 = vst.msk [vmem:[#allocation2 + $0x1b8] sm:$0x3] %vm540_vm1, %v4560_v0 }
  0x3d   : > { %597 = vst.msk [vmem:[#allocation2 + $0x1c8] sm:$0x3] %vm540_vm1, %v4560_v0  ;;  %599 = vst.msk [vmem:[#allocation2 + $0x1d8] sm:$0x3] %vm540_vm1, %v4560_v0 }
  0x3e   : > { %601 = vst.msk [vmem:[#allocation2 + $0x1e8] sm:$0x3] %vm540_vm1, %v4560_v0  ;;  %603 = vst.msk [vmem:[#allocation2 + $0x1f8] sm:$0x3] %vm540_vm1, %v4560_v0 }
  0x3f   : > { %605 = vst.msk [vmem:[#allocation2 + $0x208] sm:$0x3] %vm540_vm1, %v4560_v0  ;;  %607 = vst.msk [vmem:[#allocation2 + $0x218] sm:$0x3] %vm540_vm1, %v4560_v0 }
  0x40   : > { %609 = vst.msk [vmem:[#allocation2 + $0x228] sm:$0x3] %vm540_vm1, %v4560_v0  ;;  %611 = vst.msk [vmem:[#allocation2 + $0x238] sm:$0x3] %vm540_vm1, %v4560_v0 }
  0x41   : > { %613 = vst.msk [vmem:[#allocation2 + $0x248] sm:$0x3] %vm540_vm1, %v4560_v0  ;;  %615 = vst.msk [vmem:[#allocation2 + $0x258] sm:$0x3] %vm540_vm1, %v4560_v0 }
  0x42   : > { %617 = vst.msk [vmem:[#allocation2 + $0x268] sm:$0x3] %vm540_vm1, %v4560_v0  ;;  %619 = vst.msk [vmem:[#allocation2 + $0x278] sm:$0x3] %vm540_vm1, %v4560_v0 }
  0x43   : > { %621 = vst.msk [vmem:[#allocation2 + $0x288] sm:$0x3] %vm540_vm1, %v4560_v0  ;;  %623 = vst.msk [vmem:[#allocation2 + $0x298] sm:$0x3] %vm540_vm1, %v4560_v0 }
  0x44   : > { %625 = vst.msk [vmem:[#allocation2 + $0x2a8] sm:$0x3] %vm540_vm1, %v4560_v0  ;;  %627 = vst.msk [vmem:[#allocation2 + $0x2b8] sm:$0x3] %vm540_vm1, %v4560_v0 }
  0x45   : > { %629 = vst.msk [vmem:[#allocation2 + $0x2c8] sm:$0x3] %vm540_vm1, %v4560_v0  ;;  %631 = vst.msk [vmem:[#allocation2 + $0x2d8] sm:$0x3] %vm540_vm1, %v4560_v0 }
  0x46   : > { %633 = vst.msk [vmem:[#allocation2 + $0x2e8] sm:$0x3] %vm540_vm1, %v4560_v0  ;;  %635 = vst.msk [vmem:[#allocation2 + $0x2f8] sm:$0x3] %vm540_vm1, %v4560_v0 }
  0x47   : > { %637 = vst.msk [vmem:[#allocation2 + $0x308] sm:$0x3] %vm540_vm1, %v4560_v0  ;;  %639 = vst.msk [vmem:[#allocation2 + $0x318] sm:$0x3] %vm540_vm1, %v4560_v0 }
  0x48   : > { %641 = vst.msk [vmem:[#allocation2 + $0x328] sm:$0x3] %vm540_vm1, %v4560_v0  ;;  %643 = vst.msk [vmem:[#allocation2 + $0x338] sm:$0x3] %vm540_vm1, %v4560_v0 }
  0x49   : > { %645 = vst.msk [vmem:[#allocation2 + $0x348] sm:$0x3] %vm540_vm1, %v4560_v0  ;;  %647 = vst.msk [vmem:[#allocation2 + $0x358] sm:$0x3] %vm540_vm1, %v4560_v0 }
  0x4a   : > { %649 = vst.msk [vmem:[#allocation2 + $0x368] sm:$0x3] %vm540_vm1, %v4560_v0  ;;  %651 = vst.msk [vmem:[#allocation2 + $0x378] sm:$0x3] %vm540_vm1, %v4560_v0 }
  0x4b   : > { %653 = vst.msk [vmem:[#allocation2 + $0x388] sm:$0x3] %vm540_vm1, %v4560_v0  ;;  %655 = vst.msk [vmem:[#allocation2 + $0x398] sm:$0x3] %vm540_vm1, %v4560_v0 }
  0x4c   : > { %657 = vst.msk [vmem:[#allocation2 + $0x3a8] sm:$0x3] %vm540_vm1, %v4560_v0  ;;  %659 = vst.msk [vmem:[#allocation2 + $0x3b8] sm:$0x3] %vm540_vm1, %v4560_v0  ;;  %v679_v0 = vld [vmem:[%s4918_s29 + $0x98] sm:$0xff] }
  0x4d   : > { %803 = vst.msk [vmem:[#allocation2 + $0xb1] sm:$0xff] %vm538_vm0, %v770_v29  ;;  %804 = vst.msk [vmem:[#allocation2 + $0xc1] sm:$0xff] %vm538_vm0, %v771_v30  ;;  %v718_v16 = vmul.f32 %v4913_v1, %v679_v0  ;;  %v686_v29 = vld [vmem:[%s4918_s29 + $0xd0] sm:$0xff]  ;;  %v786_v30 = vmax.f32 %v754_v19, 0.0 }
  0x4e   : > { %805 = vst.msk [vmem:[#allocation2 + $0xd1] sm:$0xff] %vm538_vm0, %v772_v31  ;;  %806 = vst.msk [vmem:[#allocation2 + $0xe1] sm:$0xff] %vm538_vm0, %v773_v35  ;;  %v787_v31 = vmax.f32 %v755_v20, 0.0  ;;  %v688_v35 = vld [vmem:[%s4918_s29 + $0xe0] sm:$0xff] }
  0x4f   : > { %807 = vst.msk [vmem:[#allocation2 + $0xf1] sm:$0xff] %vm538_vm0, %v774_v36  ;;  %808 = vst.msk [vmem:[#allocation2 + $0x101] sm:$0xff] %vm538_vm0, %v775_v37  ;;  %v757_v23 = vadd.f32 %v4928_v2, %v718_v16  ;;  %v689_v36 = vld [vmem:[%s4918_s29 + $0xe8] sm:$0xff]  ;;  %v727_v49 = vmul.f32 %v4913_v1, %v688_v35 }
  0x50   : > { %809 = vst.msk [vmem:[#allocation2 + $0x111] sm:$0xff] %vm538_vm0, %v776_v40  ;;  %810 = vst.msk [vmem:[#allocation2 + $0x121] sm:$0xff] %vm538_vm0, %v777_v45  ;;  %v761_v40 = vadd.f32 %v4928_v2, %v722_v26  ;;  %v725_v45 = vmul.f32 %v4913_v1, %v686_v29  ;;  %v728_v50 = vmul.f32 %v4913_v1, %v689_v36  ;;  %v801_v1 = vmax.f32 %v769_v4, 0.0  ;;  %v844_v16 = vld [vmem:[%s4975_s22 + $0x28] sm:$0xff] (!%p3864_p11) }
  0x51   : > { %811 = vst.msk [vmem:[#allocation2 + $0x151] sm:$0xff] %vm538_vm0, %v778_v60  ;;  %812 = vst.msk [vmem:[#allocation2 + $0x161] sm:$0xff] %vm538_vm0, %v779_v61  ;;  %v789_v37 = vmax.f32 %v757_v23, 0.0  ;;  %v766_v56 = vadd.f32 %v4928_v2, %v727_v49  ;;  %v795_v60 = vmax.f32 %v763_v52, 0.0 }
  0x52   : > { %813 = vst.msk [vmem:[#allocation2 + $0x171] sm:$0xff] %vm538_vm0, %v780_v62  ;;  %814 = vst.msk [vmem:[#allocation2 + $0x181] sm:$0xff] %vm538_vm0, %v781_v5  ;;  %v793_v47 = vmax.f32 %v761_v40, 0.0  ;;  %v764_v53 = vadd.f32 %v4928_v2, %v725_v45  ;;  %v767_v57 = vadd.f32 %v4928_v2, %v728_v50  ;;  %v768_v62 = vadd.f32 %v4928_v2, %v729_v54  ;;  %v839_v2 = vld [vmem:[%s4975_s22] sm:$0xff] (!%p3864_p11) }
  0x53   : > { %815 = vst.msk [vmem:[#allocation2 + $0x191] sm:$0xff] %vm538_vm0, %v782_v6  ;;  %816 = vst.msk [vmem:[#allocation2 + $0x1a1] sm:$0xff] %vm538_vm0, %v783_v7  ;;  %v798_v0 = vmax.f32 %v766_v56, 0.0  ;;  %v3865_v6 = vld [vmem:[%s6833_s3] ss:$0 sm:$0xff] (!%p3864_p11) }
  0x54   : > { %817 = vst.msk [vmem:[#allocation2 + $0x1b1] sm:$0xff] %vm538_vm0, %v784_v10  ;;  %818 = vst.msk [vmem:[#allocation2 + $0x1c1] sm:$0xff] %vm538_vm0, %v785_v15  ;;  %v796_v61 = vmax.f32 %v764_v53, 0.0  ;;  %v799_v3 = vmax.f32 %v767_v57, 0.0  ;;  %v800_v5 = vmax.f32 %v768_v62, 0.0  ;;  %v854_v8 = vmul.f32 (!%p3864_p11), %v3865_v6, %v839_v2  ;;  %v841_v10 = vld [vmem:[%s4975_s22 + $0x10] sm:$0xff] (!%p3864_p11) }
  0x55   : > { %819 = vst.msk [vmem:[#allocation2 + $0x1f1] sm:$0xff] %vm538_vm0, %v786_v30  ;;  %820 = vst.msk [vmem:[#allocation2 + $0x201] sm:$0xff] %vm538_vm0, %v787_v31  ;;  %v3866_v7 = vld [vmem:[%s6834_s4] ss:$0 sm:$0xff] (!%p3864_p11)  ;;  %v855_v12 = vmul.f32 (!%p3864_p11), %v3865_v6, %v840_v9  ;;  %v856_v13 = vmul.f32 (!%p3864_p11), %v3865_v6, %v841_v10  ;;  %v857_v14 = vmul.f32 (!%p3864_p11), %v3865_v6, %v842_v11 }
  0x56   : > { %821 = vst.msk [vmem:[#allocation2 + $0x211] sm:$0xff] %vm538_vm0, %v788_v32  ;;  %822 = vst.msk [vmem:[#allocation2 + $0x221] sm:$0xff] %vm538_vm0, %v789_v37  ;;  %838 = sbr.rel (%p3864_p11) target bundleno = 97 (0x61), region = 52  ;;  %v843_v15 = vld [vmem:[%s4975_s22 + $0x20] sm:$0xff] (!%p3864_p11)  ;;  %v869_v18 = vadd.f32 (!%p3864_p11), %v3866_v7, %v854_v8  ;;  %v859_v20 = vmul.f32 (!%p3864_p11), %v3865_v6, %v844_v16  ;;  %v860_v21 = vmul.f32 (!%p3864_p11), %v3865_v6, %v845_v17 }
  0x57   : > { %823 = vst.msk [vmem:[#allocation2 + $0x231] sm:$0xff] %vm538_vm0, %v790_v38  ;;  %824 = vst.msk [vmem:[#allocation2 + $0x241] sm:$0xff] %vm538_vm0, %v791_v39  ;;  %v858_v19 = vmul.f32 (!%p3864_p11), %v3865_v6, %v843_v15  ;;  %v870_v23 = vadd.f32 (!%p3864_p11), %v3866_v7, %v855_v12  ;;  %v871_v24 = vadd.f32 (!%p3864_p11), %v3866_v7, %v856_v13 }
  0x58   : > { %825 = vst.msk [vmem:[#allocation2 + $0x251] sm:$0xff] %vm538_vm0, %v792_v42  ;;  %826 = vst.msk [vmem:[#allocation2 + $0x261] sm:$0xff] %vm538_vm0, %v793_v47  ;;  %v872_v25 = vadd.f32 (!%p3864_p11), %v3866_v7, %v857_v14  ;;  %v861_v26 = vmul.f32 (!%p3864_p11), %v3865_v6, %v846_v22  ;;  %v877_v27 = vmax.f32 (!%p3864_p11), %v869_v18, 0.0  ;;  %v874_v29 = vadd.f32 (!%p3864_p11), %v3866_v7, %v859_v20 }
  0x59   : > { %827 = vst.msk [vmem:[#allocation2 + $0x291] sm:$0xff] %vm538_vm0, %v794_v59  ;;  %828 = vst.msk [vmem:[#allocation2 + $0x2a1] sm:$0xff] %vm538_vm0, %v795_v60  ;;  %v873_v28 = vadd.f32 (!%p3864_p11), %v3866_v7, %v858_v19  ;;  %v875_v30 = vadd.f32 (!%p3864_p11), %v3866_v7, %v860_v21  ;;  %v878_v31 = vmax.f32 (!%p3864_p11), %v870_v23, 0.0  ;;  %v879_v32 = vmax.f32 (!%p3864_p11), %v871_v24, 0.0 }
  0x5a   : > { %829 = vst.msk [vmem:[#allocation2 + $0x2b1] sm:$0xff] %vm538_vm0, %v796_v61  ;;  %830 = vst.msk [vmem:[#allocation2 + $0x2c1] sm:$0xff] %vm538_vm0, %v797_v63  ;;  %v880_v33 = vmax.f32 (!%p3864_p11), %v872_v25, 0.0  ;;  %v876_v34 = vadd.f32 (!%p3864_p11), %v3866_v7, %v861_v26  ;;  %v882_v36 = vmax.f32 (!%p3864_p11), %v874_v29, 0.0 }
  0x5b   : > { %831 = vst.msk [vmem:[#allocation2 + $0x2d1] sm:$0xff] %vm538_vm0, %v798_v0  ;;  %832 = vst.msk [vmem:[#allocation2 + $0x2e1] sm:$0xff] %vm538_vm0, %v799_v3  ;;  %v881_v35 = vmax.f32 (!%p3864_p11), %v873_v28, 0.0  ;;  %v883_v37 = vmax.f32 (!%p3864_p11), %v875_v30, 0.0 }
  0x5c   : > { %833 = vst.msk [vmem:[#allocation2 + $0x2f1] sm:$0xff] %vm538_vm0, %v800_v5  ;;  %834 = vst.msk [vmem:[#allocation2 + $0x301] sm:$0xff] %vm538_vm0, %v801_v1  ;;  %v884_v38 = vmax.f32 (!%p3864_p11), %v876_v34, 0.0 }
  0x5d   : > { %886 = vst.msk [vmem:[#allocation2 + $0x11] sm:$0xff] %vm538_vm0, %v877_v27  ;;  %887 = vst.msk [vmem:[#allocation2 + $0x21] sm:$0xff] %vm538_vm0, %v878_v31 }
  0x5e   : > { %888 = vst.msk [vmem:[#allocation2 + $0x31] sm:$0xff] %vm538_vm0, %v879_v32  ;;  %889 = vst.msk [vmem:[#allocation2 + $0x41] sm:$0xff] %vm538_vm0, %v880_v33 }
  0x5f   : > { %890 = vst.msk [vmem:[#allocation2 + $0x51] sm:$0xff] %vm538_vm0, %v881_v35  ;;  %891 = vst.msk [vmem:[#allocation2 + $0x61] sm:$0xff] %vm538_vm0, %v882_v36 }
  0x60   : > { %892 = vst.msk [vmem:[#allocation2 + $0x71] sm:$0xff] %vm538_vm0, %v883_v37  ;;  %893 = vst.msk [vmem:[#allocation2 + $0x81] sm:$0xff] %vm538_vm0, %v884_v38 }
  0x61 PF: > { %p3867_p12 = scmp.ge.s32.totalorder %s4542_s30, 1 }
  0x62   : > { %v898_v39 = vld [vmem:[%s4987_s21] sm:$0xff] (!%p3867_p12)  ;;  %v899_v43 = vld [vmem:[%s4987_s21 + $0x8] sm:$0xff] (!%p3867_p12)  ;;  %v900_v44 = vld [vmem:[%s4987_s21 + $0x10] sm:$0xff] (!%p3867_p12) }
  0x63   : > { %897 = sbr.rel (%p3867_p12) target bundleno = 110 (0x6e), region = 56  ;;  %v3868_v40 = vld [vmem:[%s6833_s3] ss:$0 sm:$0xff] (!%p3867_p12)  ;;  %v901_v45 = vld [vmem:[%s4987_s21 + $0x18] sm:$0xff] (!%p3867_p12)  ;;  %v903_v50 = vld [vmem:[%s4987_s21 + $0x28] sm:$0xff] (!%p3867_p12) }
  0x64   : > { %v3869_v41 = vld [vmem:[%s6834_s4] ss:$0 sm:$0xff] (!%p3867_p12)  ;;  %v913_v42 = vmul.f32 (!%p3867_p12), %v3868_v40, %v898_v39  ;;  %v914_v46 = vmul.f32 (!%p3867_p12), %v3868_v40, %v899_v43  ;;  %v915_v47 = vmul.f32 (!%p3867_p12), %v3868_v40, %v900_v44  ;;  %v916_v48 = vmul.f32 (!%p3867_p12), %v3868_v40, %v901_v45  ;;  %v904_v51 = vld [vmem:[%s4987_s21 + $0x30] sm:$0xff] (!%p3867_p12)  ;;  %v905_v56 = vld [vmem:[%s4987_s21 + $0x38] sm:$0xff] (!%p3867_p12) }
  0x65   : > { %v902_v49 = vld [vmem:[%s4987_s21 + $0x20] sm:$0xff] (!%p3867_p12)  ;;  %v918_v54 = vmul.f32 (!%p3867_p12), %v3868_v40, %v903_v50  ;;  %v919_v55 = vmul.f32 (!%p3867_p12), %v3868_v40, %v904_v51  ;;  %v920_v60 = vmul.f32 (!%p3867_p12), %v3868_v40, %v905_v56 }
  0x66   : > { %v928_v52 = vadd.f32 (!%p3867_p12), %v3869_v41, %v913_v42  ;;  %v917_v53 = vmul.f32 (!%p3867_p12), %v3868_v40, %v902_v49  ;;  %v929_v57 = vadd.f32 (!%p3867_p12), %v3869_v41, %v914_v46  ;;  %v930_v58 = vadd.f32 (!%p3867_p12), %v3869_v41, %v915_v47 }
  0x67   : > { %v931_v59 = vadd.f32 (!%p3867_p12), %v3869_v41, %v916_v48  ;;  %v933_v63 = vadd.f32 (!%p3867_p12), %v3869_v41, %v918_v54  ;;  %v934_v0 = vadd.f32 (!%p3867_p12), %v3869_v41, %v919_v55  ;;  %v935_v1 = vadd.f32 (!%p3867_p12), %v3869_v41, %v920_v60 }
  0x68   : > { %v936_v61 = vmax.f32 (!%p3867_p12), %v928_v52, 0.0  ;;  %v932_v62 = vadd.f32 (!%p3867_p12), %v3869_v41, %v917_v53  ;;  %v937_v3 = vmax.f32 (!%p3867_p12), %v929_v57, 0.0  ;;  %v938_v4 = vmax.f32 (!%p3867_p12), %v930_v58, 0.0 }
  0x69   : > { %v939_v5 = vmax.f32 (!%p3867_p12), %v931_v59, 0.0  ;;  %v941_v6 = vmax.f32 (!%p3867_p12), %v933_v63, 0.0  ;;  %v942_v7 = vmax.f32 (!%p3867_p12), %v934_v0, 0.0  ;;  %v943_v8 = vmax.f32 (!%p3867_p12), %v935_v1, 0.0 }
  0x6a   : > { %945 = vst.msk [vmem:[#allocation2 + $0x331] sm:$0xff] %vm538_vm0, %v936_v61  ;;  %v940_v2 = vmax.f32 %v932_v62, 0.0  ;;  %946 = vst.msk [vmem:[#allocation2 + $0x341] sm:$0xff] %vm538_vm0, %v937_v3 }
  0x6b   : > { %947 = vst.msk [vmem:[#allocation2 + $0x351] sm:$0xff] %vm538_vm0, %v938_v4  ;;  %948 = vst.msk [vmem:[#allocation2 + $0x361] sm:$0xff] %vm538_vm0, %v939_v5 }
  0x6c   : > { %949 = vst.msk [vmem:[#allocation2 + $0x371] sm:$0xff] %vm538_vm0, %v940_v2  ;;  %950 = vst.msk [vmem:[#allocation2 + $0x381] sm:$0xff] %vm538_vm0, %v941_v6 }
  0x6d   : > { %951 = vst.msk [vmem:[#allocation2 + $0x391] sm:$0xff] %vm538_vm0, %v942_v7  ;;  %952 = vst.msk [vmem:[#allocation2 + $0x3a1] sm:$0xff] %vm538_vm0, %v943_v8 }
  0x6e PF: > { %v957_v9 = vld [vmem:[#allocation2 + $0x20] sm:$0xff]  ;;  %v958_v10 = vld [vmem:[#allocation2 + $0x28] sm:$0x3]  ;;  %vm1193_vm2 = vcmask 1046528   ;;  %v955_v11 = vld [vmem:[#allocation2 + $0x10] sm:$0xff]  ;;  %s4561_s30 = smov 8  }
  0x6f   : > { %v1200_v12 = vrot.slane %v957_v9, 1  ;;  %v1201_v13 = vrot.slane %v958_v10, 1  ;;  %v956_v14 = vld [vmem:[#allocation2 + $0x18] sm:$0x3]  ;;  %v1197_v15 = vrot.slane %v955_v11, 1  ;;  %v977_v16 = vld [vmem:[#allocation2 + $0xc0] sm:$0xff] }
  0x70   : > { %v1198_v17 = vrot.slane %v956_v14, 1  ;;  %v978_v18 = vld [vmem:[#allocation2 + $0xc8] sm:$0x3]  ;;  %v1230_v19 = vrot.slane %v977_v16, 1  ;;  %v5139_v20 = vld [vmem:[#allocation2 + $0xb0] sm:$0xff]  ;;  %vm1554_vm3 = vcmask 1045504  }
  0x71   : > { %v1202_v21 = vsel %vm1193_vm2, %v1200_v12, %v1201_v13  ;;  %v1231_v22 = vrot.slane %v978_v18, 1  ;;  %v976_v23 = vld [vmem:[#allocation2 + $0xb8] sm:$0x3]  ;;  %v1227_v24 = vrot.slane %v5139_v20, 1  ;;  %v1588_v28 = vrot.slane %v5139_v20, 2  ;;  %v979_v33 = vld [vmem:[#allocation2 + $0xd0] sm:$0xff] }
  0x72   : > { %1378 = vrot.lane.b32.xlu1 %v1202_v21, %s4561_s30  ;;  %v1199_v25 = vsel %vm1193_vm2, %v1197_v15, %v1198_v17  ;;  %v1228_v26 = vrot.slane %v976_v23, 1  ;;  %v1589_v29 = vrot.slane %v976_v23, 2  ;;  %v1558_v31 = vrot.slane %v955_v11, 2  ;;  %v980_v34 = vld [vmem:[#allocation2 + $0xd8] sm:$0x3]  ;;  %v959_v35 = vld [vmem:[#allocation2 + $0x30] sm:$0xff] }
  0x73   : > { %1376 = vrot.lane.b32.xlu0 %v1199_v25, %s4561_s30  ;;  %v1232_v27 = vsel %vm1193_vm2, %v1230_v19, %v1231_v22  ;;  %v1559_v32 = vrot.slane %v956_v14, 2  ;;  %v960_v36 = vld [vmem:[#allocation2 + $0x38] sm:$0x3]  ;;  %v1233_v38 = vrot.slane %v979_v33, 1  ;;  %v1234_v39 = vrot.slane %v980_v34, 1  ;;  %s4562_s21 = smov 16  }
  0x74   : > { %v1229_v30 = vsel %vm1193_vm2, %v1227_v24, %v1228_v26  ;;  %v1590_v37 = vsel %vm1554_vm3, %v1588_v28, %v1589_v29  ;;  %v1203_v41 = vrot.slane %v959_v35, 1  ;;  %v1204_v42 = vrot.slane %v960_v36, 1  ;;  %v981_v55 = vld [vmem:[#allocation2 + $0xe0] sm:$0xff]  ;;  %v982_v56 = vld [vmem:[#allocation2 + $0xe8] sm:$0x3]  ;;  %v983_v3 = vld [vmem:[#allocation2 + $0xf0] sm:$0xff] }
  0x75   : > { %v1560_v40 = vsel %vm1554_vm3, %v1558_v31, %v1559_v32  ;;  %v1235_v43 = vsel %vm1193_vm2, %v1233_v38, %v1234_v39  ;;  %v1591_v44 = vrot.slane %v977_v16, 2  ;;  %v1592_v45 = vrot.slane %v978_v18, 2  ;;  %v961_v57 = vld [vmem:[#allocation2 + $0x40] sm:$0xff]  ;;  %v962_v58 = vld [vmem:[#allocation2 + $0x48] sm:$0x3]  ;;  %v963_v5 = vld [vmem:[#allocation2 + $0x50] sm:$0xff] }
  0x76   : > { %1398 = vrot.lane.b32.xlu1 %v1232_v27, %s4561_s30  ;;  %v1205_v46 = vsel %vm1193_vm2, %v1203_v41, %v1204_v42  ;;  %v1561_v47 = vrot.slane %v957_v9, 2  ;;  %v1562_v48 = vrot.slane %v958_v10, 2  ;;  %v1594_v50 = vrot.slane %v979_v33, 2  ;;  %v984_v4 = vld [vmem:[#allocation2 + $0xf8] sm:$0x3]  ;;  %v985_v24 = vld [vmem:[#allocation2 + $0x100] sm:$0xff] }
  0x77   : > { %1396 = vrot.lane.b32.xlu0 %v1229_v30, %s4561_s30  ;;  %v1593_v49 = vsel %vm1554_vm3, %v1591_v44, %v1592_v45  ;;  %v1595_v51 = vrot.slane %v980_v34, 2  ;;  %v1564_v53 = vrot.slane %v959_v35, 2  ;;  %v1565_v54 = vrot.slane %v960_v36, 2  ;;  %v964_v1 = vld [vmem:[#allocation2 + $0x58] sm:$0x3]  ;;  %v965_v26 = vld [vmem:[#allocation2 + $0x60] sm:$0xff] }
  0x78   : > { %v1563_v52 = vsel %vm1554_vm3, %v1561_v47, %v1562_v48  ;;  %v1236_v60 = vrot.slane %v981_v55, 1  ;;  %v1237_v61 = vrot.slane %v982_v56, 1  ;;  %v1206_v63 = vrot.slane %v961_v57, 1  ;;  %v986_v25 = vld [vmem:[#allocation2 + $0x108] sm:$0x3]  ;;  %v987_v34 = vld [vmem:[#allocation2 + $0x110] sm:$0xff] }
  0x79   : > { %v1596_v59 = vsel %vm1554_vm3, %v1594_v50, %v1595_v51  ;;  %v1566_v62 = vsel %vm1554_vm3, %v1564_v53, %v1565_v54  ;;  %v1207_v0 = vrot.slane %v962_v58, 1  ;;  %v1239_v6 = vrot.slane %v983_v3, 1  ;;  %v966_v27 = vld [vmem:[#allocation2 + $0x68] sm:$0x3]  ;;  %v988_v35 = vld [vmem:[#allocation2 + $0x118] sm:$0x3] }
  0x7a   : > { %1757 = vrot.lane.b32.xlu1 %v1590_v37, %s4562_s21  ;;  %v1238_v2 = vsel %vm1193_vm2, %v1236_v60, %v1237_v61  ;;  %v1240_v7 = vrot.slane %v984_v4, 1  ;;  %v1209_v9 = vrot.slane %v963_v5, 1  ;;  %v1210_v10 = vrot.slane %v964_v1, 1  ;;  %v967_v36 = vld [vmem:[#allocation2 + $0x70] sm:$0xff]  ;;  %v968_v37 = vld [vmem:[#allocation2 + $0x78] sm:$0x3] }
  0x7b   : > { %1737 = vrot.lane.b32.xlu0 %v1560_v40, %s4562_s21  ;;  %v1208_v8 = vsel %vm1193_vm2, %v1206_v63, %v1207_v0  ;;  %v1597_v12 = vrot.slane %v981_v55, 2  ;;  %v1598_v13 = vrot.slane %v982_v56, 2  ;;  %v1567_v15 = vrot.slane %v961_v57, 2  ;;  %v5193_v56 = vld [vmem:[#allocation2 + $0x120] sm:$0xff]  ;;  %v990_v57 = vld [vmem:[#allocation2 + $0x128] sm:$0x3] }
  0x7c   : > { %v1241_v11 = vsel %vm1193_vm2, %v1239_v6, %v1240_v7  ;;  %v1211_v14 = vsel %vm1193_vm2, %v1209_v9, %v1210_v10  ;;  %v1568_v16 = vrot.slane %v962_v58, 2  ;;  %v1600_v18 = vrot.slane %v983_v3, 2  ;;  %v5195_v58 = vld [vmem:[#allocation2 + $0x80] sm:$0xff]  ;;  %s4563_s20 = smov 24   ;;  %s4564_s18 = smov 48  }
  0x7d   : > { %v1599_v17 = vsel %vm1554_vm3, %v1597_v12, %v1598_v13  ;;  %v1601_v19 = vrot.slane %v984_v4, 2  ;;  %v1570_v22 = vrot.slane %v963_v5, 2  ;;  %v1571_v23 = vrot.slane %v964_v1, 2  ;;  %v991_v4 = vld [vmem:[#allocation2 + $0x130] sm:$0xff]  ;;  %v992_v5 = vld [vmem:[#allocation2 + $0x138] sm:$0x3] }
  0x7e   : > { %1400 = vrot.lane.b32.xlu1 %v1235_v43, %s4561_s30  ;;  %v1569_v21 = vsel %vm1554_vm3, %v1567_v15, %v1568_v16  ;;  %v1242_v29 = vrot.slane %v985_v24, 1  ;;  %v1243_v30 = vrot.slane %v986_v25, 1  ;;  %v1212_v32 = vrot.slane %v965_v26, 1  ;;  %v5203_v1 = vld [vmem:[#allocation2 + $0x90] sm:$0xff] }
  0x7f   : > { %1380 = vrot.lane.b32.xlu0 %v1205_v46, %s4561_s30  ;;  %v1602_v28 = vsel %vm1554_vm3, %v1600_v18, %v1601_v19  ;;  %v1572_v31 = vsel %vm1554_vm3, %v1570_v22, %v1571_v23  ;;  %v1213_v33 = vrot.slane %v966_v27, 1  ;;  %v1245_v39 = vrot.slane %v987_v34, 1 }
  0x80   : > { %v1244_v38 = vsel %vm1193_vm2, %v1242_v29, %v1243_v30  ;;  %v1246_v40 = vrot.slane %v988_v35, 1  ;;  %v1215_v42 = vrot.slane %v967_v36, 1  ;;  %v1216_v43 = vrot.slane %v968_v37, 1 }
  0x81   : > { %v1214_v41 = vsel %vm1193_vm2, %v1212_v32, %v1213_v33  ;;  %v1603_v45 = vrot.slane %v985_v24, 2  ;;  %v1604_v46 = vrot.slane %v986_v25, 2  ;;  %v1573_v48 = vrot.slane %v965_v26, 2  ;;  %v5221_v25 = vld [vmem:[#allocation2 + $0x160] sm:$0xff]  ;;  %v998_v26 = vld [vmem:[#allocation2 + $0x168] sm:$0x3] }
  0x82   : > { %1759 = vrot.lane.b32.xlu1 %v1593_v49, %s4562_s21  ;;  %v1247_v44 = vsel %vm1193_vm2, %v1245_v39, %v1246_v40  ;;  %v1217_v47 = vsel %vm1193_vm2, %v1215_v42, %v1216_v43  ;;  %v1574_v49 = vrot.slane %v966_v27, 2  ;;  %v1606_v51 = vrot.slane %v987_v34, 2  ;;  %v5223_v27 = vld [vmem:[#allocation2 + $0x150] sm:$0xff] }
  0x83   : > { %1739 = vrot.lane.b32.xlu0 %v1563_v52, %s4562_s21  ;;  %v1605_v50 = vsel %vm1554_vm3, %v1603_v45, %v1604_v46  ;;  %v1607_v52 = vrot.slane %v988_v35, 2  ;;  %v1576_v54 = vrot.slane %v967_v36, 2  ;;  %v1577_v55 = vrot.slane %v968_v37, 2  ;;  %v5231_v35 = vld [vmem:[#allocation2 + $0x170] sm:$0xff]  ;;  %v1000_v36 = vld [vmem:[#allocation2 + $0x178] sm:$0x3] }
  0x84   : > { %v1575_v53 = vsel %vm1554_vm3, %v1573_v48, %v1574_v49  ;;  %v1248_v61 = vrot.slane %v5193_v56, 1  ;;  %v1218_v0 = vrot.slane %v5195_v58, 1  ;;  %v1251_v7 = vrot.slane %v991_v4, 1  ;;  %v1003_v49 = vld [vmem:[#allocation2 + $0x190] sm:$0xff] }
  0x85   : > { %v1608_v60 = vsel %vm1554_vm3, %v1606_v51, %v1607_v52  ;;  %v1578_v63 = vsel %vm1554_vm3, %v1576_v54, %v1577_v55  ;;  %v1221_v10 = vrot.slane %v5203_v1, 1  ;;  %v1609_v13 = vrot.slane %v5193_v56, 2  ;;  %v5245_v51 = vld [vmem:[#allocation2 + $0x180] sm:$0xff]  ;;  %v1002_v52 = vld [vmem:[#allocation2 + $0x188] sm:$0x3] }
  0x86   : > { %1761 = vrot.lane.b32.xlu1 %v1596_v59, %s4562_s21  ;;  %v970_v59 = vld [vmem:[#allocation2 + $0x88] sm:$0x3]  ;;  %v1579_v16 = vrot.slane %v5195_v58, 2  ;;  %v1612_v19 = vrot.slane %v991_v4, 2  ;;  %v1582_v23 = vrot.slane %v5203_v1, 2  ;;  %v1260_v30 = vrot.slane %v5221_v25, 1 }
  0x87   : > { %1741 = vrot.lane.b32.xlu0 %v1566_v62, %s4562_s21  ;;  %v1249_v62 = vrot.slane %v990_v57, 1  ;;  %v1219_v3 = vrot.slane %v970_v59, 1  ;;  %v1257_v33 = vrot.slane %v5223_v27, 1  ;;  %v1264_v39 = vrot.slane %v1000_v36, 1 }
  0x88   : > { %v1625_v45 = vrot.slane %v1000_v36, 2  ;;  %v1622_v48 = vrot.slane %v998_v26, 2  ;;  %v1269_v54 = vrot.slane %v1003_v49, 1  ;;  %v1628_v4 = vrot.slane %v1002_v52, 2 }
  0x89   : > { %v1250_v6 = vsel %vm1193_vm2, %v1248_v61, %v1249_v62  ;;  %v1220_v9 = vsel %vm1193_vm2, %v1218_v0, %v1219_v3  ;;  %v1630_v62 = vrot.slane %v1003_v49, 2  ;;  %v1627_v3 = vrot.slane %v5245_v51, 2 }
  0x8a   : > { %1402 = vrot.lane.b32.xlu1 %v1238_v2, %s4561_s30  ;;  %v972_v2 = vld [vmem:[#allocation2 + $0x98] sm:$0x3]  ;;  %vm1975_vm4 = vcmask 130048   ;;  %vm2378_vm5 = vcmask 195584   ;;  %vm2427_vm6 = vcmask 392192   ;;  %vm2495_vm7 = vcmask 588800  }
  0x8b   : > { %1382 = vrot.lane.b32.xlu0 %v1208_v8, %s4561_s30  ;;  %v1252_v8 = vrot.slane %v992_v5, 1  ;;  %v1583_v24 = vrot.slane %v972_v2, 2  ;;  %vm3465_vm8 = vcmask 57344  }
  0x8d   : > { %v1253_v12 = vsel %vm1193_vm2, %v1251_v7, %v1252_v8  ;;  %v1584_v32 = vsel %vm1554_vm3, %v1582_v23, %v1583_v24  ;;  %v1006_v7 = vld [vmem:[#allocation2 + $0x1a8] sm:$0x3]  ;;  %v1009_v23 = vld [vmem:[#allocation2 + $0x1c0] sm:$0xff] }
  0x8e   : > { %1404 = vrot.lane.b32.xlu1 %v1241_v11, %s4561_s30  ;;  %v1222_v11 = vrot.slane %v972_v2, 1  ;;  %v1008_v2 = vld [vmem:[#allocation2 + $0x1b8] sm:$0x3]  ;;  %v1010_v24 = vld [vmem:[#allocation2 + $0x1c8] sm:$0x3] }
  0x8f   : > { %1384 = vrot.lane.b32.xlu0 %v1211_v14, %s4561_s30  ;;  %v1610_v14 = vrot.slane %v990_v57, 2 }
  0x90   : > { %v1223_v15 = vsel %vm1193_vm2, %v1221_v10, %v1222_v11  ;;  %v1276_v10 = vrot.slane %v1008_v2, 1  ;;  %v1629_v11 = vsel %vm1554_vm3, %v1627_v3, %v1628_v4 }
  0x91   : > { %v1611_v18 = vsel %vm1554_vm3, %v1609_v13, %v1610_v14  ;;  %v1273_v13 = vrot.slane %v1006_v7, 1 }
  0x92   : > { %1763 = vrot.lane.b32.xlu1 %v1599_v17, %s4562_s21  ;;  %v1580_v17 = vrot.slane %v970_v59, 2  ;;  %v1266_v59 = vrot.slane %v5245_v51, 1 }
  0x93   : > { %1743 = vrot.lane.b32.xlu0 %v1569_v21, %s4562_s21  ;;  %v1613_v21 = vrot.slane %v992_v5, 2  ;;  %v1007_v5 = vld [vmem:[#allocation2 + $0x1b0] sm:$0xff] }
  0x94   : > { %v1581_v22 = vsel %vm1554_vm3, %v1579_v16, %v1580_v17  ;;  %v1637_v16 = vrot.slane %v1008_v2, 2  ;;  %v1024_v2 = vld [vmem:[#allocation2 + $0x238] sm:$0x3] }
  0x95   : > { %v1614_v29 = vsel %vm1554_vm3, %v1612_v19, %v1613_v21  ;;  %v1634_v19 = vrot.slane %v1006_v7, 2  ;;  %v1011_v21 = vld [vmem:[#allocation2 + $0x1d0] sm:$0xff]  ;;  %v1022_v7 = vld [vmem:[#allocation2 + $0x228] sm:$0x3] }
  0x96   : > { %1765 = vrot.lane.b32.xlu1 %v1602_v28, %s4562_s21  ;;  %v996_v28 = vld [vmem:[#allocation2 + $0x158] sm:$0x3] }
  0x97   : > { %1745 = vrot.lane.b32.xlu0 %v1572_v31, %s4562_s21  ;;  %v1261_v31 = vrot.slane %v998_v26, 1  ;;  %v1258_v34 = vrot.slane %v996_v28, 1  ;;  %v1619_v42 = vrot.slane %v996_v28, 2  ;;  %v1281_v28 = vrot.slane %v1011_v21, 1 }
  0x99   : > { %v1262_v37 = vsel %vm1193_vm2, %v1260_v30, %v1261_v31  ;;  %v1259_v40 = vsel %vm1193_vm2, %v1257_v33, %v1258_v34  ;;  %v1278_v31 = vrot.slane %v1009_v23, 1  ;;  %v1642_v34 = vrot.slane %v1011_v21, 2 }
  0x9a   : > { %1406 = vrot.lane.b32.xlu1 %v1244_v38, %s4561_s30  ;;  %v1263_v38 = vrot.slane %v5231_v35, 1 }
  0x9b   : > { %1386 = vrot.lane.b32.xlu0 %v1214_v41, %s4561_s30  ;;  %v1618_v41 = vrot.slane %v5223_v27, 2 }
  0x9c   : > { %v1265_v43 = vsel %vm1193_vm2, %v1263_v38, %v1264_v39  ;;  %v1639_v38 = vrot.slane %v1009_v23, 2  ;;  %v1640_v39 = vrot.slane %v1010_v24, 2  ;;  %v1658_v23 = vrot.slane %v1022_v7, 2 }
  0x9d   : > { %v1620_v46 = vsel %vm1554_vm3, %v1618_v41, %v1619_v42  ;;  %v1018_v41 = vld [vmem:[#allocation2 + $0x208] sm:$0x3]  ;;  %v1015_v42 = vld [vmem:[#allocation2 + $0x1f0] sm:$0xff] }
  0x9e   : > { %1408 = vrot.lane.b32.xlu1 %v1247_v44, %s4561_s30  ;;  %v1624_v44 = vrot.slane %v5231_v35, 2  ;;  %v1652_v4 = vrot.slane %v1018_v41, 2 }
  0x9f   : > { %1388 = vrot.lane.b32.xlu0 %v1217_v47, %s4561_s30  ;;  %v1621_v47 = vrot.slane %v5221_v25, 2 }
  0xa1   : > { %v1623_v57 = vsel %vm1554_vm3, %v1621_v47, %v1622_v48  ;;  %v1641_v47 = vsel %vm1554_vm3, %v1639_v38, %v1640_v39  ;;  %v1287_v48 = vrot.slane %v1015_v42, 1 }
  0xa2   : > { %1767 = vrot.lane.b32.xlu1 %v1605_v50, %s4562_s21  ;;  %v1004_v50 = vld [vmem:[#allocation2 + $0x198] sm:$0x3] }
  0xa3   : > { %1747 = vrot.lane.b32.xlu0 %v1575_v53, %s4562_s21  ;;  %v1626_v53 = vsel %vm1554_vm3, %v1624_v44, %v1625_v45  ;;  %v1270_v55 = vrot.slane %v1004_v50, 1 }
  0xa5   : > { %v1271_v61 = vsel %vm1193_vm2, %v1269_v54, %v1270_v55 }
  0xa6   : > { %1769 = vrot.lane.b32.xlu1 %v1608_v60, %s4562_s21  ;;  %v1267_v60 = vrot.slane %v1002_v52, 1  ;;  %v1020_v52 = vld [vmem:[#allocation2 + $0x218] sm:$0x3] }
  0xa7   : > { %1749 = vrot.lane.b32.xlu0 %v1578_v63, %s4562_s21  ;;  %v1631_v63 = vrot.slane %v1004_v50, 2  ;;  %v1019_v50 = vld [vmem:[#allocation2 + $0x210] sm:$0xff]  ;;  %v1294_v55 = vrot.slane %v1020_v52, 1 }
  0xa8   : > { %v1268_v0 = vsel %vm1193_vm2, %v1266_v59, %v1267_v60  ;;  %v1293_v54 = vrot.slane %v1019_v50, 1  ;;  %v1648_v59 = vrot.slane %v1015_v42, 2 }
  0xa9   : > { %v1632_v8 = vsel %vm1554_vm3, %v1630_v62, %v1631_v63  ;;  %v1654_v62 = vrot.slane %v1019_v50, 2  ;;  %v1655_v63 = vrot.slane %v1020_v52, 2  ;;  %v1029_v50 = vld [vmem:[#allocation2 + $0x260] sm:$0xff]  ;;  %v1030_v52 = vld [vmem:[#allocation2 + $0x268] sm:$0x3] }
  0xaa   : > { %1410 = vrot.lane.b32.xlu1 %v1250_v6, %s4561_s30  ;;  %v1005_v6 = vld [vmem:[#allocation2 + $0x1a0] sm:$0xff] }
  0xab   : > { %1390 = vrot.lane.b32.xlu0 %v1220_v9, %s4561_s30  ;;  %v1275_v9 = vrot.slane %v1007_v5, 1 }
  0xad   : > { %v1277_v14 = vsel %vm1193_vm2, %v1275_v9, %v1276_v10  ;;  %v1300_v10 = vrot.slane %v1024_v2, 1 }
  0xae   : > { %1412 = vrot.lane.b32.xlu1 %v1253_v12, %s4561_s30  ;;  %v1272_v12 = vrot.slane %v1005_v6, 1 }
  0xaf   : > { %1392 = vrot.lane.b32.xlu0 %v1223_v15, %s4561_s30  ;;  %v1636_v15 = vrot.slane %v1007_v5, 2  ;;  %v1023_v5 = vld [vmem:[#allocation2 + $0x230] sm:$0xff] }
  0xb0   : > { %v1274_v17 = vsel %vm1193_vm2, %v1272_v12, %v1273_v13  ;;  %v1299_v9 = vrot.slane %v1023_v5, 1 }
  0xb1   : > { %v1638_v26 = vsel %vm1554_vm3, %v1636_v15, %v1637_v16 }
  0xb2   : > { %1771 = vrot.lane.b32.xlu1 %v1611_v18, %s4562_s21  ;;  %v1633_v18 = vrot.slane %v1005_v6, 2  ;;  %v1021_v6 = vld [vmem:[#allocation2 + $0x220] sm:$0xff]  ;;  %v1301_v16 = vsel %vm1193_vm2, %v1299_v9, %v1300_v10  ;;  %v1035_v10 = vld [vmem:[#allocation2 + $0x290] sm:$0xff] }
  0xb3   : > { %1751 = vrot.lane.b32.xlu0 %v1581_v22, %s4562_s21  ;;  %v1012_v22 = vld [vmem:[#allocation2 + $0x1d8] sm:$0x3]  ;;  %v1296_v13 = vrot.slane %v1021_v6, 1 }
  0xb4   : > { %v1635_v30 = vsel %vm1554_vm3, %v1633_v18, %v1634_v19  ;;  %v1643_v36 = vrot.slane %v1012_v22, 2  ;;  %v1661_v18 = vrot.slane %v1024_v2, 2  ;;  %v1669_v2 = vrot.slane %v1029_v50, 2 }
  0xb6   : > { %1773 = vrot.lane.b32.xlu1 %v1614_v29, %s4562_s21  ;;  %v1282_v29 = vrot.slane %v1012_v22, 1  ;;  %v1644_v44 = vsel %vm1554_vm3, %v1642_v34, %v1643_v36  ;;  %v1657_v22 = vrot.slane %v1021_v6, 2  ;;  %v1670_v6 = vrot.slane %v1030_v52, 2 }
  0xb7   : > { %1753 = vrot.lane.b32.xlu0 %v1584_v32, %s4562_s21  ;;  %v1279_v32 = vrot.slane %v1010_v24, 1  ;;  %v1027_v24 = vld [vmem:[#allocation2 + $0x250] sm:$0xff] }
  0xb8   : > { %v1283_v33 = vsel %vm1193_vm2, %v1281_v28, %v1282_v29  ;;  %v1025_v29 = vld [vmem:[#allocation2 + $0x240] sm:$0xff]  ;;  %v1659_v36 = vsel %vm1554_vm3, %v1657_v22, %v1658_v23  ;;  %v1039_v23 = vld [vmem:[#allocation2 + $0x2b0] sm:$0xff] }
  0xba   : > { %1418 = vrot.lane.b32.xlu1 %v1262_v37, %s4561_s30  ;;  %v1280_v37 = vsel %vm1193_vm2, %v1278_v31, %v1279_v32  ;;  %v1305_v32 = vrot.slane %v1027_v24, 1 }
  0xbb   : > { %1416 = vrot.lane.b32.xlu0 %v1259_v40, %s4561_s30  ;;  %v1017_v40 = vld [vmem:[#allocation2 + $0x200] sm:$0xff] }
  0xbc   : > { %v1290_v45 = vrot.slane %v1017_v40, 1  ;;  %v1651_v3 = vrot.slane %v1017_v40, 2 }
  0xbe   : > { %1420 = vrot.lane.b32.xlu1 %v1265_v43, %s4561_s30  ;;  %v1016_v43 = vld [vmem:[#allocation2 + $0x1f8] sm:$0x3]  ;;  %v1653_v12 = vsel %vm1554_vm3, %v1651_v3, %v1652_v4 }
  0xbf   : > { %1777 = vrot.lane.b32.xlu0 %v1620_v46, %s4562_s21  ;;  %v1291_v46 = vrot.slane %v1018_v41, 1  ;;  %v1288_v49 = vrot.slane %v1016_v43, 1  ;;  %v1649_v60 = vrot.slane %v1016_v43, 2  ;;  %v1666_v41 = vrot.slane %v1027_v24, 2  ;;  %v1040_v24 = vld [vmem:[#allocation2 + $0x2b8] sm:$0x3] }
  0xc2   : > { %1781 = vrot.lane.b32.xlu1 %v1626_v53, %s4562_s21  ;;  %v1292_v53 = vsel %vm1193_vm2, %v1290_v45, %v1291_v46  ;;  %v1663_v45 = vrot.slane %v1025_v29, 2 }
  0xc3   : > { %1779 = vrot.lane.b32.xlu0 %v1623_v57, %s4562_s21  ;;  %v1289_v57 = vsel %vm1193_vm2, %v1287_v48, %v1288_v49  ;;  %v1032_v48 = vld [vmem:[#allocation2 + $0x278] sm:$0x3] }
  0xc4   : > { %v1673_v3 = vrot.slane %v1032_v48, 2 }
  0xc6   : > { %1424 = vrot.lane.b32.xlu1 %v1271_v61, %s4561_s30  ;;  %v1295_v61 = vsel %vm1193_vm2, %v1293_v54, %v1294_v55  ;;  %v1312_v55 = vrot.slane %v1032_v48, 1  ;;  %v1043_v48 = vld [vmem:[#allocation2 + $0x2d0] sm:$0xff] }
  0xc7   : > { %1422 = vrot.lane.b32.xlu0 %v1268_v0, %s4561_s30  ;;  %v1650_v0 = vsel %vm1554_vm3, %v1648_v59, %v1649_v60  ;;  %v1308_v60 = vrot.slane %v1029_v50, 1  ;;  %v1044_v50 = vld [vmem:[#allocation2 + $0x2d8] sm:$0x3] }
  0xca   : > { %1785 = vrot.lane.b32.xlu1 %v1632_v8, %s4562_s21  ;;  %v1656_v8 = vsel %vm1554_vm3, %v1654_v62, %v1655_v63 }
  0xcb   : > { %1783 = vrot.lane.b32.xlu0 %v1629_v11, %s4562_s21 }
  0xce   : > { %1428 = vrot.lane.b32.xlu1 %v1277_v14, %s4561_s30  ;;  %v1297_v14 = vrot.slane %v1022_v7, 1  ;;  %v1037_v7 = vld [vmem:[#allocation2 + $0x2a0] sm:$0xff] }
  0xcf   : > { %1426 = vrot.lane.b32.xlu0 %v1274_v17, %s4561_s30  ;;  %v1660_v17 = vrot.slane %v1023_v5, 2 }
  0xd0   : > { %v1298_v21 = vsel %vm1193_vm2, %v1296_v13, %v1297_v14  ;;  %v1320_v14 = vrot.slane %v1037_v7, 1 }
  0xd1   : > { %v1662_v31 = vsel %vm1554_vm3, %v1660_v17, %v1661_v18  ;;  %v1671_v18 = vsel %vm1554_vm3, %v1669_v2, %v1670_v6  ;;  %v1690_v6 = vrot.slane %v1043_v48, 2 }
  0xd2   : > { %1789 = vrot.lane.b32.xlu1 %v1638_v26, %s4562_s21  ;;  %v1028_v26 = vld [vmem:[#allocation2 + $0x258] sm:$0x3] }
  0xd3   : > { %1787 = vrot.lane.b32.xlu0 %v1635_v30, %s4562_s21  ;;  %v1026_v30 = vld [vmem:[#allocation2 + $0x248] sm:$0x3]  ;;  %v1667_v42 = vrot.slane %v1028_v26, 2 }
  0xd4   : > { %v1303_v38 = vrot.slane %v1026_v30, 1  ;;  %v1664_v46 = vrot.slane %v1026_v30, 2  ;;  %v1323_v30 = vrot.slane %v1039_v23, 1 }
  0xd6   : > { %1432 = vrot.lane.b32.xlu1 %v1283_v33, %s4561_s30  ;;  %v1306_v33 = vrot.slane %v1028_v26, 1  ;;  %v1665_v59 = vsel %vm1554_vm3, %v1663_v45, %v1664_v46  ;;  %v1681_v46 = vrot.slane %v1037_v7, 2  ;;  %v1691_v7 = vrot.slane %v1044_v50, 2 }
  0xd7   : > { %1430 = vrot.lane.b32.xlu0 %v1280_v37, %s4561_s30  ;;  %v1302_v37 = vrot.slane %v1025_v29, 1 }
  0xd8   : > { %v1307_v40 = vsel %vm1193_vm2, %v1305_v32, %v1306_v33 }
  0xda   : > { %1793 = vrot.lane.b32.xlu1 %v1644_v44, %s4562_s21  ;;  %v1304_v44 = vsel %vm1193_vm2, %v1302_v37, %v1303_v38 }
  0xdb   : > { %1791 = vrot.lane.b32.xlu0 %v1641_v47, %s4562_s21  ;;  %v1031_v47 = vld [vmem:[#allocation2 + $0x270] sm:$0xff] }
  0xdc   : > { %v1311_v54 = vrot.slane %v1031_v47, 1 }
  0xde   : > { %1438 = vrot.lane.b32.xlu1 %v1292_v53, %s4561_s30  ;;  %v1668_v53 = vsel %vm1554_vm3, %v1666_v41, %v1667_v42  ;;  %v1313_v63 = vsel %vm1193_vm2, %v1311_v54, %v1312_v55  ;;  %v1684_v41 = vrot.slane %v1039_v23, 2  ;;  %v1685_v42 = vrot.slane %v1040_v24, 2  ;;  %v1042_v54 = vld [vmem:[#allocation2 + $0x2c8] sm:$0x3] }
  0xdf   : > { %1436 = vrot.lane.b32.xlu0 %v1289_v57, %s4561_s30  ;;  %v1692_v23 = vsel %vm1554_vm3, %v1690_v6, %v1691_v7 }
  0xe0   : > { %v1686_v55 = vsel %vm1554_vm3, %v1684_v41, %v1685_v42  ;;  %v5384_v42 = vld [vmem:[#allocation2 + $0xa0] sm:$0xff] }
  0xe2   : > { %1440 = vrot.lane.b32.xlu1 %v1295_v61, %s4561_s30  ;;  %v1309_v61 = vrot.slane %v1030_v52, 1 }
  0xe3   : > { %1797 = vrot.lane.b32.xlu0 %v1650_v0, %s4562_s21  ;;  %v1672_v0 = vrot.slane %v1031_v47, 2 }
  0xe4   : > { %v5288_v11 = vpop.permute.xlu1 %1378  ;;  %v1310_v5 = vsel %vm1193_vm2, %v1308_v60, %v1309_v61  ;;  %v1330_v60 = vrot.slane %v1044_v50, 1 }
  0xe5   : > { %v5291_v15 = vpop.permute.xlu0 %1376  ;;  %v1674_v13 = vsel %vm1554_vm3, %v1672_v0, %v1673_v3  ;;  %v1327_v3 = vrot.slane %v1042_v54, 1 }
  0xe6   : > { %1801 = vrot.lane.b32.xlu1 %v1656_v8, %s4562_s21  ;;  %v1038_v8 = vld [vmem:[#allocation2 + $0x2a8] sm:$0x3] }
  0xe7   : > { %1799 = vrot.lane.b32.xlu0 %v1653_v12, %s4562_s21  ;;  %v1036_v12 = vld [vmem:[#allocation2 + $0x298] sm:$0x3]  ;;  %v1682_v47 = vrot.slane %v1038_v8, 2 }
  0xe8   : > { %v5296_v19 = vpop.permute.xlu1 %1398  ;;  %v1318_v22 = vrot.slane %v1036_v12, 1  ;;  %v1679_v37 = vrot.slane %v1036_v12, 2 }
  0xe9   : > { %v5299_v28 = vpop.permute.xlu0 %1396 }
  0xea   : > { %1444 = vrot.lane.b32.xlu1 %v1301_v16, %s4561_s30  ;;  %v1321_v16 = vrot.slane %v1038_v8, 1 }
  0xeb   : > { %1442 = vrot.lane.b32.xlu0 %v1298_v21, %s4561_s30  ;;  %v1317_v21 = vrot.slane %v1035_v10, 1 }
  0xec   : > { %v5304_v34 = vpop.permute.xlu1 %1757  ;;  %v1322_v29 = vsel %vm1193_vm2, %v1320_v14, %v1321_v16  ;;  %v5371_v14 = vld [vmem:[#allocation2] sm:$0xff]  ;;  %v954_v16 = vld [vmem:[#allocation2 + $0x8] sm:$0x3] }
  0xed   : > { %v5307_v39 = vpop.permute.xlu0 %1737  ;;  %v1319_v33 = vsel %vm1193_vm2, %v1317_v21, %v1318_v22  ;;  %v1045_v21 = vld [vmem:[#allocation2 + $0x2e0] sm:$0xff]  ;;  %v1046_v22 = vld [vmem:[#allocation2 + $0x2e8] sm:$0x3] }
  0xee   : > { %1805 = vrot.lane.b32.xlu1 %v1662_v31, %s4562_s21  ;;  %v1324_v31 = vrot.slane %v1040_v24, 1  ;;  %v1194_v24 = vrot.slane %v5371_v14, 1 }
  0xef   : > { %1803 = vrot.lane.b32.xlu0 %v1659_v36, %s4562_s21  ;;  %v1678_v36 = vrot.slane %v1035_v10, 2 }
  0xf0   : > { %v5312_v43 = vpop.permute.xlu1 %1400 }
  0xf1   : > { %v5315_v49 = vpop.permute.xlu0 %1380  ;;  %v1680_v45 = vsel %vm1554_vm3, %v1678_v36, %v1679_v37  ;;  %v1333_v36 = vrot.slane %v1046_v22, 1  ;;  %v1047_v37 = vld [vmem:[#allocation2 + $0x2f0] sm:$0xff] }
  0xf2   : > { %1448 = vrot.lane.b32.xlu1 %v1307_v40, %s4561_s30  ;;  %v1325_v40 = vsel %vm1193_vm2, %v1323_v30, %v1324_v31 }
  0xf3   : > { %1446 = vrot.lane.b32.xlu0 %v1304_v44, %s4561_s30 }
  0xf4   : > { %v5320_v57 = vpop.permute.xlu1 %1759 }
  0xf5   : > { %v5323_v62 = vpop.permute.xlu0 %1739 }
  0xf6   : > { %1809 = vrot.lane.b32.xlu1 %v1668_v53, %s4562_s21  ;;  %v1041_v53 = vld [vmem:[#allocation2 + $0x2c0] sm:$0xff] }
  0xf7   : > { %1807 = vrot.lane.b32.xlu0 %v1665_v59, %s4562_s21  ;;  %v1329_v59 = vrot.slane %v1043_v48, 1  ;;  %v1326_v0 = vrot.slane %v1041_v53, 1  ;;  %v1687_v12 = vrot.slane %v1041_v53, 2 }
  0xf8   : > { %v5328_v4 = vpop.permute.xlu1 %1761 }
  0xf9   : > { %v5331_v9 = vpop.permute.xlu0 %1741  ;;  %v1331_v2 = vsel %vm1193_vm2, %v1329_v59, %v1330_v60  ;;  %v1328_v10 = vsel %vm1193_vm2, %v1326_v0, %v1327_v3  ;;  %v2476_v60 = vld [vmem:[%s6835_s5] sm:$0xff]  ;;  %v1555_v3 = vrot.slane %v5371_v14, 2 }
  0xfa   : > { %1452 = vrot.lane.b32.xlu1 %v1313_v63, %s4561_s30  ;;  %v1683_v63 = vsel %vm1554_vm3, %v1681_v46, %v1682_v47  ;;  %v1335_v47 = vrot.slane %v1047_v37, 1 }
  0xfb   : > { %1450 = vrot.lane.b32.xlu0 %v1310_v5, %s4561_s30 }
  0xfc   : > { %v5336_v17 = vpop.permute.xlu1 %1402 }
  0xfd   : > { %v5339_v26 = vpop.permute.xlu0 %1382 }
  0xfe   : > { %1813 = vrot.lane.b32.xlu1 %v1674_v13, %s4562_s21  ;;  %v1688_v13 = vrot.slane %v1042_v54, 2  ;;  %v1224_v54 = vrot.slane %v5384_v42, 1 }
  0xff   : > { %1811 = vrot.lane.b32.xlu0 %v1671_v18, %s4562_s21 }
 0x100   : > { %v5344_v32 = vpop.permute.xlu1 %1404  ;;  %v1689_v31 = vsel %vm1554_vm3, %v1687_v12, %v1688_v13  ;;  %v1693_v12 = vrot.slane %v1045_v21, 2  ;;  %v1694_v13 = vrot.slane %v1046_v22, 2 }
 0x101   : > { %v5347_v38 = vpop.permute.xlu0 %1384 }
 0x102   : > { %1458 = vrot.lane.b32.xlu1 %v1322_v29, %s4561_s30  ;;  %v1195_v29 = vrot.slane %v954_v16, 1 }
 0x103   : > { %1456 = vrot.lane.b32.xlu0 %v1319_v33, %s4561_s30  ;;  %v1332_v33 = vrot.slane %v1045_v21, 1  ;;  %v2478_v21 = vld [vmem:[%s6835_s5 + $0x10] sm:$0xff] }
 0x104   : > { %v5352_v44 = vpop.permute.xlu1 %1763  ;;  %v1196_v46 = vsel %vm1193_vm2, %v1194_v24, %v1195_v29  ;;  %v3871_v24 = vld [vmem:[%s6835_s5 + $0x50] sm:$0xff]  ;;  %v1696_v29 = vrot.slane %v1047_v37, 2  ;;  %v3872_v37 = vld [vmem:[%s6835_s5 + $0x58] sm:$0xff] }
 0x105   : > { %v5355_v52 = vpop.permute.xlu0 %1743  ;;  %v1334_v53 = vsel %vm1193_vm2, %v1332_v33, %v1333_v36  ;;  %v2479_v36 = vld [vmem:[%s6835_s5 + $0x18] sm:$0xff] }
 0x106   : > { %1460 = vrot.lane.b32.xlu1 %v1325_v40, %s4561_s30  ;;  %v1048_v40 = vld [vmem:[#allocation2 + $0x2f8] sm:$0x3] }
 0x107   : > { %1817 = vrot.lane.b32.xlu0 %v1680_v45, %s4562_s21  ;;  %v974_v45 = vld [vmem:[#allocation2 + $0xa8] sm:$0x3]  ;;  %v1336_v48 = vrot.slane %v1048_v40, 1 }
 0x108   : > { %v5360_v61 = vpop.permute.xlu1 %1765 }
 0x109   : > { %v5363_v5 = vpop.permute.xlu0 %1745  ;;  %v1337_v0 = vsel %vm1193_vm2, %v1335_v47, %v1336_v48  ;;  %v1695_v47 = vsel %vm1554_vm3, %v1693_v12, %v1694_v13  ;;  %v1585_v48 = vrot.slane %v5384_v42, 2  ;;  %v5461_v13 = vld [vmem:[#allocation2 + $0x300] sm:$0xff] }
 0x10a   : > { %1821 = vrot.lane.b32.xlu1 %v1686_v55, %s4562_s21  ;;  %v1225_v55 = vrot.slane %v974_v45, 1 }
 0x10b   : > { %1819 = vrot.lane.b32.xlu0 %v1683_v63, %s4562_s21  ;;  %v2477_v63 = vld [vmem:[%s6835_s5 + $0x8] sm:$0xff] }
 0x10c   : > { %v5368_v8 = vpop.permute.xlu1 %1406  ;;  %v5405_v6 = vpack.c.bf16 %v2477_v63, %v2476_v60 }
 0x10d   : > { %v5373_v18 = vpop.permute.xlu0 %1386 }
 0x10e   : > { %1464 = vrot.lane.b32.xlu1 %v1331_v2, %s4561_s30  ;;  %v1556_v2 = vrot.slane %v954_v16, 2  ;;  %4333 = vmatprep.subr.bf16.mxu0 %v5405_v6  ;;  %v3870_v16 = vld [vmem:[%s6835_s5 + $0x48] sm:$0xff] }
 0x10f   : > { %1462 = vrot.lane.b32.xlu0 %v1328_v10, %s4561_s30  ;;  %v1226_v10 = vsel %vm1193_vm2, %v1224_v54, %v1225_v55  ;;  %4335 = vmatpush3.bf16.msra.mxu0 %v5405_v6  ;;  %v4316_v33 = vpack.c.bf16 %v3871_v24, %v3870_v16  ;;  %v5433_v54 = vpack.c.bf16 %v2479_v36, %v2478_v21  ;;  %v5463_v16 = vld [vmem:[#allocation2 + $0x308] sm:$0x3] }
 0x110   : > { %v5379_v30 = vpop.permute.xlu1 %1408  ;;  %v1557_v22 = vsel %vm1554_vm3, %v1555_v3, %v1556_v2  ;;  %v1926_v24 = vsel %vm538_vm0, %v5139_v20, %v5299_v28  ;;  %v3874_v21 = vld [vmem:[%s6835_s5 + $0x68] sm:$0xff]  ;;  %v2483_v28 = vld [vmem:[%s6835_s5 + $0x38] sm:$0xff]  ;;  %v1339_v36 = vrot.slane %v5463_v16, 1 }
 0x111   : > { %v5382_v41 = vpop.permute.xlu0 %1388  ;;  %4317 = vmatprep.subr.bf16.mxu1 %v4316_v33  ;;  %4337 = vmatprep.subr.bf16.mxu0 %v5433_v54 }
 0x112   : > { %1825 = vrot.lane.b32.xlu1 %v1692_v23, %s4562_s21  ;;  %4319 = vmatpush3.bf16.msra.mxu1 %v4316_v33  ;;  %v1338_v33 = vrot.slane %v5461_v13, 1 }
 0x113   : > { %1823 = vrot.lane.b32.xlu0 %v1689_v31, %s4562_s21  ;;  %v1697_v31 = vrot.slane %v1048_v40, 2  ;;  %v3873_v40 = vld [vmem:[%s6835_s5 + $0x60] sm:$0xff]  ;;  %4339 = vmatpush3.bf16.msra.mxu0 %v5433_v54 }
 0x114   : > { %v5389_v50 = vpop.permute.xlu1 %1767  ;;  %v4320_v63 = vpack.c.bf16 %v3873_v40, %v3872_v37  ;;  %v5496_v40 = vsel %vm1975_vm4, %v1926_v24, %v5304_v34  ;;  %v3877_v34 = vld [vmem:[%s6835_s5 + $0x80] sm:$0xff]  ;;  %v1340_v24 = vsel %vm1193_vm2, %v1338_v33, %v1339_v36  ;;  %v3878_v33 = vld [vmem:[%s6835_s5 + $0x88] sm:$0xff] }
 0x115   : > { %v5393_v59 = vpop.permute.xlu0 %1747  ;;  %v1698_v60 = vsel %vm1554_vm3, %v1696_v29, %v1697_v31  ;;  %v2482_v29 = vld [vmem:[%s6835_s5 + $0x30] sm:$0xff] }
 0x116   : > { %1374 = vrot.lane.b32.xlu1 %v1196_v46, %s4561_s30  ;;  %4321 = vmatprep.subr.bf16.mxu1 %v4320_v63 }
 0x117   : > { %1466 = vrot.lane.b32.xlu0 %v1334_v53, %s4561_s30  ;;  %v1586_v53 = vrot.slane %v974_v45, 2  ;;  %v2480_v45 = vld [vmem:[%s6835_s5 + $0x20] sm:$0xff]  ;;  %4323 = vmatpush3.bf16.msra.mxu1 %v4320_v63 }
 0x118   : > { %v5407_v7 = vpop.permute.xlu1 %1769  ;;  %v4484_v63 = vld [vmem:[#allocation2 + $0x20] sm:$0xff] }
 0x119   : > { %v5410_v23 = vpop.permute.xlu0 %1749  ;;  %v1587_v2 = vsel %vm1554_vm3, %v1585_v48, %v1586_v53  ;;  %v4483_v48 = vld [vmem:[#allocation2 + $0x10] sm:$0xff] }
 0x11a   : > { %1468 = vrot.lane.b32.xlu1 %v1337_v0, %s4561_s30  ;;  %v2481_v0 = vld [vmem:[%s6835_s5 + $0x28] sm:$0xff]  ;;  %v1916_v53 = vsel %vm538_vm0, %v4483_v48, %v5291_v15  ;;  %v3876_v15 = vld [vmem:[%s6835_s5 + $0x78] sm:$0xff] }
 0x11b   : > { %1394 = vrot.lane.b32.xlu0 %v1226_v10, %s4561_s30  ;;  %v5457_v10 = vpack.c.bf16 %v2481_v0, %v2480_v45  ;;  %v5500_v45 = vsel %vm1975_vm4, %v1916_v53, %v5307_v39  ;;  %v4328_v39 = vpack.c.bf16 %v3877_v34, %v3876_v15  ;;  %v1917_v0 = vsel %vm538_vm0, %v4484_v63, %v5288_v11 }
 0x11c   : > { %v5429_v46 = vpop.permute.xlu1 %1410  ;;  %v1700_v63 = vrot.slane %v5463_v16, 2 }
 0x11d   : > { %v5435_v55 = vpop.permute.xlu0 %1390  ;;  %4341 = vmatprep.subr.bf16.mxu0 %v5457_v10 }
 0x11e   : > { %1735 = vrot.lane.b32.xlu1 %v1557_v22, %s4562_s21  ;;  %v3875_v22 = vld [vmem:[%s6835_s5 + $0x70] sm:$0xff]  ;;  %4343 = vmatpush3.bf16.msra.mxu0 %v5457_v10 }
 0x11f   : > { %1827 = vrot.lane.b32.xlu0 %v1695_v47, %s4562_s21  ;;  %v4324_v20 = vpack.c.bf16 %v3875_v22, %v3874_v21  ;;  %v5488_v47 = vpack.c.bf16 %v2483_v28, %v2482_v29  ;;  %v1051_v21 = vld [vmem:[#allocation2 + $0x310] sm:$0xff]  ;;  %v1052_v22 = vld [vmem:[#allocation2 + $0x318] sm:$0x3] }
 0x120   : > { %v5453_v3 = vpop.permute.xlu1 %1412  ;;  %v1341_v11 = vrot.slane %v1051_v21, 1  ;;  %v1342_v28 = vrot.slane %v1052_v22, 1 }
 0x121   : > { %v5459_v12 = vpop.permute.xlu0 %1392  ;;  %4325 = vmatprep.subr.bf16.mxu1 %v4324_v20  ;;  %4345 = vmatprep.subr.bf16.mxu0 %v5488_v47 }
 0x122   : > { %1829 = vrot.lane.b32.xlu1 %v1698_v60, %s4562_s21  ;;  %4327 = vmatpush3.bf16.msra.mxu1 %v4324_v20  ;;  %v5516_v60 = vld [vmem:[%s6835_s5 + $0x40] sm:$0xff]  ;;  %v5528_v20 = vsel %vm1975_vm4, %v1917_v0, %v5323_v62  ;;  %v1343_v34 = vsel %vm1193_vm2, %v1341_v11, %v1342_v28  ;;  %v1702_v0 = vrot.slane %v1051_v21, 2 }
 0x123   : > { %1755 = vrot.lane.b32.xlu0 %v1587_v2, %s4562_s21  ;;  %4347 = vmatpush3.bf16.msra.mxu0 %v5488_v47  ;;  %v4485_v62 = vld [vmem:[#allocation2 + $0xc0] sm:$0xff] }
 0x124   : > { %v5483_v31 = vpop.permute.xlu1 %1771  ;;  %4329 = vmatprep.subr.bf16.mxu1 %v4328_v39  ;;  %4200 = vmatprep.subr.mxu0 %v5516_v60  ;;  %v1927_v48 = vsel %vm538_vm0, %v4485_v62, %v5296_v19  ;;  %v1699_v19 = vrot.slane %v5461_v13, 2  ;;  %v4486_v62 = vld [vmem:[#allocation2 + $0x30] sm:$0xff] }
 0x125   : > { %v5492_v37 = vpop.permute.xlu0 %1751  ;;  %v5546_v15 = vsel %vm1975_vm4, %v1927_v48, %v5320_v57  ;;  %v1918_v11 = vsel %vm538_vm0, %v4486_v62, %v5315_v49  ;;  %v4487_v49 = vld [vmem:[#allocation2 + $0xd0] sm:$0xff] }
 0x126   : > { %2100 = vrot.lane.b32.xlu1 %v5496_v40, %s4563_s20  ;;  %4331 = vmatpush3.bf16.msra.mxu1 %v4328_v39  ;;  %v1701_v13 = vsel %vm1554_vm3, %v1699_v19, %v1700_v63  ;;  %v5570_v16 = vsel %vm1975_vm4, %v1918_v11, %v5331_v9  ;;  %v1928_v48 = vsel %vm538_vm0, %v4487_v49, %v5312_v43  ;;  %v4488_v43 = vld [vmem:[#allocation2 + $0xe0] sm:$0xff] }
 0x127   : > { %2084 = vrot.lane.b32.xlu0 %v5500_v45, %s4563_s20  ;;  %4201 = vmatpush3.msra.mxu0 %v5516_v60  ;;  %v5586_v9 = vsel %vm1975_vm4, %v1928_v48, %v5328_v4  ;;  %v1929_v4 = vsel %vm538_vm0, %v4488_v43, %v5336_v17  ;;  %v4491_v48 = vld [vmem:[#allocation2 + $0x50] sm:$0xff] }
 0x128   : > { %v5520_v2 = vpop.permute.xlu1 %1773  ;;  %4134 = vmatprep.subr.mxu1 %v3878_v33  ;;  %v5607_v11 = vsel %vm1975_vm4, %v1929_v4, %v5352_v44  ;;  %v1920_v43 = vsel %vm538_vm0, %v4491_v48, %v5347_v38  ;;  %v4492_v38 = vld [vmem:[#allocation2 + $0x100] sm:$0xff] }
 0x129   : > { %v5524_v29 = vpop.permute.xlu0 %1753  ;;  %6862 = vst [vmem:[#allocation4_spill] sm:$0xff] %v5607_v11 }
 0x12a   : > { %2086 = vrot.lane.b32.xlu1 %v5528_v20, %s4563_s20  ;;  %4135 = vmatpush3.msra.mxu1 %v3878_v33 }
 0x12b   : > { %1470 = vrot.lane.b32.xlu0 %v1340_v24, %s4561_s30  ;;  %4364 = vmatprep.subr.bf16.mxu1 %v5405_v6  ;;  %v1703_v24 = vrot.slane %v1052_v22, 2 }
 0x12c   : > { %v5537_v36 = vpop.permute.xlu1 %1418 }
 0x12d   : > { %v5542_v53 = vpop.permute.xlu0 %1416  ;;  %v1704_v21 = vsel %vm1554_vm3, %v1702_v0, %v1703_v24  ;;  %v4489_v24 = vld [vmem:[#allocation2 + $0x40] sm:$0xff] }
 0x12e   : > { %2234 = vrot.lane.b32.xlu1 %v5528_v20, %s4564_s18  ;;  %v1919_v62 = vsel %vm538_vm0, %v4489_v24, %v5339_v26  ;;  %v4490_v26 = vld [vmem:[#allocation2 + $0xf0] sm:$0xff] }
 0x12f   : > { %2102 = vrot.lane.b32.xlu0 %v5546_v15, %s4563_s20  ;;  %v1930_v44 = vsel %vm538_vm0, %v4490_v26, %v5344_v32 }
 0x130   : > { %v5553_v39 = vpop.permute.xlu1 %1420  ;;  %v5635_v4 = vsel %vm1975_vm4, %v1930_v44, %v5360_v61  ;;  %v1931_v61 = vsel %vm538_vm0, %v4492_v38, %v5368_v8  ;;  %v4493_v44 = vld [vmem:[#allocation2 + $0x60] sm:$0xff] }
 0x131   : > { %v5558_v57 = vpop.permute.xlu0 %1777  ;;  %6864 = vst [vmem:[#allocation6_spill] sm:$0xff] %v5635_v4  ;;  %v1921_v48 = vsel %vm538_vm0, %v4493_v44, %v5373_v18  ;;  %v4494_v18 = vld [vmem:[#allocation2 + $0x110] sm:$0xff] }
 0x132   : > { %1472 = vrot.lane.b32.xlu1 %v1343_v34, %s4561_s30 }
 0x133   : > { %2250 = vrot.lane.b32.xlu0 %v5546_v15, %s4564_s18 }
 0x134   : > { %v5565_v28 = vpop.permute.xlu1 %1781 }
 0x135   : > { %v5572_v33 = vpop.permute.xlu0 %1779 }
 0x136   : > { %2236 = vrot.lane.b32.xlu1 %v5570_v16, %s4564_s18 }
 0x137   : > { %1831 = vrot.lane.b32.xlu0 %v1701_v13, %s4562_s21 }
 0x138   : > { %v5578_v22 = vpop.permute.xlu1 %1424 }
 0x139   : > { %v5582_v34 = vpop.permute.xlu0 %1422 }
 0x13a   : > { %1833 = vrot.lane.b32.xlu1 %v1704_v21, %s4562_s21  ;;  %v5613_v21 = vsel %vm1975_vm4, %v1919_v62, %v5355_v52  ;;  %v5641_v62 = vsel %vm1975_vm4, %v1920_v43, %v5363_v5  ;;  %v5663_v43 = vsel %vm1975_vm4, %v1931_v61, %v5389_v50  ;;  %v1932_v50 = vsel %vm538_vm0, %v4494_v18, %v5379_v30  ;;  %v4495_v61 = vld [vmem:[#allocation2 + $0x70] sm:$0xff] }
 0x13b   : > { %2252 = vrot.lane.b32.xlu0 %v5586_v9, %s4564_s18  ;;  %6863 = vst [vmem:[#allocation5_spill] sm:$0xff] %v5613_v21  ;;  %6865 = vst [vmem:[#allocation7_spill] sm:$0xff] %v5641_v62  ;;  %v1922_v44 = vsel %vm538_vm0, %v4495_v61, %v5382_v41  ;;  %v3943_v41 = vld [vmem:[%s6835_s5 + $0x90] sm:$0xff] }
 0x13c   : > { %v5591_v19 = vpop.permute.xlu1 %1785  ;;  %6866 = vst [vmem:[#allocation8_spill] sm:$0xff] %v5663_v43 }
 0x13d   : > { %v5593_v63 = vpop.permute.xlu0 %1783 }
 0x13e   : > { %2104 = vrot.lane.b32.xlu1 %v5586_v9, %s4563_s20 }
 0x13f   : > { %2088 = vrot.lane.b32.xlu0 %v5570_v16, %s4563_s20 }
 0x140   : > { %v5601_v0 = vpop.permute.xlu1 %1428 }
 0x141   : > { %v5609_v13 = vpop.permute.xlu0 %1426 }
 0x142   : > { %2106 = vrot.lane.b32.xlu1 %v5607_v11, %s4563_s20 }
 0x143   : > { %2090 = vrot.lane.b32.xlu0 %v5613_v21, %s4563_s20 }
 0x144   : > { %v5619_v17 = vpop.permute.xlu1 %1789 }
 0x145   : > { %v5621_v49 = vpop.permute.xlu0 %1787 }
 0x146   : > { %2254 = vrot.lane.b32.xlu1 %v5607_v11, %s4564_s18  ;;  %v5731_v11 = vld [vmem:[#allocation2 + $0x140] sm:$0xff] }
 0x147   : > { %2238 = vrot.lane.b32.xlu0 %v5613_v21, %s4564_s18  ;;  %6871 = vst [vmem:[#allocation13_spill] sm:$0xff] %v5731_v11 }
 0x148   : > { %v5629_v52 = vpop.permute.xlu1 %1432 }
 0x149   : > { %v5637_v24 = vpop.permute.xlu0 %1430 }
 0x14a   : > { %2256 = vrot.lane.b32.xlu1 %v5635_v4, %s4564_s18 }
 0x14b   : > { %2240 = vrot.lane.b32.xlu0 %v5641_v62, %s4564_s18 }
 0x14c   : > { %v5647_v32 = vpop.permute.xlu1 %1793 }
 0x14d   : > { %v5649_v26 = vpop.permute.xlu0 %1791 }
 0x14e   : > { %2108 = vrot.lane.b32.xlu1 %v5635_v4, %s4563_s20  ;;  %v5669_v4 = vsel %vm1975_vm4, %v1921_v48, %v5393_v59  ;;  %v5691_v48 = vsel %vm1975_vm4, %v1932_v50, %v5407_v7  ;;  %v3944_v7 = vld [vmem:[%s6835_s5 + $0x98] sm:$0xff]  ;;  %v1933_v50 = vsel %vm538_vm0, %v5193_v56, %v5429_v46 }
 0x14f   : > { %2092 = vrot.lane.b32.xlu0 %v5641_v62, %s4563_s20  ;;  %6867 = vst [vmem:[#allocation9_spill] sm:$0xff] %v5669_v4  ;;  %6868 = vst [vmem:[#allocation10_spill] sm:$0xff] %v5691_v48 }
 0x150   : > { %v5657_v5 = vpop.permute.xlu1 %1438 }
 0x151   : > { %v5665_v21 = vpop.permute.xlu0 %1436 }
 0x152   : > { %2110 = vrot.lane.b32.xlu1 %v5663_v43, %s4563_s20 }
 0x153   : > { %2094 = vrot.lane.b32.xlu0 %v5669_v4, %s4563_s20 }
 0x154   : > { %v5675_v8 = vpop.permute.xlu1 %1440 }
 0x155   : > { %v5677_v38 = vpop.permute.xlu0 %1797 }
 0x156   : > { %2258 = vrot.lane.b32.xlu1 %v5663_v43, %s4564_s18  ;;  %v5697_v43 = vsel %vm1975_vm4, %v1922_v44, %v5410_v23  ;;  %v5717_v23 = vpack.c.bf16 %v3944_v7, %v3943_v41  ;;  %v1923_v44 = vsel %vm538_vm0, %v5195_v58, %v5435_v55  ;;  %v1254_v58 = vrot.slane %v5731_v11, 1 }
 0x157   : > { %2242 = vrot.lane.b32.xlu0 %v5669_v4, %s4564_s18  ;;  %6869 = vst [vmem:[#allocation11_spill] sm:$0xff] %v5697_v43  ;;  %v1984_v41 = vsel %vm1975_vm4, %v1923_v44, %v5492_v37  ;;  %v1924_v37 = vsel %vm538_vm0, %v5203_v1, %v5459_v12 }
 0x158   : > { %v5685_v59 = vpop.permute.xlu1 %1801  ;;  %4349 = vmatprep.subr.bf16.mxu0 %v5717_v23 }
 0x159   : > { %v5693_v62 = vpop.permute.xlu0 %1799 }
 0x15a   : > { %2260 = vrot.lane.b32.xlu1 %v5691_v48, %s4564_s18 }
 0x15b   : > { %2244 = vrot.lane.b32.xlu0 %v5697_v43, %s4564_s18 }
 0x15c   : > { %v5703_v30 = vpop.permute.xlu1 %1444 }
 0x15d   : > { %v5705_v18 = vpop.permute.xlu0 %1442 }
 0x15e   : > { %2112 = vrot.lane.b32.xlu1 %v5691_v48, %s4563_s20  ;;  %v1994_v48 = vsel %vm1975_vm4, %v1933_v50, %v5483_v31  ;;  %v1615_v31 = vrot.slane %v5731_v11, 2 }
 0x15f   : > { %2096 = vrot.lane.b32.xlu0 %v5697_v43, %s4563_s20  ;;  %v994_v43 = vld [vmem:[#allocation2 + $0x148] sm:$0x3] }
 0x160   : > { %v5722_v61 = vpop.permute.xlu1 %1805  ;;  %v1255_v46 = vrot.slane %v994_v43, 1  ;;  %v1616_v7 = vrot.slane %v994_v43, 2 }
 0x161   : > { %6870 = vst [vmem:[#allocation12_spill] sm:$0xff] %v5722_v61  ;;  %v5729_v4 = vpop.permute.xlu0 %1803 }
 0x162   : > { %2114 = vrot.lane.b32.xlu1 %v1994_v48, %s4563_s20  ;;  %v1256_v44 = vsel %vm1193_vm2, %v1254_v58, %v1255_v46 }
 0x163   : > { %2098 = vrot.lane.b32.xlu0 %v1984_v41, %s4563_s20 }
 0x164   : > { %v5738_v56 = vpop.permute.xlu1 %1448 }
 0x165   : > { %6872 = vst [vmem:[#allocation14_spill] sm:$0xff] %v5738_v56  ;;  %v5741_v55 = vpop.permute.xlu0 %1446  ;;  %v1985_v56 = vsel %vm1975_vm4, %v1924_v37, %v5524_v29  ;;  %v1936_v29 = vsel %vm538_vm0, %v5223_v27, %v5542_v53 }
 0x166   : > { %2262 = vrot.lane.b32.xlu1 %v1994_v48, %s4564_s18  ;;  %v1617_v48 = vsel %vm1554_vm3, %v1615_v31, %v1616_v7  ;;  %v1056_v7 = vld [vmem:[#allocation2 + $0x338] sm:$0x3]  ;;  %v5787_v27 = vsel %vm1975_vm4, %v1936_v29, %v5558_v57 }
 0x167   : > { %2246 = vrot.lane.b32.xlu0 %v1984_v41, %s4564_s18  ;;  %v4496_v41 = vld [vmem:[#allocation2 + $0x130] sm:$0xff]  ;;  %6875 = vst [vmem:[#allocation17_spill] sm:$0xff] %v5787_v27 }
 0x168   : > { %v5749_v50 = vpop.permute.xlu1 %1809  ;;  %v1934_v1 = vsel %vm538_vm0, %v4496_v41, %v5453_v3 }
 0x169   : > { %v5754_v61 = vpop.permute.xlu0 %1807  ;;  %v1995_v58 = vsel %vm1975_vm4, %v1934_v1, %v5520_v2  ;;  %v5783_v2 = vld [vmem:[#allocation2 + $0x330] sm:$0xff] }
 0x16a   : > { %2248 = vrot.lane.b32.xlu1 %v1985_v56, %s4564_s18  ;;  %v1937_v56 = vsel %vm538_vm0, %v5221_v25, %v5537_v36  ;;  %6874 = vst [vmem:[#allocation16_spill] sm:$0xff] %v5783_v2  ;;  %v1938_v25 = vsel %vm538_vm0, %v5231_v35, %v5553_v39  ;;  %v1347_v53 = vrot.slane %v5783_v2, 1  ;;  %v1708_v35 = vrot.slane %v5783_v2, 2 }
 0x16b   : > { %1414 = vrot.lane.b32.xlu0 %v1256_v44, %s4561_s30  ;;  %v5779_v3 = vsel %vm1975_vm4, %v1937_v56, %v5572_v33  ;;  %v1348_v33 = vrot.slane %v1056_v7, 1  ;;  %v5801_v37 = vsel %vm1975_vm4, %v1938_v25, %v5565_v28  ;;  %v5805_v44 = vld [vmem:[#allocation2 + $0x340] sm:$0xff]  ;;  %v1709_v39 = vrot.slane %v1056_v7, 2 }
 0x16c   : > { %v5759_v43 = vpop.permute.xlu1 %1452  ;;  %6873 = vst [vmem:[#allocation15_spill] sm:$0xff] %v5779_v3  ;;  %6876 = vst [vmem:[#allocation18_spill] sm:$0xff] %v5801_v37  ;;  %v1350_v28 = vrot.slane %v5805_v44, 1 }
 0x16d   : > { %v5763_v12 = vpop.permute.xlu0 %1450  ;;  %6877 = vst [vmem:[#allocation19_spill] sm:$0xff] %v5805_v44  ;;  %v1349_v1 = vsel %vm1193_vm2, %v1347_v53, %v1348_v33  ;;  %v1710_v56 = vsel %vm1554_vm3, %v1708_v35, %v1709_v39  ;;  %v1060_v53 = vld [vmem:[#allocation2 + $0x358] sm:$0x3]  ;;  %v1939_v33 = vsel %vm538_vm0, %v5245_v51, %v5582_v34 }
 0x16e   : > { %1775 = vrot.lane.b32.xlu1 %v1617_v48, %s4562_s21  ;;  %v1058_v48 = vld [vmem:[#allocation2 + $0x348] sm:$0x3] }
 0x16f   : > { %2264 = vrot.lane.b32.xlu0 %v1995_v58, %s4564_s18  ;;  %v1351_v58 = vrot.slane %v1058_v48, 1  ;;  %v1712_v35 = vrot.slane %v1058_v48, 2  ;;  %v1715_v48 = vrot.slane %v1060_v53, 2 }
 0x170   : > { %v5775_v46 = vpop.permute.xlu1 %1813 }
 0x171   : > { %v5781_v31 = vpop.permute.xlu0 %1811  ;;  %v1352_v7 = vsel %vm1193_vm2, %v1350_v28, %v1351_v58  ;;  %v1354_v58 = vrot.slane %v1060_v53, 1  ;;  %v4497_v53 = vld [vmem:[#allocation2 + $0x190] sm:$0xff] }
 0x172   : > { %2118 = vrot.lane.b32.xlu1 %v5779_v3, %s4563_s20 }
 0x173   : > { %2116 = vrot.lane.b32.xlu0 %v5787_v27, %s4563_s20 }
 0x174   : > { %v5796_v36 = vpop.permute.xlu1 %1458 }
 0x175   : > { %v5803_v57 = vpop.permute.xlu0 %1456 }
 0x176   : > { %2268 = vrot.lane.b32.xlu1 %v5801_v37, %s4564_s18 }
 0x177   : > { %2266 = vrot.lane.b32.xlu0 %v5779_v3, %s4564_s18  ;;  %v5827_v3 = vld [vmem:[#allocation2 + $0x350] sm:$0xff] }
 0x178   : > { %v5812_v41 = vpop.permute.xlu1 %1460  ;;  %6878 = vst [vmem:[#allocation20_spill] sm:$0xff] %v5827_v3  ;;  %v1353_v28 = vrot.slane %v5827_v3, 1  ;;  %v1714_v34 = vrot.slane %v5827_v3, 2 }
 0x179   : > { %v5816_v29 = vpop.permute.xlu0 %1817 }
 0x17a   : > { %2120 = vrot.lane.b32.xlu1 %v5801_v37, %s4563_s20  ;;  %v5840_v37 = vsel %vm1975_vm4, %v1939_v33, %v5593_v63  ;;  %v1062_v63 = vld [vmem:[#allocation2 + $0x368] sm:$0x3] }
 0x17b   : > { %1476 = vrot.lane.b32.xlu0 %v1349_v1, %s4561_s30  ;;  %v1711_v1 = vrot.slane %v5805_v44, 2  ;;  %6880 = vst [vmem:[#allocation22_spill] sm:$0xff] %v5840_v37  ;;  %v5853_v44 = vld [vmem:[#allocation2 + $0x360] sm:$0xff] }
 0x17c   : > { %v5822_v25 = vpop.permute.xlu1 %1821  ;;  %6882 = vst [vmem:[#allocation24_spill] sm:$0xff] %v5853_v44 }
 0x17d   : > { %v5825_v2 = vpop.permute.xlu0 %1819  ;;  %v1713_v51 = vsel %vm1554_vm3, %v1711_v1, %v1712_v35  ;;  %v1356_v1 = vrot.slane %v5853_v44, 1  ;;  %v1357_v35 = vrot.slane %v1062_v63, 1 }
 0x17e   : > { %1837 = vrot.lane.b32.xlu1 %v1710_v56, %s4562_s21 }
 0x17f   : > { %1478 = vrot.lane.b32.xlu0 %v1352_v7, %s4561_s30  ;;  %v1355_v7 = vsel %vm1193_vm2, %v1353_v28, %v1354_v58 }
 0x180   : > { %v5835_v39 = vpop.permute.xlu1 %1464 }
 0x181   : > { %6879 = vst [vmem:[#allocation21_spill] sm:$0xff] %v5835_v39  ;;  %v5842_v27 = vpop.permute.xlu0 %1462 }
 0x182   : > { %2270 = vrot.lane.b32.xlu1 %v5840_v37, %s4564_s18 }
 0x183   : > { %2122 = vrot.lane.b32.xlu0 %v5840_v37, %s4563_s20  ;;  %v1716_v37 = vsel %vm1554_vm3, %v1714_v34, %v1715_v48 }
 0x184   : > { %v5850_v56 = vpop.permute.xlu1 %1825 }
 0x185   : > { %6881 = vst [vmem:[#allocation23_spill] sm:$0xff] %v5850_v56  ;;  %v5855_v33 = vpop.permute.xlu0 %1823  ;;  %v1940_v56 = vsel %vm538_vm0, %v4497_v53, %v5578_v22  ;;  %v1064_v22 = vld [vmem:[#allocation2 + $0x378] sm:$0x3]  ;;  %v4498_v53 = vld [vmem:[#allocation2 + $0x1a0] sm:$0xff] }
 0x186   : > { %6883 = vst [vmem:[#allocation25_spill] sm:$0xff] %v5855_v33  ;;  %1839 = vrot.lane.b32.xlu1 %v1713_v51, %s4562_s21  ;;  %v5867_v58 = vsel %vm1975_vm4, %v1940_v56, %v5591_v19  ;;  %v1358_v51 = vsel %vm1193_vm2, %v1356_v1, %v1357_v35  ;;  %v1717_v19 = vrot.slane %v5853_v44, 2  ;;  %v1360_v35 = vrot.slane %v1064_v22, 1  ;;  %v5901_v44 = vld [vmem:[#allocation2 + $0x380] sm:$0xff] }
 0x187   : > { %1480 = vrot.lane.b32.xlu0 %v1355_v7, %s4561_s30  ;;  %6885 = vst [vmem:[#allocation27_spill] sm:$0xff] %v5867_v58  ;;  %v5877_v7 = vld [vmem:[#allocation2 + $0x370] sm:$0xff] }
 0x188   : > { %v1375_v3 = vpop.permute.xlu1 %1374  ;;  %6887 = vst [vmem:[#allocation29_spill] sm:$0xff] %v5877_v7  ;;  %v1359_v1 = vrot.slane %v5877_v7, 1 }
 0x189   : > { %v5863_v28 = vpop.permute.xlu0 %1466 }
 0x18a   : > { %6884 = vst [vmem:[#allocation26_spill] sm:$0xff] %v5863_v28  ;;  %1841 = vrot.lane.b32.xlu1 %v1716_v37, %s4562_s21  ;;  %v1941_v28 = vsel %vm538_vm0, %v4498_v53, %v5609_v13  ;;  %v1718_v37 = vrot.slane %v1062_v63, 2  ;;  %v1720_v63 = vrot.slane %v5877_v7, 2  ;;  %v4499_v7 = vld [vmem:[#allocation2 + $0x1b0] sm:$0xff] }
 0x18b   : > { %2272 = vrot.lane.b32.xlu0 %v5867_v58, %s4564_s18 }
 0x18c   : > { %v5873_v34 = vpop.permute.xlu1 %1468  ;;  %v1719_v13 = vsel %vm1554_vm3, %v1717_v19, %v1718_v37 }
 0x18d   : > { %6886 = vst [vmem:[#allocation28_spill] sm:$0xff] %v5873_v34  ;;  %v5875_v48 = vpop.permute.xlu0 %1394  ;;  %v5888_v34 = vsel %vm1975_vm4, %v1941_v28, %v5621_v49  ;;  %v1066_v49 = vld [vmem:[#allocation2 + $0x388] sm:$0x3] }
 0x18e   : > { %1482 = vrot.lane.b32.xlu1 %v1358_v51, %s4561_s30  ;;  %6888 = vst [vmem:[#allocation30_spill] sm:$0xff] %v5888_v34  ;;  %v1721_v51 = vrot.slane %v1064_v22, 2  ;;  %v1363_v19 = vrot.slane %v1066_v49, 1  ;;  %v1942_v22 = vsel %vm538_vm0, %v4499_v7, %v5601_v0  ;;  %v5921_v0 = vld [vmem:[#allocation2 + $0x1e0] sm:$0xff]  ;;  %v5923_v7 = vld [vmem:[#allocation2 + $0x1e8] sm:$0x3] }
 0x18f   : > { %2124 = vrot.lane.b32.xlu0 %v5867_v58, %s4563_s20  ;;  %v1361_v58 = vsel %vm1193_vm2, %v1359_v1, %v1360_v35  ;;  %v5911_v1 = vsel %vm1975_vm4, %v1942_v22, %v5619_v17  ;;  %v4500_v17 = vld [vmem:[#allocation2 + $0x1c0] sm:$0xff]  ;;  %v1915_v22 = vsel %vm538_vm0, %v5371_v14, %v1375_v3 }
 0x190   : > { %v1736_v56 = vpop.permute.xlu1 %1735 }
 0x191   : > { %v5890_v39 = vpop.permute.xlu0 %1827 }
 0x192   : > { %6889 = vst [vmem:[#allocation31_spill] sm:$0xff] %v5890_v39  ;;  %2274 = vrot.lane.b32.xlu1 %v5888_v34, %s4564_s18  ;;  %v1722_v39 = vsel %vm1554_vm3, %v1720_v63, %v1721_v51  ;;  %v1068_v63 = vld [vmem:[#allocation2 + $0x398] sm:$0x3] }
 0x193   : > { %2126 = vrot.lane.b32.xlu0 %v5888_v34, %s4563_s20  ;;  %v1362_v34 = vrot.slane %v5901_v44, 1 }
 0x194   : > { %v5898_v53 = vpop.permute.xlu1 %1829 }
 0x195   : > { %6890 = vst [vmem:[#allocation32_spill] sm:$0xff] %v5898_v53  ;;  %v1756_v28 = vpop.permute.xlu0 %1755 }
 0x196   : > { %1843 = vrot.lane.b32.xlu1 %v1719_v13, %s4562_s21  ;;  %v5917_v13 = vld [vmem:[#allocation2 + $0x390] sm:$0xff] }
 0x197   : > { %1484 = vrot.lane.b32.xlu0 %v1361_v58, %s4561_s30  ;;  %v1364_v58 = vsel %vm1193_vm2, %v1362_v34, %v1363_v19  ;;  %v1976_v34 = vsel %vm1975_vm4, %v1915_v22, %v1736_v56  ;;  %v1365_v19 = vrot.slane %v5917_v13, 1  ;;  %v1723_v22 = vrot.slane %v5901_v44, 2 }
 0x198   : > { %v2101_v37 = vpop.permute.xlu1 %2100 }
 0x199   : > { %v2085_v53 = vpop.permute.xlu0 %2084 }
 0x19a   : > { %1845 = vrot.lane.b32.xlu1 %v1722_v39, %s4562_s21  ;;  %v1943_v39 = vsel %vm538_vm0, %v4500_v17, %v5637_v24  ;;  %v2379_v11 = vsel %vm2378_vm5, %v1976_v34, %v2085_v53  ;;  %v1284_v24 = vrot.slane %v5921_v0, 1  ;;  %v1285_v17 = vrot.slane %v5923_v7, 1 }
 0x19b   : > { %2276 = vrot.lane.b32.xlu0 %v5911_v1, %s4564_s18  ;;  %v2004_v14 = vsel %vm1975_vm4, %v1943_v39, %v5649_v26  ;;  %v1724_v34 = vrot.slane %v1066_v49, 2 }
 0x19c   : > { %v2087_v35 = vpop.permute.xlu1 %2086 }
 0x19d   : > { %v5919_v51 = vpop.permute.xlu0 %1470 }
 0x19e   : > { %6891 = vst [vmem:[#allocation33_spill] sm:$0xff] %v5919_v51  ;;  %1486 = vrot.lane.b32.xlu1 %v1364_v58, %s4561_s30  ;;  %v1366_v51 = vrot.slane %v1068_v63, 1  ;;  %v1925_v58 = vsel %vm538_vm0, %v5384_v42, %v5875_v48  ;;  %v3945_v42 = vld [vmem:[%s6835_s5 + $0xa0] sm:$0xff]  ;;  %v3946_v48 = vld [vmem:[%s6835_s5 + $0xa8] sm:$0xff] }
 0x19f   : > { %2128 = vrot.lane.b32.xlu0 %v5911_v1, %s4563_s20  ;;  %v1986_v26 = vsel %vm1975_vm4, %v1925_v58, %v1756_v28  ;;  %v1725_v28 = vsel %vm1554_vm3, %v1723_v22, %v1724_v34 }
 0x1a0   : > { %v2235_v33 = vpop.permute.xlu1 %2234  ;;  %v1367_v53 = vsel %vm1193_vm2, %v1365_v19, %v1366_v51  ;;  %v1726_v51 = vrot.slane %v5917_v13, 2  ;;  %v1727_v19 = vrot.slane %v1068_v63, 2 }
 0x1a1   : > { %v2103_v3 = vpop.permute.xlu0 %2102  ;;  %v2428_v56 = vsel %vm2427_vm6, %v2379_v11, %v2235_v33  ;;  %v1286_v11 = vsel %vm1193_vm2, %v1284_v24, %v1285_v17  ;;  %v2387_v33 = vsel %vm2378_vm5, %v1986_v26, %v2101_v37  ;;  %v1645_v37 = vrot.slane %v5921_v0, 2  ;;  %v4501_v24 = vld [vmem:[#allocation2 + $0x1d0] sm:$0xff]  ;;  %v5974_v26 = vld [vmem:[#allocation2 + $0x3a0] sm:$0xff] }
 0x1a2   : > { %2278 = vrot.lane.b32.xlu1 %v2004_v14, %s4564_s18  ;;  %4202 = vmatprep.mubr.msk.f32.mxu0 %vm2495_vm7, %v2428_v56  ;;  %v1944_v17 = vsel %vm538_vm0, %v4501_v24, %v5629_v52  ;;  %v3948_v52 = vld [vmem:[%s6835_s5 + $0xb8] sm:$0xff] }
 0x1a3   : > { %2130 = vrot.lane.b32.xlu0 %v2004_v14, %s4563_s20  ;;  %v2380_v14 = vsel %vm2378_vm5, %v5500_v45, %v2087_v35  ;;  %v2005_v22 = vsel %vm1975_vm4, %v1944_v17, %v5647_v32  ;;  %v3947_v45 = vld [vmem:[%s6835_s5 + $0xb0] sm:$0xff]  ;;  %v1728_v32 = vsel %vm1554_vm3, %v1726_v51, %v1727_v19  ;;  %v1368_v35 = vrot.slane %v5974_v26, 1 }
 0x1a4   : > { %v5949_v39 = vpop.permute.xlu1 %1472  ;;  %v4356_v17 = vpack.c.bf16 %v3948_v52, %v3947_v45 }
 0x1a5   : > { %v2251_v56 = vpop.permute.xlu0 %2250 }
 0x1a6   : > { %1488 = vrot.lane.b32.xlu1 %v1367_v53, %s4561_s30  ;;  %v5961_v49 = vsel %vm2427_vm6, %v2387_v33, %v2251_v56  ;;  %v1646_v53 = vrot.slane %v5923_v7, 2  ;;  %v4352_v33 = vpack.c.bf16 %v3946_v48, %v3945_v42  ;;  %v2388_v48 = vsel %vm2378_vm5, %v5496_v40, %v2103_v3 }
 0x1a7   : > { %1434 = vrot.lane.b32.xlu0 %v1286_v11, %s4561_s30  ;;  %4136 = vmatprep.mubr.msk.f32.mxu1 %vm2495_vm7, %v5961_v49  ;;  %v1070_v11 = vld [vmem:[#allocation2 + $0x3a8] sm:$0x3] }
 0x1a8   : > { %v2237_v58 = vpop.permute.xlu1 %2236  ;;  %v1369_v7 = vrot.slane %v1070_v11, 1  ;;  %v1647_v42 = vsel %vm1554_vm3, %v1645_v37, %v1646_v53  ;;  %v4502_v37 = vld [vmem:[#allocation2 + $0x1f0] sm:$0xff]  ;;  %v1072_v53 = vld [vmem:[#allocation2 + $0x3b8] sm:$0x3] }
 0x1a9   : > { %v5978_v34 = vpop.permute.xlu0 %1831  ;;  %v2429_v63 = vsel %vm2427_vm6, %v2380_v14, %v2237_v58  ;;  %v1946_v51 = vsel %vm538_vm0, %v4502_v37, %v5665_v21  ;;  %v6015_v58 = vld [vmem:[#allocation2 + $0x3b0] sm:$0xff] }
 0x1aa   : > { %2280 = vrot.lane.b32.xlu1 %v2005_v22, %s4564_s18  ;;  %4203 = vmatmul.mubr.msk.f32.vlgmr.msra.gmra.mrb[0].mxu0 %vm2495_vm7, %v2429_v63  ;;  %v1370_v40 = vsel %vm1193_vm2, %v1368_v35, %v1369_v7  ;;  %v6020_v21 = vsel %vm1975_vm4, %v1946_v51, %v5677_v38  ;;  %v4503_v63 = vld [vmem:[#allocation2 + $0x200] sm:$0xff]  ;;  %v1372_v35 = vrot.slane %v1072_v53, 1  ;;  %v4504_v51 = vld [vmem:[#allocation2 + $0x210] sm:$0xff] }
 0x1ab   : > { %1847 = vrot.lane.b32.xlu0 %v1725_v28, %s4562_s21  ;;  %4351 = vmatpush3.bf16.msra.mxu0 %v5717_v23  ;;  %v3949_v28 = vld [vmem:[%s6835_s5 + $0xc0] sm:$0xff]  ;;  %v3950_v23 = vld [vmem:[%s6835_s5 + $0xc8] sm:$0xff]  ;;  %v1947_v45 = vsel %vm538_vm0, %v4503_v63, %v5657_v5  ;;  %v3951_v5 = vld [vmem:[%s6835_s5 + $0xd0] sm:$0xff] }
 0x1ac   : > { %v5993_v56 = vpop.permute.xlu1 %1833  ;;  %4353 = vmatprep.subr.bf16.mxu0 %v4352_v33  ;;  %v4360_v22 = vpack.c.bf16 %v3950_v23, %v3949_v28  ;;  %v6032_v38 = vsel %vm1975_vm4, %v1947_v45, %v5693_v62  ;;  %v1733_v62 = vrot.slane %v1072_v53, 2  ;;  %v6892_v45 = vld [vmem:[#allocation12_spill] sm:$0xff] }
 0x1ad   : > { %v2253_v24 = vpop.permute.xlu0 %2252 }
 0x1ae   : > { %v5999_v14 = vsel %vm2427_vm6, %v2388_v48, %v2253_v24  ;;  %1849 = vrot.lane.b32.xlu1 %v1728_v32, %s4562_s21  ;;  %v1371_v32 = vrot.slane %v6015_v58, 1 }
 0x1af   : > { %1795 = vrot.lane.b32.xlu0 %v1647_v42, %s4562_s21  ;;  %4137 = vmatmul.mubr.msk.f32.vlgmr.msra.gmra.mrb[0].mxu1 %vm2495_vm7, %v5999_v14 }
 0x1b0   : > { %v2105_v3 = vpop.permute.xlu1 %2104  ;;  %4355 = vmatpush3.bf16.msra.mxu0 %v4352_v33  ;;  %4369 = vmatpush3.bf16.msra.mxu1 %v5405_v6  ;;  %v1729_v33 = vrot.slane %v5974_v26, 2  ;;  %v1730_v6 = vrot.slane %v1070_v11, 2  ;;  %v1732_v11 = vrot.slane %v6015_v58, 2  ;;  %v1373_v24 = vsel %vm1193_vm2, %v1371_v32, %v1372_v35  ;;  %v4507_v32 = vld [vmem:[#allocation2 + $0x240] sm:$0xff] }
 0x1b1   : > { %v2089_v19 = vpop.permute.xlu0 %2088  ;;  %4357 = vmatprep.subr.bf16.mxu0 %v4356_v17  ;;  %4365 = vmatprep.subr.bf16.mxu1 %v5433_v54  ;;  %v2389_v42 = vsel %vm2378_vm5, %v5546_v15, %v2105_v3  ;;  %v6893_v35 = vld [vmem:[#allocation4_spill] sm:$0xff] }
 0x1b2   : > { %1490 = vrot.lane.b32.xlu1 %v1370_v40, %s4561_s30  ;;  %v1948_v40 = vsel %vm538_vm0, %v4504_v51, %v5675_v8  ;;  %v6897_v51 = vld [vmem:[#allocation7_spill] sm:$0xff] }
 0x1b3   : > { %2132 = vrot.lane.b32.xlu0 %v6020_v21, %s4563_s20 }
 0x1b4   : > { %v2107_v52 = vpop.permute.xlu1 %2106  ;;  %4359 = vmatpush3.bf16.msra.mxu0 %v4356_v17  ;;  %4370 = vmatpush3.bf16.msra.mxu1 %v5433_v54  ;;  %v1731_v54 = vsel %vm1554_vm3, %v1729_v33, %v1730_v6  ;;  %v2381_v17 = vsel %vm2378_vm5, %v5528_v20, %v2089_v19 }
 0x1b5   : > { %v2091_v7 = vpop.permute.xlu0 %2090  ;;  %4361 = vmatprep.subr.bf16.mxu0 %v4360_v22  ;;  %4366 = vmatprep.subr.bf16.mxu1 %v5457_v10  ;;  %v2390_v20 = vsel %vm2378_vm5, %v5586_v9, %v2107_v52  ;;  %v6074_v9 = vsel %vm1975_vm4, %v1948_v40, %v5685_v59 }
 0x1b6   : > { %2282 = vrot.lane.b32.xlu1 %v6032_v38, %s4564_s18  ;;  %v2382_v3 = vsel %vm2378_vm5, %v5570_v16, %v2091_v7 }
 0x1b7   : > { %2134 = vrot.lane.b32.xlu0 %v6032_v38, %s4563_s20 }
 0x1b8   : > { %v2255_v48 = vpop.permute.xlu1 %2254  ;;  %4363 = vmatpush3.bf16.msra.mxu0 %v4360_v22  ;;  %4371 = vmatpush3.bf16.msra.mxu1 %v5457_v10  ;;  %v1734_v10 = vsel %vm1554_vm3, %v1732_v11, %v1733_v62  ;;  %v4505_v22 = vld [vmem:[#allocation2 + $0x220] sm:$0xff] }
 0x1b9   : > { %v2239_v28 = vpop.permute.xlu0 %2238  ;;  %v6051_v23 = vsel %vm2427_vm6, %v2389_v42, %v2255_v48  ;;  %4266 = vmatprep.subr.mxu0 %v3951_v5  ;;  %4367 = vmatprep.subr.bf16.mxu1 %v5488_v47  ;;  %v6895_v48 = vld [vmem:[#allocation14_spill] sm:$0xff] }
 0x1ba   : > { %v2430_v37 = vsel %vm2427_vm6, %v2381_v17, %v2239_v28  ;;  %1851 = vrot.lane.b32.xlu1 %v1731_v54, %s4562_s21  ;;  %4139 = vmatprep.mubr.msk.f32.mxu1 %vm2495_vm7, %v6051_v23  ;;  %v6894_v54 = vld [vmem:[#allocation5_spill] sm:$0xff]  ;;  %v6896_v17 = vld [vmem:[#allocation6_spill] sm:$0xff] }
 0x1bb   : > { %1492 = vrot.lane.b32.xlu0 %v1373_v24, %s4561_s30  ;;  %4205 = vmatprep.mubr.msk.f32.mxu0 %vm2495_vm7, %v2430_v37 }
 0x1bc   : > { %v2257_v15 = vpop.permute.xlu1 %2256  ;;  %4267 = vmatpush3.msra.mxu0 %v3951_v5  ;;  %4372 = vmatpush3.bf16.msra.mxu1 %v5488_v47  ;;  %v1949_v47 = vsel %vm538_vm0, %v4505_v22, %v5705_v18  ;;  %v4506_v18 = vld [vmem:[#allocation2 + $0x230] sm:$0xff]  ;;  %v4509_v22 = vld [vmem:[#allocation2 + $0x260] sm:$0xff] }
 0x1bd   : > { %v2241_v19 = vpop.permute.xlu0 %2240  ;;  %v6069_v53 = vsel %vm2427_vm6, %v2390_v20, %v2257_v15  ;;  %4368 = vmatprep.subr.mxu1 %v5516_v60  ;;  %v6088_v8 = vsel %vm1975_vm4, %v1949_v47, %v5729_v4  ;;  %v1950_v6 = vsel %vm538_vm0, %v4506_v18, %v5703_v30  ;;  %v1951_v4 = vsel %vm538_vm0, %v4507_v32, %v5741_v55  ;;  %v1034_v20 = vld [vmem:[#allocation2 + $0x288] sm:$0x3] }
 0x1be   : > { %v2431_v33 = vsel %vm2427_vm6, %v2382_v3, %v2241_v19  ;;  %1853 = vrot.lane.b32.xlu1 %v1734_v10, %s4562_s21  ;;  %4140 = vmatmul.mubr.msk.f32.gmra.mrb[2].mxu1 %vm2495_vm7, %v6069_v53  ;;  %v6098_v52 = vsel %vm1975_vm4, %v1950_v6, %v6892_v45  ;;  %v6110_v5 = vsel %vm1975_vm4, %v1951_v4, %v5754_v61  ;;  %v4508_v61 = vld [vmem:[#allocation2 + $0x250] sm:$0xff]  ;;  %v6129_v10 = vld [vmem:[#allocation2 + $0x280] sm:$0xff]  ;;  %v1676_v45 = vrot.slane %v1034_v20, 2 }
 0x1bf   : > { %2284 = vrot.lane.b32.xlu0 %v6074_v9, %s4564_s18  ;;  %4206 = vmatmul.mubr.msk.f32.gmra.mrb[2].mxu0 %vm2495_vm7, %v2431_v33  ;;  %v1952_v24 = vsel %vm538_vm0, %v4508_v61, %v6895_v48  ;;  %v1953_v47 = vsel %vm538_vm0, %v4509_v22, %v5763_v12 }
 0x1c0   : > { %v2109_v16 = vpop.permute.xlu1 %2108  ;;  %4373 = vmatpush3.msra.mxu1 %v5516_v60  ;;  %v6133_v15 = vsel %vm1975_vm4, %v1952_v24, %v5749_v50  ;;  %v1314_v50 = vrot.slane %v6129_v10, 1  ;;  %v2014_v12 = vsel %vm1975_vm4, %v1953_v47, %v5781_v31  ;;  %v6898_v31 = vld [vmem:[#allocation8_spill] sm:$0xff] }
 0x1c1   : > { %v2093_v59 = vpop.permute.xlu0 %2092  ;;  %v2391_v7 = vsel %vm2378_vm5, %v6893_v35, %v2109_v16  ;;  %v1315_v16 = vrot.slane %v1034_v20, 1  ;;  %v6900_v20 = vld [vmem:[#allocation11_spill] sm:$0xff] }
 0x1c2   : > { %2138 = vrot.lane.b32.xlu1 %v6088_v8, %s4563_s20  ;;  %v2383_v11 = vsel %vm2378_vm5, %v6894_v54, %v2093_v59 }
 0x1c3   : > { %2136 = vrot.lane.b32.xlu0 %v6074_v9, %s4563_s20  ;;  %v1316_v6 = vsel %vm1193_vm2, %v1314_v50, %v1315_v16 }
 0x1c4   : > { %v2111_v63 = vpop.permute.xlu1 %2110 }
 0x1c5   : > { %v2095_v60 = vpop.permute.xlu0 %2094  ;;  %v2392_v28 = vsel %vm2378_vm5, %v6896_v17, %v2111_v63  ;;  %v1675_v63 = vrot.slane %v6129_v10, 2  ;;  %v4511_v17 = vld [vmem:[#allocation2 + $0x290] sm:$0xff] }
 0x1c6   : > { %2288 = vrot.lane.b32.xlu1 %v6098_v52, %s4564_s18  ;;  %v2384_v40 = vsel %vm2378_vm5, %v6897_v51, %v2095_v60 }
 0x1c7   : > { %2286 = vrot.lane.b32.xlu0 %v6088_v8, %s4564_s18  ;;  %v1677_v4 = vsel %vm1554_vm3, %v1675_v63, %v1676_v45 }
 0x1c8   : > { %v2259_v30 = vpop.permute.xlu1 %2258 }
 0x1c9   : > { %v2243_v62 = vpop.permute.xlu0 %2242  ;;  %v6115_v55 = vsel %vm2427_vm6, %v2391_v7, %v2259_v30  ;;  %v4510_v30 = vld [vmem:[#allocation2 + $0x270] sm:$0xff] }
 0x1ca   : > { %v2432_v42 = vsel %vm2427_vm6, %v2383_v11, %v2243_v62  ;;  %2142 = vrot.lane.b32.xlu1 %v6110_v5, %s4563_s20  ;;  %4142 = vmatprep.mubr.msk.f32.mxu1 %vm2495_vm7, %v6115_v55  ;;  %v1954_v54 = vsel %vm538_vm0, %v4510_v30, %v5759_v43  ;;  %v6899_v11 = vld [vmem:[#allocation9_spill] sm:$0xff]  ;;  %v4512_v43 = vld [vmem:[#allocation2 + $0x2a0] sm:$0xff] }
 0x1cb   : > { %2140 = vrot.lane.b32.xlu0 %v6098_v52, %s4563_s20  ;;  %4208 = vmatprep.mubr.msk.f32.mxu0 %vm2495_vm7, %v2432_v42  ;;  %v2015_v48 = vsel %vm1975_vm4, %v1954_v54, %v5775_v46 }
 0x1cc   : > { %v2261_v37 = vpop.permute.xlu1 %2260 }
 0x1cd   : > { %v2245_v3 = vpop.permute.xlu0 %2244  ;;  %v6138_v19 = vsel %vm2427_vm6, %v2392_v28, %v2261_v37  ;;  %v1956_v28 = vsel %vm538_vm0, %v4511_v17, %v5803_v57  ;;  %v1957_v37 = vsel %vm538_vm0, %v4512_v43, %v5796_v36  ;;  %v6909_v43 = vld [vmem:[#allocation28_spill] sm:$0xff] }
 0x1ce   : > { %v2433_v33 = vsel %vm2427_vm6, %v2384_v40, %v2245_v3  ;;  %2292 = vrot.lane.b32.xlu1 %v6133_v15, %s4564_s18  ;;  %4143 = vmatmul.mubr.msk.f32.gmra.mrb[4].mxu1 %vm2495_vm7, %v6138_v19  ;;  %v6183_v40 = vsel %vm1975_vm4, %v1957_v37, %v5825_v2  ;;  %v6188_v57 = vsel %vm1975_vm4, %v1956_v28, %v5816_v29  ;;  %v4513_v2 = vld [vmem:[#allocation2 + $0x2b0] sm:$0xff] }
 0x1cf   : > { %2290 = vrot.lane.b32.xlu0 %v6110_v5, %s4564_s18  ;;  %4209 = vmatmul.mubr.msk.f32.gmra.mrb[4].mxu0 %vm2495_vm7, %v2433_v33  ;;  %v1958_v36 = vsel %vm538_vm0, %v4513_v2, %v5812_v41  ;;  %v6901_v33 = vld [vmem:[#allocation10_spill] sm:$0xff] }
 0x1d0   : > { %v2113_v59 = vpop.permute.xlu1 %2112  ;;  %v6201_v29 = vsel %vm1975_vm4, %v1958_v36, %v5822_v25  ;;  %v6902_v25 = vld [vmem:[#allocation25_spill] sm:$0xff]  ;;  %v4517_v28 = vld [vmem:[#allocation2 + $0x2f0] sm:$0xff]  ;;  %v6912_v36 = vld [vmem:[#allocation15_spill] sm:$0xff] }
 0x1d1   : > { %v2097_v18 = vpop.permute.xlu0 %2096  ;;  %v2393_v35 = vsel %vm2378_vm5, %v6898_v31, %v2113_v59  ;;  %v4514_v59 = vld [vmem:[#allocation2 + $0x2c0] sm:$0xff] }
 0x1d2   : > { %2146 = vrot.lane.b32.xlu1 %v2014_v12, %s4563_s20  ;;  %v2385_v62 = vsel %vm2378_vm5, %v6899_v11, %v2097_v18  ;;  %v4516_v11 = vld [vmem:[#allocation2 + $0x2e0] sm:$0xff] }
 0x1d3   : > { %2144 = vrot.lane.b32.xlu0 %v6133_v15, %s4563_s20 }
 0x1d4   : > { %v2115_v60 = vpop.permute.xlu1 %2114 }
 0x1d5   : > { %v2099_v32 = vpop.permute.xlu0 %2098  ;;  %v2394_v50 = vsel %vm2378_vm5, %v6901_v33, %v2115_v60 }
 0x1d6   : > { %1454 = vrot.lane.b32.xlu1 %v1316_v6, %s4561_s30  ;;  %v2386_v46 = vsel %vm2378_vm5, %v6900_v20, %v2099_v32  ;;  %v6905_v32 = vld [vmem:[#allocation17_spill] sm:$0xff]  ;;  %v6910_v20 = vld [vmem:[#allocation32_spill] sm:$0xff] }
 0x1d7   : > { %2294 = vrot.lane.b32.xlu0 %v2014_v12, %s4564_s18  ;;  %v1959_v12 = vsel %vm538_vm0, %v4514_v59, %v5842_v27 }
 0x1d8   : > { %v2263_v7 = vpop.permute.xlu1 %2262  ;;  %v6219_v27 = vsel %vm1975_vm4, %v1959_v12, %v6902_v25 }
 0x1d9   : > { %v2247_v42 = vpop.permute.xlu0 %2246  ;;  %v2442_v61 = vsel %vm2427_vm6, %v2393_v35, %v2263_v7  ;;  %v6906_v35 = vld [vmem:[#allocation23_spill] sm:$0xff] }
 0x1da   : > { %v2434_v24 = vsel %vm2427_vm6, %v2385_v62, %v2247_v42  ;;  %1815 = vrot.lane.b32.xlu1 %v1677_v4, %s4562_s21  ;;  %4145 = vmatprep.mubr.msk.f32.mxu1 %vm2495_vm7, %v2442_v61  ;;  %v6907_v62 = vld [vmem:[#allocation26_spill] sm:$0xff] }
 0x1db   : > { %2296 = vrot.lane.b32.xlu0 %v2015_v48, %s4564_s18  ;;  %4211 = vmatprep.mubr.msk.f32.mxu0 %vm2495_vm7, %v2434_v24  ;;  %v1961_v42 = vsel %vm538_vm0, %v4516_v11, %v6907_v62  ;;  %v6908_v24 = vld [vmem:[#allocation31_spill] sm:$0xff] }
 0x1dc   : > { %v2249_v51 = vpop.permute.xlu1 %2248  ;;  %v6262_v17 = vsel %vm1975_vm4, %v1961_v42, %v6908_v24  ;;  %v6915_v11 = vld [vmem:[#allocation19_spill] sm:$0xff] }
 0x1dd   : > { %v1415_v3 = vpop.permute.xlu0 %1414  ;;  %v2435_v22 = vsel %vm2427_vm6, %v2386_v46, %v2249_v51 }
 0x1de   : > { %2150 = vrot.lane.b32.xlu1 %v6183_v40, %s4563_s20  ;;  %4212 = vmatmul.mubr.msk.f32.gmra.mrb[6].mxu0 %vm2495_vm7, %v2435_v22  ;;  %v6911_v22 = vld [vmem:[#allocation33_spill] sm:$0xff] }
 0x1df   : > { %2148 = vrot.lane.b32.xlu0 %v6188_v57, %s4563_s20  ;;  %4214 = vmatprep.mubr.msk.f32.mxu0 %vm2495_vm7, %v5961_v49  ;;  %v6903_v49 = vld [vmem:[#allocation13_spill] sm:$0xff] }
 0x1e0   : > { %v1776_v47 = vpop.permute.xlu1 %1775  ;;  %v1935_v6 = vsel %vm538_vm0, %v6903_v49, %v1415_v3  ;;  %v4518_v3 = vld [vmem:[#allocation2 + $0x300] sm:$0xff]  ;;  %v4519_v49 = vld [vmem:[#allocation2 + $0x310] sm:$0xff] }
 0x1e1   : > { %v2265_v16 = vpop.permute.xlu0 %2264  ;;  %v1996_v60 = vsel %vm1975_vm4, %v1935_v6, %v1776_v47  ;;  %v1963_v2 = vsel %vm538_vm0, %v4518_v3, %v6911_v22 }
 0x1e2   : > { %v2443_v18 = vsel %vm2427_vm6, %v2394_v50, %v2265_v16  ;;  %2300 = vrot.lane.b32.xlu1 %v6201_v29, %s4564_s18  ;;  %4215 = vmatmul.mubr.msk.f32.gmra.mrb[8].mxu0 %vm2495_vm7, %v5999_v14  ;;  %v4515_v14 = vld [vmem:[#allocation2 + $0x2d0] sm:$0xff]  ;;  %v6287_v50 = vld [vmem:[#allocation2 + $0x320] sm:$0xff]  ;;  %v1054_v16 = vld [vmem:[#allocation2 + $0x328] sm:$0x3]  ;;  %v2024_v59 = vsel %vm1975_vm4, %v1963_v2, %v5978_v34  ;;  %v1964_v34 = vsel %vm538_vm0, %v4519_v49, %v5949_v39 }
 0x1e3   : > { %2298 = vrot.lane.b32.xlu0 %v6183_v40, %s4564_s18  ;;  %4146 = vmatmul.mubr.msk.f32.gmra.mrb[6].mxu1 %vm2495_vm7, %v2443_v18  ;;  %v1706_v25 = vrot.slane %v1054_v16, 2  ;;  %v6918_v2 = vld [vmem:[#allocation24_spill] sm:$0xff] }
 0x1e4   : > { %4217 = vmatprep.mubr.msk.f32.mxu0 %vm2495_vm7, %v6051_v23  ;;  %v2119_v41 = vpop.permute.xlu1 %2118  ;;  %v6904_v23 = vld [vmem:[#allocation21_spill] sm:$0xff] }
 0x1e5   : > { %v2117_v63 = vpop.permute.xlu0 %2116  ;;  %v1960_v45 = vsel %vm538_vm0, %v4515_v14, %v6904_v23  ;;  %v2396_v4 = vsel %vm2378_vm5, %v6905_v32, %v2119_v41  ;;  %v1705_v41 = vrot.slane %v6287_v50, 2  ;;  %v1345_v14 = vrot.slane %v1054_v16, 1 }
 0x1e6   : > { %2154 = vrot.lane.b32.xlu1 %v6219_v27, %s4563_s20  ;;  %4218 = vmatmul.mubr.msk.f32.gmra.mrb[10].mxu0 %vm2495_vm7, %v6069_v53  ;;  %v6238_v7 = vsel %vm1975_vm4, %v1960_v45, %v6906_v35  ;;  %v2395_v53 = vsel %vm2378_vm5, %v1996_v60, %v2117_v63  ;;  %v1344_v63 = vrot.slane %v6287_v50, 1  ;;  %v2025_v23 = vsel %vm1975_vm4, %v1964_v34, %v5993_v56  ;;  %v6914_v56 = vld [vmem:[#allocation16_spill] sm:$0xff] }
 0x1e7   : > { %2152 = vrot.lane.b32.xlu0 %v6201_v29, %s4563_s20  ;;  %4220 = vmatprep.mubr.msk.f32.mxu0 %vm2495_vm7, %v6115_v55  ;;  %v1707_v60 = vsel %vm1554_vm3, %v1705_v41, %v1706_v25  ;;  %v6920_v25 = vld [vmem:[#allocation27_spill] sm:$0xff] }
 0x1e8   : > { %v2269_v31 = vpop.permute.xlu1 %2268 }
 0x1e9   : > { %v2267_v30 = vpop.permute.xlu0 %2266  ;;  %v6242_v54 = vsel %vm2427_vm6, %v2396_v4, %v2269_v31  ;;  %v1346_v4 = vsel %vm1193_vm2, %v1344_v63, %v1345_v14  ;;  %v6913_v31 = vld [vmem:[#allocation18_spill] sm:$0xff] }
 0x1ea   : > { %v6245_v55 = vsel %vm2427_vm6, %v2395_v53, %v2267_v30  ;;  %2304 = vrot.lane.b32.xlu1 %v6238_v7, %s4564_s18  ;;  %4221 = vmatmul.mubr.msk.f32.gmra.mrb[12].mxu0 %vm2495_vm7, %v6138_v19 }
 0x1eb   : > { %2302 = vrot.lane.b32.xlu0 %v6219_v27, %s4564_s18  ;;  %4148 = vmatprep.mubr.msk.f32.mxu1 %vm2495_vm7, %v6245_v55 }
 0x1ec   : > { %4149 = vmatmul.mubr.msk.f32.gmra.mrb[8].mxu1 %vm2495_vm7, %v6242_v54  ;;  %4223 = vmatprep.mubr.msk.f32.mxu0 %vm2495_vm7, %v2442_v61  ;;  %v2121_v48 = vpop.permute.xlu1 %2120  ;;  %v1962_v61 = vsel %vm538_vm0, %v4517_v28, %v6909_v43 }
 0x1ed   : > { %v1477_v19 = vpop.permute.xlu0 %1476  ;;  %v6275_v46 = vsel %vm1975_vm4, %v1962_v61, %v6910_v20  ;;  %v2397_v47 = vsel %vm2378_vm5, %v6912_v36, %v2121_v48  ;;  %v6917_v61 = vld [vmem:[#allocation22_spill] sm:$0xff] }
 0x1ee   : > { %2158 = vrot.lane.b32.xlu1 %v6262_v17, %s4563_s20  ;;  %4224 = vmatmul.mubr.msk.f32.gmra.mrb[14].mxu0 %vm2495_vm7, %v2443_v18  ;;  %v1966_v30 = vsel %vm538_vm0, %v6914_v56, %v1477_v19  ;;  %v6916_v19 = vld [vmem:[#allocation20_spill] sm:$0xff] }
 0x1ef   : > { %2156 = vrot.lane.b32.xlu0 %v6238_v7, %s4563_s20  ;;  %4268 = vmatprep.mubr.msk.f32.mxu0 %vm2495_vm7, %v6245_v55 }
 0x1f0   : > { %v1838_v37 = vpop.permute.xlu1 %1837 }
 0x1f1   : > { %v1479_v51 = vpop.permute.xlu0 %1478  ;;  %v6330_v28 = vsel %vm1975_vm4, %v1966_v30, %v1838_v37 }
 0x1f2   : > { %2308 = vrot.lane.b32.xlu1 %v6275_v46, %s4564_s18  ;;  %4269 = vmatmul.mubr.msk.f32.vlgmr.msra.gmra.mrb[0].mxu0 %vm2495_vm7, %v6242_v54  ;;  %v1967_v62 = vsel %vm538_vm0, %v6915_v11, %v1479_v51 }
 0x1f3   : > { %2306 = vrot.lane.b32.xlu0 %v6262_v17, %s4564_s18 }
 0x1f4   : > { %v2271_v33 = vpop.permute.xlu1 %2270 }
 0x1f5   : > { %v2123_v12 = vpop.permute.xlu0 %2122  ;;  %v6292_v18 = vsel %vm2427_vm6, %v2397_v47, %v2271_v33 }
 0x1f6   : > { %2162 = vrot.lane.b32.xlu1 %v2024_v59, %s4563_s20  ;;  %4151 = vmatprep.mubr.msk.f32.mxu1 %vm2495_vm7, %v6292_v18  ;;  %v2398_v39 = vsel %vm2378_vm5, %v6913_v31, %v2123_v12 }
 0x1f7   : > { %2160 = vrot.lane.b32.xlu0 %v6275_v46, %s4563_s20  ;;  %4271 = vmatprep.mubr.msk.f32.mxu0 %vm2495_vm7, %v6292_v18 }
 0x1f8   : > { %v1840_v6 = vpop.permute.xlu1 %1839 }
 0x1f9   : > { %v1481_v45 = vpop.permute.xlu0 %1480  ;;  %v6327_v48 = vsel %vm1975_vm4, %v1967_v62, %v1840_v6 }
 0x1fa   : > { %2312 = vrot.lane.b32.xlu1 %v2025_v23, %s4564_s18  ;;  %v1968_v43 = vsel %vm538_vm0, %v6916_v19, %v1481_v45  ;;  %v6921_v45 = vld [vmem:[#allocation30_spill] sm:$0xff] }
 0x1fb   : > { %2310 = vrot.lane.b32.xlu0 %v2024_v59, %s4564_s18  ;;  %v6919_v59 = vld [vmem:[#allocation29_spill] sm:$0xff] }
 0x1fc   : > { %v1842_v32 = vpop.permute.xlu1 %1841 }
 0x1fd   : > { %v2273_v35 = vpop.permute.xlu0 %2272  ;;  %v6341_v3 = vsel %vm1975_vm4, %v1968_v43, %v1842_v32 }
 0x1fe   : > { %v6314_v53 = vsel %vm2427_vm6, %v2398_v39, %v2273_v35  ;;  %1835 = vrot.lane.b32.xlu1 %v1707_v60, %s4562_s21 }
 0x1ff   : > { %1474 = vrot.lane.b32.xlu0 %v1346_v4, %s4561_s30  ;;  %4152 = vmatmul.mubr.msk.f32.gmra.mrb[10].mxu1 %vm2495_vm7, %v6314_v53 }
 0x200   : > { %4272 = vmatmul.mubr.msk.f32.gmra.mrb[2].mxu0 %vm2495_vm7, %v6314_v53  ;;  %v1483_v42 = vpop.permute.xlu1 %1482 }
 0x201   : > { %v2125_v24 = vpop.permute.xlu0 %2124  ;;  %v1969_v36 = vsel %vm538_vm0, %v6918_v2, %v1483_v42 }
 0x202   : > { %2166 = vrot.lane.b32.xlu1 %v6327_v48, %s4563_s20  ;;  %v2399_v20 = vsel %vm2378_vm5, %v6917_v61, %v2125_v24 }
 0x203   : > { %2164 = vrot.lane.b32.xlu0 %v6330_v28, %s4563_s20 }
 0x204   : > { %v2275_v51 = vpop.permute.xlu1 %2274 }
 0x205   : > { %v2127_v22 = vpop.permute.xlu0 %2126  ;;  %v6344_v37 = vsel %vm2427_vm6, %v2399_v20, %v2275_v51 }
 0x206   : > { %2316 = vrot.lane.b32.xlu1 %v6341_v3, %s4564_s18  ;;  %4154 = vmatprep.mubr.msk.f32.mxu1 %vm2495_vm7, %v6344_v37  ;;  %v2400_v49 = vsel %vm2378_vm5, %v6920_v25, %v2127_v22 }
 0x207   : > { %2314 = vrot.lane.b32.xlu0 %v6327_v48, %s4564_s18  ;;  %4274 = vmatprep.mubr.msk.f32.mxu0 %vm2495_vm7, %v6344_v37 }
 0x208   : > { %v1844_v47 = vpop.permute.xlu1 %1843 }
 0x209   : > { %v1485_v33 = vpop.permute.xlu0 %1484  ;;  %v6357_v16 = vsel %vm1975_vm4, %v1969_v36, %v1844_v47 }
 0x20a   : > { %v1970_v12 = vsel %vm538_vm0, %v6919_v59, %v1485_v33  ;;  %2170 = vrot.lane.b32.xlu1 %v6357_v16, %s4563_s20 }
 0x20b   : > { %2168 = vrot.lane.b32.xlu0 %v6341_v3, %s4563_s20 }
 0x20c   : > { %v1846_v41 = vpop.permute.xlu1 %1845 }
 0x20d   : > { %v2277_v34 = vpop.permute.xlu0 %2276  ;;  %v6368_v6 = vsel %vm1975_vm4, %v1970_v12, %v1846_v41 }
 0x20e   : > { %v6371_v63 = vsel %vm2427_vm6, %v2400_v49, %v2277_v34  ;;  %2320 = vrot.lane.b32.xlu1 %v6368_v6, %s4564_s18 }
 0x20f   : > { %4155 = vmatmul.mubr.msk.f32.gmra.mrb[12].mxu1 %vm2495_vm7, %v6371_v63  ;;  %4275 = vmatmul.mubr.msk.f32.gmra.mrb[4].mxu0 %vm2495_vm7, %v6371_v63 }
 0x210   : > { %2318 = vrot.lane.b32.xlu0 %v6357_v16, %s4564_s18  ;;  %v1487_v14 = vpop.permute.xlu1 %1486 }
 0x211   : > { %v2129_v23 = vpop.permute.xlu0 %2128  ;;  %v1971_v11 = vsel %vm538_vm0, %v5901_v44, %v1487_v14 }
 0x212   : > { %v2401_v60 = vsel %vm2378_vm5, %v6921_v45, %v2129_v23 }
 0x214   : > { %2172 = vrot.lane.b32.xlu0 %v6368_v6, %s4563_s20  ;;  %v2279_v32 = vpop.permute.xlu1 %2278 }
 0x215   : > { %v2131_v4 = vpop.permute.xlu0 %2130  ;;  %v6386_v31 = vsel %vm2427_vm6, %v2401_v60, %v2279_v32 }
 0x216   : > { %4157 = vmatprep.mubr.msk.f32.mxu1 %vm2495_vm7, %v6386_v31  ;;  %4277 = vmatprep.mubr.msk.f32.mxu0 %vm2495_vm7, %v6386_v31  ;;  %v2402_v56 = vsel %vm2378_vm5, %v5911_v1, %v2131_v4 }
 0x218   : > { %v1489_v39 = vpop.permute.xlu1 %1488 }
 0x219   : > { %v1435_v35 = vpop.permute.xlu0 %1434  ;;  %v1972_v44 = vsel %vm538_vm0, %v5917_v13, %v1489_v39 }
 0x21a   : > { %v1945_v51 = vsel %vm538_vm0, %v5921_v0, %v1435_v35 }
 0x21c   : > { %v2281_v30 = vpop.permute.xlu1 %2280 }
 0x21d   : > { %v1848_v62 = vpop.permute.xlu0 %1847  ;;  %v6397_v42 = vsel %vm2427_vm6, %v2402_v56, %v2281_v30 }
 0x21e   : > { %v6400_v24 = vsel %vm1975_vm4, %v1971_v11, %v1848_v62  ;;  %4158 = vmatmul.mubr.msk.f32.gmra.mrb[14].mxu1 %vm2495_vm7, %v6397_v42  ;;  %4278 = vmatmul.mubr.msk.f32.gmra.mrb[6].mxu0 %vm2495_vm7, %v6397_v42 }
 0x21f   : > { %2322 = vrot.lane.b32.xlu0 %v6400_v24, %s4564_s18  ;;  %2174 = vrot.lane.b32.xlu1 %v6400_v24, %s4563_s20 }
 0x220   : > { %v1850_v1 = vpop.permute.xlu1 %1849 }
 0x221   : > { %v1796_v19 = vpop.permute.xlu0 %1795  ;;  %v6413_v43 = vsel %vm1975_vm4, %v1972_v44, %v1850_v1 }
 0x222   : > { %v2006_v22 = vsel %vm1975_vm4, %v1945_v51, %v1796_v19 }
 0x223   : > { %2176 = vrot.lane.b32.xlu0 %v6413_v43, %s4563_s20  ;;  %2324 = vrot.lane.b32.xlu1 %v6413_v43, %s4564_s18 }
 0x224   : > { %v1491_v61 = vpop.permute.xlu1 %1490 }
 0x225   : > { %v2133_v20 = vpop.permute.xlu0 %2132  ;;  %v1973_v33 = vsel %vm538_vm0, %v5974_v26, %v1491_v61 }
 0x226   : > { %v2403_v13 = vsel %vm2378_vm5, %v2006_v22, %v2133_v20 }
 0x228   : > { %v2283_v2 = vpop.permute.xlu1 %2282 }
 0x229   : > { %v2135_v36 = vpop.permute.xlu0 %2134  ;;  %v6424_v47 = vsel %vm2427_vm6, %v2403_v13, %v2283_v2 }
 0x22a   : > { %4160 = vmatprep.mubr.msk.f32.mxu1 %vm2495_vm7, %v6424_v47  ;;  %4280 = vmatprep.mubr.msk.f32.mxu0 %vm2495_vm7, %v6424_v47  ;;  %v2404_v49 = vsel %vm2378_vm5, %v6020_v21, %v2135_v36 }
 0x22c   : > { %v1852_v59 = vpop.permute.xlu1 %1851 }
 0x22d   : > { %v1493_v0 = vpop.permute.xlu0 %1492  ;;  %v2034_v12 = vsel %vm1975_vm4, %v1973_v33, %v1852_v59 }
 0x22e   : > { %v1974_v41 = vsel %vm538_vm0, %v6015_v58, %v1493_v0  ;;  %2326 = vrot.lane.b32.xlu0 %v2034_v12, %s4564_s18  ;;  %2178 = vrot.lane.b32.xlu1 %v2034_v12, %s4563_s20 }
 0x230   : > { %v1854_v25 = vpop.permute.xlu1 %1853 }
 0x231   : > { %v2285_v34 = vpop.permute.xlu0 %2284  ;;  %v2035_v14 = vsel %vm1975_vm4, %v1974_v41, %v1854_v25 }
 0x232   : > { %v6441_v26 = vsel %vm2427_vm6, %v2404_v49, %v2285_v34  ;;  %2328 = vrot.lane.b32.xlu1 %v2035_v14, %s4564_s18 }
 0x233   : > { %4161 = vmatmul.mubr.msk.f32.gmra.mrb[16].mxu1 %vm2495_vm7, %v6441_v26  ;;  %4281 = vmatmul.mubr.msk.f32.gmra.mrb[8].mxu0 %vm2495_vm7, %v6441_v26 }
 0x234   : > { %v2139_v58 = vpop.permute.xlu1 %2138 }
 0x235   : > { %v2137_v23 = vpop.permute.xlu0 %2136  ;;  %v2406_v45 = vsel %vm2378_vm5, %v6074_v9, %v2139_v58 }
 0x236   : > { %v2405_v60 = vsel %vm2378_vm5, %v6032_v38, %v2137_v23 }
 0x238   : > { %v2289_v21 = vpop.permute.xlu1 %2288 }
 0x239   : > { %v2287_v32 = vpop.permute.xlu0 %2286  ;;  %v6453_v4 = vsel %vm2427_vm6, %v2406_v45, %v2289_v21 }
 0x23a   : > { %v6456_v39 = vsel %vm2427_vm6, %v2405_v60, %v2287_v32 }
 0x23b   : > { %4163 = vmatprep.mubr.msk.f32.mxu1 %vm2495_vm7, %v6456_v39  ;;  %4283 = vmatprep.mubr.msk.f32.mxu0 %vm2495_vm7, %v6456_v39 }
 0x23c   : > { %4164 = vmatmul.mubr.msk.f32.gmra.mrb[18].mxu1 %vm2495_vm7, %v6453_v4  ;;  %4284 = vmatmul.mubr.msk.f32.gmra.mrb[10].mxu0 %vm2495_vm7, %v6453_v4  ;;  %v2143_v38 = vpop.permute.xlu1 %2142 }
 0x23d   : > { %v2141_v9 = vpop.permute.xlu0 %2140  ;;  %v2408_v35 = vsel %vm2378_vm5, %v6098_v52, %v2143_v38 }
 0x23e   : > { %v2407_v30 = vsel %vm2378_vm5, %v6088_v8, %v2141_v9 }
 0x240   : > { %v2293_v56 = vpop.permute.xlu1 %2292 }
 0x241   : > { %v2291_v11 = vpop.permute.xlu0 %2290  ;;  %v6471_v62 = vsel %vm2427_vm6, %v2408_v35, %v2293_v56 }
 0x242   : > { %v6474_v44 = vsel %vm2427_vm6, %v2407_v30, %v2291_v11 }
 0x243   : > { %4166 = vmatprep.mubr.msk.f32.mxu1 %vm2495_vm7, %v6474_v44  ;;  %4286 = vmatprep.mubr.msk.f32.mxu0 %vm2495_vm7, %v6474_v44 }
 0x244   : > { %4167 = vmatmul.mubr.msk.f32.gmra.mrb[20].mxu1 %vm2495_vm7, %v6471_v62  ;;  %4287 = vmatmul.mubr.msk.f32.gmra.mrb[12].mxu0 %vm2495_vm7, %v6471_v62  ;;  %v2147_v8 = vpop.permute.xlu1 %2146 }
 0x245   : > { %v2145_v52 = vpop.permute.xlu0 %2144  ;;  %v2410_v22 = vsel %vm2378_vm5, %v6133_v15, %v2147_v8 }
 0x246   : > { %v2409_v19 = vsel %vm2378_vm5, %v6110_v5, %v2145_v52 }
 0x248   : > { %v1455_v1 = vpop.permute.xlu1 %1454 }
 0x249   : > { %v2295_v61 = vpop.permute.xlu0 %2294  ;;  %v1955_v5 = vsel %vm538_vm0, %v6129_v10, %v1455_v1 }
 0x24a   : > { %v6487_v20 = vsel %vm2427_vm6, %v2409_v19, %v2295_v61 }
 0x24b   : > { %4169 = vmatprep.mubr.msk.f32.mxu1 %vm2495_vm7, %v6487_v20  ;;  %4289 = vmatprep.mubr.msk.f32.mxu0 %vm2495_vm7, %v6487_v20 }
 0x24c   : > { %v1816_v51 = vpop.permute.xlu1 %1815 }
 0x24d   : > { %v2297_v13 = vpop.permute.xlu0 %2296  ;;  %v2016_v59 = vsel %vm1975_vm4, %v1955_v5, %v1816_v51 }
 0x24e   : > { %v6496_v2 = vsel %vm2427_vm6, %v2410_v22, %v2297_v13 }
 0x24f   : > { %4170 = vmatmul.mubr.msk.f32.gmra.mrb[22].mxu1 %vm2495_vm7, %v6496_v2  ;;  %4290 = vmatmul.mubr.msk.f32.gmra.mrb[14].mxu0 %vm2495_vm7, %v6496_v2 }
 0x250   : > { %v2151_v36 = vpop.permute.xlu1 %2150 }
 0x251   : > { %v2149_v33 = vpop.permute.xlu0 %2148  ;;  %v2412_v15 = vsel %vm2378_vm5, %v6188_v57, %v2151_v36 }
 0x252   : > { %v2411_v12 = vsel %vm2378_vm5, %v2016_v59, %v2149_v33 }
 0x254   : > { %v2301_v0 = vpop.permute.xlu1 %2300 }
 0x255   : > { %v2299_v41 = vpop.permute.xlu0 %2298  ;;  %v2461_v25 = vsel %vm2427_vm6, %v2412_v15, %v2301_v0 }
 0x256   : > { %v2460_v10 = vsel %vm2427_vm6, %v2411_v12, %v2299_v41 }
 0x257   : > { %4172 = vmatprep.mubr.msk.f32.mxu1 %vm2495_vm7, %v2460_v10  ;;  %4292 = vmatprep.mubr.msk.f32.mxu0 %vm2495_vm7, %v2460_v10 }
 0x258   : > { %4173 = vmatmul.mubr.msk.f32.gmra.mrb[24].mxu1 %vm2495_vm7, %v2461_v25  ;;  %4293 = vmatmul.mubr.msk.f32.gmra.mrb[16].mxu0 %vm2495_vm7, %v2461_v25  ;;  %v2155_v49 = vpop.permute.xlu1 %2154 }
 0x259   : > { %v2153_v34 = vpop.permute.xlu0 %2152  ;;  %v2414_v57 = vsel %vm2378_vm5, %v6201_v29, %v2155_v49 }
 0x25a   : > { %v2413_v58 = vsel %vm2378_vm5, %v6183_v40, %v2153_v34 }
 0x25c   : > { %v2305_v14 = vpop.permute.xlu1 %2304 }
 0x25d   : > { %v2303_v23 = vpop.permute.xlu0 %2302  ;;  %v2463_v45 = vsel %vm2427_vm6, %v2414_v57, %v2305_v14 }
 0x25e   : > { %v2462_v21 = vsel %vm2427_vm6, %v2413_v58, %v2303_v23 }
 0x25f   : > { %4175 = vmatprep.mubr.msk.f32.mxu1 %vm2495_vm7, %v2462_v21  ;;  %4295 = vmatprep.mubr.msk.f32.mxu0 %vm2495_vm7, %v2462_v21 }
 0x260   : > { %4176 = vmatmul.mubr.msk.f32.gmra.mrb[26].mxu1 %vm2495_vm7, %v2463_v45  ;;  %4296 = vmatmul.mubr.msk.f32.gmra.mrb[18].mxu0 %vm2495_vm7, %v2463_v45  ;;  %v2159_v60 = vpop.permute.xlu1 %2158 }
 0x261   : > { %v2157_v32 = vpop.permute.xlu0 %2156  ;;  %v2416_v29 = vsel %vm2378_vm5, %v6238_v7, %v2159_v60 }
 0x262   : > { %v2415_v40 = vsel %vm2378_vm5, %v6219_v27, %v2157_v32 }
 0x264   : > { %v2309_v38 = vpop.permute.xlu1 %2308 }
 0x265   : > { %v2307_v9 = vpop.permute.xlu0 %2306  ;;  %v2465_v35 = vsel %vm2427_vm6, %v2416_v29, %v2309_v38 }
 0x266   : > { %v2464_v56 = vsel %vm2427_vm6, %v2415_v40, %v2307_v9 }
 0x267   : > { %4178 = vmatprep.mubr.msk.f32.mxu1 %vm2495_vm7, %v2464_v56  ;;  %4298 = vmatprep.mubr.msk.f32.mxu0 %vm2495_vm7, %v2464_v56 }
 0x268   : > { %4179 = vmatmul.mubr.msk.f32.gmra.mrb[28].mxu1 %vm2495_vm7, %v2465_v35  ;;  %4299 = vmatmul.mubr.msk.f32.gmra.mrb[20].mxu0 %vm2495_vm7, %v2465_v35  ;;  %v2163_v30 = vpop.permute.xlu1 %2162 }
 0x269   : > { %v2161_v11 = vpop.permute.xlu0 %2160  ;;  %v2418_v7 = vsel %vm2378_vm5, %v6275_v46, %v2163_v30 }
 0x26a   : > { %v2417_v27 = vsel %vm2378_vm5, %v6262_v17, %v2161_v11 }
 0x26c   : > { %v2313_v8 = vpop.permute.xlu1 %2312 }
 0x26d   : > { %v2311_v52 = vpop.permute.xlu0 %2310  ;;  %v2467_v1 = vsel %vm2427_vm6, %v2418_v7, %v2313_v8 }
 0x26e   : > { %v2466_v19 = vsel %vm2427_vm6, %v2417_v27, %v2311_v52 }
 0x26f   : > { %4181 = vmatprep.mubr.msk.f32.mxu1 %vm2495_vm7, %v2466_v19  ;;  %4301 = vmatprep.mubr.msk.f32.mxu0 %vm2495_vm7, %v2466_v19 }
 0x270   : > { %4182 = vmatmul.mubr.msk.f32.gmra.mrb[30].mxu1 %vm2495_vm7, %v2467_v1  ;;  %4302 = vmatmul.mubr.msk.f32.gmra.mrb[22].mxu0 %vm2495_vm7, %v2467_v1  ;;  %v1836_v61 = vpop.permute.xlu1 %1835 }
 0x271   : > { %v1475_v51 = vpop.permute.xlu0 %1474  ;;  %4226 = vmatprep.mubr.msk.f32.mxu1 %vm2495_vm7, %v6245_v55 }
 0x272   : > { %v1965_v17 = vsel %vm538_vm0, %v6287_v50, %v1475_v51 }
 0x273   : > { %v2026_v13 = vsel %vm1975_vm4, %v1965_v17, %v1836_v61 }
 0x274   : > { %4227 = vmatmul.mubr.msk.f32.vlgmr.msra.gmra.mrb[16].mxu1 %vm2495_vm7, %v6242_v54  ;;  %v2167_v46 = vpop.permute.xlu1 %2166 }
 0x275   : > { %v2165_v22 = vpop.permute.xlu0 %2164  ;;  %4229 = vmatprep.mubr.msk.f32.mxu1 %vm2495_vm7, %v6292_v18  ;;  %v2420_v5 = vsel %vm2378_vm5, %v6330_v28, %v2167_v46 }
 0x276   : > { %v2419_v36 = vsel %vm2378_vm5, %v2026_v13, %v2165_v22 }
 0x278   : > { %4230 = vmatmul.mubr.msk.f32.gmra.mrb[18].mxu1 %vm2495_vm7, %v6314_v53  ;;  %v2317_v55 = vpop.permute.xlu1 %2316 }
 0x279   : > { %v2315_v50 = vpop.permute.xlu0 %2314  ;;  %4232 = vmatprep.mubr.msk.f32.mxu1 %vm2495_vm7, %v6344_v37  ;;  %v2469_v54 = vsel %vm2427_vm6, %v2420_v5, %v2317_v55 }
 0x27a   : > { %v2468_v33 = vsel %vm2427_vm6, %v2419_v36, %v2315_v50 }
 0x27b   : > { %4304 = vmatprep.mubr.msk.f32.mxu0 %vm2495_vm7, %v2468_v33 }
 0x27c   : > { %4233 = vmatmul.mubr.msk.f32.gmra.mrb[20].mxu1 %vm2495_vm7, %v6371_v63  ;;  %4305 = vmatmul.mubr.msk.f32.gmra.mrb[24].mxu0 %vm2495_vm7, %v2469_v54  ;;  %v2171_v18 = vpop.permute.xlu1 %2170 }
 0x27d   : > { %v2169_v53 = vpop.permute.xlu0 %2168  ;;  %4235 = vmatprep.mubr.msk.f32.mxu1 %vm2495_vm7, %v6386_v31  ;;  %v2422_v37 = vsel %vm2378_vm5, %v6341_v3, %v2171_v18 }
 0x27e   : > { %v2421_v63 = vsel %vm2378_vm5, %v6327_v48, %v2169_v53 }
 0x280   : > { %4236 = vmatmul.mubr.msk.f32.gmra.mrb[22].mxu1 %vm2495_vm7, %v6397_v42  ;;  %v2321_v28 = vpop.permute.xlu1 %2320 }
 0x281   : > { %4238 = vmatprep.mubr.msk.f32.mxu1 %vm2495_vm7, %v6424_v47  ;;  %v2471_v15 = vsel %vm2427_vm6, %v2422_v37, %v2321_v28 }
 0x282   : > { %v2319_v59 = vpop.permute.xlu0 %2318  ;;  %v4138_v0 = vpop.f32.mrb[0].mxu1 }
 0x283   : > { %v2470_v12 = vsel %vm2427_vm6, %v2421_v63, %v2319_v59  ;;  %v2658_v31 = vpop.f32.mrb[1].mxu1 }
 0x284   : > { %4307 = vmatprep.mubr.msk.f32.mxu0 %vm2495_vm7, %v2470_v12  ;;  %4239 = vmatmul.mubr.msk.f32.gmra.mrb[24].mxu1 %vm2495_vm7, %v6441_v26 }
 0x285   : > { %4308 = vmatmul.mubr.msk.f32.gmra.mrb[26].mxu0 %vm2495_vm7, %v2471_v15  ;;  %4241 = vmatprep.mubr.msk.f32.mxu1 %vm2495_vm7, %v6456_v39 }
 0x286   : > { %v2173_v48 = vpop.permute.xlu0 %2172 }
 0x287   : > { %v2423_v3 = vsel %vm2378_vm5, %v6357_v16, %v2173_v48 }
 0x288   : > { %4242 = vmatmul.mubr.msk.f32.gmra.mrb[26].mxu1 %vm2495_vm7, %v6453_v4 }
 0x289   : > { %4244 = vmatprep.mubr.msk.f32.mxu1 %vm2495_vm7, %v6474_v44 }
 0x28c   : > { %4245 = vmatmul.mubr.msk.f32.gmra.mrb[28].mxu1 %vm2495_vm7, %v6471_v62 }
 0x28d   : > { %4247 = vmatprep.mubr.msk.f32.mxu1 %vm2495_vm7, %v6487_v20 }
 0x290   : > { %4248 = vmatmul.mubr.msk.f32.gmra.mrb[30].mxu1 %vm2495_vm7, %v6496_v2 }
 0x291   : > { %v2323_v42 = vpop.permute.xlu0 %2322  ;;  %v2175_v47 = vpop.permute.xlu1 %2174 }
 0x292   : > { %v2472_v26 = vsel %vm2427_vm6, %v2423_v3, %v2323_v42  ;;  %v4141_v4 = vpop.f32.mrb[2].mxu1  ;;  %v2424_v62 = vsel %vm2378_vm5, %v6368_v6, %v2175_v47 }
 0x293   : > { %v2668_v39 = vpop.f32.mrb[3].mxu1  ;;  %4310 = vmatprep.mubr.msk.f32.mxu0 %vm2495_vm7, %v2472_v26 }
 0x295   : > { %v2325_v44 = vpop.permute.xlu1 %2324  ;;  %v2177_v2 = vpop.permute.xlu0 %2176 }
 0x296   : > { %v2473_v20 = vsel %vm2427_vm6, %v2424_v62, %v2325_v44  ;;  %v2425_v16 = vsel %vm2378_vm5, %v6400_v24, %v2177_v2 }
 0x297   : > { %4311 = vmatmul.mubr.msk.f32.gmra.mrb[28].mxu0 %vm2495_vm7, %v2473_v20 }
 0x2a0   : > { %v2327_v41 = vpop.permute.xlu0 %2326  ;;  %v2179_v25 = vpop.permute.xlu1 %2178 }
 0x2a1   : > { %v2474_v10 = vsel %vm2427_vm6, %v2425_v16, %v2327_v41  ;;  %v4144_v49 = vpop.f32.mrb[4].mxu1  ;;  %v2426_v6 = vsel %vm2378_vm5, %v6413_v43, %v2179_v25  ;;  %v6621_v43 = vld [vmem:[%s6836_s6] ss:$0 sm:$0xff] }
 0x2a2   : > { %v2678_v34 = vpop.f32.mrb[5].mxu1  ;;  %4313 = vmatprep.mubr.msk.f32.mxu0 %vm2495_vm7, %v2474_v10 }
 0x2a4   : > { %v2329_v57 = vpop.permute.xlu1 %2328 }
 0x2a5   : > { %v2475_v14 = vsel %vm2427_vm6, %v2426_v6, %v2329_v57 }
 0x2a6   : > { %4314 = vmatmul.mubr.msk.f32.gmra.mrb[30].mxu0 %vm2495_vm7, %v2475_v14 }
 0x2b6   : > { %v6610_v58 = vpop.f32.mrb[6].mxu1 }
 0x2b7   : > { %v6612_v24 = vpop.f32.mrb[7].mxu1 }
 0x2bf   : > { %v6614_v23 = vpop.f32.mrb[8].mxu1 }
 0x2c0   : > { %v6616_v45 = vpop.f32.mrb[9].mxu1 }
 0x2c5   : > { %v4270_v21 = vpop.f32.mrb[0].mxu0 }
 0x2c6   : > { %v4374_v60 = vadd.f32 %v4270_v21, %v4138_v0  ;;  %v3166_v32 = vpop.f32.mrb[1].mxu0 }
 0x2c7   : > { %v4375_v29 = vadd.f32 %v3166_v32, %v2658_v31 }
 0x2c8   : > { %v3365_v38 = vadd.f32 %v4374_v60, %v6621_v43 }
 0x2c9   : > { %v3364_v40 = vadd.f32 %v4375_v29, %v6621_v43 }
 0x2ca   : > { %v3397_v9 = vsel %vm538_vm0, %v3365_v38, 0.0  ;;  %v3468_v35 = vmul.f32 %v3365_v38, %v3365_v38  ;;  %3570 = vst.msk [vmem:[%s4923_s16 + $0x8] sm:$0xff] %vm538_vm0, %v3365_v38 }
 0x2cb   : > { %v3396_v56 = vsel %vm538_vm0, %v3364_v40, 0.0  ;;  %v3467_v30 = vmul.f32 %v3364_v40, %v3364_v40  ;;  %3569 = vst.msk [vmem:[%s4923_s16] sm:$0xff] %vm538_vm0, %v3364_v40 }
 0x2cc   : > { %v3500_v11 = vsel %vm538_vm0, %v3468_v35, 0.0  ;;  %v3398_v7 = vadd.f32 %v3397_v9, %v3396_v56 }
 0x2cd   : > { %v3499_v8 = vsel %vm538_vm0, %v3467_v30, 0.0 }
 0x2ce   : > { %v3501_v27 = vadd.f32 %v3500_v11, %v3499_v8 }
 0x2d2   : > { %v6633_v52 = vpop.f32.mrb[10].mxu1 }
 0x2d3   : > { %v4273_v1 = vpop.f32.mrb[2].mxu0  ;;  %v6635_v19 = vpop.f32.mrb[11].mxu1 }
 0x2d4   : > { %v4376_v61 = vadd.f32 %v4273_v1, %v4141_v4  ;;  %v3176_v51 = vpop.f32.mrb[3].mxu0 }
 0x2d5   : > { %v4377_v17 = vadd.f32 %v3176_v51, %v2668_v39 }
 0x2d6   : > { %v3367_v46 = vadd.f32 %v4376_v61, %v6621_v43 }
 0x2d7   : > { %v3366_v22 = vadd.f32 %v4377_v17, %v6621_v43 }
 0x2d8   : > { %3572 = vst.msk [vmem:[%s4923_s16 + $0x18] sm:$0xff] %vm538_vm0, %v3367_v46  ;;  %v3470_v13 = vmul.f32 %v3367_v46, %v3367_v46  ;;  %v3401_v50 = vsel %vm538_vm0, %v3367_v46, 0.0 }
 0x2d9   : > { %v3399_v5 = vsel %vm538_vm0, %v3366_v22, 0.0  ;;  %v3469_v55 = vmul.f32 %v3366_v22, %v3366_v22  ;;  %3571 = vst.msk [vmem:[%s4923_s16 + $0x10] sm:$0xff] %vm538_vm0, %v3366_v22 }
 0x2da   : > { %v3400_v36 = vadd.f32 %v3399_v5, %v3398_v7  ;;  %v3504_v53 = vsel %vm538_vm0, %v3470_v13, 0.0 }
 0x2db   : > { %v3502_v54 = vsel %vm538_vm0, %v3469_v55, 0.0 }
 0x2dc   : > { %v3503_v33 = vadd.f32 %v3502_v54, %v3501_v27  ;;  %v3402_v18 = vadd.f32 %v3401_v50, %v3400_v36 }
 0x2de   : > { %v3505_v28 = vadd.f32 %v3504_v53, %v3503_v33 }
 0x2e2   : > { %v6647_v37 = vpop.f32.mrb[12].mxu1  ;;  %v4276_v63 = vpop.f32.mrb[4].mxu0 }
 0x2e3   : > { %v4378_v59 = vadd.f32 %v4276_v63, %v4144_v49  ;;  %v6649_v15 = vpop.f32.mrb[13].mxu1  ;;  %v3186_v0 = vpop.f32.mrb[5].mxu0 }
 0x2e4   : > { %v4379_v12 = vadd.f32 %v3186_v0, %v2678_v34 }
 0x2e5   : > { %v3369_v31 = vadd.f32 %v4378_v59, %v6621_v43 }
 0x2e6   : > { %v3368_v48 = vadd.f32 %v4379_v12, %v6621_v43 }
 0x2e7   : > { %3574 = vst.msk [vmem:[%s4923_s16 + $0x28] sm:$0xff] %vm538_vm0, %v3369_v31  ;;  %v3472_v3 = vmul.f32 %v3369_v31, %v3369_v31  ;;  %v3405_v4 = vsel %vm538_vm0, %v3369_v31, 0.0 }
 0x2e8   : > { %v3403_v42 = vsel %vm538_vm0, %v3368_v48, 0.0  ;;  %v3471_v47 = vmul.f32 %v3368_v48, %v3368_v48  ;;  %3573 = vst.msk [vmem:[%s4923_s16 + $0x20] sm:$0xff] %vm538_vm0, %v3368_v48 }
 0x2e9   : > { %v3404_v26 = vadd.f32 %v3403_v42, %v3402_v18  ;;  %v3508_v20 = vsel %vm538_vm0, %v3472_v3, 0.0 }
 0x2ea   : > { %v3506_v39 = vsel %vm538_vm0, %v3471_v47, 0.0 }
 0x2eb   : > { %v3507_v62 = vadd.f32 %v3506_v39, %v3505_v28  ;;  %v3406_v44 = vadd.f32 %v3405_v4, %v3404_v26 }
 0x2ed   : > { %v3509_v2 = vadd.f32 %v3508_v20, %v3507_v62 }
 0x2f1   : > { %v6661_v16 = vpop.f32.mrb[14].mxu1  ;;  %v4279_v41 = vpop.f32.mrb[6].mxu0 }
 0x2f2   : > { %v4380_v25 = vadd.f32 %v4279_v41, %v6610_v58  ;;  %v6664_v10 = vpop.f32.mrb[15].mxu1  ;;  %v3196_v49 = vpop.f32.mrb[7].mxu0 }
 0x2f3   : > { %v4381_v34 = vadd.f32 %v3196_v49, %v6612_v24 }
 0x2f4   : > { %v3371_v6 = vadd.f32 %v4380_v25, %v6621_v43 }
 0x2f5   : > { %v3370_v57 = vadd.f32 %v4381_v34, %v6621_v43 }
 0x2f6   : > { %3576 = vst.msk [vmem:[%s4923_s16 + $0x38] sm:$0xff] %vm538_vm0, %v3371_v6  ;;  %v3474_v14 = vmul.f32 %v3371_v6, %v3371_v6  ;;  %v3409_v58 = vsel %vm538_vm0, %v3371_v6, 0.0 }
 0x2f7   : > { %v3407_v21 = vsel %vm538_vm0, %v3370_v57, 0.0  ;;  %v3473_v60 = vmul.f32 %v3370_v57, %v3370_v57  ;;  %3575 = vst.msk [vmem:[%s4923_s16 + $0x30] sm:$0xff] %vm538_vm0, %v3370_v57 }
 0x2f8   : > { %v3408_v32 = vadd.f32 %v3407_v21, %v3406_v44  ;;  %v3512_v40 = vsel %vm538_vm0, %v3474_v14, 0.0 }
 0x2f9   : > { %v3510_v29 = vsel %vm538_vm0, %v3473_v60, 0.0 }
 0x2fa   : > { %v3511_v24 = vadd.f32 %v3510_v29, %v3509_v2  ;;  %v3410_v38 = vadd.f32 %v3409_v58, %v3408_v32 }
 0x2fc   : > { %v3513_v9 = vadd.f32 %v3512_v40, %v3511_v24 }
 0x306   : > { %v4282_v35 = vpop.f32.mrb[8].mxu0 }
 0x307   : > { %v4382_v56 = vadd.f32 %v4282_v35, %v6614_v23  ;;  %v3206_v30 = vpop.f32.mrb[9].mxu0 }
 0x308   : > { %v4383_v11 = vadd.f32 %v3206_v30, %v6616_v45 }
 0x309   : > { %v3373_v7 = vadd.f32 %v4382_v56, %v6621_v43 }
 0x30a   : > { %v3372_v8 = vadd.f32 %v4383_v11, %v6621_v43 }
 0x30b   : > { %3578 = vst.msk [vmem:[%s4923_s16 + $0x48] sm:$0xff] %vm538_vm0, %v3373_v7  ;;  %v3476_v27 = vmul.f32 %v3373_v7, %v3373_v7  ;;  %v3413_v17 = vsel %vm538_vm0, %v3373_v7, 0.0 }
 0x30c   : > { %v3411_v1 = vsel %vm538_vm0, %v3372_v8, 0.0  ;;  %v3475_v61 = vmul.f32 %v3372_v8, %v3372_v8  ;;  %3577 = vst.msk [vmem:[%s4923_s16 + $0x40] sm:$0xff] %vm538_vm0, %v3372_v8 }
 0x30d   : > { %v3412_v51 = vadd.f32 %v3411_v1, %v3410_v38  ;;  %v3516_v13 = vsel %vm538_vm0, %v3476_v27, 0.0 }
 0x30e   : > { %v3514_v23 = vsel %vm538_vm0, %v3475_v61, 0.0 }
 0x30f   : > { %v3515_v45 = vadd.f32 %v3514_v23, %v3513_v9  ;;  %v4285_v46 = vpop.f32.mrb[10].mxu0  ;;  %v3414_v22 = vadd.f32 %v3413_v17, %v3412_v51 }
 0x310   : > { %v4384_v5 = vadd.f32 %v4285_v46, %v6633_v52  ;;  %v3216_v55 = vpop.f32.mrb[11].mxu0 }
 0x311   : > { %v4385_v36 = vadd.f32 %v3216_v55, %v6635_v19  ;;  %v3517_v50 = vadd.f32 %v3516_v13, %v3515_v45 }
 0x312   : > { %v3375_v54 = vadd.f32 %v4384_v5, %v6621_v43 }
 0x313   : > { %v3374_v33 = vadd.f32 %v4385_v36, %v6621_v43 }
 0x314   : > { %3580 = vst.msk [vmem:[%s4923_s16 + $0x58] sm:$0xff] %vm538_vm0, %v3375_v54  ;;  %v3478_v18 = vmul.f32 %v3375_v54, %v3375_v54  ;;  %v3417_v52 = vsel %vm538_vm0, %v3375_v54, 0.0 }
 0x315   : > { %v3415_v53 = vsel %vm538_vm0, %v3374_v33, 0.0  ;;  %v3477_v28 = vmul.f32 %v3374_v33, %v3374_v33  ;;  %3579 = vst.msk [vmem:[%s4923_s16 + $0x50] sm:$0xff] %vm538_vm0, %v3374_v33 }
 0x316   : > { %v3416_v63 = vadd.f32 %v3415_v53, %v3414_v22  ;;  %v3520_v3 = vsel %vm538_vm0, %v3478_v18, 0.0 }
 0x317   : > { %v3518_v19 = vsel %vm538_vm0, %v3477_v28, 0.0  ;;  %v4288_v59 = vpop.f32.mrb[12].mxu0 }
 0x318   : > { %v3519_v0 = vadd.f32 %v3518_v19, %v3517_v50  ;;  %v4386_v12 = vadd.f32 %v4288_v59, %v6647_v37  ;;  %v3226_v31 = vpop.f32.mrb[13].mxu0  ;;  %v3418_v48 = vadd.f32 %v3417_v52, %v3416_v63 }
 0x319   : > { %v4387_v42 = vadd.f32 %v3226_v31, %v6649_v15 }
 0x31a   : > { %v3377_v47 = vadd.f32 %v4386_v12, %v6621_v43  ;;  %v3521_v26 = vadd.f32 %v3520_v3, %v3519_v0 }
 0x31b   : > { %v3376_v4 = vadd.f32 %v4387_v42, %v6621_v43 }
 0x31c   : > { %3582 = vst.msk [vmem:[%s4923_s16 + $0x68] sm:$0xff] %vm538_vm0, %v3377_v47  ;;  %v3480_v39 = vmul.f32 %v3377_v47, %v3377_v47  ;;  %v3421_v20 = vsel %vm538_vm0, %v3377_v47, 0.0 }
 0x31d   : > { %v3419_v62 = vsel %vm538_vm0, %v3376_v4, 0.0  ;;  %v3479_v44 = vmul.f32 %v3376_v4, %v3376_v4  ;;  %3581 = vst.msk [vmem:[%s4923_s16 + $0x60] sm:$0xff] %vm538_vm0, %v3376_v4 }
 0x31e   : > { %v3420_v37 = vadd.f32 %v3419_v62, %v3418_v48  ;;  %v3524_v25 = vsel %vm538_vm0, %v3480_v39, 0.0 }
 0x31f   : > { %v3522_v15 = vsel %vm538_vm0, %v3479_v44, 0.0 }
 0x320   : > { %v3523_v2 = vadd.f32 %v3522_v15, %v3521_v26  ;;  %v3422_v41 = vadd.f32 %v3421_v20, %v3420_v37 }
 0x322   : > { %v4291_v49 = vpop.f32.mrb[14].mxu0  ;;  %v3525_v34 = vadd.f32 %v3524_v25, %v3523_v2 }
 0x323   : > { %v4388_v6 = vadd.f32 %v4291_v49, %v6661_v16  ;;  %v3236_v57 = vpop.f32.mrb[15].mxu0 }
 0x324   : > { %v4389_v14 = vadd.f32 %v3236_v57, %v6664_v10 }
 0x325   : > { %v3379_v21 = vadd.f32 %v4388_v6, %v6621_v43 }
 0x326   : > { %v3378_v60 = vadd.f32 %v4389_v14, %v6621_v43 }
 0x327   : > { %3584 = vst.msk [vmem:[%s4923_s16 + $0x78] sm:$0xff] %vm538_vm0, %v3379_v21  ;;  %v3482_v32 = vmul.f32 %v3379_v21, %v3379_v21  ;;  %v3425_v38 = vsel %vm538_vm0, %v3379_v21, 0.0 }
 0x328   : > { %v3423_v58 = vsel %vm538_vm0, %v3378_v60, 0.0  ;;  %v3481_v29 = vmul.f32 %v3378_v60, %v3378_v60  ;;  %3583 = vst.msk [vmem:[%s4923_s16 + $0x70] sm:$0xff] %vm538_vm0, %v3378_v60 }
 0x329   : > { %v3424_v24 = vadd.f32 %v3423_v58, %v3422_v41  ;;  %v3528_v35 = vsel %vm538_vm0, %v3482_v32, 0.0 }
 0x32a   : > { %v3526_v16 = vsel %vm538_vm0, %v3481_v29, 0.0 }
 0x32b   : > { %v3527_v40 = vadd.f32 %v3526_v16, %v3525_v34  ;;  %v4294_v9 = vpop.f32.mrb[16].mxu0  ;;  %v3426_v10 = vadd.f32 %v3425_v38, %v3424_v24 }
 0x32c   : > { %v3246_v56 = vpop.f32.mrb[17].mxu0 }
 0x32d   : > { %v3529_v30 = vadd.f32 %v3528_v35, %v3527_v40 }
 0x333   : > { %v4297_v11 = vpop.f32.mrb[18].mxu0 }
 0x334   : > { %v3256_v7 = vpop.f32.mrb[19].mxu0 }
 0x33b   : > { %v4300_v8 = vpop.f32.mrb[20].mxu0 }
 0x33c   : > { %v3266_v27 = vpop.f32.mrb[21].mxu0 }
 0x343   : > { %v4303_v1 = vpop.f32.mrb[22].mxu0 }
 0x344   : > { %v3276_v61 = vpop.f32.mrb[23].mxu0 }
 0x347   : > { %v4228_v51 = vpop.f32.mrb[16].mxu1 }
 0x348   : > { %v4390_v17 = vadd.f32 %v4294_v9, %v4228_v51  ;;  %v2987_v23 = vpop.f32.mrb[17].mxu1 }
 0x349   : > { %v4391_v45 = vadd.f32 %v3246_v56, %v2987_v23 }
 0x34a   : > { %v3381_v46 = vadd.f32 %v4390_v17, %v6621_v43 }
 0x34b   : > { %v3380_v22 = vadd.f32 %v4391_v45, %v6621_v43  ;;  %v4231_v13 = vpop.f32.mrb[18].mxu1 }
 0x34c   : > { %v3484_v5 = vmul.f32 %v3381_v46, %v3381_v46  ;;  %3586 = vst.msk [vmem:[%s4923_s16 + $0x88] sm:$0xff] %vm538_vm0, %v3381_v46  ;;  %v4392_v55 = vadd.f32 %v4297_v11, %v4231_v13  ;;  %v2997_v36 = vpop.f32.mrb[19].mxu1  ;;  %v3429_v28 = vsel %vm538_vm0, %v3381_v46, 0.0 }
 0x34d   : > { %v3427_v50 = vsel %vm538_vm0, %v3380_v22, 0.0  ;;  %v3483_v54 = vmul.f32 %v3380_v22, %v3380_v22  ;;  %3585 = vst.msk [vmem:[%s4923_s16 + $0x80] sm:$0xff] %vm538_vm0, %v3380_v22  ;;  %v4393_v33 = vadd.f32 %v3256_v7, %v2997_v36 }
 0x34e   : > { %v3428_v18 = vadd.f32 %v3427_v50, %v3426_v10  ;;  %v3383_v53 = vadd.f32 %v4392_v55, %v6621_v43  ;;  %v3532_v0 = vsel %vm538_vm0, %v3484_v5, 0.0 }
 0x34f   : > { %v3530_v63 = vsel %vm538_vm0, %v3483_v54, 0.0  ;;  %v3382_v52 = vadd.f32 %v4393_v33, %v6621_v43  ;;  %v4234_v19 = vpop.f32.mrb[20].mxu1  ;;  %v4306_v59 = vpop.f32.mrb[24].mxu0 }
 0x350   : > { %v3531_v12 = vadd.f32 %v3530_v63, %v3529_v30  ;;  %v3486_v31 = vmul.f32 %v3383_v53, %v3383_v53  ;;  %3588 = vst.msk [vmem:[%s4923_s16 + $0x98] sm:$0xff] %vm538_vm0, %v3383_v53  ;;  %v3430_v48 = vadd.f32 %v3429_v28, %v3428_v18  ;;  %v3007_v3 = vpop.f32.mrb[21].mxu1  ;;  %v3286_v42 = vpop.f32.mrb[25].mxu0  ;;  %v4394_v4 = vadd.f32 %v4300_v8, %v4234_v19 }
 0x351   : > { %v3431_v47 = vsel %vm538_vm0, %v3382_v52, 0.0  ;;  %v3485_v26 = vmul.f32 %v3382_v52, %v3382_v52  ;;  %3587 = vst.msk [vmem:[%s4923_s16 + $0x90] sm:$0xff] %vm538_vm0, %v3382_v52  ;;  %v4395_v39 = vadd.f32 %v3266_v27, %v3007_v3  ;;  %v3433_v37 = vsel %vm538_vm0, %v3383_v53, 0.0 }
 0x352   : > { %v3432_v62 = vadd.f32 %v3431_v47, %v3430_v48  ;;  %v3533_v44 = vadd.f32 %v3532_v0, %v3531_v12  ;;  %v3385_v15 = vadd.f32 %v4394_v4, %v6621_v43  ;;  %v3536_v57 = vsel %vm538_vm0, %v3486_v31, 0.0 }
 0x353   : > { %v3534_v20 = vsel %vm538_vm0, %v3485_v26, 0.0  ;;  %v3384_v2 = vadd.f32 %v4395_v39, %v6621_v43  ;;  %v4237_v41 = vpop.f32.mrb[22].mxu1 }
 0x354   : > { %v3535_v25 = vadd.f32 %v3534_v20, %v3533_v44  ;;  %v3434_v49 = vadd.f32 %v3433_v37, %v3432_v62  ;;  %v4396_v34 = vadd.f32 %v4303_v1, %v4237_v41  ;;  %v3017_v6 = vpop.f32.mrb[23].mxu1  ;;  %v3488_v14 = vmul.f32 %v3385_v15, %v3385_v15  ;;  %3590 = vst.msk [vmem:[%s4923_s16 + $0xa8] sm:$0xff] %vm538_vm0, %v3385_v15 }
 0x355   : > { %v3435_v21 = vsel %vm538_vm0, %v3384_v2, 0.0  ;;  %v3487_v60 = vmul.f32 %v3384_v2, %v3384_v2  ;;  %3589 = vst.msk [vmem:[%s4923_s16 + $0xa0] sm:$0xff] %vm538_vm0, %v3384_v2  ;;  %v4397_v24 = vadd.f32 %v3276_v61, %v3017_v6  ;;  %v3437_v40 = vsel %vm538_vm0, %v3385_v15, 0.0 }
 0x356   : > { %v3436_v32 = vadd.f32 %v3435_v21, %v3434_v49  ;;  %v3537_v58 = vadd.f32 %v3536_v57, %v3535_v25  ;;  %v3387_v29 = vadd.f32 %v4396_v34, %v6621_v43  ;;  %v3540_v9 = vsel %vm538_vm0, %v3488_v14, 0.0 }
 0x357   : > { %v3538_v38 = vsel %vm538_vm0, %v3487_v60, 0.0  ;;  %v4240_v16 = vpop.f32.mrb[24].mxu1  ;;  %v3386_v35 = vadd.f32 %v4397_v24, %v6621_v43 }
 0x358   : > { %v3539_v10 = vadd.f32 %v3538_v38, %v3537_v58  ;;  %3592 = vst.msk [vmem:[%s4923_s16 + $0xb8] sm:$0xff] %vm538_vm0, %v3387_v29  ;;  %v4309_v56 = vpop.f32.mrb[26].mxu0  ;;  %v3027_v30 = vpop.f32.mrb[25].mxu1  ;;  %v3490_v11 = vmul.f32 %v3387_v29, %v3387_v29  ;;  %v3438_v7 = vadd.f32 %v3437_v40, %v3436_v32  ;;  %v4398_v8 = vadd.f32 %v4306_v59, %v4240_v16 }
 0x359   : > { %v4399_v27 = vadd.f32 %v3286_v42, %v3027_v30  ;;  %v3296_v1 = vpop.f32.mrb[27].mxu0  ;;  %v3439_v61 = vsel %vm538_vm0, %v3386_v35, 0.0  ;;  %v3489_v51 = vmul.f32 %v3386_v35, %v3386_v35  ;;  %3591 = vst.msk [vmem:[%s4923_s16 + $0xb0] sm:$0xff] %vm538_vm0, %v3386_v35  ;;  %v3441_v13 = vsel %vm538_vm0, %v3387_v29, 0.0 }
 0x35a   : > { %v3541_v17 = vadd.f32 %v3540_v9, %v3539_v10  ;;  %v3440_v23 = vadd.f32 %v3439_v61, %v3438_v7  ;;  %v3389_v45 = vadd.f32 %v4398_v8, %v6621_v43  ;;  %v3544_v50 = vsel %vm538_vm0, %v3490_v11, 0.0 }
 0x35b   : > { %v3388_v46 = vadd.f32 %v4399_v27, %v6621_v43  ;;  %v4243_v22 = vpop.f32.mrb[26].mxu1  ;;  %v3542_v5 = vsel %vm538_vm0, %v3489_v51, 0.0 }
 0x35c   : > { %v4400_v55 = vadd.f32 %v4309_v56, %v4243_v22  ;;  %v3037_v36 = vpop.f32.mrb[27].mxu1  ;;  %v3543_v54 = vadd.f32 %v3542_v5, %v3541_v17  ;;  %v3492_v33 = vmul.f32 %v3389_v45, %v3389_v45  ;;  %3594 = vst.msk [vmem:[%s4923_s16 + $0xc8] sm:$0xff] %vm538_vm0, %v3389_v45  ;;  %v3442_v18 = vadd.f32 %v3441_v13, %v3440_v23 }
 0x35d   : > { %3593 = vst.msk [vmem:[%s4923_s16 + $0xc0] sm:$0xff] %vm538_vm0, %v3388_v46  ;;  %v3443_v53 = vsel %vm538_vm0, %v3388_v46, 0.0  ;;  %v3491_v28 = vmul.f32 %v3388_v46, %v3388_v46  ;;  %v4401_v52 = vadd.f32 %v3296_v1, %v3037_v36  ;;  %v3445_v12 = vsel %vm538_vm0, %v3389_v45, 0.0 }
 0x35e   : > { %v3391_v63 = vadd.f32 %v4400_v55, %v6621_v43  ;;  %v3444_v19 = vadd.f32 %v3443_v53, %v3442_v18  ;;  %v3545_v59 = vadd.f32 %v3544_v50, %v3543_v54  ;;  %v3548_v26 = vsel %vm538_vm0, %v3492_v33, 0.0 }
 0x35f   : > { %v4246_v0 = vpop.f32.mrb[28].mxu1  ;;  %v3546_v31 = vsel %vm538_vm0, %v3491_v28, 0.0  ;;  %v3390_v48 = vadd.f32 %v4401_v52, %v6621_v43 }
 0x360   : > { %3596 = vst.msk [vmem:[%s4923_s16 + $0xd8] sm:$0xff] %vm538_vm0, %v3391_v63  ;;  %v3047_v3 = vpop.f32.mrb[29].mxu1  ;;  %v3547_v42 = vadd.f32 %v3546_v31, %v3545_v59  ;;  %v3446_v47 = vadd.f32 %v3445_v12, %v3444_v19  ;;  %v3494_v4 = vmul.f32 %v3391_v63, %v3391_v63  ;;  %v3449_v15 = vsel %vm538_vm0, %v3391_v63, 0.0 }
 0x361   : > { %v3447_v39 = vsel %vm538_vm0, %v3390_v48, 0.0  ;;  %v3493_v62 = vmul.f32 %v3390_v48, %v3390_v48  ;;  %3595 = vst.msk [vmem:[%s4923_s16 + $0xd0] sm:$0xff] %vm538_vm0, %v3390_v48 }
 0x362   : > { %v3448_v44 = vadd.f32 %v3447_v39, %v3446_v47  ;;  %v3549_v37 = vadd.f32 %v3548_v26, %v3547_v42  ;;  %v3552_v34 = vsel %vm538_vm0, %v3494_v4, 0.0 }
 0x363   : > { %v4249_v20 = vpop.f32.mrb[30].mxu1  ;;  %v3550_v2 = vsel %vm538_vm0, %v3493_v62, 0.0 }
 0x364   : > { %v3057_v41 = vpop.f32.mrb[31].mxu1  ;;  %v3551_v25 = vadd.f32 %v3550_v2, %v3549_v37  ;;  %v3450_v49 = vadd.f32 %v3449_v15, %v3448_v44 }
 0x366   : > { %v3553_v6 = vadd.f32 %v3552_v34, %v3551_v25 }
 0x36a   : > { %v4312_v57 = vpop.f32.mrb[28].mxu0 }
 0x36b   : > { %v4402_v14 = vadd.f32 %v4312_v57, %v4246_v0  ;;  %v3306_v21 = vpop.f32.mrb[29].mxu0 }
 0x36c   : > { %v4403_v60 = vadd.f32 %v3306_v21, %v3047_v3 }
 0x36d   : > { %v3393_v32 = vadd.f32 %v4402_v14, %v6621_v43 }
 0x36e   : > { %v3392_v58 = vadd.f32 %v4403_v60, %v6621_v43 }
 0x36f   : > { %3598 = vst.msk [vmem:[%s4923_s16 + $0xe8] sm:$0xff] %vm538_vm0, %v3393_v32  ;;  %v3496_v29 = vmul.f32 %v3393_v32, %v3393_v32  ;;  %v3453_v40 = vsel %vm538_vm0, %v3393_v32, 0.0 }
 0x370   : > { %v3451_v24 = vsel %vm538_vm0, %v3392_v58, 0.0  ;;  %v3495_v38 = vmul.f32 %v3392_v58, %v3392_v58  ;;  %3597 = vst.msk [vmem:[%s4923_s16 + $0xe0] sm:$0xff] %vm538_vm0, %v3392_v58 }
 0x371   : > { %v3452_v16 = vadd.f32 %v3451_v24, %v3450_v49  ;;  %v3556_v56 = vsel %vm538_vm0, %v3496_v29, 0.0 }
 0x372   : > { %v3554_v9 = vsel %vm538_vm0, %v3495_v38, 0.0 }
 0x373   : > { %v3555_v10 = vadd.f32 %v3554_v9, %v3553_v6  ;;  %v3454_v35 = vadd.f32 %v3453_v40, %v3452_v16 }
 0x375   : > { %v3557_v30 = vadd.f32 %v3556_v56, %v3555_v10 }
 0x379   : > { %v4315_v11 = vpop.f32.mrb[30].mxu0 }
 0x37a   : > { %v4404_v7 = vadd.f32 %v4315_v11, %v4249_v20  ;;  %v3316_v8 = vpop.f32.mrb[31].mxu0 }
 0x37b   : > { %v4405_v27 = vadd.f32 %v3316_v8, %v3057_v41 }
 0x37c   : > { %v3395_v1 = vadd.f32 %v4404_v7, %v6621_v43 }
 0x37d   : > { %v3394_v61 = vadd.f32 %v4405_v27, %v6621_v43 }
 0x37e   : > { %3600 = vst.msk [vmem:[%s4923_s16 + $0xf8] sm:$0xff] %vm538_vm0, %v3395_v1  ;;  %v3498_v51 = vmul.f32 %v3395_v1, %v3395_v1  ;;  %v3457_v46 = vsel %vm538_vm0, %v3395_v1, 0.0 }
 0x37f   : > { %v3455_v17 = vsel %vm538_vm0, %v3394_v61, 0.0  ;;  %v3497_v23 = vmul.f32 %v3394_v61, %v3394_v61  ;;  %3599 = vst.msk [vmem:[%s4923_s16 + $0xf0] sm:$0xff] %vm538_vm0, %v3394_v61 }
 0x380   : > { %v3456_v45 = vadd.f32 %v3455_v17, %v3454_v35  ;;  %v3560_v55 = vsel %vm538_vm0, %v3498_v51, 0.0 }
 0x381   : > { %v3558_v22 = vsel %vm538_vm0, %v3497_v23, 0.0 }
 0x382   : > { %v3458_v13 = vadd.f32 %v3457_v46, %v3456_v45  ;;  %v3559_v5 = vadd.f32 %v3558_v22, %v3557_v30 }
 0x384   : > { %v3459_v43 = vrot.slane %v3458_v13, 4  ;;  %v3561_v36 = vadd.f32 %v3560_v55, %v3559_v5 }
 0x386   : > { %v3460_v50 = vadd.f32 %v3459_v43, %v3458_v13  ;;  %v3562_v54 = vrot.slane %v3561_v36, 4 }
 0x388   : > { %v3461_v33 = vrot.slane %v3460_v50, 2  ;;  %v3563_v18 = vadd.f32 %v3562_v54, %v3561_v36 }
 0x38a   : > { %v3462_v53 = vadd.f32 %v3461_v33, %v3460_v50  ;;  %v3564_v28 = vrot.slane %v3563_v18, 2 }
 0x38c   : > { %v3463_v63 = vrot.slane %v3462_v53, 1  ;;  %v3565_v52 = vadd.f32 %v3564_v28, %v3563_v18 }
 0x38e   : > { %v3464_v19 = vadd.f32 %v3463_v63, %v3462_v53  ;;  %v3566_v59 = vrot.slane %v3565_v52, 1 }
 0x390   : > { %3466 = vst.msk [vmem:[%s530_s24] sm:$0x1] %vm3465_vm8, %v3464_v19  ;;  %v3567_v0 = vadd.f32 %v3566_v59, %v3565_v52 }
 0x392   : > { %3568 = vst.msk [vmem:[%s537_s28] sm:$0x1] %vm3465_vm8, %v3567_v0 }
 0x393 PF: > { %s20_s13 = sadd.s32 1, %s4558_s13   ;;  %s6922_s22 = sld [smem:[#allocation3_spill]] }
 0x394   : > { %p17_p13 = scmp.ge.s32.totalorder %s20_s13, 6   ;;  %s6923_s30 = smov %s4550_s11 }
 0x395   : > { %s6924_s10 = smov %s4554_s12  ;;  %s6925_s11 = smov %s6928_s14 }
 0x396   :  { %19 = sbr.rel (!%p17_p13) target bundleno = 3 (0x3), region = 121 }
 0x399   : > { %s6926_s12 = smov %s6922_s22 }

</bundles_post_ra>
